<compile_context>
chip_gen: v7x
topology: tpu7x:2x2x1
jax: 0.10.0
libtpu: 0.0.40
codegen_flags: <defaults>
</compile_context>

<pallas_src>
import functools

import jax
import jax.numpy as jnp
from jax.experimental import pallas as pl
from jax.experimental.pallas import tpu as pltpu

_EPS = 1e-5
_LANE = 128


def _round_up(x, m):
    return (x + m - 1) // m * m


# -----------------------------------------------------------------------------
# Fused tiled matmul: out = relu_opt((x @ w) * scale + shift [+ residual])
# -----------------------------------------------------------------------------

def _matmul_kernel(x_ref, w_ref, a_ref, b_ref, o_ref, acc_ref, *, relu):
    @pl.when(pl.program_id(2) == 0)
    def _init():
        acc_ref[...] = jnp.zeros_like(acc_ref)

    acc_ref[...] += jnp.dot(x_ref[...], w_ref[...],
                            preferred_element_type=jnp.float32)

    @pl.when(pl.program_id(2) == pl.num_programs(2) - 1)
    def _fin():
        y = acc_ref[...] * a_ref[...] + b_ref[...]
        if relu:
            y = jnp.maximum(y, 0.0)
        o_ref[...] = y.astype(o_ref.dtype)


def _matmul_res_kernel(x_ref, w_ref, a_ref, b_ref, r_ref, o_ref, acc_ref, *, relu):
    @pl.when(pl.program_id(2) == 0)
    def _init():
        acc_ref[...] = jnp.zeros_like(acc_ref)

    acc_ref[...] += jnp.dot(x_ref[...], w_ref[...],
                            preferred_element_type=jnp.float32)

    @pl.when(pl.program_id(2) == pl.num_programs(2) - 1)
    def _fin():
        y = acc_ref[...] * a_ref[...] + b_ref[...] + r_ref[...].astype(jnp.float32)
        if relu:
            y = jnp.maximum(y, 0.0)
        o_ref[...] = y.astype(o_ref.dtype)


def fused_linear(x, w_pad, scale, shift, *, relu, residual=None,
                 out_dtype=jnp.bfloat16):
    """relu_opt((x @ w_pad) * scale + shift [+ residual]).

    w_pad: (Kp, N) bf16, K pre-padded to a multiple of 128 with zero rows.
    scale/shift: per-output-column (folded BatchNorm / bias).
    """
    M, K = x.shape
    Kp, N = w_pad.shape

    if M > 256:
        Mp, tm = _round_up(M, 256), 256
    else:
        Mp = _round_up(M, 8)
        tm = Mp
    tn = N
    for cand in (256, 128):
        if N % cand == 0:
            tn = cand
            break
    tk = Kp
    for cand in (512, 384, 256, 128):
        if Kp % cand == 0:
            tk = cand
            break
    gm, gn, gk = Mp // tm, N // tn, Kp // tk

    xp = x.astype(jnp.bfloat16)
    if (Mp, Kp) != (M, K):
        xp = jnp.pad(xp, ((0, Mp - M), (0, Kp - K)))
    a2 = scale.reshape(1, N).astype(jnp.float32)
    b2 = shift.reshape(1, N).astype(jnp.float32)

    in_specs = [
        pl.BlockSpec((tm, tk), lambda i, j, k: (i, k)),
        pl.BlockSpec((tk, tn), lambda i, j, k: (k, j)),
        pl.BlockSpec((1, tn), lambda i, j, k: (0, j)),
        pl.BlockSpec((1, tn), lambda i, j, k: (0, j)),
    ]
    args = [xp, w_pad, a2, b2]
    if residual is not None:
        r = residual.astype(jnp.bfloat16)
        if Mp != M:
            r = jnp.pad(r, ((0, Mp - M), (0, 0)))
        in_specs.append(pl.BlockSpec((tm, tn), lambda i, j, k: (i, j)))
        args.append(r)
        kernel = functools.partial(_matmul_res_kernel, relu=relu)
    else:
        kernel = functools.partial(_matmul_kernel, relu=relu)

    out_bytes = jnp.dtype(out_dtype).itemsize
    cost = pl.CostEstimate(
        flops=2 * Mp * Kp * N,
        transcendentals=0,
        bytes_accessed=2 * (Mp * Kp + Kp * N) + out_bytes * Mp * N,
    )

    out = pl.pallas_call(
        kernel,
        out_shape=jax.ShapeDtypeStruct((Mp, N), out_dtype),
        grid=(gm, gn, gk),
        in_specs=in_specs,
        out_specs=pl.BlockSpec((tm, tn), lambda i, j, k: (i, j)),
        scratch_shapes=[pltpu.VMEM((tm, tn), jnp.float32)],
        compiler_params=pltpu.CompilerParams(
            dimension_semantics=("parallel", "parallel", "arbitrary")),
        cost_estimate=cost,
    )(*args)
    if Mp != M:
        out = out[:M]
    return out


# -----------------------------------------------------------------------------
# Max-pool 3x3 stride 2 pad 1 (lane-dense: channels stay in lanes)
# -----------------------------------------------------------------------------

def _max9_kernel(x_ref, o_ref):
    o_ref[...] = jnp.max(x_ref[...], axis=0)


def maxpool_3x3_s2_p1(x_nhwc):
    N, H, W, C = x_nhwc.shape
    Ho = (H + 2 - 3) // 2 + 1
    Wo = (W + 2 - 3) // 2 + 1
    # zero padding is safe: inputs are post-ReLU (>= 0)
    xp = jnp.pad(x_nhwc, ((0, 0), (1, 1), (1, 1), (0, 0)))
    taps = []
    for dh in range(3):
        for dw in range(3):
            t = jax.lax.slice(xp, (0, dh, dw, 0),
                              (N, dh + 2 * Ho - 1, dw + 2 * Wo - 1, C),
                              (1, 2, 2, 1))
            taps.append(t.reshape(N * Ho * Wo, C))
    stacked = jnp.stack(taps, axis=0)            # (9, M, C)  -- C in lanes
    M = N * Ho * Wo
    Mp = _round_up(M, 8)
    if Mp != M:
        stacked = jnp.pad(stacked, ((0, 0), (0, Mp - M), (0, 0)))
    tm = Mp
    for cand in (512, 256, 128):
        if Mp > cand and Mp % cand == 0:
            tm = cand
            break
    out = pl.pallas_call(
        _max9_kernel,
        out_shape=jax.ShapeDtypeStruct((Mp, C), x_nhwc.dtype),
        grid=(Mp // tm,),
        in_specs=[pl.BlockSpec((9, tm, C), lambda i: (0, i, 0))],
        out_specs=pl.BlockSpec((tm, C), lambda i: (i, 0)),
        compiler_params=pltpu.CompilerParams(dimension_semantics=("parallel",)),
    )(stacked)
    if Mp != M:
        out = out[:M]
    return out.reshape(N, Ho, Wo, C)


# -----------------------------------------------------------------------------
# Global average pool
# -----------------------------------------------------------------------------

def _gap_kernel(x_ref, o_ref):
    o_ref[...] = jnp.mean(x_ref[...].astype(jnp.float32), axis=1)


def global_avg_pool(x_nhwc):
    N, H, W, C = x_nhwc.shape
    x = x_nhwc.reshape(N, H * W, C)
    return pl.pallas_call(
        _gap_kernel,
        out_shape=jax.ShapeDtypeStruct((N, C), jnp.float32),
    )(x)


# -----------------------------------------------------------------------------
# Fused MLP branch + concat + combined head (single tiny kernel, all in VMEM)
# -----------------------------------------------------------------------------

def _head_kernel(x1_ref, csv_ref,
                 w1_ref, b1_ref, w2_ref, b2_ref,
                 wa_ref, wb_ref, s1_ref, t1_ref,
                 w4_ref, s2_ref, t2_ref, w5_ref, b5_ref, o_ref):
    f32 = jnp.float32
    h1 = jnp.maximum(
        jnp.dot(csv_ref[...], w1_ref[...], preferred_element_type=f32)
        + b1_ref[...], 0.0)
    h2 = jnp.maximum(
        jnp.dot(h1, w2_ref[...], preferred_element_type=f32) + b2_ref[...], 0.0)
    # concat([x1, h2]) @ W_fc1  ==  x1 @ W_fc1[:512] + h2 @ W_fc1[512:]
    pre = (jnp.dot(x1_ref[...], wa_ref[...], preferred_element_type=f32)
           + jnp.dot(h2, wb_ref[...], preferred_element_type=f32))
    f1 = jnp.maximum(pre * s1_ref[...] + t1_ref[...], 0.0)
    f2 = jnp.maximum(
        jnp.dot(f1, w4_ref[...], preferred_element_type=f32) * s2_ref[...]
        + t2_ref[...], 0.0)
    o_ref[...] = jnp.dot(f2, w5_ref[...], preferred_element_type=f32) + b5_ref[...]


# -----------------------------------------------------------------------------
# Conv / block wrappers
# -----------------------------------------------------------------------------

def conv_bn_relu(x_nhwc, p, kh, kw, stride, padding, relu=True, residual=None):
    """Conv2d (no bias) + folded BN (+ optional residual add, optional ReLU)."""
    N, H, W, C = x_nhwc.shape
    patches = jax.lax.conv_general_dilated_patches(
        x_nhwc, (kh, kw), (stride, stride),
        [(padding, padding), (padding, padding)],
        dimension_numbers=("NHWC", "HWIO", "NHWC"))
    _, Ho, Wo, K = patches.shape                  # K ordered (C, kh, kw)
    pm = patches.reshape(N * Ho * Wo, K)
    res = None if residual is None else residual.reshape(N * Ho * Wo, -1)
    out = fused_linear(pm, p['w'], p['scale'], p['shift'],
                       relu=relu, residual=res)
    return out.reshape(N, Ho, Wo, p['w'].shape[1])


def basic_block(x, blk, stride):
    out1 = conv_bn_relu(x, blk['conv1'], 3, 3, stride, 1, relu=True)
    if 'down' in blk:
        sc = conv_bn_relu(x, blk['down'], 1, 1, stride, 0, relu=False)
    else:
        sc = x
    # second conv: BN + residual add + ReLU fused into the matmul epilogue
    return conv_bn_relu(out1, blk['conv2'], 3, 3, 1, 1, relu=True, residual=sc)


# -----------------------------------------------------------------------------
# Parameter init (pre-packed / pre-padded for the kernels)
# -----------------------------------------------------------------------------

def _he(key, shape, fan_in):
    return jax.random.normal(key, shape, jnp.float32) * jnp.sqrt(2.0 / fan_in)


def _pad2(a, rows, cols):
    r, c = a.shape
    return jnp.pad(a, ((0, rows - r), (0, cols - c)))


def _pad_row(v, cols):
    return jnp.pad(v.reshape(1, -1), ((0, 0), (0, cols - v.shape[0])))


def init_conv_bn(key, outc, inc, kh, kw):
    w = _he(key, (outc, inc, kh, kw), inc * kh * kw)
    K = inc * kh * kw
    Kp = _round_up(K, _LANE)
    # matmul layout (K, outC), (C, kh, kw) ordering, K zero-padded, bf16
    wm = jnp.pad(w.reshape(outc, K).T, ((0, Kp - K), (0, 0))).astype(jnp.bfloat16)
    gamma = jnp.ones((outc,), jnp.float32)
    beta = jnp.zeros((outc,), jnp.float32)
    mean = jnp.zeros((outc,), jnp.float32)
    var = jnp.ones((outc,), jnp.float32)
    scale = gamma / jnp.sqrt(var + _EPS)
    shift = beta - mean * scale
    return {'w': wm, 'scale': scale, 'shift': shift}


def init_head(key, csv_dim, mlp_hidden, mlp_out, n_classes, res_feats=512):
    assert csv_dim <= _LANE and mlp_hidden <= _LANE and mlp_out <= _LANE
    assert n_classes <= _LANE
    ks = jax.random.split(key, 5)
    D = _LANE
    csv_p = _round_up(csv_dim, _LANE)

    def lin(k, fi, fo):
        kw_, kb_ = jax.random.split(k)
        w = jax.random.normal(kw_, (fi, fo), jnp.float32) / jnp.sqrt(float(fi))
        b = jax.random.normal(kb_, (fo,), jnp.float32) * 0.01
        return w, b

    def bn_fold(bias, feats):
        gamma = jnp.ones((feats,), jnp.float32)
        beta = jnp.zeros((feats,), jnp.float32)
        mean = jnp.zeros((feats,), jnp.float32)
        var = jnp.ones((feats,), jnp.float32)
        scale = gamma / jnp.sqrt(var + _EPS)
        shift = (bias - mean) * scale + beta
        return scale, shift

    # mlp = Sequential(Linear(csv, 32), ReLU, Linear(32, 16), ReLU)
    w1, b1 = lin(ks[0], csv_dim, mlp_hidden)
    w2, b2 = lin(ks[1], mlp_hidden, mlp_out)
    # combined = Linear(528,128)+BN+ReLU, Linear(128,16)+BN+ReLU, Linear(16,nc)
    w3, b3 = lin(ks[2], res_feats + mlp_out, 128)
    s1, t1 = bn_fold(b3, 128)
    w4, b4 = lin(ks[3], 128, 16)
    s2, t2 = bn_fold(b4, 16)
    w5, b5 = lin(ks[4], 16, n_classes)

    return {
        'w1': _pad2(w1, csv_p, D), 'b1': _pad_row(b1, D),
        'w2': _pad2(w2, D, D), 'b2': _pad_row(b2, D),
        'wa': w3[:res_feats],                 # (512, 128)
        'wb': _pad2(w3[res_feats:], D, D),    # (128, 128), rows 16: zero
        's1': s1.reshape(1, -1), 't1': t1.reshape(1, -1),
        'w4': _pad2(w4, D, D), 's2': _pad_row(s2, D), 't2': _pad_row(t2, D),
        'w5': _pad2(w5, D, D), 'b5': _pad_row(b5, D),
    }


def init_params(key, csv_dim=8, mlp_hidden=32, mlp_out=16, n_classes=5):
    keys = iter(jax.random.split(key, 64))
    resnet = {'conv1': init_conv_bn(next(keys), 64, 3, 7, 7)}
    layers = []
    inc = 64
    for outc, stride in [(64, 1), (128, 2), (256, 2), (512, 2)]:
        def make_block(in_c, s, outc=outc):
            blk = {'conv1': init_conv_bn(next(keys), outc, in_c, 3, 3),
                   'conv2': init_conv_bn(next(keys), outc, outc, 3, 3)}
            if s != 1 or in_c != outc:
                blk['down'] = init_conv_bn(next(keys), outc, in_c, 1, 1)
            return blk
        layers.append([make_block(inc, stride), make_block(outc, 1)])
        inc = outc
    resnet['layers'] = layers
    head = init_head(next(keys), csv_dim, mlp_hidden, mlp_out, n_classes)
    return {'resnet': resnet, 'head': head}


# -----------------------------------------------------------------------------
# Forward
# -----------------------------------------------------------------------------

@functools.partial(jax.jit, static_argnames=("n_classes",))
def combined_model_forward(params, image_nchw, csv_data, n_classes=5):
    rn, hd = params['resnet'], params['head']

    # ----- resnet18 backbone (fc = Identity); NHWC bf16 activations -----
    x = jnp.transpose(image_nchw, (0, 2, 3, 1)).astype(jnp.bfloat16)
    x = conv_bn_relu(x, rn['conv1'], 7, 7, 2, 3, relu=True)
    x = maxpool_3x3_s2_p1(x)
    strides = (1, 2, 2, 2)
    for li in range(4):
        b0, b1 = rn['layers'][li]
        x = basic_block(x, b0, strides[li])
        x = basic_block(x, b1, 1)
    x1 = global_avg_pool(x)                                   # (B, 512) f32

    # ----- MLP branch + concat + combined head: one fused kernel -----
    B = x1.shape[0]
    Bp = _round_up(B, 8)
    x1p = jnp.pad(x1, ((0, Bp - B), (0, 0)))
    csv = csv_data.astype(jnp.float32)
    csvp = jnp.pad(csv, ((0, Bp - B), (0, hd['w1'].shape[0] - csv.shape[1])))

    logits = pl.pallas_call(
        _head_kernel,
        out_shape=jax.ShapeDtypeStruct((Bp, _LANE), jnp.float32),
    )(x1p, csvp, hd['w1'], hd['b1'], hd['w2'], hd['b2'],
      hd['wa'], hd['wb'], hd['s1'], hd['t1'],
      hd['w4'], hd['s2'], hd['t2'], hd['w5'], hd['b5'])
    return logits[:B, :n_classes]


# -----------------------------------------------------------------------------
# Main
# -----------------------------------------------------------------------------

if __name__ == "__main__":
    key = jax.random.PRNGKey(0)
    k_params, k_img, k_csv = jax.random.split(key, 3)

    N_CLASSES, CSV_DIM = 5, 8
    params = init_params(k_params, csv_dim=CSV_DIM, n_classes=N_CLASSES)

    image = jax.random.normal(k_img, (2, 3, 32, 32), jnp.float32)   # NCHW
    csv_data = jax.random.normal(k_csv, (2, CSV_DIM), jnp.float32)

    out = combined_model_forward(params, image, csv_data, n_classes=N_CLASSES)
    out = jax.block_until_ready(out)

    assert out.shape == (2, N_CLASSES), out.shape
    assert bool(jnp.all(jnp.isfinite(out)))
    print("KERNEL_OK")
</pallas_src>

<mosaic_0001>
module attributes {stable_mosaic.version = 11 : i64} {
  func.func @_matmul_kernel(%arg0: i32, %arg1: i32, %arg2: i32, %arg3: memref<256x256xbf16, #tpu.memory_space<vmem>>, %arg4: memref<256x64xbf16, #tpu.memory_space<vmem>>, %arg5: memref<1x64xf32, #tpu.memory_space<vmem>>, %arg6: memref<1x64xf32, #tpu.memory_space<vmem>>, %arg7: memref<256x64xbf16, #tpu.memory_space<vmem>>, %arg8: memref<256x64xf32, #tpu.memory_space<vmem>>) attributes {dimension_semantics = [#tpu.dimension_semantics<parallel>, #tpu.dimension_semantics<parallel>, #tpu.dimension_semantics<arbitrary>], iteration_bounds = array<i64: 2, 1, 1>, scalar_prefetch = 0 : i64, scratch_operands = 1 : i64, tpu.core_type = #tpu.core_type<tc>, window_params = [{transform_indices = @transform_0, window_bounds = array<i64: 256, 256>}, {transform_indices = @transform_1, window_bounds = array<i64: 256, 64>}, {transform_indices = @transform_2, window_bounds = array<i64: 1, 64>}, {transform_indices = @transform_3, window_bounds = array<i64: 1, 64>}, {transform_indices = @transform_4, window_bounds = array<i64: 256, 64>}]} {
    %c0_i32 = arith.constant 0 : i32
    %0 = arith.cmpi eq, %arg2, %c0_i32 : i32
    %1 = arith.extui %0 : i1 to i32
    %c0_i32_0 = arith.constant 0 : i32
    %2 = arith.cmpi ne, %1, %c0_i32_0 : i32
    scf.if %2 {
      %cst_10 = arith.constant 0.000000e+00 : f32
      %12 = vector.broadcast %cst_10 : f32 to vector<256x64xf32>
      %c0_11 = arith.constant 0 : index
      %c0_12 = arith.constant 0 : index
      %13 = vector.load %arg8[%c0_11, %c0_12] : memref<256x64xf32, #tpu.memory_space<vmem>>, vector<256x64xf32>
      tpu.vector_store %arg8[%c0_11, %c0_12], %12 {strides = array<i32>} : memref<256x64xf32, #tpu.memory_space<vmem>>, vector<256x64xf32>,
    } else {
    }
    %c0 = arith.constant 0 : index
    %c0_1 = arith.constant 0 : index
    %3 = vector.load %arg8[%c0, %c0_1] : memref<256x64xf32, #tpu.memory_space<vmem>>, vector<256x64xf32>
    %c0_2 = arith.constant 0 : index
    %c0_3 = arith.constant 0 : index
    %4 = vector.load %arg3[%c0_2, %c0_3] : memref<256x256xbf16, #tpu.memory_space<vmem>>, vector<256x256xbf16>
    %c0_4 = arith.constant 0 : index
    %c0_5 = arith.constant 0 : index
    %5 = vector.load %arg4[%c0_4, %c0_5] : memref<256x64xbf16, #tpu.memory_space<vmem>>, vector<256x64xbf16>
    %cst = arith.constant dense<0.000000e+00> : vector<256x64xf32>
    %6 = tpu.matmul %4, %5, %cst {dimension_numbers = #tpu.dot_dimension_numbers<[1], [0], [0], [1], [0, 0, 1, 1], [], []>} : vector<256x256xbf16>, vector<256x64xbf16>, vector<256x64xf32> -> vector<256x64xf32>
    %7 = arith.addf %3, %6 : vector<256x64xf32>
    %c0_6 = arith.constant 0 : index
    %c0_7 = arith.constant 0 : index
    %8 = vector.load %arg8[%c0_6, %c0_7] : memref<256x64xf32, #tpu.memory_space<vmem>>, vector<256x64xf32>
    tpu.vector_store %arg8[%c0_6, %c0_7], %7 {strides = array<i32>} : memref<256x64xf32, #tpu.memory_space<vmem>>, vector<256x64xf32>,
    %c0_i32_8 = arith.constant 0 : i32
    %9 = arith.cmpi eq, %arg2, %c0_i32_8 : i32
    %10 = arith.extui %9 : i1 to i32
    %c0_i32_9 = arith.constant 0 : i32
    %11 = arith.cmpi ne, %10, %c0_i32_9 : i32
    scf.if %11 {
      %c0_10 = arith.constant 0 : index
      %c0_11 = arith.constant 0 : index
      %12 = vector.load %arg8[%c0_10, %c0_11] : memref<256x64xf32, #tpu.memory_space<vmem>>, vector<256x64xf32>
      %c0_12 = arith.constant 0 : index
      %c0_13 = arith.constant 0 : index
      %13 = vector.load %arg5[%c0_12, %c0_13] : memref<1x64xf32, #tpu.memory_space<vmem>>, vector<1x64xf32>
      %14 = vector.broadcast %13 : vector<1x64xf32> to vector<256x64xf32>
      %15 = arith.mulf %12, %14 : vector<256x64xf32>
      %c0_14 = arith.constant 0 : index
      %c0_15 = arith.constant 0 : index
      %16 = vector.load %arg6[%c0_14, %c0_15] : memref<1x64xf32, #tpu.memory_space<vmem>>, vector<1x64xf32>
      %17 = vector.broadcast %16 : vector<1x64xf32> to vector<256x64xf32>
      %18 = arith.addf %15, %17 : vector<256x64xf32>
      %cst_16 = arith.constant 0.000000e+00 : f32
      %19 = vector.broadcast %cst_16 : f32 to vector<256x64xf32>
      %20 = arith.maximumf %18, %19 : vector<256x64xf32>
      %21 = arith.truncf %20 : vector<256x64xf32> to vector<256x64xbf16>
      %c0_17 = arith.constant 0 : index
      %c0_18 = arith.constant 0 : index
      %22 = vector.load %arg7[%c0_17, %c0_18] : memref<256x64xbf16, #tpu.memory_space<vmem>>, vector<256x64xbf16>
      tpu.vector_store %arg7[%c0_17, %c0_18], %21 {strides = array<i32>} : memref<256x64xbf16, #tpu.memory_space<vmem>>, vector<256x64xbf16>,
    } else {
    }
    return
  }
  func.func @transform_0(%arg0: i32, %arg1: i32, %arg2: i32) -> (i32, i32) {
    %c0_i32 = arith.constant 0 : i32
    return %arg0, %arg2 : i32, i32
  }
  func.func @transform_1(%arg0: i32, %arg1: i32, %arg2: i32) -> (i32, i32) {
    %c0_i32 = arith.constant 0 : i32
    return %arg2, %arg1 : i32, i32
  }
  func.func @transform_2(%arg0: i32, %arg1: i32, %arg2: i32) -> (i32, i32) {
    %c0_i32 = arith.constant 0 : i32
    %c0_i32_0 = arith.constant 0 : i32
    return %c0_i32, %arg1 : i32, i32
  }
  func.func @transform_3(%arg0: i32, %arg1: i32, %arg2: i32) -> (i32, i32) {
    %c0_i32 = arith.constant 0 : i32
    %c0_i32_0 = arith.constant 0 : i32
    return %c0_i32, %arg1 : i32, i32
  }
  func.func @transform_4(%arg0: i32, %arg1: i32, %arg2: i32) -> (i32, i32) {
    %c0_i32 = arith.constant 0 : i32
    return %arg0, %arg1 : i32, i32
  }
}

module attributes {stable_mosaic.version = 11 : i64} {
  func.func @_max9_kernel(%arg0: i32, %arg1: memref<9x128x64xbf16, #tpu.memory_space<vmem>>, %arg2: memref<128x64xbf16, #tpu.memory_space<vmem>>) attributes {dimension_semantics = [#tpu.dimension_semantics<parallel>], iteration_bounds = array<i64: 1>, scalar_prefetch = 0 : i64, scratch_operands = 0 : i64, tpu.core_type = #tpu.core_type<tc>, window_params = [{transform_indices = @transform_0, window_bounds = array<i64: 9, 128, 64>}, {transform_indices = @transform_1, window_bounds = array<i64: 128, 64>}]} {
    %c0 = arith.constant 0 : index
    %c0_0 = arith.constant 0 : index
    %c0_1 = arith.constant 0 : index
    %0 = vector.load %arg1[%c0, %c0_0, %c0_1] : memref<9x128x64xbf16, #tpu.memory_space<vmem>>, vector<9x128x64xbf16>
    %cst = arith.constant dense<0xFF80> : vector<128x64xbf16>
    %1 = vector.multi_reduction <maximumf>, %0, %cst [0] : vector<9x128x64xbf16> to vector<128x64xbf16>
    %c0_2 = arith.constant 0 : index
    %c0_3 = arith.constant 0 : index
    %2 = vector.load %arg2[%c0_2, %c0_3] : memref<128x64xbf16, #tpu.memory_space<vmem>>, vector<128x64xbf16>
    tpu.vector_store %arg2[%c0_2, %c0_3], %1 {strides = array<i32>} : memref<128x64xbf16, #tpu.memory_space<vmem>>, vector<128x64xbf16>,
    return
  }
  func.func @transform_0(%arg0: i32) -> (i32, i32, i32) {
    %c0_i32 = arith.constant 0 : i32
    %c0_i32_0 = arith.constant 0 : i32
    %c0_i32_1 = arith.constant 0 : i32
    return %c0_i32, %arg0, %c0_i32_0 : i32, i32, i32
  }
  func.func @transform_1(%arg0: i32) -> (i32, i32) {
    %c0_i32 = arith.constant 0 : i32
    %c0_i32_0 = arith.constant 0 : i32
    return %arg0, %c0_i32 : i32, i32
  }
}

module attributes {stable_mosaic.version = 11 : i64} {
  func.func @_matmul_res_kernel(%arg0: i32, %arg1: i32, %arg2: i32, %arg3: memref<128x128xbf16, #tpu.memory_space<vmem>>, %arg4: memref<128x64xbf16, #tpu.memory_space<vmem>>, %arg5: memref<1x64xf32, #tpu.memory_space<vmem>>, %arg6: memref<1x64xf32, #tpu.memory_space<vmem>>, %arg7: memref<128x64xbf16, #tpu.memory_space<vmem>>, %arg8: memref<128x64xbf16, #tpu.memory_space<vmem>>, %arg9: memref<128x64xf32, #tpu.memory_space<vmem>>) attributes {dimension_semantics = [#tpu.dimension_semantics<parallel>, #tpu.dimension_semantics<parallel>, #tpu.dimension_semantics<arbitrary>], iteration_bounds = array<i64: 1, 1, 5>, scalar_prefetch = 0 : i64, scratch_operands = 1 : i64, tpu.core_type = #tpu.core_type<tc>, window_params = [{transform_indices = @transform_0, window_bounds = array<i64: 128, 128>}, {transform_indices = @transform_1, window_bounds = array<i64: 128, 64>}, {transform_indices = @transform_2, window_bounds = array<i64: 1, 64>}, {transform_indices = @transform_3, window_bounds = array<i64: 1, 64>}, {transform_indices = @transform_4, window_bounds = array<i64: 128, 64>}, {transform_indices = @transform_5, window_bounds = array<i64: 128, 64>}]} {
    %c0_i32 = arith.constant 0 : i32
    %0 = arith.cmpi eq, %arg2, %c0_i32 : i32
    %1 = arith.extui %0 : i1 to i32
    %c0_i32_0 = arith.constant 0 : i32
    %2 = arith.cmpi ne, %1, %c0_i32_0 : i32
    scf.if %2 {
      %cst_9 = arith.constant 0.000000e+00 : f32
      %12 = vector.broadcast %cst_9 : f32 to vector<128x64xf32>
      %c0_10 = arith.constant 0 : index
      %c0_11 = arith.constant 0 : index
      %13 = vector.load %arg9[%c0_10, %c0_11] : memref<128x64xf32, #tpu.memory_space<vmem>>, vector<128x64xf32>
      tpu.vector_store %arg9[%c0_10, %c0_11], %12 {strides = array<i32>} : memref<128x64xf32, #tpu.memory_space<vmem>>, vector<128x64xf32>,
    } else {
    }
    %c0 = arith.constant 0 : index
    %c0_1 = arith.constant 0 : index
    %3 = vector.load %arg9[%c0, %c0_1] : memref<128x64xf32, #tpu.memory_space<vmem>>, vector<128x64xf32>
    %c0_2 = arith.constant 0 : index
    %c0_3 = arith.constant 0 : index
    %4 = vector.load %arg3[%c0_2, %c0_3] : memref<128x128xbf16, #tpu.memory_space<vmem>>, vector<128x128xbf16>
    %c0_4 = arith.constant 0 : index
    %c0_5 = arith.constant 0 : index
    %5 = vector.load %arg4[%c0_4, %c0_5] : memref<128x64xbf16, #tpu.memory_space<vmem>>, vector<128x64xbf16>
    %cst = arith.constant dense<0.000000e+00> : vector<128x64xf32>
    %6 = tpu.matmul %4, %5, %cst {dimension_numbers = #tpu.dot_dimension_numbers<[1], [0], [0], [1], [0, 0, 1, 1], [], []>} : vector<128x128xbf16>, vector<128x64xbf16>, vector<128x64xf32> -> vector<128x64xf32>
    %7 = arith.addf %3, %6 : vector<128x64xf32>
    %c0_6 = arith.constant 0 : index
    %c0_7 = arith.constant 0 : index
    %8 = vector.load %arg9[%c0_6, %c0_7] : memref<128x64xf32, #tpu.memory_space<vmem>>, vector<128x64xf32>
    tpu.vector_store %arg9[%c0_6, %c0_7], %7 {strides = array<i32>} : memref<128x64xf32, #tpu.memory_space<vmem>>, vector<128x64xf32>,
    %c4_i32 = arith.constant 4 : i32
    %9 = arith.cmpi eq, %arg2, %c4_i32 : i32
    %10 = arith.extui %9 : i1 to i32
    %c0_i32_8 = arith.constant 0 : i32
    %11 = arith.cmpi ne, %10, %c0_i32_8 : i32
    scf.if %11 {
      %c0_9 = arith.constant 0 : index
      %c0_10 = arith.constant 0 : index
      %12 = vector.load %arg9[%c0_9, %c0_10] : memref<128x64xf32, #tpu.memory_space<vmem>>, vector<128x64xf32>
      %c0_11 = arith.constant 0 : index
      %c0_12 = arith.constant 0 : index
      %13 = vector.load %arg5[%c0_11, %c0_12] : memref<1x64xf32, #tpu.memory_space<vmem>>, vector<1x64xf32>
      %14 = vector.broadcast %13 : vector<1x64xf32> to vector<128x64xf32>
      %15 = arith.mulf %12, %14 : vector<128x64xf32>
      %c0_13 = arith.constant 0 : index
      %c0_14 = arith.constant 0 : index
      %16 = vector.load %arg6[%c0_13, %c0_14] : memref<1x64xf32, #tpu.memory_space<vmem>>, vector<1x64xf32>
      %17 = vector.broadcast %16 : vector<1x64xf32> to vector<128x64xf32>
      %18 = arith.addf %15, %17 : vector<128x64xf32>
      %c0_15 = arith.constant 0 : index
      %c0_16 = arith.constant 0 : index
      %19 = vector.load %arg7[%c0_15, %c0_16] : memref<128x64xbf16, #tpu.memory_space<vmem>>, vector<128x64xbf16>
      %20 = arith.extf %19 : vector<128x64xbf16> to vector<128x64xf32>
      %21 = arith.addf %18, %20 : vector<128x64xf32>
      %cst_17 = arith.constant 0.000000e+00 : f32
      %22 = vector.broadcast %cst_17 : f32 to vector<128x64xf32>
      %23 = arith.maximumf %21, %22 : vector<128x64xf32>
      %24 = arith.truncf %23 : vector<128x64xf32> to vector<128x64xbf16>
      %c0_18 = arith.constant 0 : index
      %c0_19 = arith.constant 0 : index
      %25 = vector.load %arg8[%c0_18, %c0_19] : memref<128x64xbf16, #tpu.memory_space<vmem>>, vector<128x64xbf16>
      tpu.vector_store %arg8[%c0_18, %c0_19], %24 {strides = array<i32>} : memref<128x64xbf16, #tpu.memory_space<vmem>>, vector<128x64xbf16>,
    } else {
    }
    return
  }
  func.func @transform_0(%arg0: i32, %arg1: i32, %arg2: i32) -> (i32, i32) {
    %c0_i32 = arith.constant 0 : i32
    return %arg0, %arg2 : i32, i32
  }
  func.func @transform_1(%arg0: i32, %arg1: i32, %arg2: i32) -> (i32, i32) {
    %c0_i32 = arith.constant 0 : i32
    return %arg2, %arg1 : i32, i32
  }
  func.func @transform_2(%arg0: i32, %arg1: i32, %arg2: i32) -> (i32, i32) {
    %c0_i32 = arith.constant 0 : i32
    %c0_i32_0 = arith.constant 0 : i32
    return %c0_i32, %arg1 : i32, i32
  }
  func.func @transform_3(%arg0: i32, %arg1: i32, %arg2: i32) -> (i32, i32) {
    %c0_i32 = arith.constant 0 : i32
    %c0_i32_0 = arith.constant 0 : i32
    return %c0_i32, %arg1 : i32, i32
  }
  func.func @transform_4(%arg0: i32, %arg1: i32, %arg2: i32) -> (i32, i32) {
    %c0_i32 = arith.constant 0 : i32
    return %arg0, %arg1 : i32, i32
  }
  func.func @transform_5(%arg0: i32, %arg1: i32, %arg2: i32) -> (i32, i32) {
    %c0_i32 = arith.constant 0 : i32
    return %arg0, %arg1 : i32, i32
  }
}

module attributes {stable_mosaic.version = 11 : i64} {
  func.func @_matmul_kernel(%arg0: i32, %arg1: i32, %arg2: i32, %arg3: memref<128x128xbf16, #tpu.memory_space<vmem>>, %arg4: memref<128x64xbf16, #tpu.memory_space<vmem>>, %arg5: memref<1x64xf32, #tpu.memory_space<vmem>>, %arg6: memref<1x64xf32, #tpu.memory_space<vmem>>, %arg7: memref<128x64xbf16, #tpu.memory_space<vmem>>, %arg8: memref<128x64xf32, #tpu.memory_space<vmem>>) attributes {dimension_semantics = [#tpu.dimension_semantics<parallel>, #tpu.dimension_semantics<parallel>, #tpu.dimension_semantics<arbitrary>], iteration_bounds = array<i64: 1, 1, 5>, scalar_prefetch = 0 : i64, scratch_operands = 1 : i64, tpu.core_type = #tpu.core_type<tc>, window_params = [{transform_indices = @transform_0, window_bounds = array<i64: 128, 128>}, {transform_indices = @transform_1, window_bounds = array<i64: 128, 64>}, {transform_indices = @transform_2, window_bounds = array<i64: 1, 64>}, {transform_indices = @transform_3, window_bounds = array<i64: 1, 64>}, {transform_indices = @transform_4, window_bounds = array<i64: 128, 64>}]} {
    %c0_i32 = arith.constant 0 : i32
    %0 = arith.cmpi eq, %arg2, %c0_i32 : i32
    %1 = arith.extui %0 : i1 to i32
    %c0_i32_0 = arith.constant 0 : i32
    %2 = arith.cmpi ne, %1, %c0_i32_0 : i32
    scf.if %2 {
      %cst_9 = arith.constant 0.000000e+00 : f32
      %12 = vector.broadcast %cst_9 : f32 to vector<128x64xf32>
      %c0_10 = arith.constant 0 : index
      %c0_11 = arith.constant 0 : index
      %13 = vector.load %arg8[%c0_10, %c0_11] : memref<128x64xf32, #tpu.memory_space<vmem>>, vector<128x64xf32>
      tpu.vector_store %arg8[%c0_10, %c0_11], %12 {strides = array<i32>} : memref<128x64xf32, #tpu.memory_space<vmem>>, vector<128x64xf32>,
    } else {
    }
    %c0 = arith.constant 0 : index
    %c0_1 = arith.constant 0 : index
    %3 = vector.load %arg8[%c0, %c0_1] : memref<128x64xf32, #tpu.memory_space<vmem>>, vector<128x64xf32>
    %c0_2 = arith.constant 0 : index
    %c0_3 = arith.constant 0 : index
    %4 = vector.load %arg3[%c0_2, %c0_3] : memref<128x128xbf16, #tpu.memory_space<vmem>>, vector<128x128xbf16>
    %c0_4 = arith.constant 0 : index
    %c0_5 = arith.constant 0 : index
    %5 = vector.load %arg4[%c0_4, %c0_5] : memref<128x64xbf16, #tpu.memory_space<vmem>>, vector<128x64xbf16>
    %cst = arith.constant dense<0.000000e+00> : vector<128x64xf32>
    %6 = tpu.matmul %4, %5, %cst {dimension_numbers = #tpu.dot_dimension_numbers<[1], [0], [0], [1], [0, 0, 1, 1], [], []>} : vector<128x128xbf16>, vector<128x64xbf16>, vector<128x64xf32> -> vector<128x64xf32>
    %7 = arith.addf %3, %6 : vector<128x64xf32>
    %c0_6 = arith.constant 0 : index
    %c0_7 = arith.constant 0 : index
    %8 = vector.load %arg8[%c0_6, %c0_7] : memref<128x64xf32, #tpu.memory_space<vmem>>, vector<128x64xf32>
    tpu.vector_store %arg8[%c0_6, %c0_7], %7 {strides = array<i32>} : memref<128x64xf32, #tpu.memory_space<vmem>>, vector<128x64xf32>,
    %c4_i32 = arith.constant 4 : i32
    %9 = arith.cmpi eq, %arg2, %c4_i32 : i32
    %10 = arith.extui %9 : i1 to i32
    %c0_i32_8 = arith.constant 0 : i32
    %11 = arith.cmpi ne, %10, %c0_i32_8 : i32
    scf.if %11 {
      %c0_9 = arith.constant 0 : index
      %c0_10 = arith.constant 0 : index
      %12 = vector.load %arg8[%c0_9, %c0_10] : memref<128x64xf32, #tpu.memory_space<vmem>>, vector<128x64xf32>
      %c0_11 = arith.constant 0 : index
      %c0_12 = arith.constant 0 : index
      %13 = vector.load %arg5[%c0_11, %c0_12] : memref<1x64xf32, #tpu.memory_space<vmem>>, vector<1x64xf32>
      %14 = vector.broadcast %13 : vector<1x64xf32> to vector<128x64xf32>
      %15 = arith.mulf %12, %14 : vector<128x64xf32>
      %c0_13 = arith.constant 0 : index
      %c0_14 = arith.constant 0 : index
      %16 = vector.load %arg6[%c0_13, %c0_14] : memref<1x64xf32, #tpu.memory_space<vmem>>, vector<1x64xf32>
      %17 = vector.broadcast %16 : vector<1x64xf32> to vector<128x64xf32>
      %18 = arith.addf %15, %17 : vector<128x64xf32>
      %cst_15 = arith.constant 0.000000e+00 : f32
      %19 = vector.broadcast %cst_15 : f32 to vector<128x64xf32>
      %20 = arith.maximumf %18, %19 : vector<128x64xf32>
      %21 = arith.truncf %20 : vector<128x64xf32> to vector<128x64xbf16>
      %c0_16 = arith.constant 0 : index
      %c0_17 = arith.constant 0 : index
      %22 = vector.load %arg7[%c0_16, %c0_17] : memref<128x64xbf16, #tpu.memory_space<vmem>>, vector<128x64xbf16>
      tpu.vector_store %arg7[%c0_16, %c0_17], %21 {strides = array<i32>} : memref<128x64xbf16, #tpu.memory_space<vmem>>, vector<128x64xbf16>,
    } else {
    }
    return
  }
  func.func @transform_0(%arg0: i32, %arg1: i32, %arg2: i32) -> (i32, i32) {
    %c0_i32 = arith.constant 0 : i32
    return %arg0, %arg2 : i32, i32
  }
  func.func @transform_1(%arg0: i32, %arg1: i32, %arg2: i32) -> (i32, i32) {
    %c0_i32 = arith.constant 0 : i32
    return %arg2, %arg1 : i32, i32
  }
  func.func @transform_2(%arg0: i32, %arg1: i32, %arg2: i32) -> (i32, i32) {
    %c0_i32 = arith.constant 0 : i32
    %c0_i32_0 = arith.constant 0 : i32
    return %c0_i32, %arg1 : i32, i32
  }
  func.func @transform_3(%arg0: i32, %arg1: i32, %arg2: i32) -> (i32, i32) {
    %c0_i32 = arith.constant 0 : i32
    %c0_i32_0 = arith.constant 0 : i32
    return %c0_i32, %arg1 : i32, i32
  }
  func.func @transform_4(%arg0: i32, %arg1: i32, %arg2: i32) -> (i32, i32) {
    %c0_i32 = arith.constant 0 : i32
    return %arg0, %arg1 : i32, i32
  }
}

module attributes {stable_mosaic.version = 11 : i64} {
  func.func @_matmul_kernel(%arg0: i32, %arg1: i32, %arg2: i32, %arg3: memref<32x128xbf16, #tpu.memory_space<vmem>>, %arg4: memref<128x128xbf16, #tpu.memory_space<vmem>>, %arg5: memref<1x128xf32, #tpu.memory_space<vmem>>, %arg6: memref<1x128xf32, #tpu.memory_space<vmem>>, %arg7: memref<32x128xbf16, #tpu.memory_space<vmem>>, %arg8: memref<32x128xf32, #tpu.memory_space<vmem>>) attributes {dimension_semantics = [#tpu.dimension_semantics<parallel>, #tpu.dimension_semantics<parallel>, #tpu.dimension_semantics<arbitrary>], iteration_bounds = array<i64: 1, 1, 5>, scalar_prefetch = 0 : i64, scratch_operands = 1 : i64, tpu.core_type = #tpu.core_type<tc>, window_params = [{transform_indices = @transform_0, window_bounds = array<i64: 32, 128>}, {transform_indices = @transform_1, window_bounds = array<i64: 128, 128>}, {transform_indices = @transform_2, window_bounds = array<i64: 1, 128>}, {transform_indices = @transform_3, window_bounds = array<i64: 1, 128>}, {transform_indices = @transform_4, window_bounds = array<i64: 32, 128>}]} {
    %c0_i32 = arith.constant 0 : i32
    %0 = arith.cmpi eq, %arg2, %c0_i32 : i32
    %1 = arith.extui %0 : i1 to i32
    %c0_i32_0 = arith.constant 0 : i32
    %2 = arith.cmpi ne, %1, %c0_i32_0 : i32
    scf.if %2 {
      %cst_9 = arith.constant 0.000000e+00 : f32
      %12 = vector.broadcast %cst_9 : f32 to vector<32x128xf32>
      %c0_10 = arith.constant 0 : index
      %c0_11 = arith.constant 0 : index
      %13 = vector.load %arg8[%c0_10, %c0_11] : memref<32x128xf32, #tpu.memory_space<vmem>>, vector<32x128xf32>
      tpu.vector_store %arg8[%c0_10, %c0_11], %12 {strides = array<i32>} : memref<32x128xf32, #tpu.memory_space<vmem>>, vector<32x128xf32>,
    } else {
    }
    %c0 = arith.constant 0 : index
    %c0_1 = arith.constant 0 : index
    %3 = vector.load %arg8[%c0, %c0_1] : memref<32x128xf32, #tpu.memory_space<vmem>>, vector<32x128xf32>
    %c0_2 = arith.constant 0 : index
    %c0_3 = arith.constant 0 : index
    %4 = vector.load %arg3[%c0_2, %c0_3] : memref<32x128xbf16, #tpu.memory_space<vmem>>, vector<32x128xbf16>
    %c0_4 = arith.constant 0 : index
    %c0_5 = arith.constant 0 : index
    %5 = vector.load %arg4[%c0_4, %c0_5] : memref<128x128xbf16, #tpu.memory_space<vmem>>, vector<128x128xbf16>
    %cst = arith.constant dense<0.000000e+00> : vector<32x128xf32>
    %6 = tpu.matmul %4, %5, %cst {dimension_numbers = #tpu.dot_dimension_numbers<[1], [0], [0], [1], [0, 0, 1, 1], [], []>} : vector<32x128xbf16>, vector<128x128xbf16>, vector<32x128xf32> -> vector<32x128xf32>
    %7 = arith.addf %3, %6 : vector<32x128xf32>
    %c0_6 = arith.constant 0 : index
    %c0_7 = arith.constant 0 : index
    %8 = vector.load %arg8[%c0_6, %c0_7] : memref<32x128xf32, #tpu.memory_space<vmem>>, vector<32x128xf32>
    tpu.vector_store %arg8[%c0_6, %c0_7], %7 {strides = array<i32>} : memref<32x128xf32, #tpu.memory_space<vmem>>, vector<32x128xf32>,
    %c4_i32 = arith.constant 4 : i32
    %9 = arith.cmpi eq, %arg2, %c4_i32 : i32
    %10 = arith.extui %9 : i1 to i32
    %c0_i32_8 = arith.constant 0 : i32
    %11 = arith.cmpi ne, %10, %c0_i32_8 : i32
    scf.if %11 {
      %c0_9 = arith.constant 0 : index
      %c0_10 = arith.constant 0 : index
      %12 = vector.load %arg8[%c0_9, %c0_10] : memref<32x128xf32, #tpu.memory_space<vmem>>, vector<32x128xf32>
      %c0_11 = arith.constant 0 : index
      %c0_12 = arith.constant 0 : index
      %13 = vector.load %arg5[%c0_11, %c0_12] : memref<1x128xf32, #tpu.memory_space<vmem>>, vector<1x128xf32>
      %14 = vector.broadcast %13 : vector<1x128xf32> to vector<32x128xf32>
      %15 = arith.mulf %12, %14 : vector<32x128xf32>
      %c0_13 = arith.constant 0 : index
      %c0_14 = arith.constant 0 : index
      %16 = vector.load %arg6[%c0_13, %c0_14] : memref<1x128xf32, #tpu.memory_space<vmem>>, vector<1x128xf32>
      %17 = vector.broadcast %16 : vector<1x128xf32> to vector<32x128xf32>
      %18 = arith.addf %15, %17 : vector<32x128xf32>
      %cst_15 = arith.constant 0.000000e+00 : f32
      %19 = vector.broadcast %cst_15 : f32 to vector<32x128xf32>
      %20 = arith.maximumf %18, %19 : vector<32x128xf32>
      %21 = arith.truncf %20 : vector<32x128xf32> to vector<32x128xbf16>
      %c0_16 = arith.constant 0 : index
      %c0_17 = arith.constant 0 : index
      %22 = vector.load %arg7[%c0_16, %c0_17] : memref<32x128xbf16, #tpu.memory_space<vmem>>, vector<32x128xbf16>
      tpu.vector_store %arg7[%c0_16, %c0_17], %21 {strides = array<i32>} : memref<32x128xbf16, #tpu.memory_space<vmem>>, vector<32x128xbf16>,
    } else {
    }
    return
  }
  func.func @transform_0(%arg0: i32, %arg1: i32, %arg2: i32) -> (i32, i32) {
    %c0_i32 = arith.constant 0 : i32
    return %arg0, %arg2 : i32, i32
  }
  func.func @transform_1(%arg0: i32, %arg1: i32, %arg2: i32) -> (i32, i32) {
    %c0_i32 = arith.constant 0 : i32
    return %arg2, %arg1 : i32, i32
  }
  func.func @transform_2(%arg0: i32, %arg1: i32, %arg2: i32) -> (i32, i32) {
    %c0_i32 = arith.constant 0 : i32
    %c0_i32_0 = arith.constant 0 : i32
    return %c0_i32, %arg1 : i32, i32
  }
  func.func @transform_3(%arg0: i32, %arg1: i32, %arg2: i32) -> (i32, i32) {
    %c0_i32 = arith.constant 0 : i32
    %c0_i32_0 = arith.constant 0 : i32
    return %c0_i32, %arg1 : i32, i32
  }
  func.func @transform_4(%arg0: i32, %arg1: i32, %arg2: i32) -> (i32, i32) {
    %c0_i32 = arith.constant 0 : i32
    return %arg0, %arg1 : i32, i32
  }
}

module attributes {stable_mosaic.version = 11 : i64} {
  func.func @_matmul_kernel(%arg0: i32, %arg1: i32, %arg2: i32, %arg3: memref<32x128xbf16, #tpu.memory_space<vmem>>, %arg4: memref<128x128xbf16, #tpu.memory_space<vmem>>, %arg5: memref<1x128xf32, #tpu.memory_space<vmem>>, %arg6: memref<1x128xf32, #tpu.memory_space<vmem>>, %arg7: memref<32x128xbf16, #tpu.memory_space<vmem>>, %arg8: memref<32x128xf32, #tpu.memory_space<vmem>>) attributes {dimension_semantics = [#tpu.dimension_semantics<parallel>, #tpu.dimension_semantics<parallel>, #tpu.dimension_semantics<arbitrary>], iteration_bounds = array<i64: 1, 1, 1>, scalar_prefetch = 0 : i64, scratch_operands = 1 : i64, tpu.core_type = #tpu.core_type<tc>, window_params = [{transform_indices = @transform_0, window_bounds = array<i64: 32, 128>}, {transform_indices = @transform_1, window_bounds = array<i64: 128, 128>}, {transform_indices = @transform_2, window_bounds = array<i64: 1, 128>}, {transform_indices = @transform_3, window_bounds = array<i64: 1, 128>}, {transform_indices = @transform_4, window_bounds = array<i64: 32, 128>}]} {
    %c0_i32 = arith.constant 0 : i32
    %0 = arith.cmpi eq, %arg2, %c0_i32 : i32
    %1 = arith.extui %0 : i1 to i32
    %c0_i32_0 = arith.constant 0 : i32
    %2 = arith.cmpi ne, %1, %c0_i32_0 : i32
    scf.if %2 {
      %cst_10 = arith.constant 0.000000e+00 : f32
      %12 = vector.broadcast %cst_10 : f32 to vector<32x128xf32>
      %c0_11 = arith.constant 0 : index
      %c0_12 = arith.constant 0 : index
      %13 = vector.load %arg8[%c0_11, %c0_12] : memref<32x128xf32, #tpu.memory_space<vmem>>, vector<32x128xf32>
      tpu.vector_store %arg8[%c0_11, %c0_12], %12 {strides = array<i32>} : memref<32x128xf32, #tpu.memory_space<vmem>>, vector<32x128xf32>,
    } else {
    }
    %c0 = arith.constant 0 : index
    %c0_1 = arith.constant 0 : index
    %3 = vector.load %arg8[%c0, %c0_1] : memref<32x128xf32, #tpu.memory_space<vmem>>, vector<32x128xf32>
    %c0_2 = arith.constant 0 : index
    %c0_3 = arith.constant 0 : index
    %4 = vector.load %arg3[%c0_2, %c0_3] : memref<32x128xbf16, #tpu.memory_space<vmem>>, vector<32x128xbf16>
    %c0_4 = arith.constant 0 : index
    %c0_5 = arith.constant 0 : index
    %5 = vector.load %arg4[%c0_4, %c0_5] : memref<128x128xbf16, #tpu.memory_space<vmem>>, vector<128x128xbf16>
    %cst = arith.constant dense<0.000000e+00> : vector<32x128xf32>
    %6 = tpu.matmul %4, %5, %cst {dimension_numbers = #tpu.dot_dimension_numbers<[1], [0], [0], [1], [0, 0, 1, 1], [], []>} : vector<32x128xbf16>, vector<128x128xbf16>, vector<32x128xf32> -> vector<32x128xf32>
    %7 = arith.addf %3, %6 : vector<32x128xf32>
    %c0_6 = arith.constant 0 : index
    %c0_7 = arith.constant 0 : index
    %8 = vector.load %arg8[%c0_6, %c0_7] : memref<32x128xf32, #tpu.memory_space<vmem>>, vector<32x128xf32>
    tpu.vector_store %arg8[%c0_6, %c0_7], %7 {strides = array<i32>} : memref<32x128xf32, #tpu.memory_space<vmem>>, vector<32x128xf32>,
    %c0_i32_8 = arith.constant 0 : i32
    %9 = arith.cmpi eq, %arg2, %c0_i32_8 : i32
    %10 = arith.extui %9 : i1 to i32
    %c0_i32_9 = arith.constant 0 : i32
    %11 = arith.cmpi ne, %10, %c0_i32_9 : i32
    scf.if %11 {
      %c0_10 = arith.constant 0 : index
      %c0_11 = arith.constant 0 : index
      %12 = vector.load %arg8[%c0_10, %c0_11] : memref<32x128xf32, #tpu.memory_space<vmem>>, vector<32x128xf32>
      %c0_12 = arith.constant 0 : index
      %c0_13 = arith.constant 0 : index
      %13 = vector.load %arg5[%c0_12, %c0_13] : memref<1x128xf32, #tpu.memory_space<vmem>>, vector<1x128xf32>
      %14 = vector.broadcast %13 : vector<1x128xf32> to vector<32x128xf32>
      %15 = arith.mulf %12, %14 : vector<32x128xf32>
      %c0_14 = arith.constant 0 : index
      %c0_15 = arith.constant 0 : index
      %16 = vector.load %arg6[%c0_14, %c0_15] : memref<1x128xf32, #tpu.memory_space<vmem>>, vector<1x128xf32>
      %17 = vector.broadcast %16 : vector<1x128xf32> to vector<32x128xf32>
      %18 = arith.addf %15, %17 : vector<32x128xf32>
      %19 = arith.truncf %18 : vector<32x128xf32> to vector<32x128xbf16>
      %c0_16 = arith.constant 0 : index
      %c0_17 = arith.constant 0 : index
      %20 = vector.load %arg7[%c0_16, %c0_17] : memref<32x128xbf16, #tpu.memory_space<vmem>>, vector<32x128xbf16>
      tpu.vector_store %arg7[%c0_16, %c0_17], %19 {strides = array<i32>} : memref<32x128xbf16, #tpu.memory_space<vmem>>, vector<32x128xbf16>,
    } else {
    }
    return
  }
  func.func @transform_0(%arg0: i32, %arg1: i32, %arg2: i32) -> (i32, i32) {
    %c0_i32 = arith.constant 0 : i32
    return %arg0, %arg2 : i32, i32
  }
  func.func @transform_1(%arg0: i32, %arg1: i32, %arg2: i32) -> (i32, i32) {
    %c0_i32 = arith.constant 0 : i32
    return %arg2, %arg1 : i32, i32
  }
  func.func @transform_2(%arg0: i32, %arg1: i32, %arg2: i32) -> (i32, i32) {
    %c0_i32 = arith.constant 0 : i32
    %c0_i32_0 = arith.constant 0 : i32
    return %c0_i32, %arg1 : i32, i32
  }
  func.func @transform_3(%arg0: i32, %arg1: i32, %arg2: i32) -> (i32, i32) {
    %c0_i32 = arith.constant 0 : i32
    %c0_i32_0 = arith.constant 0 : i32
    return %c0_i32, %arg1 : i32, i32
  }
  func.func @transform_4(%arg0: i32, %arg1: i32, %arg2: i32) -> (i32, i32) {
    %c0_i32 = arith.constant 0 : i32
    return %arg0, %arg1 : i32, i32
  }
}

module attributes {stable_mosaic.version = 11 : i64} {
  func.func @_matmul_res_kernel(%arg0: i32, %arg1: i32, %arg2: i32, %arg3: memref<32x384xbf16, #tpu.memory_space<vmem>>, %arg4: memref<384x128xbf16, #tpu.memory_space<vmem>>, %arg5: memref<1x128xf32, #tpu.memory_space<vmem>>, %arg6: memref<1x128xf32, #tpu.memory_space<vmem>>, %arg7: memref<32x128xbf16, #tpu.memory_space<vmem>>, %arg8: memref<32x128xbf16, #tpu.memory_space<vmem>>, %arg9: memref<32x128xf32, #tpu.memory_space<vmem>>) attributes {dimension_semantics = [#tpu.dimension_semantics<parallel>, #tpu.dimension_semantics<parallel>, #tpu.dimension_semantics<arbitrary>], iteration_bounds = array<i64: 1, 1, 3>, scalar_prefetch = 0 : i64, scratch_operands = 1 : i64, tpu.core_type = #tpu.core_type<tc>, window_params = [{transform_indices = @transform_0, window_bounds = array<i64: 32, 384>}, {transform_indices = @transform_1, window_bounds = array<i64: 384, 128>}, {transform_indices = @transform_2, window_bounds = array<i64: 1, 128>}, {transform_indices = @transform_3, window_bounds = array<i64: 1, 128>}, {transform_indices = @transform_4, window_bounds = array<i64: 32, 128>}, {transform_indices = @transform_5, window_bounds = array<i64: 32, 128>}]} {
    %c0_i32 = arith.constant 0 : i32
    %0 = arith.cmpi eq, %arg2, %c0_i32 : i32
    %1 = arith.extui %0 : i1 to i32
    %c0_i32_0 = arith.constant 0 : i32
    %2 = arith.cmpi ne, %1, %c0_i32_0 : i32
    scf.if %2 {
      %cst_9 = arith.constant 0.000000e+00 : f32
      %12 = vector.broadcast %cst_9 : f32 to vector<32x128xf32>
      %c0_10 = arith.constant 0 : index
      %c0_11 = arith.constant 0 : index
      %13 = vector.load %arg9[%c0_10, %c0_11] : memref<32x128xf32, #tpu.memory_space<vmem>>, vector<32x128xf32>
      tpu.vector_store %arg9[%c0_10, %c0_11], %12 {strides = array<i32>} : memref<32x128xf32, #tpu.memory_space<vmem>>, vector<32x128xf32>,
    } else {
    }
    %c0 = arith.constant 0 : index
    %c0_1 = arith.constant 0 : index
    %3 = vector.load %arg9[%c0, %c0_1] : memref<32x128xf32, #tpu.memory_space<vmem>>, vector<32x128xf32>
    %c0_2 = arith.constant 0 : index
    %c0_3 = arith.constant 0 : index
    %4 = vector.load %arg3[%c0_2, %c0_3] : memref<32x384xbf16, #tpu.memory_space<vmem>>, vector<32x384xbf16>
    %c0_4 = arith.constant 0 : index
    %c0_5 = arith.constant 0 : index
    %5 = vector.load %arg4[%c0_4, %c0_5] : memref<384x128xbf16, #tpu.memory_space<vmem>>, vector<384x128xbf16>
    %cst = arith.constant dense<0.000000e+00> : vector<32x128xf32>
    %6 = tpu.matmul %4, %5, %cst {dimension_numbers = #tpu.dot_dimension_numbers<[1], [0], [0], [1], [0, 0, 1, 1], [], []>} : vector<32x384xbf16>, vector<384x128xbf16>, vector<32x128xf32> -> vector<32x128xf32>
    %7 = arith.addf %3, %6 : vector<32x128xf32>
    %c0_6 = arith.constant 0 : index
    %c0_7 = arith.constant 0 : index
    %8 = vector.load %arg9[%c0_6, %c0_7] : memref<32x128xf32, #tpu.memory_space<vmem>>, vector<32x128xf32>
    tpu.vector_store %arg9[%c0_6, %c0_7], %7 {strides = array<i32>} : memref<32x128xf32, #tpu.memory_space<vmem>>, vector<32x128xf32>,
    %c2_i32 = arith.constant 2 : i32
    %9 = arith.cmpi eq, %arg2, %c2_i32 : i32
    %10 = arith.extui %9 : i1 to i32
    %c0_i32_8 = arith.constant 0 : i32
    %11 = arith.cmpi ne, %10, %c0_i32_8 : i32
    scf.if %11 {
      %c0_9 = arith.constant 0 : index
      %c0_10 = arith.constant 0 : index
      %12 = vector.load %arg9[%c0_9, %c0_10] : memref<32x128xf32, #tpu.memory_space<vmem>>, vector<32x128xf32>
      %c0_11 = arith.constant 0 : index
      %c0_12 = arith.constant 0 : index
      %13 = vector.load %arg5[%c0_11, %c0_12] : memref<1x128xf32, #tpu.memory_space<vmem>>, vector<1x128xf32>
      %14 = vector.broadcast %13 : vector<1x128xf32> to vector<32x128xf32>
      %15 = arith.mulf %12, %14 : vector<32x128xf32>
      %c0_13 = arith.constant 0 : index
      %c0_14 = arith.constant 0 : index
      %16 = vector.load %arg6[%c0_13, %c0_14] : memref<1x128xf32, #tpu.memory_space<vmem>>, vector<1x128xf32>
      %17 = vector.broadcast %16 : vector<1x128xf32> to vector<32x128xf32>
      %18 = arith.addf %15, %17 : vector<32x128xf32>
      %c0_15 = arith.constant 0 : index
      %c0_16 = arith.constant 0 : index
      %19 = vector.load %arg7[%c0_15, %c0_16] : memref<32x128xbf16, #tpu.memory_space<vmem>>, vector<32x128xbf16>
      %20 = arith.extf %19 : vector<32x128xbf16> to vector<32x128xf32>
      %21 = arith.addf %18, %20 : vector<32x128xf32>
      %cst_17 = arith.constant 0.000000e+00 : f32
      %22 = vector.broadcast %cst_17 : f32 to vector<32x128xf32>
      %23 = arith.maximumf %21, %22 : vector<32x128xf32>
      %24 = arith.truncf %23 : vector<32x128xf32> to vector<32x128xbf16>
      %c0_18 = arith.constant 0 : index
      %c0_19 = arith.constant 0 : index
      %25 = vector.load %arg8[%c0_18, %c0_19] : memref<32x128xbf16, #tpu.memory_space<vmem>>, vector<32x128xbf16>
      tpu.vector_store %arg8[%c0_18, %c0_19], %24 {strides = array<i32>} : memref<32x128xbf16, #tpu.memory_space<vmem>>, vector<32x128xbf16>,
    } else {
    }
    return
  }
  func.func @transform_0(%arg0: i32, %arg1: i32, %arg2: i32) -> (i32, i32) {
    %c0_i32 = arith.constant 0 : i32
    return %arg0, %arg2 : i32, i32
  }
  func.func @transform_1(%arg0: i32, %arg1: i32, %arg2: i32) -> (i32, i32) {
    %c0_i32 = arith.constant 0 : i32
    return %arg2, %arg1 : i32, i32
  }
  func.func @transform_2(%arg0: i32, %arg1: i32, %arg2: i32) -> (i32, i32) {
    %c0_i32 = arith.constant 0 : i32
    %c0_i32_0 = arith.constant 0 : i32
    return %c0_i32, %arg1 : i32, i32
  }
  func.func @transform_3(%arg0: i32, %arg1: i32, %arg2: i32) -> (i32, i32) {
    %c0_i32 = arith.constant 0 : i32
    %c0_i32_0 = arith.constant 0 : i32
    return %c0_i32, %arg1 : i32, i32
  }
  func.func @transform_4(%arg0: i32, %arg1: i32, %arg2: i32) -> (i32, i32) {
    %c0_i32 = arith.constant 0 : i32
    return %arg0, %arg1 : i32, i32
  }
  func.func @transform_5(%arg0: i32, %arg1: i32, %arg2: i32) -> (i32, i32) {
    %c0_i32 = arith.constant 0 : i32
    return %arg0, %arg1 : i32, i32
  }
}

module attributes {stable_mosaic.version = 11 : i64} {
  func.func @_matmul_kernel(%arg0: i32, %arg1: i32, %arg2: i32, %arg3: memref<32x384xbf16, #tpu.memory_space<vmem>>, %arg4: memref<384x128xbf16, #tpu.memory_space<vmem>>, %arg5: memref<1x128xf32, #tpu.memory_space<vmem>>, %arg6: memref<1x128xf32, #tpu.memory_space<vmem>>, %arg7: memref<32x128xbf16, #tpu.memory_space<vmem>>, %arg8: memref<32x128xf32, #tpu.memory_space<vmem>>) attributes {dimension_semantics = [#tpu.dimension_semantics<parallel>, #tpu.dimension_semantics<parallel>, #tpu.dimension_semantics<arbitrary>], iteration_bounds = array<i64: 1, 1, 3>, scalar_prefetch = 0 : i64, scratch_operands = 1 : i64, tpu.core_type = #tpu.core_type<tc>, window_params = [{transform_indices = @transform_0, window_bounds = array<i64: 32, 384>}, {transform_indices = @transform_1, window_bounds = array<i64: 384, 128>}, {transform_indices = @transform_2, window_bounds = array<i64: 1, 128>}, {transform_indices = @transform_3, window_bounds = array<i64: 1, 128>}, {transform_indices = @transform_4, window_bounds = array<i64: 32, 128>}]} {
    %c0_i32 = arith.constant 0 : i32
    %0 = arith.cmpi eq, %arg2, %c0_i32 : i32
    %1 = arith.extui %0 : i1 to i32
    %c0_i32_0 = arith.constant 0 : i32
    %2 = arith.cmpi ne, %1, %c0_i32_0 : i32
    scf.if %2 {
      %cst_9 = arith.constant 0.000000e+00 : f32
      %12 = vector.broadcast %cst_9 : f32 to vector<32x128xf32>
      %c0_10 = arith.constant 0 : index
      %c0_11 = arith.constant 0 : index
      %13 = vector.load %arg8[%c0_10, %c0_11] : memref<32x128xf32, #tpu.memory_space<vmem>>, vector<32x128xf32>
      tpu.vector_store %arg8[%c0_10, %c0_11], %12 {strides = array<i32>} : memref<32x128xf32, #tpu.memory_space<vmem>>, vector<32x128xf32>,
    } else {
    }
    %c0 = arith.constant 0 : index
    %c0_1 = arith.constant 0 : index
    %3 = vector.load %arg8[%c0, %c0_1] : memref<32x128xf32, #tpu.memory_space<vmem>>, vector<32x128xf32>
    %c0_2 = arith.constant 0 : index
    %c0_3 = arith.constant 0 : index
    %4 = vector.load %arg3[%c0_2, %c0_3] : memref<32x384xbf16, #tpu.memory_space<vmem>>, vector<32x384xbf16>
    %c0_4 = arith.constant 0 : index
    %c0_5 = arith.constant 0 : index
    %5 = vector.load %arg4[%c0_4, %c0_5] : memref<384x128xbf16, #tpu.memory_space<vmem>>, vector<384x128xbf16>
    %cst = arith.constant dense<0.000000e+00> : vector<32x128xf32>
    %6 = tpu.matmul %4, %5, %cst {dimension_numbers = #tpu.dot_dimension_numbers<[1], [0], [0], [1], [0, 0, 1, 1], [], []>} : vector<32x384xbf16>, vector<384x128xbf16>, vector<32x128xf32> -> vector<32x128xf32>
    %7 = arith.addf %3, %6 : vector<32x128xf32>
    %c0_6 = arith.constant 0 : index
    %c0_7 = arith.constant 0 : index
    %8 = vector.load %arg8[%c0_6, %c0_7] : memref<32x128xf32, #tpu.memory_space<vmem>>, vector<32x128xf32>
    tpu.vector_store %arg8[%c0_6, %c0_7], %7 {strides = array<i32>} : memref<32x128xf32, #tpu.memory_space<vmem>>, vector<32x128xf32>,
    %c2_i32 = arith.constant 2 : i32
    %9 = arith.cmpi eq, %arg2, %c2_i32 : i32
    %10 = arith.extui %9 : i1 to i32
    %c0_i32_8 = arith.constant 0 : i32
    %11 = arith.cmpi ne, %10, %c0_i32_8 : i32
    scf.if %11 {
      %c0_9 = arith.constant 0 : index
      %c0_10 = arith.constant 0 : index
      %12 = vector.load %arg8[%c0_9, %c0_10] : memref<32x128xf32, #tpu.memory_space<vmem>>, vector<32x128xf32>
      %c0_11 = arith.constant 0 : index
      %c0_12 = arith.constant 0 : index
      %13 = vector.load %arg5[%c0_11, %c0_12] : memref<1x128xf32, #tpu.memory_space<vmem>>, vector<1x128xf32>
      %14 = vector.broadcast %13 : vector<1x128xf32> to vector<32x128xf32>
      %15 = arith.mulf %12, %14 : vector<32x128xf32>
      %c0_13 = arith.constant 0 : index
      %c0_14 = arith.constant 0 : index
      %16 = vector.load %arg6[%c0_13, %c0_14] : memref<1x128xf32, #tpu.memory_space<vmem>>, vector<1x128xf32>
      %17 = vector.broadcast %16 : vector<1x128xf32> to vector<32x128xf32>
      %18 = arith.addf %15, %17 : vector<32x128xf32>
      %cst_15 = arith.constant 0.000000e+00 : f32
      %19 = vector.broadcast %cst_15 : f32 to vector<32x128xf32>
      %20 = arith.maximumf %18, %19 : vector<32x128xf32>
      %21 = arith.truncf %20 : vector<32x128xf32> to vector<32x128xbf16>
      %c0_16 = arith.constant 0 : index
      %c0_17 = arith.constant 0 : index
      %22 = vector.load %arg7[%c0_16, %c0_17] : memref<32x128xbf16, #tpu.memory_space<vmem>>, vector<32x128xbf16>
      tpu.vector_store %arg7[%c0_16, %c0_17], %21 {strides = array<i32>} : memref<32x128xbf16, #tpu.memory_space<vmem>>, vector<32x128xbf16>,
    } else {
    }
    return
  }
  func.func @transform_0(%arg0: i32, %arg1: i32, %arg2: i32) -> (i32, i32) {
    %c0_i32 = arith.constant 0 : i32
    return %arg0, %arg2 : i32, i32
  }
  func.func @transform_1(%arg0: i32, %arg1: i32, %arg2: i32) -> (i32, i32) {
    %c0_i32 = arith.constant 0 : i32
    return %arg2, %arg1 : i32, i32
  }
  func.func @transform_2(%arg0: i32, %arg1: i32, %arg2: i32) -> (i32, i32) {
    %c0_i32 = arith.constant 0 : i32
    %c0_i32_0 = arith.constant 0 : i32
    return %c0_i32, %arg1 : i32, i32
  }
  func.func @transform_3(%arg0: i32, %arg1: i32, %arg2: i32) -> (i32, i32) {
    %c0_i32 = arith.constant 0 : i32
    %c0_i32_0 = arith.constant 0 : i32
    return %c0_i32, %arg1 : i32, i32
  }
  func.func @transform_4(%arg0: i32, %arg1: i32, %arg2: i32) -> (i32, i32) {
    %c0_i32 = arith.constant 0 : i32
    return %arg0, %arg1 : i32, i32
  }
}

module attributes {stable_mosaic.version = 11 : i64} {
  func.func @_matmul_kernel(%arg0: i32, %arg1: i32, %arg2: i32, %arg3: memref<8x384xbf16, #tpu.memory_space<vmem>>, %arg4: memref<384x256xbf16, #tpu.memory_space<vmem>>, %arg5: memref<1x256xf32, #tpu.memory_space<vmem>>, %arg6: memref<1x256xf32, #tpu.memory_space<vmem>>, %arg7: memref<8x256xbf16, #tpu.memory_space<vmem>>, %arg8: memref<8x256xf32, #tpu.memory_space<vmem>>) attributes {dimension_semantics = [#tpu.dimension_semantics<parallel>, #tpu.dimension_semantics<parallel>, #tpu.dimension_semantics<arbitrary>], iteration_bounds = array<i64: 1, 1, 3>, scalar_prefetch = 0 : i64, scratch_operands = 1 : i64, tpu.core_type = #tpu.core_type<tc>, window_params = [{transform_indices = @transform_0, window_bounds = array<i64: 8, 384>}, {transform_indices = @transform_1, window_bounds = array<i64: 384, 256>}, {transform_indices = @transform_2, window_bounds = array<i64: 1, 256>}, {transform_indices = @transform_3, window_bounds = array<i64: 1, 256>}, {transform_indices = @transform_4, window_bounds = array<i64: 8, 256>}]} {
    %c0_i32 = arith.constant 0 : i32
    %0 = arith.cmpi eq, %arg2, %c0_i32 : i32
    %1 = arith.extui %0 : i1 to i32
    %c0_i32_0 = arith.constant 0 : i32
    %2 = arith.cmpi ne, %1, %c0_i32_0 : i32
    scf.if %2 {
      %cst_9 = arith.constant 0.000000e+00 : f32
      %12 = vector.broadcast %cst_9 : f32 to vector<8x256xf32>
      %c0_10 = arith.constant 0 : index
      %c0_11 = arith.constant 0 : index
      %13 = vector.load %arg8[%c0_10, %c0_11] : memref<8x256xf32, #tpu.memory_space<vmem>>, vector<8x256xf32>
      tpu.vector_store %arg8[%c0_10, %c0_11], %12 {strides = array<i32>} : memref<8x256xf32, #tpu.memory_space<vmem>>, vector<8x256xf32>,
    } else {
    }
    %c0 = arith.constant 0 : index
    %c0_1 = arith.constant 0 : index
    %3 = vector.load %arg8[%c0, %c0_1] : memref<8x256xf32, #tpu.memory_space<vmem>>, vector<8x256xf32>
    %c0_2 = arith.constant 0 : index
    %c0_3 = arith.constant 0 : index
    %4 = vector.load %arg3[%c0_2, %c0_3] : memref<8x384xbf16, #tpu.memory_space<vmem>>, vector<8x384xbf16>
    %c0_4 = arith.constant 0 : index
    %c0_5 = arith.constant 0 : index
    %5 = vector.load %arg4[%c0_4, %c0_5] : memref<384x256xbf16, #tpu.memory_space<vmem>>, vector<384x256xbf16>
    %cst = arith.constant dense<0.000000e+00> : vector<8x256xf32>
    %6 = tpu.matmul %4, %5, %cst {dimension_numbers = #tpu.dot_dimension_numbers<[1], [0], [0], [1], [0, 0, 1, 1], [], []>} : vector<8x384xbf16>, vector<384x256xbf16>, vector<8x256xf32> -> vector<8x256xf32>
    %7 = arith.addf %3, %6 : vector<8x256xf32>
    %c0_6 = arith.constant 0 : index
    %c0_7 = arith.constant 0 : index
    %8 = vector.load %arg8[%c0_6, %c0_7] : memref<8x256xf32, #tpu.memory_space<vmem>>, vector<8x256xf32>
    tpu.vector_store %arg8[%c0_6, %c0_7], %7 {strides = array<i32>} : memref<8x256xf32, #tpu.memory_space<vmem>>, vector<8x256xf32>,
    %c2_i32 = arith.constant 2 : i32
    %9 = arith.cmpi eq, %arg2, %c2_i32 : i32
    %10 = arith.extui %9 : i1 to i32
    %c0_i32_8 = arith.constant 0 : i32
    %11 = arith.cmpi ne, %10, %c0_i32_8 : i32
    scf.if %11 {
      %c0_9 = arith.constant 0 : index
      %c0_10 = arith.constant 0 : index
      %12 = vector.load %arg8[%c0_9, %c0_10] : memref<8x256xf32, #tpu.memory_space<vmem>>, vector<8x256xf32>
      %c0_11 = arith.constant 0 : index
      %c0_12 = arith.constant 0 : index
      %13 = vector.load %arg5[%c0_11, %c0_12] : memref<1x256xf32, #tpu.memory_space<vmem>>, vector<1x256xf32>
      %14 = vector.broadcast %13 : vector<1x256xf32> to vector<8x256xf32>
      %15 = arith.mulf %12, %14 : vector<8x256xf32>
      %c0_13 = arith.constant 0 : index
      %c0_14 = arith.constant 0 : index
      %16 = vector.load %arg6[%c0_13, %c0_14] : memref<1x256xf32, #tpu.memory_space<vmem>>, vector<1x256xf32>
      %17 = vector.broadcast %16 : vector<1x256xf32> to vector<8x256xf32>
      %18 = arith.addf %15, %17 : vector<8x256xf32>
      %cst_15 = arith.constant 0.000000e+00 : f32
      %19 = vector.broadcast %cst_15 : f32 to vector<8x256xf32>
      %20 = arith.maximumf %18, %19 : vector<8x256xf32>
      %21 = arith.truncf %20 : vector<8x256xf32> to vector<8x256xbf16>
      %c0_16 = arith.constant 0 : index
      %c0_17 = arith.constant 0 : index
      %22 = vector.load %arg7[%c0_16, %c0_17] : memref<8x256xbf16, #tpu.memory_space<vmem>>, vector<8x256xbf16>
      tpu.vector_store %arg7[%c0_16, %c0_17], %21 {strides = array<i32>} : memref<8x256xbf16, #tpu.memory_space<vmem>>, vector<8x256xbf16>,
    } else {
    }
    return
  }
  func.func @transform_0(%arg0: i32, %arg1: i32, %arg2: i32) -> (i32, i32) {
    %c0_i32 = arith.constant 0 : i32
    return %arg0, %arg2 : i32, i32
  }
  func.func @transform_1(%arg0: i32, %arg1: i32, %arg2: i32) -> (i32, i32) {
    %c0_i32 = arith.constant 0 : i32
    return %arg2, %arg1 : i32, i32
  }
  func.func @transform_2(%arg0: i32, %arg1: i32, %arg2: i32) -> (i32, i32) {
    %c0_i32 = arith.constant 0 : i32
    %c0_i32_0 = arith.constant 0 : i32
    return %c0_i32, %arg1 : i32, i32
  }
  func.func @transform_3(%arg0: i32, %arg1: i32, %arg2: i32) -> (i32, i32) {
    %c0_i32 = arith.constant 0 : i32
    %c0_i32_0 = arith.constant 0 : i32
    return %c0_i32, %arg1 : i32, i32
  }
  func.func @transform_4(%arg0: i32, %arg1: i32, %arg2: i32) -> (i32, i32) {
    %c0_i32 = arith.constant 0 : i32
    return %arg0, %arg1 : i32, i32
  }
}

module attributes {stable_mosaic.version = 11 : i64} {
  func.func @_matmul_kernel(%arg0: i32, %arg1: i32, %arg2: i32, %arg3: memref<8x128xbf16, #tpu.memory_space<vmem>>, %arg4: memref<128x256xbf16, #tpu.memory_space<vmem>>, %arg5: memref<1x256xf32, #tpu.memory_space<vmem>>, %arg6: memref<1x256xf32, #tpu.memory_space<vmem>>, %arg7: memref<8x256xbf16, #tpu.memory_space<vmem>>, %arg8: memref<8x256xf32, #tpu.memory_space<vmem>>) attributes {dimension_semantics = [#tpu.dimension_semantics<parallel>, #tpu.dimension_semantics<parallel>, #tpu.dimension_semantics<arbitrary>], iteration_bounds = array<i64: 1, 1, 1>, scalar_prefetch = 0 : i64, scratch_operands = 1 : i64, tpu.core_type = #tpu.core_type<tc>, window_params = [{transform_indices = @transform_0, window_bounds = array<i64: 8, 128>}, {transform_indices = @transform_1, window_bounds = array<i64: 128, 256>}, {transform_indices = @transform_2, window_bounds = array<i64: 1, 256>}, {transform_indices = @transform_3, window_bounds = array<i64: 1, 256>}, {transform_indices = @transform_4, window_bounds = array<i64: 8, 256>}]} {
    %c0_i32 = arith.constant 0 : i32
    %0 = arith.cmpi eq, %arg2, %c0_i32 : i32
    %1 = arith.extui %0 : i1 to i32
    %c0_i32_0 = arith.constant 0 : i32
    %2 = arith.cmpi ne, %1, %c0_i32_0 : i32
    scf.if %2 {
      %cst_10 = arith.constant 0.000000e+00 : f32
      %12 = vector.broadcast %cst_10 : f32 to vector<8x256xf32>
      %c0_11 = arith.constant 0 : index
      %c0_12 = arith.constant 0 : index
      %13 = vector.load %arg8[%c0_11, %c0_12] : memref<8x256xf32, #tpu.memory_space<vmem>>, vector<8x256xf32>
      tpu.vector_store %arg8[%c0_11, %c0_12], %12 {strides = array<i32>} : memref<8x256xf32, #tpu.memory_space<vmem>>, vector<8x256xf32>,
    } else {
    }
    %c0 = arith.constant 0 : index
    %c0_1 = arith.constant 0 : index
    %3 = vector.load %arg8[%c0, %c0_1] : memref<8x256xf32, #tpu.memory_space<vmem>>, vector<8x256xf32>
    %c0_2 = arith.constant 0 : index
    %c0_3 = arith.constant 0 : index
    %4 = vector.load %arg3[%c0_2, %c0_3] : memref<8x128xbf16, #tpu.memory_space<vmem>>, vector<8x128xbf16>
    %c0_4 = arith.constant 0 : index
    %c0_5 = arith.constant 0 : index
    %5 = vector.load %arg4[%c0_4, %c0_5] : memref<128x256xbf16, #tpu.memory_space<vmem>>, vector<128x256xbf16>
    %cst = arith.constant dense<0.000000e+00> : vector<8x256xf32>
    %6 = tpu.matmul %4, %5, %cst {dimension_numbers = #tpu.dot_dimension_numbers<[1], [0], [0], [1], [0, 0, 1, 1], [], []>} : vector<8x128xbf16>, vector<128x256xbf16>, vector<8x256xf32> -> vector<8x256xf32>
    %7 = arith.addf %3, %6 : vector<8x256xf32>
    %c0_6 = arith.constant 0 : index
    %c0_7 = arith.constant 0 : index
    %8 = vector.load %arg8[%c0_6, %c0_7] : memref<8x256xf32, #tpu.memory_space<vmem>>, vector<8x256xf32>
    tpu.vector_store %arg8[%c0_6, %c0_7], %7 {strides = array<i32>} : memref<8x256xf32, #tpu.memory_space<vmem>>, vector<8x256xf32>,
    %c0_i32_8 = arith.constant 0 : i32
    %9 = arith.cmpi eq, %arg2, %c0_i32_8 : i32
    %10 = arith.extui %9 : i1 to i32
    %c0_i32_9 = arith.constant 0 : i32
    %11 = arith.cmpi ne, %10, %c0_i32_9 : i32
    scf.if %11 {
      %c0_10 = arith.constant 0 : index
      %c0_11 = arith.constant 0 : index
      %12 = vector.load %arg8[%c0_10, %c0_11] : memref<8x256xf32, #tpu.memory_space<vmem>>, vector<8x256xf32>
      %c0_12 = arith.constant 0 : index
      %c0_13 = arith.constant 0 : index
      %13 = vector.load %arg5[%c0_12, %c0_13] : memref<1x256xf32, #tpu.memory_space<vmem>>, vector<1x256xf32>
      %14 = vector.broadcast %13 : vector<1x256xf32> to vector<8x256xf32>
      %15 = arith.mulf %12, %14 : vector<8x256xf32>
      %c0_14 = arith.constant 0 : index
      %c0_15 = arith.constant 0 : index
      %16 = vector.load %arg6[%c0_14, %c0_15] : memref<1x256xf32, #tpu.memory_space<vmem>>, vector<1x256xf32>
      %17 = vector.broadcast %16 : vector<1x256xf32> to vector<8x256xf32>
      %18 = arith.addf %15, %17 : vector<8x256xf32>
      %19 = arith.truncf %18 : vector<8x256xf32> to vector<8x256xbf16>
      %c0_16 = arith.constant 0 : index
      %c0_17 = arith.constant 0 : index
      %20 = vector.load %arg7[%c0_16, %c0_17] : memref<8x256xbf16, #tpu.memory_space<vmem>>, vector<8x256xbf16>
      tpu.vector_store %arg7[%c0_16, %c0_17], %19 {strides = array<i32>} : memref<8x256xbf16, #tpu.memory_space<vmem>>, vector<8x256xbf16>,
    } else {
    }
    return
  }
  func.func @transform_0(%arg0: i32, %arg1: i32, %arg2: i32) -> (i32, i32) {
    %c0_i32 = arith.constant 0 : i32
    return %arg0, %arg2 : i32, i32
  }
  func.func @transform_1(%arg0: i32, %arg1: i32, %arg2: i32) -> (i32, i32) {
    %c0_i32 = arith.constant 0 : i32
    return %arg2, %arg1 : i32, i32
  }
  func.func @transform_2(%arg0: i32, %arg1: i32, %arg2: i32) -> (i32, i32) {
    %c0_i32 = arith.constant 0 : i32
    %c0_i32_0 = arith.constant 0 : i32
    return %c0_i32, %arg1 : i32, i32
  }
  func.func @transform_3(%arg0: i32, %arg1: i32, %arg2: i32) -> (i32, i32) {
    %c0_i32 = arith.constant 0 : i32
    %c0_i32_0 = arith.constant 0 : i32
    return %c0_i32, %arg1 : i32, i32
  }
  func.func @transform_4(%arg0: i32, %arg1: i32, %arg2: i32) -> (i32, i32) {
    %c0_i32 = arith.constant 0 : i32
    return %arg0, %arg1 : i32, i32
  }
}

module attributes {stable_mosaic.version = 11 : i64} {
  func.func @_matmul_res_kernel(%arg0: i32, %arg1: i32, %arg2: i32, %arg3: memref<8x384xbf16, #tpu.memory_space<vmem>>, %arg4: memref<384x256xbf16, #tpu.memory_space<vmem>>, %arg5: memref<1x256xf32, #tpu.memory_space<vmem>>, %arg6: memref<1x256xf32, #tpu.memory_space<vmem>>, %arg7: memref<8x256xbf16, #tpu.memory_space<vmem>>, %arg8: memref<8x256xbf16, #tpu.memory_space<vmem>>, %arg9: memref<8x256xf32, #tpu.memory_space<vmem>>) attributes {dimension_semantics = [#tpu.dimension_semantics<parallel>, #tpu.dimension_semantics<parallel>, #tpu.dimension_semantics<arbitrary>], iteration_bounds = array<i64: 1, 1, 6>, scalar_prefetch = 0 : i64, scratch_operands = 1 : i64, tpu.core_type = #tpu.core_type<tc>, window_params = [{transform_indices = @transform_0, window_bounds = array<i64: 8, 384>}, {transform_indices = @transform_1, window_bounds = array<i64: 384, 256>}, {transform_indices = @transform_2, window_bounds = array<i64: 1, 256>}, {transform_indices = @transform_3, window_bounds = array<i64: 1, 256>}, {transform_indices = @transform_4, window_bounds = array<i64: 8, 256>}, {transform_indices = @transform_5, window_bounds = array<i64: 8, 256>}]} {
    %c0_i32 = arith.constant 0 : i32
    %0 = arith.cmpi eq, %arg2, %c0_i32 : i32
    %1 = arith.extui %0 : i1 to i32
    %c0_i32_0 = arith.constant 0 : i32
    %2 = arith.cmpi ne, %1, %c0_i32_0 : i32
    scf.if %2 {
      %cst_9 = arith.constant 0.000000e+00 : f32
      %12 = vector.broadcast %cst_9 : f32 to vector<8x256xf32>
      %c0_10 = arith.constant 0 : index
      %c0_11 = arith.constant 0 : index
      %13 = vector.load %arg9[%c0_10, %c0_11] : memref<8x256xf32, #tpu.memory_space<vmem>>, vector<8x256xf32>
      tpu.vector_store %arg9[%c0_10, %c0_11], %12 {strides = array<i32>} : memref<8x256xf32, #tpu.memory_space<vmem>>, vector<8x256xf32>,
    } else {
    }
    %c0 = arith.constant 0 : index
    %c0_1 = arith.constant 0 : index
    %3 = vector.load %arg9[%c0, %c0_1] : memref<8x256xf32, #tpu.memory_space<vmem>>, vector<8x256xf32>
    %c0_2 = arith.constant 0 : index
    %c0_3 = arith.constant 0 : index
    %4 = vector.load %arg3[%c0_2, %c0_3] : memref<8x384xbf16, #tpu.memory_space<vmem>>, vector<8x384xbf16>
    %c0_4 = arith.constant 0 : index
    %c0_5 = arith.constant 0 : index
    %5 = vector.load %arg4[%c0_4, %c0_5] : memref<384x256xbf16, #tpu.memory_space<vmem>>, vector<384x256xbf16>
    %cst = arith.constant dense<0.000000e+00> : vector<8x256xf32>
    %6 = tpu.matmul %4, %5, %cst {dimension_numbers = #tpu.dot_dimension_numbers<[1], [0], [0], [1], [0, 0, 1, 1], [], []>} : vector<8x384xbf16>, vector<384x256xbf16>, vector<8x256xf32> -> vector<8x256xf32>
    %7 = arith.addf %3, %6 : vector<8x256xf32>
    %c0_6 = arith.constant 0 : index
    %c0_7 = arith.constant 0 : index
    %8 = vector.load %arg9[%c0_6, %c0_7] : memref<8x256xf32, #tpu.memory_space<vmem>>, vector<8x256xf32>
    tpu.vector_store %arg9[%c0_6, %c0_7], %7 {strides = array<i32>} : memref<8x256xf32, #tpu.memory_space<vmem>>, vector<8x256xf32>,
    %c5_i32 = arith.constant 5 : i32
    %9 = arith.cmpi eq, %arg2, %c5_i32 : i32
    %10 = arith.extui %9 : i1 to i32
    %c0_i32_8 = arith.constant 0 : i32
    %11 = arith.cmpi ne, %10, %c0_i32_8 : i32
    scf.if %11 {
      %c0_9 = arith.constant 0 : index
      %c0_10 = arith.constant 0 : index
      %12 = vector.load %arg9[%c0_9, %c0_10] : memref<8x256xf32, #tpu.memory_space<vmem>>, vector<8x256xf32>
      %c0_11 = arith.constant 0 : index
      %c0_12 = arith.constant 0 : index
      %13 = vector.load %arg5[%c0_11, %c0_12] : memref<1x256xf32, #tpu.memory_space<vmem>>, vector<1x256xf32>
      %14 = vector.broadcast %13 : vector<1x256xf32> to vector<8x256xf32>
      %15 = arith.mulf %12, %14 : vector<8x256xf32>
      %c0_13 = arith.constant 0 : index
      %c0_14 = arith.constant 0 : index
      %16 = vector.load %arg6[%c0_13, %c0_14] : memref<1x256xf32, #tpu.memory_space<vmem>>, vector<1x256xf32>
      %17 = vector.broadcast %16 : vector<1x256xf32> to vector<8x256xf32>
      %18 = arith.addf %15, %17 : vector<8x256xf32>
      %c0_15 = arith.constant 0 : index
      %c0_16 = arith.constant 0 : index
      %19 = vector.load %arg7[%c0_15, %c0_16] : memref<8x256xbf16, #tpu.memory_space<vmem>>, vector<8x256xbf16>
      %20 = arith.extf %19 : vector<8x256xbf16> to vector<8x256xf32>
      %21 = arith.addf %18, %20 : vector<8x256xf32>
      %cst_17 = arith.constant 0.000000e+00 : f32
      %22 = vector.broadcast %cst_17 : f32 to vector<8x256xf32>
      %23 = arith.maximumf %21, %22 : vector<8x256xf32>
      %24 = arith.truncf %23 : vector<8x256xf32> to vector<8x256xbf16>
      %c0_18 = arith.constant 0 : index
      %c0_19 = arith.constant 0 : index
      %25 = vector.load %arg8[%c0_18, %c0_19] : memref<8x256xbf16, #tpu.memory_space<vmem>>, vector<8x256xbf16>
      tpu.vector_store %arg8[%c0_18, %c0_19], %24 {strides = array<i32>} : memref<8x256xbf16, #tpu.memory_space<vmem>>, vector<8x256xbf16>,
    } else {
    }
    return
  }
  func.func @transform_0(%arg0: i32, %arg1: i32, %arg2: i32) -> (i32, i32) {
    %c0_i32 = arith.constant 0 : i32
    return %arg0, %arg2 : i32, i32
  }
  func.func @transform_1(%arg0: i32, %arg1: i32, %arg2: i32) -> (i32, i32) {
    %c0_i32 = arith.constant 0 : i32
    return %arg2, %arg1 : i32, i32
  }
  func.func @transform_2(%arg0: i32, %arg1: i32, %arg2: i32) -> (i32, i32) {
    %c0_i32 = arith.constant 0 : i32
    %c0_i32_0 = arith.constant 0 : i32
    return %c0_i32, %arg1 : i32, i32
  }
  func.func @transform_3(%arg0: i32, %arg1: i32, %arg2: i32) -> (i32, i32) {
    %c0_i32 = arith.constant 0 : i32
    %c0_i32_0 = arith.constant 0 : i32
    return %c0_i32, %arg1 : i32, i32
  }
  func.func @transform_4(%arg0: i32, %arg1: i32, %arg2: i32) -> (i32, i32) {
    %c0_i32 = arith.constant 0 : i32
    return %arg0, %arg1 : i32, i32
  }
  func.func @transform_5(%arg0: i32, %arg1: i32, %arg2: i32) -> (i32, i32) {
    %c0_i32 = arith.constant 0 : i32
    return %arg0, %arg1 : i32, i32
  }
}

module attributes {stable_mosaic.version = 11 : i64} {
  func.func @_matmul_kernel(%arg0: i32, %arg1: i32, %arg2: i32, %arg3: memref<8x384xbf16, #tpu.memory_space<vmem>>, %arg4: memref<384x256xbf16, #tpu.memory_space<vmem>>, %arg5: memref<1x256xf32, #tpu.memory_space<vmem>>, %arg6: memref<1x256xf32, #tpu.memory_space<vmem>>, %arg7: memref<8x256xbf16, #tpu.memory_space<vmem>>, %arg8: memref<8x256xf32, #tpu.memory_space<vmem>>) attributes {dimension_semantics = [#tpu.dimension_semantics<parallel>, #tpu.dimension_semantics<parallel>, #tpu.dimension_semantics<arbitrary>], iteration_bounds = array<i64: 1, 1, 6>, scalar_prefetch = 0 : i64, scratch_operands = 1 : i64, tpu.core_type = #tpu.core_type<tc>, window_params = [{transform_indices = @transform_0, window_bounds = array<i64: 8, 384>}, {transform_indices = @transform_1, window_bounds = array<i64: 384, 256>}, {transform_indices = @transform_2, window_bounds = array<i64: 1, 256>}, {transform_indices = @transform_3, window_bounds = array<i64: 1, 256>}, {transform_indices = @transform_4, window_bounds = array<i64: 8, 256>}]} {
    %c0_i32 = arith.constant 0 : i32
    %0 = arith.cmpi eq, %arg2, %c0_i32 : i32
    %1 = arith.extui %0 : i1 to i32
    %c0_i32_0 = arith.constant 0 : i32
    %2 = arith.cmpi ne, %1, %c0_i32_0 : i32
    scf.if %2 {
      %cst_9 = arith.constant 0.000000e+00 : f32
      %12 = vector.broadcast %cst_9 : f32 to vector<8x256xf32>
      %c0_10 = arith.constant 0 : index
      %c0_11 = arith.constant 0 : index
      %13 = vector.load %arg8[%c0_10, %c0_11] : memref<8x256xf32, #tpu.memory_space<vmem>>, vector<8x256xf32>
      tpu.vector_store %arg8[%c0_10, %c0_11], %12 {strides = array<i32>} : memref<8x256xf32, #tpu.memory_space<vmem>>, vector<8x256xf32>,
    } else {
    }
    %c0 = arith.constant 0 : index
    %c0_1 = arith.constant 0 : index
    %3 = vector.load %arg8[%c0, %c0_1] : memref<8x256xf32, #tpu.memory_space<vmem>>, vector<8x256xf32>
    %c0_2 = arith.constant 0 : index
    %c0_3 = arith.constant 0 : index
    %4 = vector.load %arg3[%c0_2, %c0_3] : memref<8x384xbf16, #tpu.memory_space<vmem>>, vector<8x384xbf16>
    %c0_4 = arith.constant 0 : index
    %c0_5 = arith.constant 0 : index
    %5 = vector.load %arg4[%c0_4, %c0_5] : memref<384x256xbf16, #tpu.memory_space<vmem>>, vector<384x256xbf16>
    %cst = arith.constant dense<0.000000e+00> : vector<8x256xf32>
    %6 = tpu.matmul %4, %5, %cst {dimension_numbers = #tpu.dot_dimension_numbers<[1], [0], [0], [1], [0, 0, 1, 1], [], []>} : vector<8x384xbf16>, vector<384x256xbf16>, vector<8x256xf32> -> vector<8x256xf32>
    %7 = arith.addf %3, %6 : vector<8x256xf32>
    %c0_6 = arith.constant 0 : index
    %c0_7 = arith.constant 0 : index
    %8 = vector.load %arg8[%c0_6, %c0_7] : memref<8x256xf32, #tpu.memory_space<vmem>>, vector<8x256xf32>
    tpu.vector_store %arg8[%c0_6, %c0_7], %7 {strides = array<i32>} : memref<8x256xf32, #tpu.memory_space<vmem>>, vector<8x256xf32>,
    %c5_i32 = arith.constant 5 : i32
    %9 = arith.cmpi eq, %arg2, %c5_i32 : i32
    %10 = arith.extui %9 : i1 to i32
    %c0_i32_8 = arith.constant 0 : i32
    %11 = arith.cmpi ne, %10, %c0_i32_8 : i32
    scf.if %11 {
      %c0_9 = arith.constant 0 : index
      %c0_10 = arith.constant 0 : index
      %12 = vector.load %arg8[%c0_9, %c0_10] : memref<8x256xf32, #tpu.memory_space<vmem>>, vector<8x256xf32>
      %c0_11 = arith.constant 0 : index
      %c0_12 = arith.constant 0 : index
      %13 = vector.load %arg5[%c0_11, %c0_12] : memref<1x256xf32, #tpu.memory_space<vmem>>, vector<1x256xf32>
      %14 = vector.broadcast %13 : vector<1x256xf32> to vector<8x256xf32>
      %15 = arith.mulf %12, %14 : vector<8x256xf32>
      %c0_13 = arith.constant 0 : index
      %c0_14 = arith.constant 0 : index
      %16 = vector.load %arg6[%c0_13, %c0_14] : memref<1x256xf32, #tpu.memory_space<vmem>>, vector<1x256xf32>
      %17 = vector.broadcast %16 : vector<1x256xf32> to vector<8x256xf32>
      %18 = arith.addf %15, %17 : vector<8x256xf32>
      %cst_15 = arith.constant 0.000000e+00 : f32
      %19 = vector.broadcast %cst_15 : f32 to vector<8x256xf32>
      %20 = arith.maximumf %18, %19 : vector<8x256xf32>
      %21 = arith.truncf %20 : vector<8x256xf32> to vector<8x256xbf16>
      %c0_16 = arith.constant 0 : index
      %c0_17 = arith.constant 0 : index
      %22 = vector.load %arg7[%c0_16, %c0_17] : memref<8x256xbf16, #tpu.memory_space<vmem>>, vector<8x256xbf16>
      tpu.vector_store %arg7[%c0_16, %c0_17], %21 {strides = array<i32>} : memref<8x256xbf16, #tpu.memory_space<vmem>>, vector<8x256xbf16>,
    } else {
    }
    return
  }
  func.func @transform_0(%arg0: i32, %arg1: i32, %arg2: i32) -> (i32, i32) {
    %c0_i32 = arith.constant 0 : i32
    return %arg0, %arg2 : i32, i32
  }
  func.func @transform_1(%arg0: i32, %arg1: i32, %arg2: i32) -> (i32, i32) {
    %c0_i32 = arith.constant 0 : i32
    return %arg2, %arg1 : i32, i32
  }
  func.func @transform_2(%arg0: i32, %arg1: i32, %arg2: i32) -> (i32, i32) {
    %c0_i32 = arith.constant 0 : i32
    %c0_i32_0 = arith.constant 0 : i32
    return %c0_i32, %arg1 : i32, i32
  }
  func.func @transform_3(%arg0: i32, %arg1: i32, %arg2: i32) -> (i32, i32) {
    %c0_i32 = arith.constant 0 : i32
    %c0_i32_0 = arith.constant 0 : i32
    return %c0_i32, %arg1 : i32, i32
  }
  func.func @transform_4(%arg0: i32, %arg1: i32, %arg2: i32) -> (i32, i32) {
    %c0_i32 = arith.constant 0 : i32
    return %arg0, %arg1 : i32, i32
  }
}

module attributes {stable_mosaic.version = 11 : i64} {
  func.func @_matmul_kernel(%arg0: i32, %arg1: i32, %arg2: i32, %arg3: memref<8x384xbf16, #tpu.memory_space<vmem>>, %arg4: memref<384x256xbf16, #tpu.memory_space<vmem>>, %arg5: memref<1x256xf32, #tpu.memory_space<vmem>>, %arg6: memref<1x256xf32, #tpu.memory_space<vmem>>, %arg7: memref<8x256xbf16, #tpu.memory_space<vmem>>, %arg8: memref<8x256xf32, #tpu.memory_space<vmem>>) attributes {dimension_semantics = [#tpu.dimension_semantics<parallel>, #tpu.dimension_semantics<parallel>, #tpu.dimension_semantics<arbitrary>], iteration_bounds = array<i64: 1, 2, 6>, scalar_prefetch = 0 : i64, scratch_operands = 1 : i64, tpu.core_type = #tpu.core_type<tc>, window_params = [{transform_indices = @transform_0, window_bounds = array<i64: 8, 384>}, {transform_indices = @transform_1, window_bounds = array<i64: 384, 256>}, {transform_indices = @transform_2, window_bounds = array<i64: 1, 256>}, {transform_indices = @transform_3, window_bounds = array<i64: 1, 256>}, {transform_indices = @transform_4, window_bounds = array<i64: 8, 256>}]} {
    %c0_i32 = arith.constant 0 : i32
    %0 = arith.cmpi eq, %arg2, %c0_i32 : i32
    %1 = arith.extui %0 : i1 to i32
    %c0_i32_0 = arith.constant 0 : i32
    %2 = arith.cmpi ne, %1, %c0_i32_0 : i32
    scf.if %2 {
      %cst_9 = arith.constant 0.000000e+00 : f32
      %12 = vector.broadcast %cst_9 : f32 to vector<8x256xf32>
      %c0_10 = arith.constant 0 : index
      %c0_11 = arith.constant 0 : index
      %13 = vector.load %arg8[%c0_10, %c0_11] : memref<8x256xf32, #tpu.memory_space<vmem>>, vector<8x256xf32>
      tpu.vector_store %arg8[%c0_10, %c0_11], %12 {strides = array<i32>} : memref<8x256xf32, #tpu.memory_space<vmem>>, vector<8x256xf32>,
    } else {
    }
    %c0 = arith.constant 0 : index
    %c0_1 = arith.constant 0 : index
    %3 = vector.load %arg8[%c0, %c0_1] : memref<8x256xf32, #tpu.memory_space<vmem>>, vector<8x256xf32>
    %c0_2 = arith.constant 0 : index
    %c0_3 = arith.constant 0 : index
    %4 = vector.load %arg3[%c0_2, %c0_3] : memref<8x384xbf16, #tpu.memory_space<vmem>>, vector<8x384xbf16>
    %c0_4 = arith.constant 0 : index
    %c0_5 = arith.constant 0 : index
    %5 = vector.load %arg4[%c0_4, %c0_5] : memref<384x256xbf16, #tpu.memory_space<vmem>>, vector<384x256xbf16>
    %cst = arith.constant dense<0.000000e+00> : vector<8x256xf32>
    %6 = tpu.matmul %4, %5, %cst {dimension_numbers = #tpu.dot_dimension_numbers<[1], [0], [0], [1], [0, 0, 1, 1], [], []>} : vector<8x384xbf16>, vector<384x256xbf16>, vector<8x256xf32> -> vector<8x256xf32>
    %7 = arith.addf %3, %6 : vector<8x256xf32>
    %c0_6 = arith.constant 0 : index
    %c0_7 = arith.constant 0 : index
    %8 = vector.load %arg8[%c0_6, %c0_7] : memref<8x256xf32, #tpu.memory_space<vmem>>, vector<8x256xf32>
    tpu.vector_store %arg8[%c0_6, %c0_7], %7 {strides = array<i32>} : memref<8x256xf32, #tpu.memory_space<vmem>>, vector<8x256xf32>,
    %c5_i32 = arith.constant 5 : i32
    %9 = arith.cmpi eq, %arg2, %c5_i32 : i32
    %10 = arith.extui %9 : i1 to i32
    %c0_i32_8 = arith.constant 0 : i32
    %11 = arith.cmpi ne, %10, %c0_i32_8 : i32
    scf.if %11 {
      %c0_9 = arith.constant 0 : index
      %c0_10 = arith.constant 0 : index
      %12 = vector.load %arg8[%c0_9, %c0_10] : memref<8x256xf32, #tpu.memory_space<vmem>>, vector<8x256xf32>
      %c0_11 = arith.constant 0 : index
      %c0_12 = arith.constant 0 : index
      %13 = vector.load %arg5[%c0_11, %c0_12] : memref<1x256xf32, #tpu.memory_space<vmem>>, vector<1x256xf32>
      %14 = vector.broadcast %13 : vector<1x256xf32> to vector<8x256xf32>
      %15 = arith.mulf %12, %14 : vector<8x256xf32>
      %c0_13 = arith.constant 0 : index
      %c0_14 = arith.constant 0 : index
      %16 = vector.load %arg6[%c0_13, %c0_14] : memref<1x256xf32, #tpu.memory_space<vmem>>, vector<1x256xf32>
      %17 = vector.broadcast %16 : vector<1x256xf32> to vector<8x256xf32>
      %18 = arith.addf %15, %17 : vector<8x256xf32>
      %cst_15 = arith.constant 0.000000e+00 : f32
      %19 = vector.broadcast %cst_15 : f32 to vector<8x256xf32>
      %20 = arith.maximumf %18, %19 : vector<8x256xf32>
      %21 = arith.truncf %20 : vector<8x256xf32> to vector<8x256xbf16>
      %c0_16 = arith.constant 0 : index
      %c0_17 = arith.constant 0 : index
      %22 = vector.load %arg7[%c0_16, %c0_17] : memref<8x256xbf16, #tpu.memory_space<vmem>>, vector<8x256xbf16>
      tpu.vector_store %arg7[%c0_16, %c0_17], %21 {strides = array<i32>} : memref<8x256xbf16, #tpu.memory_space<vmem>>, vector<8x256xbf16>,
    } else {
    }
    return
  }
  func.func @transform_0(%arg0: i32, %arg1: i32, %arg2: i32) -> (i32, i32) {
    %c0_i32 = arith.constant 0 : i32
    return %arg0, %arg2 : i32, i32
  }
  func.func @transform_1(%arg0: i32, %arg1: i32, %arg2: i32) -> (i32, i32) {
    %c0_i32 = arith.constant 0 : i32
    return %arg2, %arg1 : i32, i32
  }
  func.func @transform_2(%arg0: i32, %arg1: i32, %arg2: i32) -> (i32, i32) {
    %c0_i32 = arith.constant 0 : i32
    %c0_i32_0 = arith.constant 0 : i32
    return %c0_i32, %arg1 : i32, i32
  }
  func.func @transform_3(%arg0: i32, %arg1: i32, %arg2: i32) -> (i32, i32) {
    %c0_i32 = arith.constant 0 : i32
    %c0_i32_0 = arith.constant 0 : i32
    return %c0_i32, %arg1 : i32, i32
  }
  func.func @transform_4(%arg0: i32, %arg1: i32, %arg2: i32) -> (i32, i32) {
    %c0_i32 = arith.constant 0 : i32
    return %arg0, %arg1 : i32, i32
  }
}

module attributes {stable_mosaic.version = 11 : i64} {
  func.func @_matmul_kernel(%arg0: i32, %arg1: i32, %arg2: i32, %arg3: memref<8x256xbf16, #tpu.memory_space<vmem>>, %arg4: memref<256x256xbf16, #tpu.memory_space<vmem>>, %arg5: memref<1x256xf32, #tpu.memory_space<vmem>>, %arg6: memref<1x256xf32, #tpu.memory_space<vmem>>, %arg7: memref<8x256xbf16, #tpu.memory_space<vmem>>, %arg8: memref<8x256xf32, #tpu.memory_space<vmem>>) attributes {dimension_semantics = [#tpu.dimension_semantics<parallel>, #tpu.dimension_semantics<parallel>, #tpu.dimension_semantics<arbitrary>], iteration_bounds = array<i64: 1, 2, 1>, scalar_prefetch = 0 : i64, scratch_operands = 1 : i64, tpu.core_type = #tpu.core_type<tc>, window_params = [{transform_indices = @transform_0, window_bounds = array<i64: 8, 256>}, {transform_indices = @transform_1, window_bounds = array<i64: 256, 256>}, {transform_indices = @transform_2, window_bounds = array<i64: 1, 256>}, {transform_indices = @transform_3, window_bounds = array<i64: 1, 256>}, {transform_indices = @transform_4, window_bounds = array<i64: 8, 256>}]} {
    %c0_i32 = arith.constant 0 : i32
    %0 = arith.cmpi eq, %arg2, %c0_i32 : i32
    %1 = arith.extui %0 : i1 to i32
    %c0_i32_0 = arith.constant 0 : i32
    %2 = arith.cmpi ne, %1, %c0_i32_0 : i32
    scf.if %2 {
      %cst_10 = arith.constant 0.000000e+00 : f32
      %12 = vector.broadcast %cst_10 : f32 to vector<8x256xf32>
      %c0_11 = arith.constant 0 : index
      %c0_12 = arith.constant 0 : index
      %13 = vector.load %arg8[%c0_11, %c0_12] : memref<8x256xf32, #tpu.memory_space<vmem>>, vector<8x256xf32>
      tpu.vector_store %arg8[%c0_11, %c0_12], %12 {strides = array<i32>} : memref<8x256xf32, #tpu.memory_space<vmem>>, vector<8x256xf32>,
    } else {
    }
    %c0 = arith.constant 0 : index
    %c0_1 = arith.constant 0 : index
    %3 = vector.load %arg8[%c0, %c0_1] : memref<8x256xf32, #tpu.memory_space<vmem>>, vector<8x256xf32>
    %c0_2 = arith.constant 0 : index
    %c0_3 = arith.constant 0 : index
    %4 = vector.load %arg3[%c0_2, %c0_3] : memref<8x256xbf16, #tpu.memory_space<vmem>>, vector<8x256xbf16>
    %c0_4 = arith.constant 0 : index
    %c0_5 = arith.constant 0 : index
    %5 = vector.load %arg4[%c0_4, %c0_5] : memref<256x256xbf16, #tpu.memory_space<vmem>>, vector<256x256xbf16>
    %cst = arith.constant dense<0.000000e+00> : vector<8x256xf32>
    %6 = tpu.matmul %4, %5, %cst {dimension_numbers = #tpu.dot_dimension_numbers<[1], [0], [0], [1], [0, 0, 1, 1], [], []>} : vector<8x256xbf16>, vector<256x256xbf16>, vector<8x256xf32> -> vector<8x256xf32>
    %7 = arith.addf %3, %6 : vector<8x256xf32>
    %c0_6 = arith.constant 0 : index
    %c0_7 = arith.constant 0 : index
    %8 = vector.load %arg8[%c0_6, %c0_7] : memref<8x256xf32, #tpu.memory_space<vmem>>, vector<8x256xf32>
    tpu.vector_store %arg8[%c0_6, %c0_7], %7 {strides = array<i32>} : memref<8x256xf32, #tpu.memory_space<vmem>>, vector<8x256xf32>,
    %c0_i32_8 = arith.constant 0 : i32
    %9 = arith.cmpi eq, %arg2, %c0_i32_8 : i32
    %10 = arith.extui %9 : i1 to i32
    %c0_i32_9 = arith.constant 0 : i32
    %11 = arith.cmpi ne, %10, %c0_i32_9 : i32
    scf.if %11 {
      %c0_10 = arith.constant 0 : index
      %c0_11 = arith.constant 0 : index
      %12 = vector.load %arg8[%c0_10, %c0_11] : memref<8x256xf32, #tpu.memory_space<vmem>>, vector<8x256xf32>
      %c0_12 = arith.constant 0 : index
      %c0_13 = arith.constant 0 : index
      %13 = vector.load %arg5[%c0_12, %c0_13] : memref<1x256xf32, #tpu.memory_space<vmem>>, vector<1x256xf32>
      %14 = vector.broadcast %13 : vector<1x256xf32> to vector<8x256xf32>
      %15 = arith.mulf %12, %14 : vector<8x256xf32>
      %c0_14 = arith.constant 0 : index
      %c0_15 = arith.constant 0 : index
      %16 = vector.load %arg6[%c0_14, %c0_15] : memref<1x256xf32, #tpu.memory_space<vmem>>, vector<1x256xf32>
      %17 = vector.broadcast %16 : vector<1x256xf32> to vector<8x256xf32>
      %18 = arith.addf %15, %17 : vector<8x256xf32>
      %19 = arith.truncf %18 : vector<8x256xf32> to vector<8x256xbf16>
      %c0_16 = arith.constant 0 : index
      %c0_17 = arith.constant 0 : index
      %20 = vector.load %arg7[%c0_16, %c0_17] : memref<8x256xbf16, #tpu.memory_space<vmem>>, vector<8x256xbf16>
      tpu.vector_store %arg7[%c0_16, %c0_17], %19 {strides = array<i32>} : memref<8x256xbf16, #tpu.memory_space<vmem>>, vector<8x256xbf16>,
    } else {
    }
    return
  }
  func.func @transform_0(%arg0: i32, %arg1: i32, %arg2: i32) -> (i32, i32) {
    %c0_i32 = arith.constant 0 : i32
    return %arg0, %arg2 : i32, i32
  }
  func.func @transform_1(%arg0: i32, %arg1: i32, %arg2: i32) -> (i32, i32) {
    %c0_i32 = arith.constant 0 : i32
    return %arg2, %arg1 : i32, i32
  }
  func.func @transform_2(%arg0: i32, %arg1: i32, %arg2: i32) -> (i32, i32) {
    %c0_i32 = arith.constant 0 : i32
    %c0_i32_0 = arith.constant 0 : i32
    return %c0_i32, %arg1 : i32, i32
  }
  func.func @transform_3(%arg0: i32, %arg1: i32, %arg2: i32) -> (i32, i32) {
    %c0_i32 = arith.constant 0 : i32
    %c0_i32_0 = arith.constant 0 : i32
    return %c0_i32, %arg1 : i32, i32
  }
  func.func @transform_4(%arg0: i32, %arg1: i32, %arg2: i32) -> (i32, i32) {
    %c0_i32 = arith.constant 0 : i32
    return %arg0, %arg1 : i32, i32
  }
}

module attributes {stable_mosaic.version = 11 : i64} {
  func.func @_matmul_res_kernel(%arg0: i32, %arg1: i32, %arg2: i32, %arg3: memref<8x512xbf16, #tpu.memory_space<vmem>>, %arg4: memref<512x256xbf16, #tpu.memory_space<vmem>>, %arg5: memref<1x256xf32, #tpu.memory_space<vmem>>, %arg6: memref<1x256xf32, #tpu.memory_space<vmem>>, %arg7: memref<8x256xbf16, #tpu.memory_space<vmem>>, %arg8: memref<8x256xbf16, #tpu.memory_space<vmem>>, %arg9: memref<8x256xf32, #tpu.memory_space<vmem>>) attributes {dimension_semantics = [#tpu.dimension_semantics<parallel>, #tpu.dimension_semantics<parallel>, #tpu.dimension_semantics<arbitrary>], iteration_bounds = array<i64: 1, 2, 9>, scalar_prefetch = 0 : i64, scratch_operands = 1 : i64, tpu.core_type = #tpu.core_type<tc>, window_params = [{transform_indices = @transform_0, window_bounds = array<i64: 8, 512>}, {transform_indices = @transform_1, window_bounds = array<i64: 512, 256>}, {transform_indices = @transform_2, window_bounds = array<i64: 1, 256>}, {transform_indices = @transform_3, window_bounds = array<i64: 1, 256>}, {transform_indices = @transform_4, window_bounds = array<i64: 8, 256>}, {transform_indices = @transform_5, window_bounds = array<i64: 8, 256>}]} {
    %c0_i32 = arith.constant 0 : i32
    %0 = arith.cmpi eq, %arg2, %c0_i32 : i32
    %1 = arith.extui %0 : i1 to i32
    %c0_i32_0 = arith.constant 0 : i32
    %2 = arith.cmpi ne, %1, %c0_i32_0 : i32
    scf.if %2 {
      %cst_9 = arith.constant 0.000000e+00 : f32
      %12 = vector.broadcast %cst_9 : f32 to vector<8x256xf32>
      %c0_10 = arith.constant 0 : index
      %c0_11 = arith.constant 0 : index
      %13 = vector.load %arg9[%c0_10, %c0_11] : memref<8x256xf32, #tpu.memory_space<vmem>>, vector<8x256xf32>
      tpu.vector_store %arg9[%c0_10, %c0_11], %12 {strides = array<i32>} : memref<8x256xf32, #tpu.memory_space<vmem>>, vector<8x256xf32>,
    } else {
    }
    %c0 = arith.constant 0 : index
    %c0_1 = arith.constant 0 : index
    %3 = vector.load %arg9[%c0, %c0_1] : memref<8x256xf32, #tpu.memory_space<vmem>>, vector<8x256xf32>
    %c0_2 = arith.constant 0 : index
    %c0_3 = arith.constant 0 : index
    %4 = vector.load %arg3[%c0_2, %c0_3] : memref<8x512xbf16, #tpu.memory_space<vmem>>, vector<8x512xbf16>
    %c0_4 = arith.constant 0 : index
    %c0_5 = arith.constant 0 : index
    %5 = vector.load %arg4[%c0_4, %c0_5] : memref<512x256xbf16, #tpu.memory_space<vmem>>, vector<512x256xbf16>
    %cst = arith.constant dense<0.000000e+00> : vector<8x256xf32>
    %6 = tpu.matmul %4, %5, %cst {dimension_numbers = #tpu.dot_dimension_numbers<[1], [0], [0], [1], [0, 0, 1, 1], [], []>} : vector<8x512xbf16>, vector<512x256xbf16>, vector<8x256xf32> -> vector<8x256xf32>
    %7 = arith.addf %3, %6 : vector<8x256xf32>
    %c0_6 = arith.constant 0 : index
    %c0_7 = arith.constant 0 : index
    %8 = vector.load %arg9[%c0_6, %c0_7] : memref<8x256xf32, #tpu.memory_space<vmem>>, vector<8x256xf32>
    tpu.vector_store %arg9[%c0_6, %c0_7], %7 {strides = array<i32>} : memref<8x256xf32, #tpu.memory_space<vmem>>, vector<8x256xf32>,
    %c8_i32 = arith.constant 8 : i32
    %9 = arith.cmpi eq, %arg2, %c8_i32 : i32
    %10 = arith.extui %9 : i1 to i32
    %c0_i32_8 = arith.constant 0 : i32
    %11 = arith.cmpi ne, %10, %c0_i32_8 : i32
    scf.if %11 {
      %c0_9 = arith.constant 0 : index
      %c0_10 = arith.constant 0 : index
      %12 = vector.load %arg9[%c0_9, %c0_10] : memref<8x256xf32, #tpu.memory_space<vmem>>, vector<8x256xf32>
      %c0_11 = arith.constant 0 : index
      %c0_12 = arith.constant 0 : index
      %13 = vector.load %arg5[%c0_11, %c0_12] : memref<1x256xf32, #tpu.memory_space<vmem>>, vector<1x256xf32>
      %14 = vector.broadcast %13 : vector<1x256xf32> to vector<8x256xf32>
      %15 = arith.mulf %12, %14 : vector<8x256xf32>
      %c0_13 = arith.constant 0 : index
      %c0_14 = arith.constant 0 : index
      %16 = vector.load %arg6[%c0_13, %c0_14] : memref<1x256xf32, #tpu.memory_space<vmem>>, vector<1x256xf32>
      %17 = vector.broadcast %16 : vector<1x256xf32> to vector<8x256xf32>
      %18 = arith.addf %15, %17 : vector<8x256xf32>
      %c0_15 = arith.constant 0 : index
      %c0_16 = arith.constant 0 : index
      %19 = vector.load %arg7[%c0_15, %c0_16] : memref<8x256xbf16, #tpu.memory_space<vmem>>, vector<8x256xbf16>
      %20 = arith.extf %19 : vector<8x256xbf16> to vector<8x256xf32>
      %21 = arith.addf %18, %20 : vector<8x256xf32>
      %cst_17 = arith.constant 0.000000e+00 : f32
      %22 = vector.broadcast %cst_17 : f32 to vector<8x256xf32>
      %23 = arith.maximumf %21, %22 : vector<8x256xf32>
      %24 = arith.truncf %23 : vector<8x256xf32> to vector<8x256xbf16>
      %c0_18 = arith.constant 0 : index
      %c0_19 = arith.constant 0 : index
      %25 = vector.load %arg8[%c0_18, %c0_19] : memref<8x256xbf16, #tpu.memory_space<vmem>>, vector<8x256xbf16>
      tpu.vector_store %arg8[%c0_18, %c0_19], %24 {strides = array<i32>} : memref<8x256xbf16, #tpu.memory_space<vmem>>, vector<8x256xbf16>,
    } else {
    }
    return
  }
  func.func @transform_0(%arg0: i32, %arg1: i32, %arg2: i32) -> (i32, i32) {
    %c0_i32 = arith.constant 0 : i32
    return %arg0, %arg2 : i32, i32
  }
  func.func @transform_1(%arg0: i32, %arg1: i32, %arg2: i32) -> (i32, i32) {
    %c0_i32 = arith.constant 0 : i32
    return %arg2, %arg1 : i32, i32
  }
  func.func @transform_2(%arg0: i32, %arg1: i32, %arg2: i32) -> (i32, i32) {
    %c0_i32 = arith.constant 0 : i32
    %c0_i32_0 = arith.constant 0 : i32
    return %c0_i32, %arg1 : i32, i32
  }
  func.func @transform_3(%arg0: i32, %arg1: i32, %arg2: i32) -> (i32, i32) {
    %c0_i32 = arith.constant 0 : i32
    %c0_i32_0 = arith.constant 0 : i32
    return %c0_i32, %arg1 : i32, i32
  }
  func.func @transform_4(%arg0: i32, %arg1: i32, %arg2: i32) -> (i32, i32) {
    %c0_i32 = arith.constant 0 : i32
    return %arg0, %arg1 : i32, i32
  }
  func.func @transform_5(%arg0: i32, %arg1: i32, %arg2: i32) -> (i32, i32) {
    %c0_i32 = arith.constant 0 : i32
    return %arg0, %arg1 : i32, i32
  }
}

module attributes {stable_mosaic.version = 11 : i64} {
  func.func @_matmul_kernel(%arg0: i32, %arg1: i32, %arg2: i32, %arg3: memref<8x512xbf16, #tpu.memory_space<vmem>>, %arg4: memref<512x256xbf16, #tpu.memory_space<vmem>>, %arg5: memref<1x256xf32, #tpu.memory_space<vmem>>, %arg6: memref<1x256xf32, #tpu.memory_space<vmem>>, %arg7: memref<8x256xbf16, #tpu.memory_space<vmem>>, %arg8: memref<8x256xf32, #tpu.memory_space<vmem>>) attributes {dimension_semantics = [#tpu.dimension_semantics<parallel>, #tpu.dimension_semantics<parallel>, #tpu.dimension_semantics<arbitrary>], iteration_bounds = array<i64: 1, 2, 9>, scalar_prefetch = 0 : i64, scratch_operands = 1 : i64, tpu.core_type = #tpu.core_type<tc>, window_params = [{transform_indices = @transform_0, window_bounds = array<i64: 8, 512>}, {transform_indices = @transform_1, window_bounds = array<i64: 512, 256>}, {transform_indices = @transform_2, window_bounds = array<i64: 1, 256>}, {transform_indices = @transform_3, window_bounds = array<i64: 1, 256>}, {transform_indices = @transform_4, window_bounds = array<i64: 8, 256>}]} {
    %c0_i32 = arith.constant 0 : i32
    %0 = arith.cmpi eq, %arg2, %c0_i32 : i32
    %1 = arith.extui %0 : i1 to i32
    %c0_i32_0 = arith.constant 0 : i32
    %2 = arith.cmpi ne, %1, %c0_i32_0 : i32
    scf.if %2 {
      %cst_9 = arith.constant 0.000000e+00 : f32
      %12 = vector.broadcast %cst_9 : f32 to vector<8x256xf32>
      %c0_10 = arith.constant 0 : index
      %c0_11 = arith.constant 0 : index
      %13 = vector.load %arg8[%c0_10, %c0_11] : memref<8x256xf32, #tpu.memory_space<vmem>>, vector<8x256xf32>
      tpu.vector_store %arg8[%c0_10, %c0_11], %12 {strides = array<i32>} : memref<8x256xf32, #tpu.memory_space<vmem>>, vector<8x256xf32>,
    } else {
    }
    %c0 = arith.constant 0 : index
    %c0_1 = arith.constant 0 : index
    %3 = vector.load %arg8[%c0, %c0_1] : memref<8x256xf32, #tpu.memory_space<vmem>>, vector<8x256xf32>
    %c0_2 = arith.constant 0 : index
    %c0_3 = arith.constant 0 : index
    %4 = vector.load %arg3[%c0_2, %c0_3] : memref<8x512xbf16, #tpu.memory_space<vmem>>, vector<8x512xbf16>
    %c0_4 = arith.constant 0 : index
    %c0_5 = arith.constant 0 : index
    %5 = vector.load %arg4[%c0_4, %c0_5] : memref<512x256xbf16, #tpu.memory_space<vmem>>, vector<512x256xbf16>
    %cst = arith.constant dense<0.000000e+00> : vector<8x256xf32>
    %6 = tpu.matmul %4, %5, %cst {dimension_numbers = #tpu.dot_dimension_numbers<[1], [0], [0], [1], [0, 0, 1, 1], [], []>} : vector<8x512xbf16>, vector<512x256xbf16>, vector<8x256xf32> -> vector<8x256xf32>
    %7 = arith.addf %3, %6 : vector<8x256xf32>
    %c0_6 = arith.constant 0 : index
    %c0_7 = arith.constant 0 : index
    %8 = vector.load %arg8[%c0_6, %c0_7] : memref<8x256xf32, #tpu.memory_space<vmem>>, vector<8x256xf32>
    tpu.vector_store %arg8[%c0_6, %c0_7], %7 {strides = array<i32>} : memref<8x256xf32, #tpu.memory_space<vmem>>, vector<8x256xf32>,
    %c8_i32 = arith.constant 8 : i32
    %9 = arith.cmpi eq, %arg2, %c8_i32 : i32
    %10 = arith.extui %9 : i1 to i32
    %c0_i32_8 = arith.constant 0 : i32
    %11 = arith.cmpi ne, %10, %c0_i32_8 : i32
    scf.if %11 {
      %c0_9 = arith.constant 0 : index
      %c0_10 = arith.constant 0 : index
      %12 = vector.load %arg8[%c0_9, %c0_10] : memref<8x256xf32, #tpu.memory_space<vmem>>, vector<8x256xf32>
      %c0_11 = arith.constant 0 : index
      %c0_12 = arith.constant 0 : index
      %13 = vector.load %arg5[%c0_11, %c0_12] : memref<1x256xf32, #tpu.memory_space<vmem>>, vector<1x256xf32>
      %14 = vector.broadcast %13 : vector<1x256xf32> to vector<8x256xf32>
      %15 = arith.mulf %12, %14 : vector<8x256xf32>
      %c0_13 = arith.constant 0 : index
      %c0_14 = arith.constant 0 : index
      %16 = vector.load %arg6[%c0_13, %c0_14] : memref<1x256xf32, #tpu.memory_space<vmem>>, vector<1x256xf32>
      %17 = vector.broadcast %16 : vector<1x256xf32> to vector<8x256xf32>
      %18 = arith.addf %15, %17 : vector<8x256xf32>
      %cst_15 = arith.constant 0.000000e+00 : f32
      %19 = vector.broadcast %cst_15 : f32 to vector<8x256xf32>
      %20 = arith.maximumf %18, %19 : vector<8x256xf32>
      %21 = arith.truncf %20 : vector<8x256xf32> to vector<8x256xbf16>
      %c0_16 = arith.constant 0 : index
      %c0_17 = arith.constant 0 : index
      %22 = vector.load %arg7[%c0_16, %c0_17] : memref<8x256xbf16, #tpu.memory_space<vmem>>, vector<8x256xbf16>
      tpu.vector_store %arg7[%c0_16, %c0_17], %21 {strides = array<i32>} : memref<8x256xbf16, #tpu.memory_space<vmem>>, vector<8x256xbf16>,
    } else {
    }
    return
  }
  func.func @transform_0(%arg0: i32, %arg1: i32, %arg2: i32) -> (i32, i32) {
    %c0_i32 = arith.constant 0 : i32
    return %arg0, %arg2 : i32, i32
  }
  func.func @transform_1(%arg0: i32, %arg1: i32, %arg2: i32) -> (i32, i32) {
    %c0_i32 = arith.constant 0 : i32
    return %arg2, %arg1 : i32, i32
  }
  func.func @transform_2(%arg0: i32, %arg1: i32, %arg2: i32) -> (i32, i32) {
    %c0_i32 = arith.constant 0 : i32
    %c0_i32_0 = arith.constant 0 : i32
    return %c0_i32, %arg1 : i32, i32
  }
  func.func @transform_3(%arg0: i32, %arg1: i32, %arg2: i32) -> (i32, i32) {
    %c0_i32 = arith.constant 0 : i32
    %c0_i32_0 = arith.constant 0 : i32
    return %c0_i32, %arg1 : i32, i32
  }
  func.func @transform_4(%arg0: i32, %arg1: i32, %arg2: i32) -> (i32, i32) {
    %c0_i32 = arith.constant 0 : i32
    return %arg0, %arg1 : i32, i32
  }
}

module attributes {stable_mosaic.version = 11 : i64} {
  func.func @_gap_kernel(%arg0: memref<2x1x512xbf16, #tpu.memory_space<vmem>>, %arg1: memref<2x512xf32, #tpu.memory_space<vmem>>) attributes {dimension_semantics = [], scalar_prefetch = 0 : i64, scratch_operands = 0 : i64, tpu.core_type = #tpu.core_type<tc>} {
    %c0 = arith.constant 0 : index
    %c0_0 = arith.constant 0 : index
    %c0_1 = arith.constant 0 : index
    %0 = vector.load %arg0[%c0, %c0_0, %c0_1] : memref<2x1x512xbf16, #tpu.memory_space<vmem>>, vector<2x1x512xbf16>
    %1 = arith.extf %0 : vector<2x1x512xbf16> to vector<2x1x512xf32>
    %cst = arith.constant dense<0.000000e+00> : vector<2x512xf32>
    %2 = vector.multi_reduction <add>, %1, %cst [1] : vector<2x1x512xf32> to vector<2x512xf32>
    %cst_2 = arith.constant 1.000000e+00 : f32
    %3 = vector.broadcast %cst_2 : f32 to vector<2x512xf32>
    %4 = arith.divf %2, %3 : vector<2x512xf32>
    %c0_3 = arith.constant 0 : index
    %c0_4 = arith.constant 0 : index
    %5 = vector.load %arg1[%c0_3, %c0_4] : memref<2x512xf32, #tpu.memory_space<vmem>>, vector<2x512xf32>
    tpu.vector_store %arg1[%c0_3, %c0_4], %4 {strides = array<i32>} : memref<2x512xf32, #tpu.memory_space<vmem>>, vector<2x512xf32>,
    return
  }
}

module attributes {stable_mosaic.version = 11 : i64} {
  func.func @_head_kernel(%arg0: memref<8x512xf32, #tpu.memory_space<vmem>>, %arg1: memref<8x128xf32, #tpu.memory_space<vmem>>, %arg2: memref<128x128xf32, #tpu.memory_space<vmem>>, %arg3: memref<1x128xf32, #tpu.memory_space<vmem>>, %arg4: memref<128x128xf32, #tpu.memory_space<vmem>>, %arg5: memref<1x128xf32, #tpu.memory_space<vmem>>, %arg6: memref<512x128xf32, #tpu.memory_space<vmem>>, %arg7: memref<128x128xf32, #tpu.memory_space<vmem>>, %arg8: memref<1x128xf32, #tpu.memory_space<vmem>>, %arg9: memref<1x128xf32, #tpu.memory_space<vmem>>, %arg10: memref<128x128xf32, #tpu.memory_space<vmem>>, %arg11: memref<1x128xf32, #tpu.memory_space<vmem>>, %arg12: memref<1x128xf32, #tpu.memory_space<vmem>>, %arg13: memref<128x128xf32, #tpu.memory_space<vmem>>, %arg14: memref<1x128xf32, #tpu.memory_space<vmem>>, %arg15: memref<8x128xf32, #tpu.memory_space<vmem>>) attributes {dimension_semantics = [], scalar_prefetch = 0 : i64, scratch_operands = 0 : i64, tpu.core_type = #tpu.core_type<tc>} {
    %c0 = arith.constant 0 : index
    %c0_0 = arith.constant 0 : index
    %0 = vector.load %arg1[%c0, %c0_0] : memref<8x128xf32, #tpu.memory_space<vmem>>, vector<8x128xf32>
    %c0_1 = arith.constant 0 : index
    %c0_2 = arith.constant 0 : index
    %1 = vector.load %arg2[%c0_1, %c0_2] : memref<128x128xf32, #tpu.memory_space<vmem>>, vector<128x128xf32>
    %cst = arith.constant dense<0.000000e+00> : vector<8x128xf32>
    %2 = tpu.matmul %0, %1, %cst {dimension_numbers = #tpu.dot_dimension_numbers<[1], [0], [0], [1], [0, 0, 1, 1], [], []>} : vector<8x128xf32>, vector<128x128xf32>, vector<8x128xf32> -> vector<8x128xf32>
    %c0_3 = arith.constant 0 : index
    %c0_4 = arith.constant 0 : index
    %3 = vector.load %arg3[%c0_3, %c0_4] : memref<1x128xf32, #tpu.memory_space<vmem>>, vector<1x128xf32>
    %4 = vector.broadcast %3 : vector<1x128xf32> to vector<8x128xf32>
    %5 = arith.addf %2, %4 : vector<8x128xf32>
    %cst_5 = arith.constant 0.000000e+00 : f32
    %6 = vector.broadcast %cst_5 : f32 to vector<8x128xf32>
    %7 = arith.maximumf %5, %6 : vector<8x128xf32>
    %c0_6 = arith.constant 0 : index
    %c0_7 = arith.constant 0 : index
    %8 = vector.load %arg4[%c0_6, %c0_7] : memref<128x128xf32, #tpu.memory_space<vmem>>, vector<128x128xf32>
    %cst_8 = arith.constant dense<0.000000e+00> : vector<8x128xf32>
    %9 = tpu.matmul %7, %8, %cst_8 {dimension_numbers = #tpu.dot_dimension_numbers<[1], [0], [0], [1], [0, 0, 1, 1], [], []>} : vector<8x128xf32>, vector<128x128xf32>, vector<8x128xf32> -> vector<8x128xf32>
    %c0_9 = arith.constant 0 : index
    %c0_10 = arith.constant 0 : index
    %10 = vector.load %arg5[%c0_9, %c0_10] : memref<1x128xf32, #tpu.memory_space<vmem>>, vector<1x128xf32>
    %11 = vector.broadcast %10 : vector<1x128xf32> to vector<8x128xf32>
    %12 = arith.addf %9, %11 : vector<8x128xf32>
    %cst_11 = arith.constant 0.000000e+00 : f32
    %13 = vector.broadcast %cst_11 : f32 to vector<8x128xf32>
    %14 = arith.maximumf %12, %13 : vector<8x128xf32>
    %c0_12 = arith.constant 0 : index
    %c0_13 = arith.constant 0 : index
    %15 = vector.load %arg0[%c0_12, %c0_13] : memref<8x512xf32, #tpu.memory_space<vmem>>, vector<8x512xf32>
    %c0_14 = arith.constant 0 : index
    %c0_15 = arith.constant 0 : index
    %16 = vector.load %arg6[%c0_14, %c0_15] : memref<512x128xf32, #tpu.memory_space<vmem>>, vector<512x128xf32>
    %cst_16 = arith.constant dense<0.000000e+00> : vector<8x128xf32>
    %17 = tpu.matmul %15, %16, %cst_16 {dimension_numbers = #tpu.dot_dimension_numbers<[1], [0], [0], [1], [0, 0, 1, 1], [], []>} : vector<8x512xf32>, vector<512x128xf32>, vector<8x128xf32> -> vector<8x128xf32>
    %c0_17 = arith.constant 0 : index
    %c0_18 = arith.constant 0 : index
    %18 = vector.load %arg7[%c0_17, %c0_18] : memref<128x128xf32, #tpu.memory_space<vmem>>, vector<128x128xf32>
    %cst_19 = arith.constant dense<0.000000e+00> : vector<8x128xf32>
    %19 = tpu.matmul %14, %18, %cst_19 {dimension_numbers = #tpu.dot_dimension_numbers<[1], [0], [0], [1], [0, 0, 1, 1], [], []>} : vector<8x128xf32>, vector<128x128xf32>, vector<8x128xf32> -> vector<8x128xf32>
    %20 = arith.addf %17, %19 : vector<8x128xf32>
    %c0_20 = arith.constant 0 : index
    %c0_21 = arith.constant 0 : index
    %21 = vector.load %arg8[%c0_20, %c0_21] : memref<1x128xf32, #tpu.memory_space<vmem>>, vector<1x128xf32>
    %22 = vector.broadcast %21 : vector<1x128xf32> to vector<8x128xf32>
    %23 = arith.mulf %20, %22 : vector<8x128xf32>
    %c0_22 = arith.constant 0 : index
    %c0_23 = arith.constant 0 : index
    %24 = vector.load %arg9[%c0_22, %c0_23] : memref<1x128xf32, #tpu.memory_space<vmem>>, vector<1x128xf32>
    %25 = vector.broadcast %24 : vector<1x128xf32> to vector<8x128xf32>
    %26 = arith.addf %23, %25 : vector<8x128xf32>
    %cst_24 = arith.constant 0.000000e+00 : f32
    %27 = vector.broadcast %cst_24 : f32 to vector<8x128xf32>
    %28 = arith.maximumf %26, %27 : vector<8x128xf32>
    %c0_25 = arith.constant 0 : index
    %c0_26 = arith.constant 0 : index
    %29 = vector.load %arg10[%c0_25, %c0_26] : memref<128x128xf32, #tpu.memory_space<vmem>>, vector<128x128xf32>
    %cst_27 = arith.constant dense<0.000000e+00> : vector<8x128xf32>
    %30 = tpu.matmul %28, %29, %cst_27 {dimension_numbers = #tpu.dot_dimension_numbers<[1], [0], [0], [1], [0, 0, 1, 1], [], []>} : vector<8x128xf32>, vector<128x128xf32>, vector<8x128xf32> -> vector<8x128xf32>
    %c0_28 = arith.constant 0 : index
    %c0_29 = arith.constant 0 : index
    %31 = vector.load %arg11[%c0_28, %c0_29] : memref<1x128xf32, #tpu.memory_space<vmem>>, vector<1x128xf32>
    %32 = vector.broadcast %31 : vector<1x128xf32> to vector<8x128xf32>
    %33 = arith.mulf %30, %32 : vector<8x128xf32>
    %c0_30 = arith.constant 0 : index
    %c0_31 = arith.constant 0 : index
    %34 = vector.load %arg12[%c0_30, %c0_31] : memref<1x128xf32, #tpu.memory_space<vmem>>, vector<1x128xf32>
    %35 = vector.broadcast %34 : vector<1x128xf32> to vector<8x128xf32>
    %36 = arith.addf %33, %35 : vector<8x128xf32>
    %cst_32 = arith.constant 0.000000e+00 : f32
    %37 = vector.broadcast %cst_32 : f32 to vector<8x128xf32>
    %38 = arith.maximumf %36, %37 : vector<8x128xf32>
    %c0_33 = arith.constant 0 : index
    %c0_34 = arith.constant 0 : index
    %39 = vector.load %arg13[%c0_33, %c0_34] : memref<128x128xf32, #tpu.memory_space<vmem>>, vector<128x128xf32>
    %cst_35 = arith.constant dense<0.000000e+00> : vector<8x128xf32>
    %40 = tpu.matmul %38, %39, %cst_35 {dimension_numbers = #tpu.dot_dimension_numbers<[1], [0], [0], [1], [0, 0, 1, 1], [], []>} : vector<8x128xf32>, vector<128x128xf32>, vector<8x128xf32> -> vector<8x128xf32>
    %c0_36 = arith.constant 0 : index
    %c0_37 = arith.constant 0 : index
    %41 = vector.load %arg14[%c0_36, %c0_37] : memref<1x128xf32, #tpu.memory_space<vmem>>, vector<1x128xf32>
    %42 = vector.broadcast %41 : vector<1x128xf32> to vector<8x128xf32>
    %43 = arith.addf %40, %42 : vector<8x128xf32>
    %c0_38 = arith.constant 0 : index
    %c0_39 = arith.constant 0 : index
    %44 = vector.load %arg15[%c0_38, %c0_39] : memref<8x128xf32, #tpu.memory_space<vmem>>, vector<8x128xf32>
    tpu.vector_store %arg15[%c0_38, %c0_39], %43 {strides = array<i32>} : memref<8x128xf32, #tpu.memory_space<vmem>>, vector<8x128xf32>,
    return
  }
}

</mosaic_0001>

<bundles_post_ra>
// kernel: combined_model_forward.23
= control target key start
LH: loop header
LB: loop body
LE: loop exit
PB: predicated region body
PF: predicated region fallthrough
CT: control target
= control target key end

     0   :  { %s1753_s15 = smov 0   ;;  %s1755_s16 = smov 0   ;;  %s2076_s0 = inlined_call_operand.vmem [shape: bf16[512,256], index: 0, kind: input, shape index: {}]   ;;  %s2077_s1 = inlined_call_operand.vmem [shape: bf16[256,64], index: 1, kind: input, shape index: {}]   ;;  %s2078_s2 = inlined_call_operand.vmem [shape: f32[1,64], index: 2, kind: input, shape index: {}]   ;;  %s2079_s3 = inlined_call_operand.vmem [shape: f32[1,64], index: 3, kind: input, shape index: {}]   ;;  %s2080_s4 = inlined_call_operand.vmem [shape: bf16[512,64], index: 4, kind: output, shape index: {}]  }
   0x1   :  { %s1757_s17 = smov 0  }
   0x2 LB: > { %s33_s18 = sadd.s32 1, %s1721_s16  ;;  %p1363_p0 = scmp.ge.s32.totalorder %s1725_s17, 1  ;;  %s1725_s17 = sphi %s1757_s17, %s14_s17   ;;  %s1721_s16 = sphi %s1755_s16, %s2082_s16   ;;  %s1717_s15 = sphi %s1753_s15, %s2081_s15  }
   0x3   : > { %p35_p1 = scmp.ge.s32.totalorder %s33_s18, 2  ;;  %p224_p2 = scmp.lt.s32.totalorder %s1725_s17, 3 }
   0x5   : > { %s2084_s18 = smov (%p35_p1, %s33_s18), 0  ;;  %p225_p3 = pnand %p1363_p0, %p224_p2 }
   0x6   : > { %v1639_v0 = vld [vmem:[%s2077_s1 + $0x40] sm:$0xff] (!%p225_p3)   ;;  %s1364_s21 = sshll.u32 (!%p225_p3), %s1717_s15, 5  ;;  %v1641_v2 = vld [vmem:[%s2077_s1 + $0x48] sm:$0xff] (!%p225_p3)   ;;  %v1643_v4 = vld [vmem:[%s2077_s1 + $0x50] sm:$0xff] (!%p225_p3)   ;;  %vm313_vm0 = vcmask (!%p225_p3), 523264   ;;  %v1727_v48 = vmov (!%p225_p3), 0.0  }
   0x7   : > { %228 = sbr.rel (%p225_p3) target bundleno = 333 (0x14d), region = 36  ;;  %v1640_v1 = vld [vmem:[%s2077_s1] sm:$0xff] (!%p225_p3)   ;;  %1486 = vmatprep.subr.bf16.mxu0 (!%p225_p3), %v1639_v0  ;;  %1598 = vmatprep.subr.bf16.mxu1 (!%p225_p3), %v1639_v0  ;;  %v1642_v3 = vld [vmem:[%s2077_s1 + $0x8] sm:$0xff] (!%p225_p3)   ;;  %p274_p4 = scmp.lt.s32.totalorder (!%p225_p3), %s1364_s21, 63  ;;  %v1644_v5 = vld [vmem:[%s2077_s1 + $0x10] sm:$0xff] (!%p225_p3)   ;;  %314 = vst.msk [vmem:[#allocation2] sm:$0xff] (!%p225_p3), %vm313_vm0, %v1727_v48 }
   0x8   : > { %1487 = vmatpush3.bf16.msra.mxu0 (!%p225_p3), %v1640_v1  ;;  %1606 = vmatpush3.bf16.msra.mxu1 (!%p225_p3), %v1640_v1  ;;  %v1645_v6 = vld [vmem:[%s2077_s1 + $0x58] sm:$0xff] (!%p225_p3)   ;;  %v1647_v8 = vld [vmem:[%s2077_s1 + $0x60] sm:$0xff] (!%p225_p3)   ;;  %v1649_v10 = vld [vmem:[%s2077_s1 + $0x68] sm:$0xff] (!%p225_p3)   ;;  %315 = vst.msk [vmem:[#allocation2 + $0x8] sm:$0xff] (!%p225_p3), %vm313_vm0, %v1727_v48  ;;  %vm1197_vm1 = vcmask (!%p225_p3), 519168  }
   0x9   : > { %1488 = vmatprep.subr.bf16.mxu0 (!%p225_p3), %v1641_v2  ;;  %1599 = vmatprep.subr.bf16.mxu1 (!%p225_p3), %v1641_v2  ;;  %v1646_v7 = vld [vmem:[%s2077_s1 + $0x18] sm:$0xff] (!%p225_p3)   ;;  %v1648_v9 = vld [vmem:[%s2077_s1 + $0x20] sm:$0xff] (!%p225_p3)   ;;  %v1650_v13 = vld [vmem:[%s2077_s1 + $0x28] sm:$0xff] (!%p225_p3)   ;;  %316 = vst.msk [vmem:[#allocation2 + $0x10] sm:$0xff] (!%p225_p3), %vm313_vm0, %v1727_v48 }
   0xa   : > { %v1651_v14 = vld [vmem:[%s2077_s1 + $0x70] sm:$0xff] (!%p225_p3)   ;;  %v1653_v16 = vld [vmem:[%s2077_s1 + $0x78] sm:$0xff] (!%p225_p3)   ;;  %317 = vst.msk [vmem:[#allocation2 + $0x18] sm:$0xff] (!%p225_p3), %vm313_vm0, %v1727_v48  ;;  %318 = vst.msk [vmem:[#allocation2 + $0x20] sm:$0xff] (!%p225_p3), %vm313_vm0, %v1727_v48 }
   0xb   : > { %v1652_v15 = vld [vmem:[%s2077_s1 + $0x30] sm:$0xff] (!%p225_p3)   ;;  %v1654_v17 = vld [vmem:[%s2077_s1 + $0x38] sm:$0xff] (!%p225_p3)   ;;  %319 = vst.msk [vmem:[#allocation2 + $0x28] sm:$0xff] (!%p225_p3), %vm313_vm0, %v1727_v48  ;;  %320 = vst.msk [vmem:[#allocation2 + $0x30] sm:$0xff] (!%p225_p3), %vm313_vm0, %v1727_v48 }
   0xc   : > { %1489 = vmatpush3.bf16.msra.mxu0 (!%p225_p3), %v1642_v3  ;;  %1607 = vmatpush3.bf16.msra.mxu1 (!%p225_p3), %v1642_v3  ;;  %321 = vst.msk [vmem:[#allocation2 + $0x38] sm:$0xff] (!%p225_p3), %vm313_vm0, %v1727_v48  ;;  %322 = vst.msk [vmem:[#allocation2 + $0x40] sm:$0xff] (!%p225_p3), %vm313_vm0, %v1727_v48 }
   0xd   : > { %1490 = vmatprep.subr.bf16.mxu0 (!%p225_p3), %v1643_v4  ;;  %1600 = vmatprep.subr.bf16.mxu1 (!%p225_p3), %v1643_v4  ;;  %323 = vst.msk [vmem:[#allocation2 + $0x48] sm:$0xff] (!%p225_p3), %vm313_vm0, %v1727_v48  ;;  %324 = vst.msk [vmem:[#allocation2 + $0x50] sm:$0xff] (!%p225_p3), %vm313_vm0, %v1727_v48 }
   0xe   : > { %s2086_s21 = smov (!%p274_p4, %s1364_s21), 63  ;;  %325 = vst.msk [vmem:[#allocation2 + $0x58] sm:$0xff] %vm313_vm0, %v1727_v48  ;;  %326 = vst.msk [vmem:[#allocation2 + $0x60] sm:$0xff] %vm313_vm0, %v1727_v48  ;;  %v346_v51 = vld [vmem:[#allocation2] sm:$0xff] }
   0xf   : > { %s1453_s10 = sshll.u32 %s2086_s21, 3  ;;  %327 = vst.msk [vmem:[#allocation2 + $0x68] sm:$0xff] %vm313_vm0, %v1727_v48  ;;  %328 = vst.msk [vmem:[#allocation2 + $0x70] sm:$0xff] %vm313_vm0, %v1727_v48  ;;  %v347_v59 = vld [vmem:[#allocation2 + $0x8] sm:$0xff]  ;;  %s1368_s12 = sshll.u32 %s2086_s21, 2 }
  0x10   : > { %1491 = vmatpush3.bf16.msra.mxu0 %v1644_v5  ;;  %1608 = vmatpush3.bf16.msra.mxu1 %v1644_v5  ;;  %s1804_s15 = scalar_lea.vmem %s2076_s0, %s1453_s10  ;;  %329 = vst.msk [vmem:[#allocation2 + $0x78] sm:$0xff] %vm313_vm0, %v1727_v48  ;;  %330 = vst.msk [vmem:[#allocation2 + $0x80] sm:$0xff] %vm313_vm0, %v1727_v48  ;;  %s1921_s14 = scalar_lea.vmem %s2080_s4, %s1368_s12 }
  0x11   : > { %1492 = vmatprep.subr.bf16.mxu0 %v1645_v6  ;;  %1601 = vmatprep.subr.bf16.mxu1 %v1645_v6  ;;  %v1657_v11 = vld [vmem:[%s1804_s15 + $0x4] ss:$8 sps:$4 sm:$0xff]   ;;  %v1655_v18 = vld [vmem:[%s1804_s15] ss:$8 sps:$4 sm:$0xff]   ;;  %v1661_v20 = vld [vmem:[%s1804_s15 + $0x14] ss:$8 sps:$4 sm:$0xff]  }
  0x12   : > { %v1660_v12 = vld [vmem:[%s1804_s15 + $0x84] ss:$8 sps:$4 sm:$0xff]   ;;  %730 = vmatprep.mubr.bf16.mxu0 %v1657_v11  ;;  %v1658_v19 = vld [vmem:[%s1804_s15 + $0x80] ss:$8 sps:$4 sm:$0xff]   ;;  %v1663_v21 = vld [vmem:[%s1804_s15 + $0x94] ss:$8 sps:$4 sm:$0xff]  }
  0x13   : > { %794 = vmatprep.mubr.bf16.mxu1 %v1660_v12  ;;  %v1665_v22 = vld [vmem:[%s1804_s15 + $0x10] ss:$8 sps:$4 sm:$0xff]   ;;  %v1667_v24 = vld [vmem:[%s1804_s15 + $0x24] ss:$8 sps:$4 sm:$0xff]   ;;  %v1671_v26 = vld [vmem:[%s1804_s15 + $0x20] ss:$8 sps:$4 sm:$0xff]  }
  0x14   : > { %1493 = vmatpush3.bf16.msra.mxu0 %v1646_v7  ;;  %1609 = vmatpush3.bf16.msra.mxu1 %v1646_v7  ;;  %v1666_v23 = vld [vmem:[%s1804_s15 + $0x90] ss:$8 sps:$4 sm:$0xff]   ;;  %v1669_v25 = vld [vmem:[%s1804_s15 + $0xa4] ss:$8 sps:$4 sm:$0xff]   ;;  %v1672_v27 = vld [vmem:[%s1804_s15 + $0xa0] ss:$8 sps:$4 sm:$0xff]  }
  0x15   : > { %1494 = vmatprep.subr.bf16.mxu0 %v1647_v8  ;;  %1602 = vmatprep.subr.bf16.mxu1 %v1647_v8  ;;  %v1673_v28 = vld [vmem:[%s1804_s15 + $0x34] ss:$8 sps:$4 sm:$0xff]   ;;  %v1677_v30 = vld [vmem:[%s1804_s15 + $0x30] ss:$8 sps:$4 sm:$0xff]   ;;  %v1679_v32 = vld [vmem:[%s1804_s15 + $0x44] ss:$8 sps:$4 sm:$0xff]  }
  0x16   : > { %v1675_v29 = vld [vmem:[%s1804_s15 + $0xb4] ss:$8 sps:$4 sm:$0xff]   ;;  %v1678_v31 = vld [vmem:[%s1804_s15 + $0xb0] ss:$8 sps:$4 sm:$0xff]   ;;  %v1681_v33 = vld [vmem:[%s1804_s15 + $0xc4] ss:$8 sps:$4 sm:$0xff]  }
  0x17   : > { %v1683_v34 = vld [vmem:[%s1804_s15 + $0x40] ss:$8 sps:$4 sm:$0xff]   ;;  %v1685_v36 = vld [vmem:[%s1804_s15 + $0x54] ss:$8 sps:$4 sm:$0xff]   ;;  %v1689_v38 = vld [vmem:[%s1804_s15 + $0x50] ss:$8 sps:$4 sm:$0xff]  }
  0x18   : > { %1495 = vmatpush3.bf16.msra.mxu0 %v1648_v9  ;;  %1610 = vmatpush3.bf16.msra.mxu1 %v1648_v9  ;;  %v1684_v35 = vld [vmem:[%s1804_s15 + $0xc0] ss:$8 sps:$4 sm:$0xff]   ;;  %v1687_v37 = vld [vmem:[%s1804_s15 + $0xd4] ss:$8 sps:$4 sm:$0xff]   ;;  %v1690_v39 = vld [vmem:[%s1804_s15 + $0xd0] ss:$8 sps:$4 sm:$0xff]  }
  0x19   : > { %1496 = vmatprep.subr.bf16.mxu0 %v1649_v10  ;;  %1603 = vmatprep.subr.bf16.mxu1 %v1649_v10  ;;  %v1691_v40 = vld [vmem:[%s1804_s15 + $0x64] ss:$8 sps:$4 sm:$0xff]   ;;  %v1695_v42 = vld [vmem:[%s1804_s15 + $0x60] ss:$8 sps:$4 sm:$0xff]   ;;  %v1697_v44 = vld [vmem:[%s1804_s15 + $0x74] ss:$8 sps:$4 sm:$0xff]  }
  0x1a   : > { %v1693_v41 = vld [vmem:[%s1804_s15 + $0xe4] ss:$8 sps:$4 sm:$0xff]   ;;  %v1696_v43 = vld [vmem:[%s1804_s15 + $0xe0] ss:$8 sps:$4 sm:$0xff]   ;;  %v1699_v45 = vld [vmem:[%s1804_s15 + $0xf4] ss:$8 sps:$4 sm:$0xff]  }
  0x1b   : > { %v1701_v46 = vld [vmem:[%s1804_s15 + $0x70] ss:$8 sps:$4 sm:$0xff]   ;;  %331 = vst.msk [vmem:[#allocation2 + $0x88] sm:$0xff] %vm313_vm0, %v1727_v48  ;;  %332 = vst.msk [vmem:[#allocation2 + $0x90] sm:$0xff] %vm313_vm0, %v1727_v48  ;;  %v362_v53 = vld [vmem:[#allocation2 + $0x80] sm:$0xff] }
  0x1c   : > { %1497 = vmatpush3.bf16.msra.mxu0 %v1650_v13  ;;  %1611 = vmatpush3.bf16.msra.mxu1 %v1650_v13  ;;  %v1702_v47 = vld [vmem:[%s1804_s15 + $0xf0] ss:$8 sps:$4 sm:$0xff]   ;;  %333 = vst.msk [vmem:[#allocation2 + $0x98] sm:$0xff] %vm313_vm0, %v1727_v48  ;;  %334 = vst.msk [vmem:[#allocation2 + $0xa0] sm:$0xff] %vm313_vm0, %v1727_v48 }
  0x1d   : > { %1498 = vmatprep.subr.bf16.mxu0 %v1651_v14  ;;  %1604 = vmatprep.subr.bf16.mxu1 %v1651_v14  ;;  %335 = vst.msk [vmem:[#allocation2 + $0xa8] sm:$0xff] %vm313_vm0, %v1727_v48  ;;  %336 = vst.msk [vmem:[#allocation2 + $0xb0] sm:$0xff] %vm313_vm0, %v1727_v48  ;;  %v348_v7 = vld [vmem:[#allocation2 + $0x10] sm:$0xff] }
  0x1e   : > { %337 = vst.msk [vmem:[#allocation2 + $0xb8] sm:$0xff] %vm313_vm0, %v1727_v48  ;;  %338 = vst.msk [vmem:[#allocation2 + $0xc0] sm:$0xff] %vm313_vm0, %v1727_v48 }
  0x1f   : > { %339 = vst.msk [vmem:[#allocation2 + $0xc8] sm:$0xff] %vm313_vm0, %v1727_v48  ;;  %340 = vst.msk [vmem:[#allocation2 + $0xd0] sm:$0xff] %vm313_vm0, %v1727_v48 }
  0x20   : > { %1499 = vmatpush3.bf16.msra.mxu0 %v1652_v15  ;;  %1612 = vmatpush3.bf16.msra.mxu1 %v1652_v15  ;;  %341 = vst.msk [vmem:[#allocation2 + $0xd8] sm:$0xff] %vm313_vm0, %v1727_v48  ;;  %342 = vst.msk [vmem:[#allocation2 + $0xe0] sm:$0xff] %vm313_vm0, %v1727_v48  ;;  %v1898_v15 = vld [vmem:[%s2078_s2] ss:$0 sm:$0xff] }
  0x21   : > { %1500 = vmatprep.subr.bf16.mxu0 %v1653_v16  ;;  %1605 = vmatprep.subr.bf16.mxu1 %v1653_v16  ;;  %343 = vst.msk [vmem:[#allocation2 + $0xe8] sm:$0xff] %vm313_vm0, %v1727_v48  ;;  %344 = vst.msk [vmem:[#allocation2 + $0xf0] sm:$0xff] %vm313_vm0, %v1727_v48  ;;  %v349_v16 = vld [vmem:[#allocation2 + $0x18] sm:$0xff] }
  0x22   : > { %345 = vst.msk [vmem:[#allocation2 + $0xf8] sm:$0xff] %vm313_vm0, %v1727_v48  ;;  %v363_v61 = vld [vmem:[#allocation2 + $0x88] sm:$0xff]  ;;  %v364_v9 = vld [vmem:[#allocation2 + $0x90] sm:$0xff] }
  0x24   : > { %1501 = vmatpush3.bf16.msra.mxu0 %v1654_v17  ;;  %1613 = vmatpush3.bf16.msra.mxu1 %v1654_v17 }
  0x27   : > { %731 = vmatmul.mubr.bf16.vlgmr.msra.gmra.mrb[0].mxu0 %v1655_v18  ;;  %795 = vmatmul.mubr.bf16.vlgmr.msra.gmra.mrb[0].mxu1 %v1658_v19  ;;  %v365_v18 = vld [vmem:[#allocation2 + $0x98] sm:$0xff] }
  0x28   : > { %738 = vmatprep.mubr.bf16.mxu0 %v1661_v20  ;;  %802 = vmatprep.mubr.bf16.mxu1 %v1663_v21 }
  0x2f   : > { %739 = vmatmul.mubr.bf16.gmra.mrb[4].mxu0 %v1665_v22  ;;  %803 = vmatmul.mubr.bf16.gmra.mrb[4].mxu1 %v1666_v23 }
  0x30   : > { %746 = vmatprep.mubr.bf16.mxu0 %v1667_v24  ;;  %810 = vmatprep.mubr.bf16.mxu1 %v1669_v25  ;;  %v1903_v25 = vld [vmem:[%s2079_s3] ss:$0 sm:$0xff] }
  0x37   : > { %747 = vmatmul.mubr.bf16.gmra.mrb[8].mxu0 %v1671_v26  ;;  %811 = vmatmul.mubr.bf16.gmra.mrb[8].mxu1 %v1672_v27 }
  0x38   : > { %754 = vmatprep.mubr.bf16.mxu0 %v1673_v28  ;;  %818 = vmatprep.mubr.bf16.mxu1 %v1675_v29 }
  0x3f   : > { %755 = vmatmul.mubr.bf16.gmra.mrb[12].mxu0 %v1677_v30  ;;  %819 = vmatmul.mubr.bf16.gmra.mrb[12].mxu1 %v1678_v31 }
  0x40   : > { %762 = vmatprep.mubr.bf16.mxu0 %v1679_v32  ;;  %826 = vmatprep.mubr.bf16.mxu1 %v1681_v33 }
  0x47   : > { %763 = vmatmul.mubr.bf16.gmra.mrb[16].mxu0 %v1683_v34  ;;  %827 = vmatmul.mubr.bf16.gmra.mrb[16].mxu1 %v1684_v35 }
  0x48   : > { %770 = vmatprep.mubr.bf16.mxu0 %v1685_v36  ;;  %834 = vmatprep.mubr.bf16.mxu1 %v1687_v37 }
  0x4f   : > { %771 = vmatmul.mubr.bf16.gmra.mrb[20].mxu0 %v1689_v38  ;;  %835 = vmatmul.mubr.bf16.gmra.mrb[20].mxu1 %v1690_v39 }
  0x50   : > { %778 = vmatprep.mubr.bf16.mxu0 %v1691_v40  ;;  %842 = vmatprep.mubr.bf16.mxu1 %v1693_v41 }
  0x57   : > { %779 = vmatmul.mubr.bf16.gmra.mrb[24].mxu0 %v1695_v42  ;;  %843 = vmatmul.mubr.bf16.gmra.mrb[24].mxu1 %v1696_v43 }
  0x58   : > { %786 = vmatprep.mubr.bf16.mxu0 %v1697_v44  ;;  %850 = vmatprep.mubr.bf16.mxu1 %v1699_v45  ;;  %v350_v45 = vld [vmem:[#allocation2 + $0x20] sm:$0xff] }
  0x5f   : > { %787 = vmatmul.mubr.bf16.gmra.mrb[28].mxu0 %v1701_v46  ;;  %851 = vmatmul.mubr.bf16.gmra.mrb[28].mxu1 %v1702_v47  ;;  %v366_v46 = vld [vmem:[#allocation2 + $0xa0] sm:$0xff] }
  0xfa   : > { %v1502_v49 = vpop.f32.mrb[0].mxu0  ;;  %v1550_v50 = vpop.f32.mrb[0].mxu1 }
  0xfb   : > { %v1503_v52 = vpop.f32.mrb[1].mxu0  ;;  %v1551_v54 = vpop.f32.mrb[1].mxu1 }
  0xfc   : > { %v1504_v55 = vadd.f32 %v1503_v52, %v1502_v49  ;;  %v1552_v56 = vadd.f32 %v1551_v54, %v1550_v50  ;;  %v1505_v57 = vpop.f32.mrb[2].mxu0  ;;  %v1553_v58 = vpop.f32.mrb[2].mxu1 }
  0xfd   : > { %v1506_v60 = vpop.f32.mrb[3].mxu0  ;;  %v1554_v62 = vpop.f32.mrb[3].mxu1 }
  0xfe   : > { %v859_v63 = vadd.f32 %v1504_v55, %v346_v51  ;;  %v875_v0 = vadd.f32 %v1552_v56, %v362_v53  ;;  %v1507_v1 = vadd.f32 %v1506_v60, %v1505_v57  ;;  %v1555_v2 = vadd.f32 %v1554_v62, %v1553_v58  ;;  %v351_v57 = vld [vmem:[#allocation2 + $0x28] sm:$0xff] }
  0xff   : > { %v367_v58 = vld [vmem:[#allocation2 + $0xa8] sm:$0xff] }
 0x100   : > { %892 = vst.msk [vmem:[#allocation2] sm:$0xff] %vm313_vm0, %v859_v63  ;;  %908 = vst.msk [vmem:[#allocation2 + $0x80] sm:$0xff] %vm313_vm0, %v875_v0  ;;  %v860_v3 = vadd.f32 %v1507_v1, %v347_v59  ;;  %v876_v4 = vadd.f32 %v1555_v2, %v363_v61 }
 0x102   : > { %893 = vst.msk [vmem:[#allocation2 + $0x8] sm:$0xff] %vm313_vm0, %v860_v3  ;;  %909 = vst.msk [vmem:[#allocation2 + $0x88] sm:$0xff] %vm313_vm0, %v876_v4  ;;  %v1508_v5 = vpop.f32.mrb[4].mxu0  ;;  %v1556_v6 = vpop.f32.mrb[4].mxu1 }
 0x103   : > { %v1509_v8 = vpop.f32.mrb[5].mxu0  ;;  %v1557_v10 = vpop.f32.mrb[5].mxu1 }
 0x104   : > { %v1510_v11 = vadd.f32 %v1509_v8, %v1508_v5  ;;  %v1558_v12 = vadd.f32 %v1557_v10, %v1556_v6  ;;  %v1511_v13 = vpop.f32.mrb[6].mxu0  ;;  %v1559_v14 = vpop.f32.mrb[6].mxu1 }
 0x105   : > { %v1512_v17 = vpop.f32.mrb[7].mxu0  ;;  %v1560_v19 = vpop.f32.mrb[7].mxu1 }
 0x106   : > { %v861_v20 = vadd.f32 %v1510_v11, %v348_v7  ;;  %v877_v21 = vadd.f32 %v1558_v12, %v364_v9  ;;  %v1513_v22 = vadd.f32 %v1512_v17, %v1511_v13  ;;  %v1561_v23 = vadd.f32 %v1560_v19, %v1559_v14 }
 0x107   : > { %v927_v24 = vld [vmem:[#allocation2] sm:$0xff] }
 0x108   : > { %v943_v26 = vld [vmem:[#allocation2 + $0x80] sm:$0xff]  ;;  %v966_v27 = vmul.f32 %v1898_v15, %v927_v24  ;;  %894 = vst.msk [vmem:[#allocation2 + $0x10] sm:$0xff] %vm313_vm0, %v861_v20  ;;  %910 = vst.msk [vmem:[#allocation2 + $0x90] sm:$0xff] %vm313_vm0, %v877_v21  ;;  %v862_v29 = vadd.f32 %v1513_v22, %v349_v16  ;;  %v878_v30 = vadd.f32 %v1561_v23, %v365_v18  ;;  %v352_v22 = vld [vmem:[#allocation2 + $0x30] sm:$0xff] }
 0x109   : > { %v982_v28 = vmul.f32 %v1898_v15, %v943_v26  ;;  %v928_v31 = vld [vmem:[#allocation2 + $0x8] sm:$0xff]  ;;  %v368_v23 = vld [vmem:[#allocation2 + $0xb0] sm:$0xff] }
 0x10a   : > { %v944_v32 = vld [vmem:[#allocation2 + $0x88] sm:$0xff]  ;;  %v1005_v33 = vadd.f32 %v1903_v25, %v966_v27  ;;  %v967_v35 = vmul.f32 %v1898_v15, %v928_v31  ;;  %895 = vst.msk [vmem:[#allocation2 + $0x18] sm:$0xff] %vm313_vm0, %v862_v29  ;;  %911 = vst.msk [vmem:[#allocation2 + $0x98] sm:$0xff] %vm313_vm0, %v878_v30  ;;  %v1514_v37 = vpop.f32.mrb[8].mxu0  ;;  %v1562_v38 = vpop.f32.mrb[8].mxu1 }
 0x10b   : > { %v1021_v34 = vadd.f32 %v1903_v25, %v982_v28  ;;  %v983_v36 = vmul.f32 %v1898_v15, %v944_v32  ;;  %v1515_v39 = vpop.f32.mrb[9].mxu0  ;;  %v1563_v40 = vpop.f32.mrb[9].mxu1 }
 0x10c   : > { %v1037_v41 = vmax.f32 %v1005_v33, 0.0  ;;  %v1006_v43 = vadd.f32 %v1903_v25, %v967_v35  ;;  %v1517_v47 = vpop.f32.mrb[10].mxu0  ;;  %v1565_v48 = vpop.f32.mrb[10].mxu1  ;;  %v1516_v49 = vadd.f32 %v1515_v39, %v1514_v37  ;;  %v1564_v50 = vadd.f32 %v1563_v40, %v1562_v38  ;;  %v353_v35 = vld [vmem:[#allocation2 + $0x38] sm:$0xff] }
 0x10d   : > { %v1053_v42 = vmax.f32 %v1021_v34, 0.0  ;;  %v1022_v44 = vadd.f32 %v1903_v25, %v983_v36  ;;  %v1518_v51 = vpop.f32.mrb[11].mxu0  ;;  %v1566_v52 = vpop.f32.mrb[11].mxu1  ;;  %v369_v36 = vld [vmem:[#allocation2 + $0xb8] sm:$0xff] }
 0x10e   : > { %v1454_v53 = vpack.c.bf16 %v1037_v41, %v1037_v41  ;;  %v1038_v55 = vmax.f32 %v1006_v43, 0.0  ;;  %v863_v61 = vadd.f32 %v1516_v49, %v350_v45  ;;  %v879_v62 = vadd.f32 %v1564_v50, %v366_v46 }
 0x10f   : > { %v1470_v54 = vpack.c.bf16 %v1053_v42, %v1053_v42  ;;  %v1054_v56 = vmax.f32 %v1022_v44, 0.0  ;;  %v929_v59 = vld [vmem:[#allocation2 + $0x10] sm:$0xff]  ;;  %v1519_v63 = vadd.f32 %v1518_v51, %v1517_v47  ;;  %v1567_v0 = vadd.f32 %v1566_v52, %v1565_v48 }
 0x110   : > { %v945_v60 = vld [vmem:[#allocation2 + $0x90] sm:$0xff]  ;;  %1198 = vst.msk [vmem:[%s1921_s14] sm:$0xf] %vm1197_vm1, %v1454_v53  ;;  %v1455_v1 = vpack.c.bf16 %v1038_v55, %v1038_v55  ;;  %v968_v3 = vmul.f32 %v1898_v15, %v929_v59  ;;  %v370_v59 = vld [vmem:[#allocation2 + $0xc0] sm:$0xff] }
 0x111   : > { %1214 = vst.msk [vmem:[%s1921_s14 + $0x40] sm:$0xf] %vm1197_vm1, %v1470_v54  ;;  %v1471_v2 = vpack.c.bf16 %v1054_v56, %v1054_v56  ;;  %v984_v4 = vmul.f32 %v1898_v15, %v945_v60  ;;  %v930_v5 = vld [vmem:[#allocation2 + $0x18] sm:$0xff]  ;;  %v864_v7 = vadd.f32 %v1519_v63, %v351_v57  ;;  %v880_v8 = vadd.f32 %v1567_v0, %v367_v58  ;;  %v354_v57 = vld [vmem:[#allocation2 + $0x40] sm:$0xff] }
 0x112   : > { %v946_v6 = vld [vmem:[#allocation2 + $0x98] sm:$0xff]  ;;  %896 = vst.msk [vmem:[#allocation2 + $0x20] sm:$0xff] %vm313_vm0, %v863_v61  ;;  %912 = vst.msk [vmem:[#allocation2 + $0xa0] sm:$0xff] %vm313_vm0, %v879_v62  ;;  %v1007_v9 = vadd.f32 %v1903_v25, %v968_v3  ;;  %v969_v11 = vmul.f32 %v1898_v15, %v930_v5  ;;  %v1520_v13 = vpop.f32.mrb[12].mxu0  ;;  %v1568_v14 = vpop.f32.mrb[12].mxu1  ;;  %v355_v5 = vld [vmem:[#allocation2 + $0x48] sm:$0xff] }
 0x113   : > { %1199 = vst.msk [vmem:[%s1921_s14 + $0x4] sm:$0xf] %vm1197_vm1, %v1455_v1  ;;  %1215 = vst.msk [vmem:[%s1921_s14 + $0x44] sm:$0xf] %vm1197_vm1, %v1471_v2  ;;  %v1023_v10 = vadd.f32 %v1903_v25, %v984_v4  ;;  %v985_v12 = vmul.f32 %v1898_v15, %v946_v6  ;;  %v1521_v16 = vpop.f32.mrb[13].mxu0  ;;  %v1569_v17 = vpop.f32.mrb[13].mxu1 }
 0x114   : > { %897 = vst.msk [vmem:[#allocation2 + $0x28] sm:$0xff] %vm313_vm0, %v864_v7  ;;  %913 = vst.msk [vmem:[#allocation2 + $0xa8] sm:$0xff] %vm313_vm0, %v880_v8  ;;  %v1039_v18 = vmax.f32 %v1007_v9, 0.0  ;;  %v1008_v20 = vadd.f32 %v1903_v25, %v969_v11  ;;  %v1523_v24 = vpop.f32.mrb[14].mxu0  ;;  %v1571_v26 = vpop.f32.mrb[14].mxu1  ;;  %v1522_v27 = vadd.f32 %v1521_v16, %v1520_v13  ;;  %v1570_v28 = vadd.f32 %v1569_v17, %v1568_v14  ;;  %v371_v7 = vld [vmem:[#allocation2 + $0xc8] sm:$0xff] }
 0x115   : > { %v1055_v19 = vmax.f32 %v1023_v10, 0.0  ;;  %v1024_v21 = vadd.f32 %v1903_v25, %v985_v12  ;;  %v1524_v29 = vpop.f32.mrb[15].mxu0  ;;  %v1572_v30 = vpop.f32.mrb[15].mxu1 }
 0x116   : > { %v1456_v31 = vpack.c.bf16 %v1039_v18, %v1039_v18  ;;  %v1040_v33 = vmax.f32 %v1008_v20, 0.0  ;;  %v865_v37 = vadd.f32 %v1522_v27, %v352_v22  ;;  %v881_v38 = vadd.f32 %v1570_v28, %v368_v23 }
 0x117   : > { %v1472_v32 = vpack.c.bf16 %v1055_v19, %v1055_v19  ;;  %v1056_v34 = vmax.f32 %v1024_v21, 0.0  ;;  %v1525_v39 = vadd.f32 %v1524_v29, %v1523_v24  ;;  %v1573_v40 = vadd.f32 %v1572_v30, %v1571_v26 }
 0x118   : > { %1200 = vst.msk [vmem:[%s1921_s14 + $0x8] sm:$0xf] %vm1197_vm1, %v1456_v31  ;;  %v1457_v41 = vpack.c.bf16 %v1040_v33, %v1040_v33 }
 0x119   : > { %1216 = vst.msk [vmem:[%s1921_s14 + $0x48] sm:$0xf] %vm1197_vm1, %v1472_v32  ;;  %v1473_v42 = vpack.c.bf16 %v1056_v34, %v1056_v34  ;;  %v931_v43 = vld [vmem:[#allocation2 + $0x20] sm:$0xff]  ;;  %v866_v47 = vadd.f32 %v1525_v39, %v353_v35  ;;  %v882_v48 = vadd.f32 %v1573_v40, %v369_v36  ;;  %v356_v35 = vld [vmem:[#allocation2 + $0x50] sm:$0xff] }
 0x11a   : > { %v947_v44 = vld [vmem:[#allocation2 + $0xa0] sm:$0xff]  ;;  %v970_v45 = vmul.f32 %v1898_v15, %v931_v43  ;;  %898 = vst.msk [vmem:[#allocation2 + $0x30] sm:$0xff] %vm313_vm0, %v865_v37  ;;  %914 = vst.msk [vmem:[#allocation2 + $0xb0] sm:$0xff] %vm313_vm0, %v881_v38  ;;  %v1526_v51 = vpop.f32.mrb[16].mxu0  ;;  %v1574_v52 = vpop.f32.mrb[16].mxu1  ;;  %v372_v37 = vld [vmem:[#allocation2 + $0xd0] sm:$0xff] }
 0x11b   : > { %v986_v46 = vmul.f32 %v1898_v15, %v947_v44  ;;  %1201 = vst.msk [vmem:[%s1921_s14 + $0xc] sm:$0xf] %vm1197_vm1, %v1457_v41  ;;  %1217 = vst.msk [vmem:[%s1921_s14 + $0x4c] sm:$0xf] %vm1197_vm1, %v1473_v42  ;;  %v932_v49 = vld [vmem:[#allocation2 + $0x28] sm:$0xff]  ;;  %v1527_v58 = vpop.f32.mrb[17].mxu0 }
 0x11c   : > { %v948_v50 = vld [vmem:[#allocation2 + $0xa8] sm:$0xff]  ;;  %v1009_v53 = vadd.f32 %v1903_v25, %v970_v45  ;;  %v971_v55 = vmul.f32 %v1898_v15, %v932_v49  ;;  %899 = vst.msk [vmem:[#allocation2 + $0x38] sm:$0xff] %vm313_vm0, %v866_v47  ;;  %915 = vst.msk [vmem:[#allocation2 + $0xb8] sm:$0xff] %vm313_vm0, %v882_v48  ;;  %v1575_v60 = vpop.f32.mrb[17].mxu1  ;;  %v1528_v61 = vadd.f32 %v1527_v58, %v1526_v51  ;;  %v1529_v63 = vpop.f32.mrb[18].mxu0  ;;  %v357_v47 = vld [vmem:[#allocation2 + $0x58] sm:$0xff] }
 0x11d   : > { %v1025_v54 = vadd.f32 %v1903_v25, %v986_v46  ;;  %v987_v56 = vmul.f32 %v1898_v15, %v948_v50  ;;  %v1576_v62 = vadd.f32 %v1575_v60, %v1574_v52  ;;  %v1577_v0 = vpop.f32.mrb[18].mxu1  ;;  %v1530_v6 = vpop.f32.mrb[19].mxu0  ;;  %v373_v49 = vld [vmem:[#allocation2 + $0xd8] sm:$0xff] }
 0x11e   : > { %v1041_v1 = vmax.f32 %v1009_v53, 0.0  ;;  %v1010_v3 = vadd.f32 %v1903_v25, %v971_v55  ;;  %v1578_v8 = vpop.f32.mrb[19].mxu1  ;;  %v867_v9 = vadd.f32 %v1528_v61, %v354_v57  ;;  %v1531_v11 = vadd.f32 %v1530_v6, %v1529_v63 }
 0x11f   : > { %v1057_v2 = vmax.f32 %v1025_v54, 0.0  ;;  %v1026_v4 = vadd.f32 %v1903_v25, %v987_v56  ;;  %v883_v10 = vadd.f32 %v1576_v62, %v370_v59  ;;  %v1579_v12 = vadd.f32 %v1578_v8, %v1577_v0 }
 0x120   : > { %v1458_v13 = vpack.c.bf16 %v1041_v1, %v1041_v1  ;;  %v1042_v16 = vmax.f32 %v1010_v3, 0.0  ;;  %900 = vst.msk [vmem:[#allocation2 + $0x40] sm:$0xff] %vm313_vm0, %v867_v9  ;;  %v868_v20 = vadd.f32 %v1531_v11, %v355_v5 }
 0x121   : > { %v1474_v14 = vpack.c.bf16 %v1057_v2, %v1057_v2  ;;  %v1058_v17 = vmax.f32 %v1026_v4, 0.0  ;;  %v933_v18 = vld [vmem:[#allocation2 + $0x30] sm:$0xff]  ;;  %916 = vst.msk [vmem:[#allocation2 + $0xc0] sm:$0xff] %vm313_vm0, %v883_v10  ;;  %v884_v21 = vadd.f32 %v1579_v12, %v371_v7 }
 0x122   : > { %v949_v19 = vld [vmem:[#allocation2 + $0xb0] sm:$0xff]  ;;  %1202 = vst.msk [vmem:[%s1921_s14 + $0x10] sm:$0xf] %vm1197_vm1, %v1458_v13  ;;  %v1459_v22 = vpack.c.bf16 %v1042_v16, %v1042_v16  ;;  %v972_v24 = vmul.f32 %v1898_v15, %v933_v18  ;;  %v1532_v29 = vpop.f32.mrb[20].mxu0  ;;  %v1580_v30 = vpop.f32.mrb[20].mxu1  ;;  %v358_v18 = vld [vmem:[#allocation2 + $0x60] sm:$0xff] }
 0x123   : > { %1218 = vst.msk [vmem:[%s1921_s14 + $0x50] sm:$0xf] %vm1197_vm1, %v1474_v14  ;;  %v1475_v23 = vpack.c.bf16 %v1058_v17, %v1058_v17  ;;  %v988_v26 = vmul.f32 %v1898_v15, %v949_v19  ;;  %v934_v27 = vld [vmem:[#allocation2 + $0x38] sm:$0xff]  ;;  %v1533_v36 = vpop.f32.mrb[21].mxu0  ;;  %v1581_v38 = vpop.f32.mrb[21].mxu1  ;;  %v374_v19 = vld [vmem:[#allocation2 + $0xe0] sm:$0xff] }
 0x124   : > { %v950_v28 = vld [vmem:[#allocation2 + $0xb8] sm:$0xff]  ;;  %901 = vst.msk [vmem:[#allocation2 + $0x48] sm:$0xff] %vm313_vm0, %v868_v20  ;;  %917 = vst.msk [vmem:[#allocation2 + $0xc8] sm:$0xff] %vm313_vm0, %v884_v21  ;;  %v1011_v31 = vadd.f32 %v1903_v25, %v972_v24  ;;  %v973_v33 = vmul.f32 %v1898_v15, %v934_v27  ;;  %v1534_v39 = vadd.f32 %v1533_v36, %v1532_v29  ;;  %v1535_v41 = vpop.f32.mrb[22].mxu0  ;;  %v1583_v42 = vpop.f32.mrb[22].mxu1 }
 0x125   : > { %1203 = vst.msk [vmem:[%s1921_s14 + $0x14] sm:$0xf] %vm1197_vm1, %v1459_v22  ;;  %1219 = vst.msk [vmem:[%s1921_s14 + $0x54] sm:$0xf] %vm1197_vm1, %v1475_v23  ;;  %v1027_v32 = vadd.f32 %v1903_v25, %v988_v26  ;;  %v989_v34 = vmul.f32 %v1898_v15, %v950_v28  ;;  %v1582_v40 = vadd.f32 %v1581_v38, %v1580_v30  ;;  %v1536_v48 = vpop.f32.mrb[23].mxu0  ;;  %v1584_v50 = vpop.f32.mrb[23].mxu1 }
 0x126   : > { %v1043_v43 = vmax.f32 %v1011_v31, 0.0  ;;  %v1012_v45 = vadd.f32 %v1903_v25, %v973_v33  ;;  %v869_v51 = vadd.f32 %v1534_v39, %v356_v35  ;;  %v1537_v53 = vadd.f32 %v1536_v48, %v1535_v41  ;;  %v359_v31 = vld [vmem:[#allocation2 + $0x68] sm:$0xff] }
 0x127   : > { %v1059_v44 = vmax.f32 %v1027_v32, 0.0  ;;  %v1028_v46 = vadd.f32 %v1903_v25, %v989_v34  ;;  %v885_v52 = vadd.f32 %v1582_v40, %v372_v37  ;;  %v1585_v54 = vadd.f32 %v1584_v50, %v1583_v42  ;;  %v935_v59 = vld [vmem:[#allocation2 + $0x40] sm:$0xff]  ;;  %v375_v32 = vld [vmem:[#allocation2 + $0xe8] sm:$0xff] }
 0x128   : > { %v1460_v55 = vpack.c.bf16 %v1043_v43, %v1043_v43  ;;  %v1044_v57 = vmax.f32 %v1012_v45, 0.0  ;;  %v951_v60 = vld [vmem:[#allocation2 + $0xc0] sm:$0xff]  ;;  %v974_v61 = vmul.f32 %v1898_v15, %v935_v59  ;;  %902 = vst.msk [vmem:[#allocation2 + $0x50] sm:$0xff] %vm313_vm0, %v869_v51  ;;  %v870_v63 = vadd.f32 %v1537_v53, %v357_v47  ;;  %v360_v59 = vld [vmem:[#allocation2 + $0x70] sm:$0xff] }
 0x129   : > { %v1476_v56 = vpack.c.bf16 %v1059_v44, %v1059_v44  ;;  %v1060_v58 = vmax.f32 %v1028_v46, 0.0  ;;  %v990_v62 = vmul.f32 %v1898_v15, %v951_v60  ;;  %918 = vst.msk [vmem:[#allocation2 + $0xd0] sm:$0xff] %vm313_vm0, %v885_v52  ;;  %v886_v0 = vadd.f32 %v1585_v54, %v373_v49  ;;  %v376_v60 = vld [vmem:[#allocation2 + $0xf0] sm:$0xff] }
 0x12a   : > { %1204 = vst.msk [vmem:[%s1921_s14 + $0x18] sm:$0xf] %vm1197_vm1, %v1460_v55  ;;  %v1461_v1 = vpack.c.bf16 %v1044_v57, %v1044_v57  ;;  %v1013_v5 = vadd.f32 %v1903_v25, %v974_v61  ;;  %v1538_v9 = vpop.f32.mrb[24].mxu0  ;;  %v1586_v10 = vpop.f32.mrb[24].mxu1 }
 0x12b   : > { %1220 = vst.msk [vmem:[%s1921_s14 + $0x58] sm:$0xf] %vm1197_vm1, %v1476_v56  ;;  %v1477_v2 = vpack.c.bf16 %v1060_v58, %v1060_v58  ;;  %v936_v3 = vld [vmem:[#allocation2 + $0x48] sm:$0xff]  ;;  %v1029_v6 = vadd.f32 %v1903_v25, %v990_v62  ;;  %v1539_v11 = vpop.f32.mrb[25].mxu0  ;;  %v1587_v12 = vpop.f32.mrb[25].mxu1 }
 0x12c   : > { %v952_v4 = vld [vmem:[#allocation2 + $0xc8] sm:$0xff]  ;;  %v975_v7 = vmul.f32 %v1898_v15, %v936_v3  ;;  %903 = vst.msk [vmem:[#allocation2 + $0x58] sm:$0xff] %vm313_vm0, %v870_v63  ;;  %919 = vst.msk [vmem:[#allocation2 + $0xd8] sm:$0xff] %vm313_vm0, %v886_v0  ;;  %v1045_v13 = vmax.f32 %v1013_v5, 0.0  ;;  %v1541_v20 = vpop.f32.mrb[26].mxu0  ;;  %v1589_v21 = vpop.f32.mrb[26].mxu1  ;;  %v1540_v22 = vadd.f32 %v1539_v11, %v1538_v9  ;;  %v1588_v23 = vadd.f32 %v1587_v12, %v1586_v10 }
 0x12d   : > { %v991_v8 = vmul.f32 %v1898_v15, %v952_v4  ;;  %1205 = vst.msk [vmem:[%s1921_s14 + $0x1c] sm:$0xf] %vm1197_vm1, %v1461_v1  ;;  %1221 = vst.msk [vmem:[%s1921_s14 + $0x5c] sm:$0xf] %vm1197_vm1, %v1477_v2  ;;  %v1061_v14 = vmax.f32 %v1029_v6, 0.0  ;;  %v1542_v24 = vpop.f32.mrb[27].mxu0 }
 0x12e   : > { %v1014_v16 = vadd.f32 %v1903_v25, %v975_v7  ;;  %v1590_v26 = vpop.f32.mrb[27].mxu1  ;;  %v1462_v27 = vpack.c.bf16 %v1045_v13, %v1045_v13  ;;  %v871_v35 = vadd.f32 %v1540_v22, %v358_v18  ;;  %v887_v36 = vadd.f32 %v1588_v23, %v374_v19  ;;  %v361_v7 = vld [vmem:[#allocation2 + $0x78] sm:$0xff] }
 0x12f   : > { %v1030_v17 = vadd.f32 %v1903_v25, %v991_v8  ;;  %v1478_v28 = vpack.c.bf16 %v1061_v14, %v1061_v14  ;;  %v937_v33 = vld [vmem:[#allocation2 + $0x50] sm:$0xff]  ;;  %v1543_v37 = vadd.f32 %v1542_v24, %v1541_v20  ;;  %v1591_v38 = vadd.f32 %v1590_v26, %v1589_v21  ;;  %v377_v8 = vld [vmem:[#allocation2 + $0xf8] sm:$0xff] }
 0x130   : > { %v1046_v29 = vmax.f32 %v1014_v16, 0.0  ;;  %v953_v34 = vld [vmem:[#allocation2 + $0xd0] sm:$0xff]  ;;  %1206 = vst.msk [vmem:[%s1921_s14 + $0x20] sm:$0xf] %vm1197_vm1, %v1462_v27  ;;  %v976_v41 = vmul.f32 %v1898_v15, %v937_v33 }
 0x131   : > { %v1062_v30 = vmax.f32 %v1030_v17, 0.0  ;;  %1222 = vst.msk [vmem:[%s1921_s14 + $0x60] sm:$0xf] %vm1197_vm1, %v1478_v28  ;;  %v992_v42 = vmul.f32 %v1898_v15, %v953_v34  ;;  %v872_v45 = vadd.f32 %v1543_v37, %v359_v31  ;;  %v888_v46 = vadd.f32 %v1591_v38, %v375_v32 }
 0x132   : > { %v1463_v39 = vpack.c.bf16 %v1046_v29, %v1046_v29  ;;  %904 = vst.msk [vmem:[#allocation2 + $0x60] sm:$0xff] %vm313_vm0, %v871_v35  ;;  %920 = vst.msk [vmem:[#allocation2 + $0xe0] sm:$0xff] %vm313_vm0, %v887_v36  ;;  %v1015_v47 = vadd.f32 %v1903_v25, %v976_v41  ;;  %v1544_v51 = vpop.f32.mrb[28].mxu0  ;;  %v1592_v52 = vpop.f32.mrb[28].mxu1 }
 0x133   : > { %v1479_v40 = vpack.c.bf16 %v1062_v30, %v1062_v30  ;;  %v938_v43 = vld [vmem:[#allocation2 + $0x58] sm:$0xff]  ;;  %v1031_v48 = vadd.f32 %v1903_v25, %v992_v42  ;;  %905 = vst.msk [vmem:[#allocation2 + $0x68] sm:$0xff] %vm313_vm0, %v872_v45  ;;  %921 = vst.msk [vmem:[#allocation2 + $0xe8] sm:$0xff] %vm313_vm0, %v888_v46  ;;  %v1545_v53 = vpop.f32.mrb[29].mxu0  ;;  %v1593_v54 = vpop.f32.mrb[29].mxu1 }
 0x134   : > { %v954_v44 = vld [vmem:[#allocation2 + $0xd8] sm:$0xff]  ;;  %1207 = vst.msk [vmem:[%s1921_s14 + $0x24] sm:$0xf] %vm1197_vm1, %v1463_v39  ;;  %v977_v49 = vmul.f32 %v1898_v15, %v938_v43  ;;  %v1047_v55 = vmax.f32 %v1015_v47, 0.0  ;;  %v1547_v61 = vpop.f32.mrb[30].mxu0  ;;  %v1595_v62 = vpop.f32.mrb[30].mxu1  ;;  %v1546_v63 = vadd.f32 %v1545_v53, %v1544_v51  ;;  %v1594_v0 = vadd.f32 %v1593_v54, %v1592_v52 }
 0x135   : > { %1223 = vst.msk [vmem:[%s1921_s14 + $0x64] sm:$0xf] %vm1197_vm1, %v1479_v40  ;;  %v993_v50 = vmul.f32 %v1898_v15, %v954_v44  ;;  %v1063_v56 = vmax.f32 %v1031_v48, 0.0  ;;  %v1548_v1 = vpop.f32.mrb[31].mxu0  ;;  %v1596_v2 = vpop.f32.mrb[31].mxu1 }
 0x136   : > { %v1016_v57 = vadd.f32 %v1903_v25, %v977_v49  ;;  %v1464_v3 = vpack.c.bf16 %v1047_v55, %v1047_v55  ;;  %v873_v9 = vadd.f32 %v1546_v63, %v360_v59  ;;  %v889_v10 = vadd.f32 %v1594_v0, %v376_v60 }
 0x137   : > { %v1032_v58 = vadd.f32 %v1903_v25, %v993_v50  ;;  %v1480_v4 = vpack.c.bf16 %v1063_v56, %v1063_v56  ;;  %v1549_v11 = vadd.f32 %v1548_v1, %v1547_v61  ;;  %v1597_v12 = vadd.f32 %v1596_v2, %v1595_v62 }
 0x138   : > { %v1048_v5 = vmax.f32 %v1016_v57, 0.0  ;;  %1208 = vst.msk [vmem:[%s1921_s14 + $0x28] sm:$0xf] %vm1197_vm1, %v1464_v3 }
 0x139   : > { %v1064_v6 = vmax.f32 %v1032_v58, 0.0  ;;  %1224 = vst.msk [vmem:[%s1921_s14 + $0x68] sm:$0xf] %vm1197_vm1, %v1480_v4  ;;  %v939_v16 = vld [vmem:[#allocation2 + $0x60] sm:$0xff]  ;;  %v874_v20 = vadd.f32 %v1549_v11, %v361_v7  ;;  %v890_v21 = vadd.f32 %v1597_v12, %v377_v8 }
 0x13a   : > { %v1465_v13 = vpack.c.bf16 %v1048_v5, %v1048_v5  ;;  %v955_v17 = vld [vmem:[#allocation2 + $0xe0] sm:$0xff]  ;;  %v978_v18 = vmul.f32 %v1898_v15, %v939_v16  ;;  %906 = vst.msk [vmem:[#allocation2 + $0x70] sm:$0xff] %vm313_vm0, %v873_v9  ;;  %922 = vst.msk [vmem:[#allocation2 + $0xf0] sm:$0xff] %vm313_vm0, %v889_v10  ;;  %v940_v22 = vld [vmem:[#allocation2 + $0x68] sm:$0xff] }
 0x13b   : > { %v1481_v14 = vpack.c.bf16 %v1064_v6, %v1064_v6  ;;  %v994_v19 = vmul.f32 %v1898_v15, %v955_v17  ;;  %v956_v23 = vld [vmem:[#allocation2 + $0xe8] sm:$0xff]  ;;  %v979_v27 = vmul.f32 %v1898_v15, %v940_v22  ;;  %907 = vst.msk [vmem:[#allocation2 + $0x78] sm:$0xff] %vm313_vm0, %v874_v20  ;;  %923 = vst.msk [vmem:[#allocation2 + $0xf8] sm:$0xff] %vm313_vm0, %v890_v21 }
 0x13c   : > { %1209 = vst.msk [vmem:[%s1921_s14 + $0x2c] sm:$0xf] %vm1197_vm1, %v1465_v13  ;;  %v1017_v24 = vadd.f32 %v1903_v25, %v978_v18  ;;  %v995_v28 = vmul.f32 %v1898_v15, %v956_v23 }
 0x13d   : > { %1225 = vst.msk [vmem:[%s1921_s14 + $0x6c] sm:$0xf] %vm1197_vm1, %v1481_v14  ;;  %v1033_v26 = vadd.f32 %v1903_v25, %v994_v19  ;;  %v1018_v31 = vadd.f32 %v1903_v25, %v979_v27 }
 0x13e   : > { %v1049_v29 = vmax.f32 %v1017_v24, 0.0  ;;  %v1034_v32 = vadd.f32 %v1903_v25, %v995_v28 }
 0x13f   : > { %v1065_v30 = vmax.f32 %v1033_v26, 0.0  ;;  %v1050_v35 = vmax.f32 %v1018_v31, 0.0 }
 0x140   : > { %v1466_v33 = vpack.c.bf16 %v1049_v29, %v1049_v29  ;;  %v1066_v36 = vmax.f32 %v1034_v32, 0.0 }
 0x141   : > { %v1482_v34 = vpack.c.bf16 %v1065_v30, %v1065_v30  ;;  %v941_v37 = vld [vmem:[#allocation2 + $0x70] sm:$0xff]  ;;  %v1467_v39 = vpack.c.bf16 %v1050_v35, %v1050_v35 }
 0x142   : > { %v957_v38 = vld [vmem:[#allocation2 + $0xf0] sm:$0xff]  ;;  %1210 = vst.msk [vmem:[%s1921_s14 + $0x30] sm:$0xf] %vm1197_vm1, %v1466_v33  ;;  %v1483_v40 = vpack.c.bf16 %v1066_v36, %v1066_v36  ;;  %v980_v41 = vmul.f32 %v1898_v15, %v941_v37  ;;  %v942_v43 = vld [vmem:[#allocation2 + $0x78] sm:$0xff] }
 0x143   : > { %1226 = vst.msk [vmem:[%s1921_s14 + $0x70] sm:$0xf] %vm1197_vm1, %v1482_v34  ;;  %v996_v42 = vmul.f32 %v1898_v15, %v957_v38  ;;  %v958_v44 = vld [vmem:[#allocation2 + $0xf8] sm:$0xff]  ;;  %1211 = vst.msk [vmem:[%s1921_s14 + $0x34] sm:$0xf] %vm1197_vm1, %v1467_v39  ;;  %v981_v47 = vmul.f32 %v1898_v15, %v942_v43 }
 0x144   : > { %1227 = vst.msk [vmem:[%s1921_s14 + $0x74] sm:$0xf] %vm1197_vm1, %v1483_v40  ;;  %v1019_v45 = vadd.f32 %v1903_v25, %v980_v41  ;;  %v997_v48 = vmul.f32 %v1898_v15, %v958_v44 }
 0x145   : > { %v1035_v46 = vadd.f32 %v1903_v25, %v996_v42  ;;  %v1020_v51 = vadd.f32 %v1903_v25, %v981_v47 }
 0x146   : > { %v1051_v49 = vmax.f32 %v1019_v45, 0.0  ;;  %v1036_v52 = vadd.f32 %v1903_v25, %v997_v48 }
 0x147   : > { %v1067_v50 = vmax.f32 %v1035_v46, 0.0  ;;  %v1052_v55 = vmax.f32 %v1020_v51, 0.0 }
 0x148   : > { %v1468_v53 = vpack.c.bf16 %v1051_v49, %v1051_v49  ;;  %v1068_v56 = vmax.f32 %v1036_v52, 0.0 }
 0x149   : > { %v1484_v54 = vpack.c.bf16 %v1067_v50, %v1067_v50  ;;  %v1469_v57 = vpack.c.bf16 %v1052_v55, %v1052_v55 }
 0x14a   : > { %1212 = vst.msk [vmem:[%s1921_s14 + $0x38] sm:$0xf] %vm1197_vm1, %v1468_v53  ;;  %v1485_v58 = vpack.c.bf16 %v1068_v56, %v1068_v56 }
 0x14b   : > { %1228 = vst.msk [vmem:[%s1921_s14 + $0x78] sm:$0xf] %vm1197_vm1, %v1484_v54  ;;  %1213 = vst.msk [vmem:[%s1921_s14 + $0x3c] sm:$0xf] %vm1197_vm1, %v1469_v57 }
 0x14c   : > { %1229 = vst.msk [vmem:[%s1921_s14 + $0x7c] sm:$0xf] %vm1197_vm1, %v1485_v58 }
 0x14d PF: > { %s14_s17 = sadd.s32 1, %s1725_s17   ;;  %s2081_s15 = smov %s1721_s16 }
 0x14e   : > { %p11_p5 = scmp.ge.s32.totalorder %s14_s17, 4   ;;  %s2082_s16 = smov %s2084_s18 }
 0x150   :  { %13 = sbr.rel (!%p11_p5) target bundleno = 2 (0x2), region = 83 }

// kernel: combined_model_forward.24
= control target key start
LH: loop header
LB: loop body
LE: loop exit
PB: predicated region body
PF: predicated region fallthrough
CT: control target
= control target key end

     0   :  { %vm153_vm0 = vcmask 519168   ;;  %s1385_s0 = inlined_call_operand.vmem [shape: bf16[9,128,64], index: 0, kind: input, shape index: {}]   ;;  %s1386_s1 = inlined_call_operand.vmem [shape: bf16[128,64], index: 1, kind: output, shape index: {}]  }
   0x1   :  { %v9_v0 = vld [vmem:[%s1385_s0] sm:$0xf]  ;;  %v10_v12 = vld [vmem:[%s1385_s0 + $0x4] sm:$0xf]  ;;  %v11_v33 = vld [vmem:[%s1385_s0 + $0x8] sm:$0xf] }
   0x2   :  { %v25_v1 = vld [vmem:[%s1385_s0 + $0x40] sm:$0xf]  ;;  %v156_v4 = vsel %vm153_vm0, %v9_v0, 4286644096  ;;  %v26_v13 = vld [vmem:[%s1385_s0 + $0x44] sm:$0xf] }
   0x3   :  { %v41_v2 = vld [vmem:[%s1385_s0 + $0x80] sm:$0xf]  ;;  %v159_v5 = vsel %vm153_vm0, %v25_v1, 4286644096  ;;  %v42_v14 = vld [vmem:[%s1385_s0 + $0x84] sm:$0xf] }
   0x4   :  { %v57_v3 = vld [vmem:[%s1385_s0 + $0xc0] sm:$0xf]  ;;  %v163_v6 = vsel %vm153_vm0, %v41_v2, 4286644096  ;;  %v161_v8 = vmax.bf16 %v159_v5, %v156_v4  ;;  %v58_v19 = vld [vmem:[%s1385_s0 + $0xc4] sm:$0xf] }
   0x5   :  { %v73_v7 = vld [vmem:[%s1385_s0 + $0x100] sm:$0xf]  ;;  %v167_v10 = vsel %vm153_vm0, %v57_v3, 4286644096  ;;  %v191_v20 = vsel %vm153_vm0, %v10_v12, 4286644096 }
   0x6   :  { %v89_v9 = vld [vmem:[%s1385_s0 + $0x140] sm:$0xf]  ;;  %v165_v11 = vmax.bf16 %v163_v6, %v161_v8  ;;  %v171_v15 = vsel %vm153_vm0, %v73_v7, 4286644096  ;;  %v194_v21 = vsel %vm153_vm0, %v26_v13, 4286644096 }
   0x7   :  { %v105_v16 = vld [vmem:[%s1385_s0 + $0x180] sm:$0xf]  ;;  %v175_v18 = vsel %vm153_vm0, %v89_v9, 4286644096  ;;  %v198_v22 = vsel %vm153_vm0, %v42_v14, 4286644096  ;;  %v196_v27 = vmax.bf16 %v194_v21, %v191_v20 }
   0x8   :  { %v169_v17 = vmax.bf16 %v167_v10, %v165_v11  ;;  %v121_v23 = vld [vmem:[%s1385_s0 + $0x1c0] sm:$0xf]  ;;  %v74_v26 = vld [vmem:[%s1385_s0 + $0x104] sm:$0xf]  ;;  %v179_v28 = vsel %vm153_vm0, %v105_v16, 4286644096 }
   0x9   :  { %v137_v24 = vld [vmem:[%s1385_s0 + $0x200] sm:$0xf]  ;;  %v90_v29 = vld [vmem:[%s1385_s0 + $0x144] sm:$0xf]  ;;  %v202_v30 = vsel %vm153_vm0, %v58_v19, 4286644096  ;;  %v200_v32 = vmax.bf16 %v198_v22, %v196_v27 }
   0xa   :  { %v173_v25 = vmax.bf16 %v171_v15, %v169_v17  ;;  %v27_v34 = vld [vmem:[%s1385_s0 + $0x48] sm:$0xf]  ;;  %v183_v36 = vsel %vm153_vm0, %v121_v23, 4286644096  ;;  %v187_v37 = vsel %vm153_vm0, %v137_v24, 4286644096 }
   0xb   :  { %v43_v35 = vld [vmem:[%s1385_s0 + $0x88] sm:$0xf]  ;;  %v206_v38 = vsel %vm153_vm0, %v74_v26, 4286644096  ;;  %v106_v40 = vld [vmem:[%s1385_s0 + $0x184] sm:$0xf]  ;;  %v204_v41 = vmax.bf16 %v202_v30, %v200_v32 }
   0xc   :  { %v177_v31 = vmax.bf16 %v175_v18, %v173_v25  ;;  %v210_v42 = vsel %vm153_vm0, %v90_v29, 4286644096  ;;  %v59_v43 = vld [vmem:[%s1385_s0 + $0xc8] sm:$0xf]  ;;  %v226_v44 = vsel %vm153_vm0, %v11_v33, 4286644096 }
   0xd   :  { %v229_v45 = vsel %vm153_vm0, %v27_v34, 4286644096  ;;  %v233_v46 = vsel %vm153_vm0, %v43_v35, 4286644096  ;;  %v122_v48 = vld [vmem:[%s1385_s0 + $0x1c4] sm:$0xf]  ;;  %v208_v50 = vmax.bf16 %v206_v38, %v204_v41 }
   0xe   :  { %v181_v39 = vmax.bf16 %v179_v28, %v177_v31  ;;  %v138_v49 = vld [vmem:[%s1385_s0 + $0x204] sm:$0xf]  ;;  %v75_v51 = vld [vmem:[%s1385_s0 + $0x108] sm:$0xf]  ;;  %v231_v52 = vmax.bf16 %v229_v45, %v226_v44  ;;  %v214_v53 = vsel %vm153_vm0, %v106_v40, 4286644096 }
   0xf   :  { %v91_v54 = vld [vmem:[%s1385_s0 + $0x148] sm:$0xf]  ;;  %v237_v55 = vsel %vm153_vm0, %v59_v43, 4286644096  ;;  %v212_v57 = vmax.bf16 %v210_v42, %v208_v50  ;;  %v12_v59 = vld [vmem:[%s1385_s0 + $0xc] sm:$0xf] }
  0x10   :  { %v185_v47 = vmax.bf16 %v183_v36, %v181_v39  ;;  %v235_v58 = vmax.bf16 %v233_v46, %v231_v52  ;;  %v28_v60 = vld [vmem:[%s1385_s0 + $0x4c] sm:$0xf]  ;;  %v218_v62 = vsel %vm153_vm0, %v122_v48, 4286644096  ;;  %v222_v63 = vsel %vm153_vm0, %v138_v49, 4286644096 }
  0x11   :  { %v44_v61 = vld [vmem:[%s1385_s0 + $0x8c] sm:$0xf]  ;;  %v241_v0 = vsel %vm153_vm0, %v75_v51, 4286644096  ;;  %v216_v1 = vmax.bf16 %v214_v53, %v212_v57  ;;  %v107_v2 = vld [vmem:[%s1385_s0 + $0x188] sm:$0xf] }
  0x12   :  { %v189_v56 = vmax.bf16 %v187_v37, %v185_v47  ;;  %v239_v3 = vmax.bf16 %v237_v55, %v235_v58  ;;  %v245_v4 = vsel %vm153_vm0, %v91_v54, 4286644096  ;;  %v60_v5 = vld [vmem:[%s1385_s0 + $0xcc] sm:$0xf]  ;;  %v261_v6 = vsel %vm153_vm0, %v12_v59, 4286644096 }
  0x13   :  { %v264_v7 = vsel %vm153_vm0, %v28_v60, 4286644096  ;;  %v268_v8 = vsel %vm153_vm0, %v44_v61, 4286644096  ;;  %v220_v9 = vmax.bf16 %v218_v62, %v216_v1  ;;  %v123_v10 = vld [vmem:[%s1385_s0 + $0x1c8] sm:$0xf] }
  0x14   :  { %715 = vst.msk [vmem:[%s1386_s1] sm:$0xf] %vm153_vm0, %v189_v56  ;;  %v139_v11 = vld [vmem:[%s1385_s0 + $0x208] sm:$0xf]  ;;  %v243_v12 = vmax.bf16 %v241_v0, %v239_v3  ;;  %v76_v13 = vld [vmem:[%s1385_s0 + $0x10c] sm:$0xf]  ;;  %v266_v14 = vmax.bf16 %v264_v7, %v261_v6 }
  0x15   :  { %v249_v15 = vsel %vm153_vm0, %v107_v2, 4286644096  ;;  %v92_v16 = vld [vmem:[%s1385_s0 + $0x14c] sm:$0xf]  ;;  %v272_v17 = vsel %vm153_vm0, %v60_v5, 4286644096  ;;  %v224_v18 = vmax.bf16 %v222_v63, %v220_v9 }
  0x16   :  { %v247_v19 = vmax.bf16 %v245_v4, %v243_v12  ;;  %v270_v20 = vmax.bf16 %v268_v8, %v266_v14  ;;  %v13_v21 = vld [vmem:[%s1385_s0 + $0x10] sm:$0xf]  ;;  %v253_v24 = vsel %vm153_vm0, %v123_v10, 4286644096  ;;  %v257_v25 = vsel %vm153_vm0, %v139_v11, 4286644096 }
  0x17   :  { %v29_v22 = vld [vmem:[%s1385_s0 + $0x50] sm:$0xf]  ;;  %v276_v26 = vsel %vm153_vm0, %v76_v13, 4286644096  ;;  %716 = vst.msk [vmem:[%s1386_s1 + $0x4] sm:$0xf] %vm153_vm0, %v224_v18 }
  0x18   :  { %v45_v23 = vld [vmem:[%s1385_s0 + $0x90] sm:$0xf]  ;;  %v251_v27 = vmax.bf16 %v249_v15, %v247_v19  ;;  %v108_v28 = vld [vmem:[%s1385_s0 + $0x18c] sm:$0xf]  ;;  %v274_v29 = vmax.bf16 %v272_v17, %v270_v20  ;;  %v280_v30 = vsel %vm153_vm0, %v92_v16, 4286644096 }
  0x19   :  { %v61_v31 = vld [vmem:[%s1385_s0 + $0xd0] sm:$0xf]  ;;  %v296_v32 = vsel %vm153_vm0, %v13_v21, 4286644096  ;;  %v299_v33 = vsel %vm153_vm0, %v29_v22, 4286644096 }
  0x1a   :  { %v303_v34 = vsel %vm153_vm0, %v45_v23, 4286644096  ;;  %v255_v35 = vmax.bf16 %v253_v24, %v251_v27  ;;  %v124_v36 = vld [vmem:[%s1385_s0 + $0x1cc] sm:$0xf]  ;;  %v278_v38 = vmax.bf16 %v276_v26, %v274_v29  ;;  %v77_v39 = vld [vmem:[%s1385_s0 + $0x110] sm:$0xf]  ;;  %v301_v40 = vmax.bf16 %v299_v33, %v296_v32 }
  0x1b   :  { %v140_v37 = vld [vmem:[%s1385_s0 + $0x20c] sm:$0xf]  ;;  %v284_v41 = vsel %vm153_vm0, %v108_v28, 4286644096  ;;  %v93_v42 = vld [vmem:[%s1385_s0 + $0x150] sm:$0xf] }
  0x1c   :  { %v307_v43 = vsel %vm153_vm0, %v61_v31, 4286644096  ;;  %v259_v44 = vmax.bf16 %v257_v25, %v255_v35  ;;  %v282_v45 = vmax.bf16 %v280_v30, %v278_v38  ;;  %v305_v46 = vmax.bf16 %v303_v34, %v301_v40  ;;  %v14_v47 = vld [vmem:[%s1385_s0 + $0x14] sm:$0xf]  ;;  %v109_v54 = vld [vmem:[%s1385_s0 + $0x190] sm:$0xf] }
  0x1d   :  { %v30_v48 = vld [vmem:[%s1385_s0 + $0x54] sm:$0xf]  ;;  %v288_v50 = vsel %vm153_vm0, %v124_v36, 4286644096  ;;  %v292_v51 = vsel %vm153_vm0, %v140_v37, 4286644096 }
  0x1e   :  { %v46_v49 = vld [vmem:[%s1385_s0 + $0x94] sm:$0xf]  ;;  %v311_v52 = vsel %vm153_vm0, %v77_v39, 4286644096  ;;  %717 = vst.msk [vmem:[%s1386_s1 + $0x8] sm:$0xf] %vm153_vm0, %v259_v44  ;;  %v286_v53 = vmax.bf16 %v284_v41, %v282_v45  ;;  %v309_v55 = vmax.bf16 %v307_v43, %v305_v46 }
  0x1f   :  { %v315_v56 = vsel %vm153_vm0, %v93_v42, 4286644096  ;;  %v62_v57 = vld [vmem:[%s1385_s0 + $0xd4] sm:$0xf]  ;;  %v331_v58 = vsel %vm153_vm0, %v14_v47, 4286644096 }
  0x20   :  { %v334_v59 = vsel %vm153_vm0, %v30_v48, 4286644096  ;;  %v338_v60 = vsel %vm153_vm0, %v46_v49, 4286644096  ;;  %v290_v61 = vmax.bf16 %v288_v50, %v286_v53  ;;  %v125_v62 = vld [vmem:[%s1385_s0 + $0x1d0] sm:$0xf]  ;;  %v313_v0 = vmax.bf16 %v311_v52, %v309_v55 }
  0x21   :  { %v141_v63 = vld [vmem:[%s1385_s0 + $0x210] sm:$0xf]  ;;  %v78_v1 = vld [vmem:[%s1385_s0 + $0x114] sm:$0xf]  ;;  %v336_v2 = vmax.bf16 %v334_v59, %v331_v58  ;;  %v319_v3 = vsel %vm153_vm0, %v109_v54, 4286644096 }
  0x22   :  { %v94_v4 = vld [vmem:[%s1385_s0 + $0x154] sm:$0xf]  ;;  %v342_v5 = vsel %vm153_vm0, %v62_v57, 4286644096  ;;  %v294_v6 = vmax.bf16 %v292_v51, %v290_v61  ;;  %v317_v7 = vmax.bf16 %v315_v56, %v313_v0  ;;  %v15_v9 = vld [vmem:[%s1385_s0 + $0x18] sm:$0xf] }
  0x23   :  { %v340_v8 = vmax.bf16 %v338_v60, %v336_v2  ;;  %v31_v10 = vld [vmem:[%s1385_s0 + $0x58] sm:$0xf]  ;;  %v323_v12 = vsel %vm153_vm0, %v125_v62, 4286644096  ;;  %v327_v13 = vsel %vm153_vm0, %v141_v63, 4286644096 }
  0x24   :  { %v47_v11 = vld [vmem:[%s1385_s0 + $0x98] sm:$0xf]  ;;  %v346_v14 = vsel %vm153_vm0, %v78_v1, 4286644096  ;;  %718 = vst.msk [vmem:[%s1386_s1 + $0xc] sm:$0xf] %vm153_vm0, %v294_v6  ;;  %v321_v15 = vmax.bf16 %v319_v3, %v317_v7 }
  0x25   :  { %v110_v16 = vld [vmem:[%s1385_s0 + $0x194] sm:$0xf]  ;;  %v344_v17 = vmax.bf16 %v342_v5, %v340_v8  ;;  %v350_v18 = vsel %vm153_vm0, %v94_v4, 4286644096  ;;  %v63_v19 = vld [vmem:[%s1385_s0 + $0xd8] sm:$0xf] }
  0x26   :  { %v366_v20 = vsel %vm153_vm0, %v15_v9, 4286644096  ;;  %v369_v21 = vsel %vm153_vm0, %v31_v10, 4286644096  ;;  %v373_v22 = vsel %vm153_vm0, %v47_v11, 4286644096  ;;  %v325_v23 = vmax.bf16 %v323_v12, %v321_v15 }
  0x27   :  { %v126_v24 = vld [vmem:[%s1385_s0 + $0x1d4] sm:$0xf]  ;;  %v348_v26 = vmax.bf16 %v346_v14, %v344_v17  ;;  %v79_v27 = vld [vmem:[%s1385_s0 + $0x118] sm:$0xf]  ;;  %v371_v28 = vmax.bf16 %v369_v21, %v366_v20  ;;  %v354_v29 = vsel %vm153_vm0, %v110_v16, 4286644096 }
  0x28   :  { %v142_v25 = vld [vmem:[%s1385_s0 + $0x214] sm:$0xf]  ;;  %v95_v30 = vld [vmem:[%s1385_s0 + $0x158] sm:$0xf]  ;;  %v377_v31 = vsel %vm153_vm0, %v63_v19, 4286644096  ;;  %v329_v32 = vmax.bf16 %v327_v13, %v325_v23 }
  0x29   :  { %v352_v33 = vmax.bf16 %v350_v18, %v348_v26  ;;  %v375_v34 = vmax.bf16 %v373_v22, %v371_v28  ;;  %v16_v35 = vld [vmem:[%s1385_s0 + $0x1c] sm:$0xf]  ;;  %v358_v38 = vsel %vm153_vm0, %v126_v24, 4286644096  ;;  %v362_v39 = vsel %vm153_vm0, %v142_v25, 4286644096 }
  0x2a   :  { %v32_v36 = vld [vmem:[%s1385_s0 + $0x5c] sm:$0xf]  ;;  %v381_v40 = vsel %vm153_vm0, %v79_v27, 4286644096  ;;  %719 = vst.msk [vmem:[%s1386_s1 + $0x10] sm:$0xf] %vm153_vm0, %v329_v32 }
  0x2b   :  { %v48_v37 = vld [vmem:[%s1385_s0 + $0x9c] sm:$0xf]  ;;  %v356_v41 = vmax.bf16 %v354_v29, %v352_v33  ;;  %v111_v42 = vld [vmem:[%s1385_s0 + $0x198] sm:$0xf]  ;;  %v379_v43 = vmax.bf16 %v377_v31, %v375_v34  ;;  %v385_v44 = vsel %vm153_vm0, %v95_v30, 4286644096 }
  0x2c   :  { %v64_v45 = vld [vmem:[%s1385_s0 + $0xdc] sm:$0xf]  ;;  %v401_v46 = vsel %vm153_vm0, %v16_v35, 4286644096  ;;  %v404_v47 = vsel %vm153_vm0, %v32_v36, 4286644096 }
  0x2d   :  { %v408_v48 = vsel %vm153_vm0, %v48_v37, 4286644096  ;;  %v360_v49 = vmax.bf16 %v358_v38, %v356_v41  ;;  %v127_v50 = vld [vmem:[%s1385_s0 + $0x1d8] sm:$0xf]  ;;  %v383_v52 = vmax.bf16 %v381_v40, %v379_v43  ;;  %v80_v53 = vld [vmem:[%s1385_s0 + $0x11c] sm:$0xf]  ;;  %v406_v54 = vmax.bf16 %v404_v47, %v401_v46 }
  0x2e   :  { %v143_v51 = vld [vmem:[%s1385_s0 + $0x218] sm:$0xf]  ;;  %v389_v55 = vsel %vm153_vm0, %v111_v42, 4286644096  ;;  %v96_v56 = vld [vmem:[%s1385_s0 + $0x15c] sm:$0xf] }
  0x2f   :  { %v412_v57 = vsel %vm153_vm0, %v64_v45, 4286644096  ;;  %v364_v58 = vmax.bf16 %v362_v39, %v360_v49  ;;  %v387_v59 = vmax.bf16 %v385_v44, %v383_v52  ;;  %v410_v60 = vmax.bf16 %v408_v48, %v406_v54  ;;  %v17_v61 = vld [vmem:[%s1385_s0 + $0x20] sm:$0xf]  ;;  %v112_v4 = vld [vmem:[%s1385_s0 + $0x19c] sm:$0xf] }
  0x30   :  { %v33_v62 = vld [vmem:[%s1385_s0 + $0x60] sm:$0xf]  ;;  %v393_v0 = vsel %vm153_vm0, %v127_v50, 4286644096  ;;  %v397_v1 = vsel %vm153_vm0, %v143_v51, 4286644096 }
  0x31   :  { %v49_v63 = vld [vmem:[%s1385_s0 + $0xa0] sm:$0xf]  ;;  %v416_v2 = vsel %vm153_vm0, %v80_v53, 4286644096  ;;  %720 = vst.msk [vmem:[%s1386_s1 + $0x14] sm:$0xf] %vm153_vm0, %v364_v58  ;;  %v391_v3 = vmax.bf16 %v389_v55, %v387_v59  ;;  %v414_v5 = vmax.bf16 %v412_v57, %v410_v60 }
  0x32   :  { %v420_v6 = vsel %vm153_vm0, %v96_v56, 4286644096  ;;  %v65_v7 = vld [vmem:[%s1385_s0 + $0xe0] sm:$0xf]  ;;  %v436_v8 = vsel %vm153_vm0, %v17_v61, 4286644096 }
  0x33   :  { %v439_v9 = vsel %vm153_vm0, %v33_v62, 4286644096  ;;  %v443_v10 = vsel %vm153_vm0, %v49_v63, 4286644096  ;;  %v395_v11 = vmax.bf16 %v393_v0, %v391_v3  ;;  %v128_v12 = vld [vmem:[%s1385_s0 + $0x1dc] sm:$0xf]  ;;  %v418_v14 = vmax.bf16 %v416_v2, %v414_v5 }
  0x34   :  { %v144_v13 = vld [vmem:[%s1385_s0 + $0x21c] sm:$0xf]  ;;  %v81_v15 = vld [vmem:[%s1385_s0 + $0x120] sm:$0xf]  ;;  %v441_v16 = vmax.bf16 %v439_v9, %v436_v8  ;;  %v424_v17 = vsel %vm153_vm0, %v112_v4, 4286644096 }
  0x35   :  { %v97_v18 = vld [vmem:[%s1385_s0 + $0x160] sm:$0xf]  ;;  %v447_v19 = vsel %vm153_vm0, %v65_v7, 4286644096  ;;  %v399_v20 = vmax.bf16 %v397_v1, %v395_v11  ;;  %v422_v21 = vmax.bf16 %v420_v6, %v418_v14  ;;  %v18_v23 = vld [vmem:[%s1385_s0 + $0x24] sm:$0xf] }
  0x36   :  { %v445_v22 = vmax.bf16 %v443_v10, %v441_v16  ;;  %v34_v24 = vld [vmem:[%s1385_s0 + $0x64] sm:$0xf]  ;;  %v428_v26 = vsel %vm153_vm0, %v128_v12, 4286644096  ;;  %v432_v27 = vsel %vm153_vm0, %v144_v13, 4286644096 }
  0x37   :  { %v50_v25 = vld [vmem:[%s1385_s0 + $0xa4] sm:$0xf]  ;;  %v451_v28 = vsel %vm153_vm0, %v81_v15, 4286644096  ;;  %721 = vst.msk [vmem:[%s1386_s1 + $0x18] sm:$0xf] %vm153_vm0, %v399_v20  ;;  %v426_v29 = vmax.bf16 %v424_v17, %v422_v21 }
  0x38   :  { %v113_v30 = vld [vmem:[%s1385_s0 + $0x1a0] sm:$0xf]  ;;  %v449_v31 = vmax.bf16 %v447_v19, %v445_v22  ;;  %v455_v32 = vsel %vm153_vm0, %v97_v18, 4286644096  ;;  %v66_v33 = vld [vmem:[%s1385_s0 + $0xe4] sm:$0xf] }
  0x39   :  { %v471_v34 = vsel %vm153_vm0, %v18_v23, 4286644096  ;;  %v474_v35 = vsel %vm153_vm0, %v34_v24, 4286644096  ;;  %v478_v36 = vsel %vm153_vm0, %v50_v25, 4286644096  ;;  %v430_v37 = vmax.bf16 %v428_v26, %v426_v29 }
  0x3a   :  { %v129_v38 = vld [vmem:[%s1385_s0 + $0x1e0] sm:$0xf]  ;;  %v453_v40 = vmax.bf16 %v451_v28, %v449_v31  ;;  %v82_v41 = vld [vmem:[%s1385_s0 + $0x124] sm:$0xf]  ;;  %v476_v42 = vmax.bf16 %v474_v35, %v471_v34  ;;  %v459_v43 = vsel %vm153_vm0, %v113_v30, 4286644096 }
  0x3b   :  { %v145_v39 = vld [vmem:[%s1385_s0 + $0x220] sm:$0xf]  ;;  %v98_v44 = vld [vmem:[%s1385_s0 + $0x164] sm:$0xf]  ;;  %v482_v45 = vsel %vm153_vm0, %v66_v33, 4286644096  ;;  %v434_v46 = vmax.bf16 %v432_v27, %v430_v37 }
  0x3c   :  { %v457_v47 = vmax.bf16 %v455_v32, %v453_v40  ;;  %v480_v48 = vmax.bf16 %v478_v36, %v476_v42  ;;  %v19_v49 = vld [vmem:[%s1385_s0 + $0x28] sm:$0xf]  ;;  %v463_v52 = vsel %vm153_vm0, %v129_v38, 4286644096  ;;  %v467_v53 = vsel %vm153_vm0, %v145_v39, 4286644096 }
  0x3d   :  { %v35_v50 = vld [vmem:[%s1385_s0 + $0x68] sm:$0xf]  ;;  %v486_v54 = vsel %vm153_vm0, %v82_v41, 4286644096  ;;  %722 = vst.msk [vmem:[%s1386_s1 + $0x1c] sm:$0xf] %vm153_vm0, %v434_v46 }
  0x3e   :  { %v51_v51 = vld [vmem:[%s1385_s0 + $0xa8] sm:$0xf]  ;;  %v461_v55 = vmax.bf16 %v459_v43, %v457_v47  ;;  %v114_v56 = vld [vmem:[%s1385_s0 + $0x1a4] sm:$0xf]  ;;  %v484_v57 = vmax.bf16 %v482_v45, %v480_v48  ;;  %v490_v58 = vsel %vm153_vm0, %v98_v44, 4286644096 }
  0x3f   :  { %v67_v59 = vld [vmem:[%s1385_s0 + $0xe8] sm:$0xf]  ;;  %v506_v60 = vsel %vm153_vm0, %v19_v49, 4286644096  ;;  %v509_v61 = vsel %vm153_vm0, %v35_v50, 4286644096 }
  0x40   :  { %v513_v62 = vsel %vm153_vm0, %v51_v51, 4286644096  ;;  %v465_v63 = vmax.bf16 %v463_v52, %v461_v55  ;;  %v130_v0 = vld [vmem:[%s1385_s0 + $0x1e4] sm:$0xf]  ;;  %v488_v2 = vmax.bf16 %v486_v54, %v484_v57  ;;  %v83_v3 = vld [vmem:[%s1385_s0 + $0x128] sm:$0xf]  ;;  %v511_v4 = vmax.bf16 %v509_v61, %v506_v60 }
  0x41   :  { %v146_v1 = vld [vmem:[%s1385_s0 + $0x224] sm:$0xf]  ;;  %v494_v5 = vsel %vm153_vm0, %v114_v56, 4286644096  ;;  %v99_v6 = vld [vmem:[%s1385_s0 + $0x168] sm:$0xf] }
  0x42   :  { %v517_v7 = vsel %vm153_vm0, %v67_v59, 4286644096  ;;  %v469_v8 = vmax.bf16 %v467_v53, %v465_v63  ;;  %v492_v9 = vmax.bf16 %v490_v58, %v488_v2  ;;  %v515_v10 = vmax.bf16 %v513_v62, %v511_v4  ;;  %v20_v11 = vld [vmem:[%s1385_s0 + $0x2c] sm:$0xf]  ;;  %v115_v18 = vld [vmem:[%s1385_s0 + $0x1a8] sm:$0xf] }
  0x43   :  { %v36_v12 = vld [vmem:[%s1385_s0 + $0x6c] sm:$0xf]  ;;  %v498_v14 = vsel %vm153_vm0, %v130_v0, 4286644096  ;;  %v502_v15 = vsel %vm153_vm0, %v146_v1, 4286644096 }
  0x44   :  { %v52_v13 = vld [vmem:[%s1385_s0 + $0xac] sm:$0xf]  ;;  %v521_v16 = vsel %vm153_vm0, %v83_v3, 4286644096  ;;  %723 = vst.msk [vmem:[%s1386_s1 + $0x20] sm:$0xf] %vm153_vm0, %v469_v8  ;;  %v496_v17 = vmax.bf16 %v494_v5, %v492_v9  ;;  %v519_v19 = vmax.bf16 %v517_v7, %v515_v10 }
  0x45   :  { %v525_v20 = vsel %vm153_vm0, %v99_v6, 4286644096  ;;  %v68_v21 = vld [vmem:[%s1385_s0 + $0xec] sm:$0xf]  ;;  %v541_v22 = vsel %vm153_vm0, %v20_v11, 4286644096 }
  0x46   :  { %v544_v23 = vsel %vm153_vm0, %v36_v12, 4286644096  ;;  %v548_v24 = vsel %vm153_vm0, %v52_v13, 4286644096  ;;  %v500_v25 = vmax.bf16 %v498_v14, %v496_v17  ;;  %v131_v26 = vld [vmem:[%s1385_s0 + $0x1e8] sm:$0xf]  ;;  %v523_v28 = vmax.bf16 %v521_v16, %v519_v19 }
  0x47   :  { %v147_v27 = vld [vmem:[%s1385_s0 + $0x228] sm:$0xf]  ;;  %v84_v29 = vld [vmem:[%s1385_s0 + $0x12c] sm:$0xf]  ;;  %v546_v30 = vmax.bf16 %v544_v23, %v541_v22  ;;  %v529_v31 = vsel %vm153_vm0, %v115_v18, 4286644096 }
  0x48   :  { %v100_v32 = vld [vmem:[%s1385_s0 + $0x16c] sm:$0xf]  ;;  %v552_v33 = vsel %vm153_vm0, %v68_v21, 4286644096  ;;  %v504_v34 = vmax.bf16 %v502_v15, %v500_v25  ;;  %v527_v35 = vmax.bf16 %v525_v20, %v523_v28  ;;  %v21_v37 = vld [vmem:[%s1385_s0 + $0x30] sm:$0xf] }
  0x49   :  { %v550_v36 = vmax.bf16 %v548_v24, %v546_v30  ;;  %v37_v38 = vld [vmem:[%s1385_s0 + $0x70] sm:$0xf]  ;;  %v533_v40 = vsel %vm153_vm0, %v131_v26, 4286644096  ;;  %v537_v41 = vsel %vm153_vm0, %v147_v27, 4286644096 }
  0x4a   :  { %v53_v39 = vld [vmem:[%s1385_s0 + $0xb0] sm:$0xf]  ;;  %v556_v42 = vsel %vm153_vm0, %v84_v29, 4286644096  ;;  %724 = vst.msk [vmem:[%s1386_s1 + $0x24] sm:$0xf] %vm153_vm0, %v504_v34  ;;  %v531_v43 = vmax.bf16 %v529_v31, %v527_v35 }
  0x4b   :  { %v116_v44 = vld [vmem:[%s1385_s0 + $0x1ac] sm:$0xf]  ;;  %v554_v45 = vmax.bf16 %v552_v33, %v550_v36  ;;  %v560_v46 = vsel %vm153_vm0, %v100_v32, 4286644096  ;;  %v69_v47 = vld [vmem:[%s1385_s0 + $0xf0] sm:$0xf] }
  0x4c   :  { %v576_v48 = vsel %vm153_vm0, %v21_v37, 4286644096  ;;  %v579_v49 = vsel %vm153_vm0, %v37_v38, 4286644096  ;;  %v583_v50 = vsel %vm153_vm0, %v53_v39, 4286644096  ;;  %v535_v51 = vmax.bf16 %v533_v40, %v531_v43 }
  0x4d   :  { %v132_v52 = vld [vmem:[%s1385_s0 + $0x1ec] sm:$0xf]  ;;  %v558_v54 = vmax.bf16 %v556_v42, %v554_v45  ;;  %v85_v55 = vld [vmem:[%s1385_s0 + $0x130] sm:$0xf]  ;;  %v581_v56 = vmax.bf16 %v579_v49, %v576_v48  ;;  %v564_v57 = vsel %vm153_vm0, %v116_v44, 4286644096 }
  0x4e   :  { %v148_v53 = vld [vmem:[%s1385_s0 + $0x22c] sm:$0xf]  ;;  %v101_v58 = vld [vmem:[%s1385_s0 + $0x170] sm:$0xf]  ;;  %v587_v59 = vsel %vm153_vm0, %v69_v47, 4286644096  ;;  %v539_v60 = vmax.bf16 %v537_v41, %v535_v51 }
  0x4f   :  { %v562_v61 = vmax.bf16 %v560_v46, %v558_v54  ;;  %v585_v62 = vmax.bf16 %v583_v50, %v581_v56  ;;  %v22_v63 = vld [vmem:[%s1385_s0 + $0x34] sm:$0xf]  ;;  %v568_v2 = vsel %vm153_vm0, %v132_v52, 4286644096  ;;  %v572_v3 = vsel %vm153_vm0, %v148_v53, 4286644096 }
  0x50   :  { %v38_v0 = vld [vmem:[%s1385_s0 + $0x74] sm:$0xf]  ;;  %v591_v4 = vsel %vm153_vm0, %v85_v55, 4286644096  ;;  %725 = vst.msk [vmem:[%s1386_s1 + $0x28] sm:$0xf] %vm153_vm0, %v539_v60 }
  0x51   :  { %v54_v1 = vld [vmem:[%s1385_s0 + $0xb4] sm:$0xf]  ;;  %v566_v5 = vmax.bf16 %v564_v57, %v562_v61  ;;  %v117_v6 = vld [vmem:[%s1385_s0 + $0x1b0] sm:$0xf]  ;;  %v589_v7 = vmax.bf16 %v587_v59, %v585_v62  ;;  %v595_v8 = vsel %vm153_vm0, %v101_v58, 4286644096 }
  0x52   :  { %v70_v9 = vld [vmem:[%s1385_s0 + $0xf4] sm:$0xf]  ;;  %v611_v10 = vsel %vm153_vm0, %v22_v63, 4286644096  ;;  %v614_v11 = vsel %vm153_vm0, %v38_v0, 4286644096 }
  0x53   :  { %v618_v12 = vsel %vm153_vm0, %v54_v1, 4286644096  ;;  %v570_v13 = vmax.bf16 %v568_v2, %v566_v5  ;;  %v133_v14 = vld [vmem:[%s1385_s0 + $0x1f0] sm:$0xf]  ;;  %v593_v16 = vmax.bf16 %v591_v4, %v589_v7  ;;  %v86_v17 = vld [vmem:[%s1385_s0 + $0x134] sm:$0xf]  ;;  %v616_v18 = vmax.bf16 %v614_v11, %v611_v10 }
  0x54   :  { %v149_v15 = vld [vmem:[%s1385_s0 + $0x230] sm:$0xf]  ;;  %v599_v19 = vsel %vm153_vm0, %v117_v6, 4286644096  ;;  %v102_v20 = vld [vmem:[%s1385_s0 + $0x174] sm:$0xf] }
  0x55   :  { %v622_v21 = vsel %vm153_vm0, %v70_v9, 4286644096  ;;  %v574_v22 = vmax.bf16 %v572_v3, %v570_v13  ;;  %v597_v23 = vmax.bf16 %v595_v8, %v593_v16  ;;  %v620_v24 = vmax.bf16 %v618_v12, %v616_v18  ;;  %v23_v25 = vld [vmem:[%s1385_s0 + $0x38] sm:$0xf]  ;;  %v118_v32 = vld [vmem:[%s1385_s0 + $0x1b4] sm:$0xf] }
  0x56   :  { %v39_v26 = vld [vmem:[%s1385_s0 + $0x78] sm:$0xf]  ;;  %v603_v28 = vsel %vm153_vm0, %v133_v14, 4286644096  ;;  %v607_v29 = vsel %vm153_vm0, %v149_v15, 4286644096 }
  0x57   :  { %v55_v27 = vld [vmem:[%s1385_s0 + $0xb8] sm:$0xf]  ;;  %v626_v30 = vsel %vm153_vm0, %v86_v17, 4286644096  ;;  %726 = vst.msk [vmem:[%s1386_s1 + $0x2c] sm:$0xf] %vm153_vm0, %v574_v22  ;;  %v601_v31 = vmax.bf16 %v599_v19, %v597_v23  ;;  %v624_v33 = vmax.bf16 %v622_v21, %v620_v24 }
  0x58   :  { %v630_v34 = vsel %vm153_vm0, %v102_v20, 4286644096  ;;  %v71_v35 = vld [vmem:[%s1385_s0 + $0xf8] sm:$0xf]  ;;  %v646_v36 = vsel %vm153_vm0, %v23_v25, 4286644096 }
  0x59   :  { %v649_v37 = vsel %vm153_vm0, %v39_v26, 4286644096  ;;  %v653_v38 = vsel %vm153_vm0, %v55_v27, 4286644096  ;;  %v605_v39 = vmax.bf16 %v603_v28, %v601_v31  ;;  %v134_v40 = vld [vmem:[%s1385_s0 + $0x1f4] sm:$0xf]  ;;  %v628_v42 = vmax.bf16 %v626_v30, %v624_v33 }
  0x5a   :  { %v150_v41 = vld [vmem:[%s1385_s0 + $0x234] sm:$0xf]  ;;  %v87_v43 = vld [vmem:[%s1385_s0 + $0x138] sm:$0xf]  ;;  %v651_v44 = vmax.bf16 %v649_v37, %v646_v36  ;;  %v634_v45 = vsel %vm153_vm0, %v118_v32, 4286644096 }
  0x5b   :  { %v103_v46 = vld [vmem:[%s1385_s0 + $0x178] sm:$0xf]  ;;  %v657_v47 = vsel %vm153_vm0, %v71_v35, 4286644096  ;;  %v609_v48 = vmax.bf16 %v607_v29, %v605_v39  ;;  %v632_v49 = vmax.bf16 %v630_v34, %v628_v42  ;;  %v24_v51 = vld [vmem:[%s1385_s0 + $0x3c] sm:$0xf] }
  0x5c   :  { %v655_v50 = vmax.bf16 %v653_v38, %v651_v44  ;;  %v40_v52 = vld [vmem:[%s1385_s0 + $0x7c] sm:$0xf]  ;;  %v638_v54 = vsel %vm153_vm0, %v134_v40, 4286644096  ;;  %v642_v55 = vsel %vm153_vm0, %v150_v41, 4286644096 }
  0x5d   :  { %v56_v53 = vld [vmem:[%s1385_s0 + $0xbc] sm:$0xf]  ;;  %v661_v56 = vsel %vm153_vm0, %v87_v43, 4286644096  ;;  %727 = vst.msk [vmem:[%s1386_s1 + $0x30] sm:$0xf] %vm153_vm0, %v609_v48  ;;  %v636_v57 = vmax.bf16 %v634_v45, %v632_v49 }
  0x5e   :  { %v119_v58 = vld [vmem:[%s1385_s0 + $0x1b8] sm:$0xf]  ;;  %v659_v59 = vmax.bf16 %v657_v47, %v655_v50  ;;  %v665_v60 = vsel %vm153_vm0, %v103_v46, 4286644096  ;;  %v72_v61 = vld [vmem:[%s1385_s0 + $0xfc] sm:$0xf] }
  0x5f   :  { %v681_v62 = vsel %vm153_vm0, %v24_v51, 4286644096  ;;  %v684_v63 = vsel %vm153_vm0, %v40_v52, 4286644096  ;;  %v688_v0 = vsel %vm153_vm0, %v56_v53, 4286644096  ;;  %v640_v1 = vmax.bf16 %v638_v54, %v636_v57 }
  0x60   :  { %v135_v2 = vld [vmem:[%s1385_s0 + $0x1f8] sm:$0xf]  ;;  %v663_v3 = vmax.bf16 %v661_v56, %v659_v59  ;;  %v88_v4 = vld [vmem:[%s1385_s0 + $0x13c] sm:$0xf]  ;;  %v686_v5 = vmax.bf16 %v684_v63, %v681_v62  ;;  %v669_v6 = vsel %vm153_vm0, %v119_v58, 4286644096 }
  0x61   :  { %v692_v7 = vsel %vm153_vm0, %v72_v61, 4286644096  ;;  %v644_v8 = vmax.bf16 %v642_v55, %v640_v1  ;;  %v151_v9 = vld [vmem:[%s1385_s0 + $0x238] sm:$0xf]  ;;  %v104_v11 = vld [vmem:[%s1385_s0 + $0x17c] sm:$0xf] }
  0x62   :  { %v667_v10 = vmax.bf16 %v665_v60, %v663_v3  ;;  %v690_v12 = vmax.bf16 %v688_v0, %v686_v5  ;;  %v673_v13 = vsel %vm153_vm0, %v135_v2, 4286644096  ;;  %v696_v14 = vsel %vm153_vm0, %v88_v4, 4286644096  ;;  %v120_v16 = vld [vmem:[%s1385_s0 + $0x1bc] sm:$0xf] }
  0x63   :  { %728 = vst.msk [vmem:[%s1386_s1 + $0x34] sm:$0xf] %vm153_vm0, %v644_v8  ;;  %v677_v18 = vsel %vm153_vm0, %v151_v9, 4286644096  ;;  %v700_v19 = vsel %vm153_vm0, %v104_v11, 4286644096 }
  0x64   :  { %v671_v15 = vmax.bf16 %v669_v6, %v667_v10  ;;  %v694_v17 = vmax.bf16 %v692_v7, %v690_v12  ;;  %v136_v21 = vld [vmem:[%s1385_s0 + $0x1fc] sm:$0xf]  ;;  %v704_v23 = vsel %vm153_vm0, %v120_v16, 4286644096 }
  0x65   :  { %v152_v25 = vld [vmem:[%s1385_s0 + $0x23c] sm:$0xf]  ;;  %v708_v27 = vsel %vm153_vm0, %v136_v21, 4286644096 }
  0x66   :  { %v675_v20 = vmax.bf16 %v673_v13, %v671_v15  ;;  %v698_v22 = vmax.bf16 %v696_v14, %v694_v17  ;;  %v712_v29 = vsel %vm153_vm0, %v152_v25, 4286644096 }
  0x68   :  { %v679_v24 = vmax.bf16 %v677_v18, %v675_v20  ;;  %v702_v26 = vmax.bf16 %v700_v19, %v698_v22 }
  0x6a   :  { %729 = vst.msk [vmem:[%s1386_s1 + $0x38] sm:$0xf] %vm153_vm0, %v679_v24  ;;  %v706_v28 = vmax.bf16 %v704_v23, %v702_v26 }
  0x6c   :  { %v710_v30 = vmax.bf16 %v708_v27, %v706_v28 }
  0x6e   :  { %v714_v31 = vmax.bf16 %v712_v29, %v710_v30 }
  0x70   :  { %730 = vst.msk [vmem:[%s1386_s1 + $0x3c] sm:$0xf] %vm153_vm0, %v714_v31 }

// kernel: combined_model_forward.26
= control target key start
LH: loop header
LB: loop body
LE: loop exit
PB: predicated region body
PF: predicated region fallthrough
CT: control target
= control target key end

     0   :  { %s1400_s18 = smov 0   ;;  %s1402_s19 = smov 0   ;;  %s1667_s0 = inlined_call_operand.vmem [shape: bf16[128,640], index: 0, kind: input, shape index: {}]   ;;  %s1668_s1 = inlined_call_operand.vmem [shape: bf16[640,64], index: 1, kind: input, shape index: {}]   ;;  %s1669_s2 = inlined_call_operand.vmem [shape: f32[1,64], index: 2, kind: input, shape index: {}]   ;;  %s1670_s3 = inlined_call_operand.vmem [shape: f32[1,64], index: 3, kind: input, shape index: {}]   ;;  %s1671_s4 = inlined_call_operand.vmem [shape: bf16[128,64], index: 4, kind: input, shape index: {}]   ;;  %s1672_s5 = inlined_call_operand.vmem [shape: bf16[128,64], index: 5, kind: output, shape index: {}]  }
   0x1   :  { %s1404_s20 = smov 0   ;;  %s1406_s21 = smov 0  }
   0x2   :  { %s1408_s22 = smov 0  }
   0x3 LB: > { %s27_s23 = sadd.s32 1, %s1363_s21  ;;  %p50_p1 = scmp.ne.s32.totalorder %s1355_s19, %s1351_s18  ;;  %s1367_s22 = sphi %s1408_s22, %s15_s22   ;;  %s1363_s21 = sphi %s1406_s21, %s1676_s21   ;;  %s1359_s20 = sphi %s1404_s20, %s1675_s20   ;;  %s1355_s19 = sphi %s1402_s19, %s1674_s19   ;;  %s1351_s18 = sphi %s1400_s18, %s1673_s18  }
   0x4   : > { %p28_p0 = scmp.ge.s32.totalorder %s27_s23, 5  ;;  %p51_p2 = scmp.eq.s32.totalorder %s1367_s22, 0 }
   0x5   : > { %s43_s25 = sadd.s32 1, %s1355_s19  ;;  %p1106_p5 = scmp.ge.s32.totalorder %s1367_s22, 5 }
   0x6   : > { %s1678_s23 = smov (%p28_p0, %s27_s23), 0  ;;  %p52_p3 = por %p51_p2, %p50_p1 }
   0x7   : > { %s39_s24 = ssub.s32 %s1363_s21, %s1678_s23  ;;  %236 = sbr.rel (%p1106_p5) target bundleno = 28 (0x1c), region = 28 }
   0x8   : > { %p41_p4 = scmp.eq.s32.totalorder %s39_s24, 0 }
   0xa   : > { %s1435_s26 = scalar_select %p41_p4, %s1355_s19, %s43_s25  }
   0xe   : > { %239 = sbr.rel (!%p52_p3) target bundleno = 28 (0x1c), region = 32  ;;  %s241_s27 = sand.u32 (%p52_p3), 1, %s1355_s19  }
   0xf   : > { %s1108_s28 = sshll.u32 (%p52_p3), %s1363_s21, 2  ;;  %s1107_s29 = sshll.u32 (%p52_p3), %s241_s27, 6 }
  0x10   : > { %s1443_s7 = scalar_lea.vmem (%p52_p3), %s1667_s0, %s1108_s28  ;;  %s243_s8 = scalar_lea.vmem (%p52_p3), [#allocation3], %s1107_s29 }
  0x11   : > { %v264_v0 = vld [vmem:[%s1443_s7] sm:$0xf] (%p52_p3)  ;;  %v266_v1 = vld [vmem:[%s1443_s7 + $0x14] sm:$0xf] (%p52_p3)  ;;  %v268_v2 = vld [vmem:[%s1443_s7 + $0x28] sm:$0xf] (%p52_p3) }
  0x12   : > { %265 = vst [vmem:[%s243_s8] sm:$0xf] (%p52_p3), %v264_v0  ;;  %267 = vst [vmem:[%s243_s8 + $0x4] sm:$0xf] (%p52_p3), %v266_v1  ;;  %v270_v3 = vld [vmem:[%s1443_s7 + $0x3c] sm:$0xf] (%p52_p3) }
  0x13   : > { %v272_v4 = vld [vmem:[%s1443_s7 + $0x50] sm:$0xf] (%p52_p3)  ;;  %269 = vst [vmem:[%s243_s8 + $0x8] sm:$0xf] (%p52_p3), %v268_v2  ;;  %271 = vst [vmem:[%s243_s8 + $0xc] sm:$0xf] (%p52_p3), %v270_v3 }
  0x14   : > { %273 = vst [vmem:[%s243_s8 + $0x10] sm:$0xf] (%p52_p3), %v272_v4  ;;  %v274_v5 = vld [vmem:[%s1443_s7 + $0x64] sm:$0xf] (%p52_p3)  ;;  %v276_v6 = vld [vmem:[%s1443_s7 + $0x78] sm:$0xf] (%p52_p3) }
  0x15   : > { %v278_v7 = vld [vmem:[%s1443_s7 + $0x8c] sm:$0xf]  ;;  %275 = vst [vmem:[%s243_s8 + $0x14] sm:$0xf] %v274_v5  ;;  %277 = vst [vmem:[%s243_s8 + $0x18] sm:$0xf] %v276_v6 }
  0x16   : > { %279 = vst [vmem:[%s243_s8 + $0x1c] sm:$0xf] %v278_v7  ;;  %v280_v8 = vld [vmem:[%s1443_s7 + $0xa0] sm:$0xf]  ;;  %v282_v9 = vld [vmem:[%s1443_s7 + $0xb4] sm:$0xf] }
  0x17   : > { %v284_v10 = vld [vmem:[%s1443_s7 + $0xc8] sm:$0xf]  ;;  %281 = vst [vmem:[%s243_s8 + $0x20] sm:$0xf] %v280_v8  ;;  %283 = vst [vmem:[%s243_s8 + $0x24] sm:$0xf] %v282_v9 }
  0x18   : > { %285 = vst [vmem:[%s243_s8 + $0x28] sm:$0xf] %v284_v10  ;;  %v286_v11 = vld [vmem:[%s1443_s7 + $0xdc] sm:$0xf]  ;;  %v288_v12 = vld [vmem:[%s1443_s7 + $0xf0] sm:$0xf] }
  0x19   : > { %v290_v13 = vld [vmem:[%s1443_s7 + $0x104] sm:$0xf]  ;;  %287 = vst [vmem:[%s243_s8 + $0x2c] sm:$0xf] %v286_v11  ;;  %289 = vst [vmem:[%s243_s8 + $0x30] sm:$0xf] %v288_v12 }
  0x1a   : > { %291 = vst [vmem:[%s243_s8 + $0x34] sm:$0xf] %v290_v13  ;;  %v292_v14 = vld [vmem:[%s1443_s7 + $0x118] sm:$0xf]  ;;  %v294_v15 = vld [vmem:[%s1443_s7 + $0x12c] sm:$0xf] }
  0x1b   : > { %293 = vst [vmem:[%s243_s8 + $0x38] sm:$0xf] %v292_v14  ;;  %295 = vst [vmem:[%s243_s8 + $0x3c] sm:$0xf] %v294_v15 }
  0x1c PF: > { %p1109_p6 = scmp.ge.s32.totalorder %s1367_s22, 1  ;;  %p361_p7 = scmp.lt.s32.totalorder %s1367_s22, 6 }
  0x1e   : > { %p362_p8 = pnand %p1109_p6, %p361_p7 }
  0x1f   : > { %s368_s9 = sand.u32 (!%p362_p8), 1, %s1351_s18   ;;  %s1111_s10 = sshll.u32 (!%p362_p8), %s1359_s20, 4 }
  0x20   : > { %365 = sbr.rel (%p362_p8) target bundleno = 335 (0x14f), region = 77  ;;  %s1110_s11 = sshll.u32 (!%p362_p8), %s368_s9, 6 }
  0x21   : > { %p422_p9 = scmp.lt.s32.totalorder (!%p362_p8), %s1111_s10, 79  ;;  %s1470_s16 = scalar_lea.vmem (!%p362_p8), [#allocation3], %s1110_s11 }
  0x22   : > { %p1113_p10 = scmp.ne.s32.totalorder (!%p362_p8), %s1359_s20, 0 }
  0x27   : > { %s1680_s10 = smov (!%p422_p9, %s1111_s10), 79  ;;  %458 = sbr.rel (%p1113_p10) target bundleno = 49 (0x31), region = 85 }
  0x28   : > { %s1112_s12 = sshll.u32 %s1680_s10, 2  ;;  %vm459_vm0 = vcmask (!%p1113_p10), 523264   ;;  %v1369_v16 = vmov (!%p1113_p10), 0.0  }
  0x29   : > { %s1468_s15 = scalar_lea.vmem %s1668_s1, %s1112_s12  ;;  %460 = vst.msk [vmem:[#allocation2] sm:$0xff] (!%p1113_p10), %vm459_vm0, %v1369_v16  ;;  %461 = vst.msk [vmem:[#allocation2 + $0x8] sm:$0xff] (!%p1113_p10), %vm459_vm0, %v1369_v16 }
  0x2a   : > { %462 = vst.msk [vmem:[#allocation2 + $0x10] sm:$0xff] (!%p1113_p10), %vm459_vm0, %v1369_v16  ;;  %463 = vst.msk [vmem:[#allocation2 + $0x18] sm:$0xff] (!%p1113_p10), %vm459_vm0, %v1369_v16 }
  0x2b   : > { %464 = vst.msk [vmem:[#allocation2 + $0x20] sm:$0xff] (!%p1113_p10), %vm459_vm0, %v1369_v16  ;;  %465 = vst.msk [vmem:[#allocation2 + $0x28] sm:$0xff] (!%p1113_p10), %vm459_vm0, %v1369_v16 }
  0x2c   : > { %466 = vst.msk [vmem:[#allocation2 + $0x30] sm:$0xff] (!%p1113_p10), %vm459_vm0, %v1369_v16  ;;  %467 = vst.msk [vmem:[#allocation2 + $0x38] sm:$0xff] (!%p1113_p10), %vm459_vm0, %v1369_v16 }
  0x2d   : > { %468 = vst.msk [vmem:[#allocation2 + $0x40] sm:$0xff] (!%p1113_p10), %vm459_vm0, %v1369_v16  ;;  %469 = vst.msk [vmem:[#allocation2 + $0x48] sm:$0xff] (!%p1113_p10), %vm459_vm0, %v1369_v16 }
  0x2e   : > { %470 = vst.msk [vmem:[#allocation2 + $0x50] sm:$0xff] %vm459_vm0, %v1369_v16  ;;  %471 = vst.msk [vmem:[#allocation2 + $0x58] sm:$0xff] %vm459_vm0, %v1369_v16 }
  0x2f   : > { %472 = vst.msk [vmem:[#allocation2 + $0x60] sm:$0xff] %vm459_vm0, %v1369_v16  ;;  %473 = vst.msk [vmem:[#allocation2 + $0x68] sm:$0xff] %vm459_vm0, %v1369_v16 }
  0x30   : > { %474 = vst.msk [vmem:[#allocation2 + $0x70] sm:$0xff] %vm459_vm0, %v1369_v16  ;;  %475 = vst.msk [vmem:[#allocation2 + $0x78] sm:$0xff] %vm459_vm0, %v1369_v16 }
  0x31 PF: > { %v1313_v17 = vld [vmem:[%s1468_s15] sm:$0xff]   ;;  %v1314_v18 = vld [vmem:[%s1468_s15 + $0x8] sm:$0xff]   ;;  %v1315_v19 = vld [vmem:[%s1468_s15 + $0x10] sm:$0xff]   ;;  %vm733_vm1 = vcmask 523264   ;;  %p1130_p11 = scmp.ne.s32.totalorder %s1359_s20, 4 }
  0x32   : > { %1224 = vmatprep.subr.bf16.mxu0 %v1313_v17  ;;  %1256 = vmatprep.subr.bf16.mxu1 %v1313_v17  ;;  %v1316_v20 = vld [vmem:[%s1468_s15 + $0x18] sm:$0xff]   ;;  %v1321_v21 = vld [vmem:[%s1470_s16] sm:$0xff]   ;;  %v1318_v24 = vld [vmem:[%s1468_s15 + $0x28] sm:$0xff]   ;;  %vm944_vm2 = vcmask (!%p1130_p11), 519168  }
  0x33   : > { %1225 = vmatpush3.bf16.msra.mxu0 %v1313_v17  ;;  %1264 = vmatpush3.bf16.msra.mxu1 %v1313_v17  ;;  %v1322_v22 = vld [vmem:[%s1470_s16 + $0x20] sm:$0xff]   ;;  %v1319_v25 = vld [vmem:[%s1468_s15 + $0x30] sm:$0xff]   ;;  %v1320_v26 = vld [vmem:[%s1468_s15 + $0x38] sm:$0xff]  }
  0x34   : > { %1226 = vmatprep.subr.bf16.mxu0 %v1314_v18  ;;  %1257 = vmatprep.subr.bf16.mxu1 %v1314_v18  ;;  %v1317_v23 = vld [vmem:[%s1468_s15 + $0x20] sm:$0xff]   ;;  %v1323_v27 = vld [vmem:[%s1470_s16 + $0x8] sm:$0xff]   ;;  %v1325_v29 = vld [vmem:[%s1470_s16 + $0x10] sm:$0xff]  }
  0x35   : > { %1240 = vmatprep.mubr.bf16.mxu0 %v1321_v21  ;;  %1248 = vmatprep.mubr.bf16.mxu1 %v1322_v22  ;;  %v1324_v28 = vld [vmem:[%s1470_s16 + $0x28] sm:$0xff]   ;;  %v1326_v30 = vld [vmem:[%s1470_s16 + $0x30] sm:$0xff]   ;;  %v1327_v31 = vld [vmem:[%s1470_s16 + $0x18] sm:$0xff]  }
  0x36   : > { %v1328_v32 = vld [vmem:[%s1470_s16 + $0x38] sm:$0xff]   ;;  %v478_v33 = vld [vmem:[#allocation2 + $0x10] sm:$0xff]  ;;  %v476_v35 = vld [vmem:[#allocation2] sm:$0xff] }
  0x37   : > { %1227 = vmatpush3.bf16.msra.mxu0 %v1314_v18  ;;  %1265 = vmatpush3.bf16.msra.mxu1 %v1314_v18  ;;  %v486_v34 = vld [vmem:[#allocation2 + $0x50] sm:$0xff]  ;;  %v484_v36 = vld [vmem:[#allocation2 + $0x40] sm:$0xff]  ;;  %v479_v39 = vld [vmem:[#allocation2 + $0x18] sm:$0xff] }
  0x38   : > { %1228 = vmatprep.subr.bf16.mxu0 %v1315_v19  ;;  %1258 = vmatprep.subr.bf16.mxu1 %v1315_v19  ;;  %v487_v40 = vld [vmem:[#allocation2 + $0x58] sm:$0xff]  ;;  %v477_v45 = vld [vmem:[#allocation2 + $0x8] sm:$0xff]  ;;  %v482_v57 = vld [vmem:[#allocation2 + $0x30] sm:$0xff] }
  0x39   : > { %v485_v46 = vld [vmem:[#allocation2 + $0x48] sm:$0xff]  ;;  %v490_v58 = vld [vmem:[#allocation2 + $0x70] sm:$0xff]  ;;  %v480_v59 = vld [vmem:[#allocation2 + $0x20] sm:$0xff] }
  0x3a   : > { %v488_v60 = vld [vmem:[#allocation2 + $0x60] sm:$0xff]  ;;  %v483_v63 = vld [vmem:[#allocation2 + $0x38] sm:$0xff]  ;;  %v481_v5 = vld [vmem:[#allocation2 + $0x28] sm:$0xff] }
  0x3b   : > { %1229 = vmatpush3.bf16.msra.mxu0 %v1315_v19  ;;  %1266 = vmatpush3.bf16.msra.mxu1 %v1315_v19  ;;  %v491_v0 = vld [vmem:[#allocation2 + $0x78] sm:$0xff]  ;;  %v489_v6 = vld [vmem:[#allocation2 + $0x68] sm:$0xff]  ;;  %v1525_v18 = vld [vmem:[%s1669_s2] ss:$0 sm:$0xff] (!%p1130_p11) }
  0x3c   : > { %1230 = vmatprep.subr.bf16.mxu0 %v1316_v20  ;;  %1259 = vmatprep.subr.bf16.mxu1 %v1316_v20  ;;  %v1530_v19 = vld [vmem:[%s1670_s3] ss:$0 sm:$0xff] (!%p1130_p11) }
  0x3d   : > { %v1170_v21 = vld [vmem:[%s1671_s4] sm:$0xff] (!%p1130_p11)  }
  0x3f   : > { %1231 = vmatpush3.bf16.msra.mxu0 %v1316_v20  ;;  %1267 = vmatpush3.bf16.msra.mxu1 %v1316_v20 }
  0x40   : > { %1232 = vmatprep.subr.bf16.mxu0 %v1317_v23  ;;  %1260 = vmatprep.subr.bf16.mxu1 %v1317_v23 }
  0x43   : > { %1233 = vmatpush3.bf16.msra.mxu0 %v1317_v23  ;;  %1268 = vmatpush3.bf16.msra.mxu1 %v1317_v23 }
  0x44   : > { %1234 = vmatprep.subr.bf16.mxu0 %v1318_v24  ;;  %1261 = vmatprep.subr.bf16.mxu1 %v1318_v24 }
  0x47   : > { %1235 = vmatpush3.bf16.msra.mxu0 %v1318_v24  ;;  %1269 = vmatpush3.bf16.msra.mxu1 %v1318_v24  ;;  %v1171_v24 = vunpack.c.l.bf16 (!%p1130_p11), %v1170_v21 }
  0x48   : > { %1236 = vmatprep.subr.bf16.mxu0 %v1319_v25  ;;  %1262 = vmatprep.subr.bf16.mxu1 %v1319_v25 }
  0x4b   : > { %1237 = vmatpush3.bf16.msra.mxu0 %v1319_v25  ;;  %1270 = vmatpush3.bf16.msra.mxu1 %v1319_v25 }
  0x4c   : > { %1238 = vmatprep.subr.bf16.mxu0 %v1320_v26  ;;  %1263 = vmatprep.subr.bf16.mxu1 %v1320_v26 }
  0x4f   : > { %1239 = vmatpush3.bf16.msra.mxu0 %v1320_v26  ;;  %1271 = vmatpush3.bf16.msra.mxu1 %v1320_v26  ;;  %v1172_v26 = vunpack.c.h.bf16 (!%p1130_p11), %v1170_v21 }
  0x52   : > { %1241 = vmatmul.mubr.bf16.vlgmr.msra.gmra.mrb[0].mxu0 %v1323_v27  ;;  %1249 = vmatmul.mubr.bf16.vlgmr.msra.gmra.mrb[0].mxu1 %v1324_v28  ;;  %v1201_v28 = vld [vmem:[%s1671_s4 + $0x8] sm:$0xff] (!%p1130_p11)  }
  0x53   : > { %1244 = vmatprep.mubr.bf16.mxu0 %v1325_v29  ;;  %1252 = vmatprep.mubr.bf16.mxu1 %v1326_v30 }
  0x5a   : > { %1245 = vmatmul.mubr.bf16.gmra.mrb[4].mxu0 %v1327_v31  ;;  %1253 = vmatmul.mubr.bf16.gmra.mrb[4].mxu1 %v1328_v32  ;;  %v1175_v32 = vunpack.c.l.bf16 (!%p1130_p11), %v1201_v28 }
 0x125   : > { %v1242_v37 = vpop.f32.mrb[0].mxu0  ;;  %v1250_v38 = vpop.f32.mrb[0].mxu1 }
 0x126   : > { %v719_v41 = vadd.f32 %v1242_v37, %v478_v33  ;;  %v727_v42 = vadd.f32 %v1250_v38, %v486_v34  ;;  %v654_v43 = vpop.f32.mrb[1].mxu0  ;;  %v686_v44 = vpop.f32.mrb[1].mxu1  ;;  %v1176_v34 = vunpack.c.h.bf16 (!%p1130_p11), %v1201_v28 }
 0x127   : > { %v717_v47 = vadd.f32 %v654_v43, %v476_v35  ;;  %v725_v48 = vadd.f32 %v686_v44, %v484_v36  ;;  %v1243_v49 = vpop.f32.mrb[2].mxu0  ;;  %v1251_v50 = vpop.f32.mrb[2].mxu1  ;;  %v1202_v35 = vld [vmem:[%s1671_s4 + $0x10] sm:$0xff] (!%p1130_p11)  }
 0x128   : > { %736 = vst.msk [vmem:[#allocation2 + $0x10] sm:$0xff] %vm733_vm1, %v719_v41  ;;  %744 = vst.msk [vmem:[#allocation2 + $0x50] sm:$0xff] %vm733_vm1, %v727_v42  ;;  %v720_v51 = vadd.f32 %v1243_v49, %v479_v39  ;;  %v728_v52 = vadd.f32 %v1251_v50, %v487_v40  ;;  %v657_v53 = vpop.f32.mrb[3].mxu0  ;;  %v689_v54 = vpop.f32.mrb[3].mxu1  ;;  %v1179_v41 = vunpack.c.l.bf16 (!%p1130_p11), %v1202_v35  ;;  %v1203_v42 = vld [vmem:[%s1671_s4 + $0x18] sm:$0xff] (!%p1130_p11)  }
 0x129   : > { %734 = vst.msk [vmem:[#allocation2] sm:$0xff] %vm733_vm1, %v717_v47  ;;  %742 = vst.msk [vmem:[#allocation2 + $0x40] sm:$0xff] %vm733_vm1, %v725_v48  ;;  %v718_v55 = vadd.f32 %v657_v53, %v477_v45  ;;  %v726_v56 = vadd.f32 %v689_v54, %v485_v46  ;;  %v1180_v46 = vunpack.c.h.bf16 (!%p1130_p11), %v1202_v35 }
 0x12a   : > { %737 = vst.msk [vmem:[#allocation2 + $0x18] sm:$0xff] %vm733_vm1, %v720_v51  ;;  %745 = vst.msk [vmem:[#allocation2 + $0x58] sm:$0xff] %vm733_vm1, %v728_v52 }
 0x12b   : > { %735 = vst.msk [vmem:[#allocation2 + $0x8] sm:$0xff] %vm733_vm1, %v718_v55  ;;  %743 = vst.msk [vmem:[#allocation2 + $0x48] sm:$0xff] %vm733_vm1, %v726_v56  ;;  %v1183_v55 = vunpack.c.l.bf16 (!%p1130_p11), %v1203_v42 }
 0x12d   : > { %v1246_v61 = vpop.f32.mrb[4].mxu0  ;;  %v1254_v62 = vpop.f32.mrb[4].mxu1  ;;  %753 = sbr.rel (%p1130_p11) target bundleno = 335 (0x14f), region = 89 }
 0x12e   : > { %v723_v1 = vadd.f32 %v1246_v61, %v482_v57  ;;  %v731_v2 = vadd.f32 %v1254_v62, %v490_v58  ;;  %v670_v3 = vpop.f32.mrb[5].mxu0  ;;  %v702_v4 = vpop.f32.mrb[5].mxu1 }
 0x12f   : > { %v721_v7 = vadd.f32 %v670_v3, %v480_v59  ;;  %v729_v8 = vadd.f32 %v702_v4, %v488_v60  ;;  %v1247_v9 = vpop.f32.mrb[6].mxu0  ;;  %v1255_v10 = vpop.f32.mrb[6].mxu1  ;;  %v756_v23 = vld [vmem:[#allocation2 + $0x10] sm:$0xff] (!%p1130_p11) }
 0x130   : > { %740 = vst.msk [vmem:[#allocation2 + $0x30] sm:$0xff] %vm733_vm1, %v723_v1  ;;  %748 = vst.msk [vmem:[#allocation2 + $0x70] sm:$0xff] %vm733_vm1, %v731_v2  ;;  %v724_v11 = vadd.f32 %v1247_v9, %v483_v63  ;;  %v732_v12 = vadd.f32 %v1255_v10, %v491_v0  ;;  %v673_v13 = vpop.f32.mrb[7].mxu0  ;;  %v705_v14 = vpop.f32.mrb[7].mxu1  ;;  %v754_v17 = vld [vmem:[#allocation2] sm:$0xff] (!%p1130_p11)  ;;  %v779_v27 = vmul.f32 (!%p1130_p11), %v1525_v18, %v756_v23  ;;  %v1184_v10 = vunpack.c.h.bf16 (!%p1130_p11), %v1203_v42 }
 0x131   : > { %738 = vst.msk [vmem:[#allocation2 + $0x20] sm:$0xff] %vm733_vm1, %v721_v7  ;;  %746 = vst.msk [vmem:[#allocation2 + $0x60] sm:$0xff] %vm733_vm1, %v729_v8  ;;  %v722_v15 = vadd.f32 %v673_v13, %v481_v5  ;;  %v730_v16 = vadd.f32 %v705_v14, %v489_v6  ;;  %v777_v20 = vmul.f32 (!%p1130_p11), %v1525_v18, %v754_v17  ;;  %v757_v29 = vld [vmem:[#allocation2 + $0x18] sm:$0xff] (!%p1130_p11)  ;;  %v762_v0 = vld [vmem:[#allocation2 + $0x40] sm:$0xff] (!%p1130_p11) }
 0x132   : > { %741 = vst.msk [vmem:[#allocation2 + $0x38] sm:$0xff] %vm733_vm1, %v724_v11  ;;  %749 = vst.msk [vmem:[#allocation2 + $0x78] sm:$0xff] %vm733_vm1, %v732_v12  ;;  %v755_v22 = vld [vmem:[#allocation2 + $0x8] sm:$0xff] (!%p1130_p11)  ;;  %v780_v33 = vmul.f32 (!%p1130_p11), %v1525_v18, %v757_v29  ;;  %v802_v39 = vadd.f32 (!%p1130_p11), %v1530_v19, %v779_v27  ;;  %v1204_v1 = vld [vmem:[%s1671_s4 + $0x20] sm:$0xff] (!%p1130_p11)  }
 0x133   : > { %739 = vst.msk [vmem:[#allocation2 + $0x28] sm:$0xff] %vm733_vm1, %v722_v15  ;;  %747 = vst.msk [vmem:[#allocation2 + $0x68] sm:$0xff] %vm733_vm1, %v730_v16  ;;  %v778_v25 = vmul.f32 (!%p1130_p11), %v1525_v18, %v755_v22  ;;  %v800_v31 = vadd.f32 (!%p1130_p11), %v1530_v19, %v777_v20  ;;  %v763_v6 = vld [vmem:[#allocation2 + $0x48] sm:$0xff] (!%p1130_p11)  ;;  %v764_v11 = vld [vmem:[#allocation2 + $0x50] sm:$0xff] (!%p1130_p11)  ;;  %v785_v15 = vmul.f32 (!%p1130_p11), %v1525_v18, %v762_v0  ;;  %v1187_v16 = vunpack.c.l.bf16 (!%p1130_p11), %v1204_v1 }
 0x134   : > { %v803_v44 = vadd.f32 %v1530_v19, %v780_v33  ;;  %v850_v48 = vadd.f32 %v1175_v32, %v802_v39  ;;  %v1205_v12 = vld [vmem:[%s1671_s4 + $0x28] sm:$0xff]   ;;  %v765_v17 = vld [vmem:[#allocation2 + $0x58] sm:$0xff]  ;;  %v786_v22 = vmul.f32 %v1525_v18, %v763_v6  ;;  %v1188_v23 = vunpack.c.h.bf16 %v1204_v1 }
 0x135   : > { %v801_v38 = vadd.f32 %v1530_v19, %v778_v25  ;;  %v848_v43 = vadd.f32 %v1171_v24, %v800_v31  ;;  %v1206_v25 = vld [vmem:[%s1671_s4 + $0x30] sm:$0xff]   ;;  %v808_v27 = vadd.f32 %v1530_v19, %v785_v15  ;;  %v787_v28 = vmul.f32 %v1525_v18, %v764_v11 }
 0x136   : > { %v851_v53 = vadd.f32 %v1176_v34, %v803_v44  ;;  %v866_v57 = vmax.f32 %v850_v48, 0.0  ;;  %v1191_v29 = vunpack.c.l.bf16 %v1205_v12  ;;  %v809_v32 = vadd.f32 %v1530_v19, %v786_v22  ;;  %v1207_v44 = vld [vmem:[%s1671_s4 + $0x38] sm:$0xff]  }
 0x137   : > { %v760_v37 = vld [vmem:[#allocation2 + $0x30] sm:$0xff]  ;;  %v849_v47 = vadd.f32 %v1172_v26, %v801_v38  ;;  %v864_v52 = vmax.f32 %v848_v43, 0.0  ;;  %v788_v33 = vmul.f32 %v1525_v18, %v765_v17  ;;  %v1192_v34 = vunpack.c.h.bf16 %v1205_v12 }
 0x138   : > { %v758_v30 = vld [vmem:[#allocation2 + $0x20] sm:$0xff]  ;;  %v783_v50 = vmul.f32 %v1525_v18, %v760_v37  ;;  %v867_v61 = vmax.f32 %v851_v53, 0.0  ;;  %v1155_v3 = vpack.c.bf16 %v866_v57, %v866_v57  ;;  %v856_v35 = vadd.f32 %v1187_v16, %v808_v27  ;;  %v768_v39 = vld [vmem:[#allocation2 + $0x70] sm:$0xff] }
 0x139   : > { %v781_v40 = vmul.f32 %v1525_v18, %v758_v30  ;;  %v761_v51 = vld [vmem:[#allocation2 + $0x38] sm:$0xff]  ;;  %v865_v56 = vmax.f32 %v849_v47, 0.0  ;;  %v1153_v60 = vpack.c.bf16 %v864_v52, %v864_v52  ;;  %v766_v24 = vld [vmem:[#allocation2 + $0x60] sm:$0xff]  ;;  %v1195_v38 = vunpack.c.l.bf16 %v1206_v25 }
 0x13a   : > { %v759_v36 = vld [vmem:[#allocation2 + $0x28] sm:$0xff]  ;;  %v806_v59 = vadd.f32 %v1530_v19, %v783_v50  ;;  %v784_v63 = vmul.f32 %v1525_v18, %v761_v51  ;;  %v1156_v7 = vpack.c.bf16 %v867_v61, %v867_v61  ;;  %947 = vst.msk [vmem:[%s1672_s5 + $0x8] sm:$0xf] %vm944_vm2, %v1155_v3  ;;  %v789_v37 = vmul.f32 %v1525_v18, %v766_v24  ;;  %v769_v53 = vld [vmem:[#allocation2 + $0x78] sm:$0xff] }
 0x13b   : > { %v782_v45 = vmul.f32 %v1525_v18, %v759_v36  ;;  %v804_v49 = vadd.f32 %v1530_v19, %v781_v40  ;;  %v1154_v2 = vpack.c.bf16 %v865_v56, %v865_v56  ;;  %945 = vst.msk [vmem:[%s1672_s5] sm:$0xf] %vm944_vm2, %v1153_v60  ;;  %v767_v30 = vld [vmem:[#allocation2 + $0x68] sm:$0xff]  ;;  %v810_v36 = vadd.f32 %v1530_v19, %v787_v28 }
 0x13c   : > { %v854_v5 = vadd.f32 %v1183_v55, %v806_v59  ;;  %v807_v9 = vadd.f32 %v1530_v19, %v784_v63  ;;  %948 = vst.msk [vmem:[%s1672_s5 + $0xc] sm:$0xf] %vm944_vm2, %v1156_v7  ;;  %v811_v42 = vadd.f32 %v1530_v19, %v788_v33  ;;  %v790_v43 = vmul.f32 %v1525_v18, %v767_v30 }
 0x13d   : > { %v805_v54 = vadd.f32 %v1530_v19, %v782_v45  ;;  %v852_v58 = vadd.f32 %v1179_v41, %v804_v49  ;;  %946 = vst.msk [vmem:[%s1672_s5 + $0x4] sm:$0xf] %vm944_vm2, %v1154_v2  ;;  %v857_v41 = vadd.f32 %v1188_v23, %v809_v32  ;;  %v872_v45 = vmax.f32 %v856_v35, 0.0 }
 0x13e   : > { %v870_v14 = vmax.f32 %v854_v5, 0.0  ;;  %v855_v21 = vadd.f32 %v1184_v10, %v807_v9  ;;  %v812_v47 = vadd.f32 %v1530_v19, %v789_v37  ;;  %v1196_v48 = vunpack.c.h.bf16 %v1206_v25 }
 0x13f   : > { %v853_v62 = vadd.f32 %v1180_v46, %v805_v54  ;;  %v868_v4 = vmax.f32 %v852_v58, 0.0  ;;  %v858_v46 = vadd.f32 %v1191_v29, %v810_v36  ;;  %v873_v49 = vmax.f32 %v857_v41, 0.0 }
 0x140   : > { %v1159_v26 = vpack.c.bf16 %v870_v14, %v870_v14  ;;  %v871_v31 = vmax.f32 %v855_v21, 0.0  ;;  %v859_v50 = vadd.f32 %v1192_v34, %v811_v42  ;;  %v813_v51 = vadd.f32 %v1530_v19, %v790_v43 }
 0x141   : > { %v869_v8 = vmax.f32 %v853_v62, 0.0  ;;  %v1157_v13 = vpack.c.bf16 %v868_v4, %v868_v4  ;;  %v791_v52 = vmul.f32 %v1525_v18, %v768_v39  ;;  %v1161_v54 = vpack.c.bf16 %v872_v45, %v872_v45 }
 0x142   : > { %951 = vst.msk [vmem:[%s1672_s5 + $0x18] sm:$0xf] %vm944_vm2, %v1159_v26  ;;  %v1160_v40 = vpack.c.bf16 %v871_v31, %v871_v31  ;;  %v874_v55 = vmax.f32 %v858_v46, 0.0  ;;  %v860_v56 = vadd.f32 %v1195_v38, %v812_v47  ;;  %v1199_v57 = vunpack.c.l.bf16 %v1207_v44 }
 0x143   : > { %v1158_v20 = vpack.c.bf16 %v869_v8, %v869_v8  ;;  %949 = vst.msk [vmem:[%s1672_s5 + $0x10] sm:$0xf] %vm944_vm2, %v1157_v13  ;;  %v1162_v58 = vpack.c.bf16 %v873_v49, %v873_v49  ;;  %v875_v59 = vmax.f32 %v859_v50, 0.0  ;;  %v861_v60 = vadd.f32 %v1196_v48, %v813_v51  ;;  %953 = vst.msk [vmem:[%s1672_s5 + $0x20] sm:$0xf] %vm944_vm2, %v1161_v54 }
 0x144   : > { %952 = vst.msk [vmem:[%s1672_s5 + $0x1c] sm:$0xf] %vm944_vm2, %v1160_v40  ;;  %v814_v61 = vadd.f32 %v1530_v19, %v791_v52  ;;  %v1163_v62 = vpack.c.bf16 %v874_v55, %v874_v55  ;;  %v876_v63 = vmax.f32 %v860_v56, 0.0  ;;  %v792_v0 = vmul.f32 %v1525_v18, %v769_v53 }
 0x145   : > { %950 = vst.msk [vmem:[%s1672_s5 + $0x14] sm:$0xf] %vm944_vm2, %v1158_v20  ;;  %v1200_v1 = vunpack.c.h.bf16 %v1207_v44  ;;  %954 = vst.msk [vmem:[%s1672_s5 + $0x24] sm:$0xf] %vm944_vm2, %v1162_v58  ;;  %v1164_v2 = vpack.c.bf16 %v875_v59, %v875_v59  ;;  %v877_v3 = vmax.f32 %v861_v60, 0.0 }
 0x146   : > { %v862_v4 = vadd.f32 %v1199_v57, %v814_v61  ;;  %955 = vst.msk [vmem:[%s1672_s5 + $0x28] sm:$0xf] %vm944_vm2, %v1163_v62  ;;  %v1165_v5 = vpack.c.bf16 %v876_v63, %v876_v63  ;;  %v815_v6 = vadd.f32 %v1530_v19, %v792_v0 }
 0x147   : > { %956 = vst.msk [vmem:[%s1672_s5 + $0x2c] sm:$0xf] %vm944_vm2, %v1164_v2  ;;  %v1166_v18 = vpack.c.bf16 %v877_v3, %v877_v3 }
 0x148   : > { %v878_v7 = vmax.f32 %v862_v4, 0.0  ;;  %957 = vst.msk [vmem:[%s1672_s5 + $0x30] sm:$0xf] %vm944_vm2, %v1165_v5  ;;  %v863_v8 = vadd.f32 %v1200_v1, %v815_v6 }
 0x149   : > { %958 = vst.msk [vmem:[%s1672_s5 + $0x34] sm:$0xf] %vm944_vm2, %v1166_v18 }
 0x14a   : > { %v1167_v9 = vpack.c.bf16 %v878_v7, %v878_v7  ;;  %v879_v19 = vmax.f32 %v863_v8, 0.0 }
 0x14c   : > { %959 = vst.msk [vmem:[%s1672_s5 + $0x38] sm:$0xf] %vm944_vm2, %v1167_v9  ;;  %v1168_v10 = vpack.c.bf16 %v879_v19, %v879_v19 }
 0x14e   : > { %960 = vst.msk [vmem:[%s1672_s5 + $0x3c] sm:$0xf] %vm944_vm2, %v1168_v10 }
 0x14f PF: > { %s15_s22 = sadd.s32 1, %s1367_s22   ;;  %s1673_s18 = smov %s1355_s19 }
 0x150   : > { %p12_p12 = scmp.ge.s32.totalorder %s15_s22, 7   ;;  %s1674_s19 = smov %s1435_s26 }
 0x151   : > { %s1675_s20 = smov %s1363_s21  ;;  %s1676_s21 = smov %s1678_s23 }
 0x152   :  { %14 = sbr.rel (!%p12_p12) target bundleno = 3 (0x3), region = 136 }

// kernel: combined_model_forward.25
= control target key start
LH: loop header
LB: loop body
LE: loop exit
PB: predicated region body
PF: predicated region fallthrough
CT: control target
= control target key end

     0   :  { %s1229_s15 = smov 0   ;;  %s1231_s16 = smov 0   ;;  %s1472_s0 = inlined_call_operand.vmem [shape: bf16[128,640], index: 0, kind: input, shape index: {}]   ;;  %s1473_s1 = inlined_call_operand.vmem [shape: bf16[640,64], index: 1, kind: input, shape index: {}]   ;;  %s1474_s2 = inlined_call_operand.vmem [shape: f32[1,64], index: 2, kind: input, shape index: {}]   ;;  %s1475_s3 = inlined_call_operand.vmem [shape: f32[1,64], index: 3, kind: input, shape index: {}]   ;;  %s1476_s4 = inlined_call_operand.vmem [shape: bf16[128,64], index: 4, kind: output, shape index: {}]  }
   0x1   :  { %s1233_s17 = smov 0   ;;  %s1235_s18 = smov 0  }
   0x2   :  { %s1237_s19 = smov 0  }
   0x3 LB: > { %s26_s20 = sadd.s32 1, %s1197_s18  ;;  %p49_p1 = scmp.ne.s32.totalorder %s1189_s16, %s1185_s15  ;;  %s1201_s19 = sphi %s1237_s19, %s14_s19   ;;  %s1197_s18 = sphi %s1235_s18, %s1480_s18   ;;  %s1193_s17 = sphi %s1233_s17, %s1479_s17   ;;  %s1189_s16 = sphi %s1231_s16, %s1478_s16   ;;  %s1185_s15 = sphi %s1229_s15, %s1477_s15  }
   0x4   : > { %p27_p0 = scmp.ge.s32.totalorder %s26_s20, 5  ;;  %p50_p2 = scmp.eq.s32.totalorder %s1201_s19, 0 }
   0x5   : > { %s42_s22 = sadd.s32 1, %s1189_s16  ;;  %p979_p5 = scmp.ge.s32.totalorder %s1201_s19, 5 }
   0x6   : > { %s1482_s20 = smov (%p27_p0, %s26_s20), 0  ;;  %p51_p3 = por %p50_p2, %p49_p1 }
   0x7   : > { %s38_s21 = ssub.s32 %s1197_s18, %s1482_s20  ;;  %195 = sbr.rel (%p979_p5) target bundleno = 28 (0x1c), region = 24 }
   0x8   : > { %p40_p4 = scmp.eq.s32.totalorder %s38_s21, 0 }
   0xa   : > { %s1264_s23 = scalar_select %p40_p4, %s1189_s16, %s42_s22  }
   0xe   : > { %198 = sbr.rel (!%p51_p3) target bundleno = 28 (0x1c), region = 28  ;;  %s200_s24 = sand.u32 (%p51_p3), 1, %s1189_s16  }
   0xf   : > { %s981_s25 = sshll.u32 (%p51_p3), %s1197_s18, 2  ;;  %s980_s26 = sshll.u32 (%p51_p3), %s200_s24, 6 }
  0x10   : > { %s1272_s29 = scalar_lea.vmem (%p51_p3), %s1472_s0, %s981_s25  ;;  %s202_s30 = scalar_lea.vmem (%p51_p3), [#allocation3], %s980_s26 }
  0x11   : > { %v223_v0 = vld [vmem:[%s1272_s29] sm:$0xf] (%p51_p3)  ;;  %v225_v1 = vld [vmem:[%s1272_s29 + $0x14] sm:$0xf] (%p51_p3)  ;;  %v227_v2 = vld [vmem:[%s1272_s29 + $0x28] sm:$0xf] (%p51_p3) }
  0x12   : > { %224 = vst [vmem:[%s202_s30] sm:$0xf] (%p51_p3), %v223_v0  ;;  %226 = vst [vmem:[%s202_s30 + $0x4] sm:$0xf] (%p51_p3), %v225_v1  ;;  %v229_v3 = vld [vmem:[%s1272_s29 + $0x3c] sm:$0xf] (%p51_p3) }
  0x13   : > { %v231_v4 = vld [vmem:[%s1272_s29 + $0x50] sm:$0xf] (%p51_p3)  ;;  %228 = vst [vmem:[%s202_s30 + $0x8] sm:$0xf] (%p51_p3), %v227_v2  ;;  %230 = vst [vmem:[%s202_s30 + $0xc] sm:$0xf] (%p51_p3), %v229_v3 }
  0x14   : > { %232 = vst [vmem:[%s202_s30 + $0x10] sm:$0xf] (%p51_p3), %v231_v4  ;;  %v233_v5 = vld [vmem:[%s1272_s29 + $0x64] sm:$0xf] (%p51_p3)  ;;  %v235_v6 = vld [vmem:[%s1272_s29 + $0x78] sm:$0xf] (%p51_p3) }
  0x15   : > { %v237_v7 = vld [vmem:[%s1272_s29 + $0x8c] sm:$0xf]  ;;  %234 = vst [vmem:[%s202_s30 + $0x14] sm:$0xf] %v233_v5  ;;  %236 = vst [vmem:[%s202_s30 + $0x18] sm:$0xf] %v235_v6 }
  0x16   : > { %238 = vst [vmem:[%s202_s30 + $0x1c] sm:$0xf] %v237_v7  ;;  %v239_v8 = vld [vmem:[%s1272_s29 + $0xa0] sm:$0xf]  ;;  %v241_v9 = vld [vmem:[%s1272_s29 + $0xb4] sm:$0xf] }
  0x17   : > { %v243_v10 = vld [vmem:[%s1272_s29 + $0xc8] sm:$0xf]  ;;  %240 = vst [vmem:[%s202_s30 + $0x20] sm:$0xf] %v239_v8  ;;  %242 = vst [vmem:[%s202_s30 + $0x24] sm:$0xf] %v241_v9 }
  0x18   : > { %244 = vst [vmem:[%s202_s30 + $0x28] sm:$0xf] %v243_v10  ;;  %v245_v11 = vld [vmem:[%s1272_s29 + $0xdc] sm:$0xf]  ;;  %v247_v12 = vld [vmem:[%s1272_s29 + $0xf0] sm:$0xf] }
  0x19   : > { %v249_v13 = vld [vmem:[%s1272_s29 + $0x104] sm:$0xf]  ;;  %246 = vst [vmem:[%s202_s30 + $0x2c] sm:$0xf] %v245_v11  ;;  %248 = vst [vmem:[%s202_s30 + $0x30] sm:$0xf] %v247_v12 }
  0x1a   : > { %250 = vst [vmem:[%s202_s30 + $0x34] sm:$0xf] %v249_v13  ;;  %v251_v14 = vld [vmem:[%s1272_s29 + $0x118] sm:$0xf]  ;;  %v253_v15 = vld [vmem:[%s1272_s29 + $0x12c] sm:$0xf] }
  0x1b   : > { %252 = vst [vmem:[%s202_s30 + $0x38] sm:$0xf] %v251_v14  ;;  %254 = vst [vmem:[%s202_s30 + $0x3c] sm:$0xf] %v253_v15 }
  0x1c PF: > { %p982_p6 = scmp.ge.s32.totalorder %s1201_s19, 1  ;;  %p320_p7 = scmp.lt.s32.totalorder %s1201_s19, 6 }
  0x1e   : > { %p321_p8 = pnand %p982_p6, %p320_p7 }
  0x1f   : > { %s327_s5 = sand.u32 (!%p321_p8), 1, %s1185_s15   ;;  %s984_s6 = sshll.u32 (!%p321_p8), %s1193_s17, 4 }
  0x20   : > { %324 = sbr.rel (%p321_p8) target bundleno = 326 (0x146), region = 73  ;;  %s983_s7 = sshll.u32 (!%p321_p8), %s327_s5, 6 }
  0x21   : > { %p371_p9 = scmp.lt.s32.totalorder (!%p321_p8), %s984_s6, 79  ;;  %s1299_s12 = scalar_lea.vmem (!%p321_p8), [#allocation3], %s983_s7 }
  0x22   : > { %p986_p10 = scmp.ne.s32.totalorder (!%p321_p8), %s1193_s17, 0 }
  0x27   : > { %s1484_s6 = smov (!%p371_p9, %s984_s6), 79  ;;  %398 = sbr.rel (%p986_p10) target bundleno = 49 (0x31), region = 81 }
  0x28   : > { %s985_s8 = sshll.u32 %s1484_s6, 2  ;;  %vm399_vm0 = vcmask (!%p986_p10), 523264   ;;  %v1203_v16 = vmov (!%p986_p10), 0.0  }
  0x29   : > { %s1297_s11 = scalar_lea.vmem %s1473_s1, %s985_s8  ;;  %400 = vst.msk [vmem:[#allocation2] sm:$0xff] (!%p986_p10), %vm399_vm0, %v1203_v16  ;;  %401 = vst.msk [vmem:[#allocation2 + $0x8] sm:$0xff] (!%p986_p10), %vm399_vm0, %v1203_v16 }
  0x2a   : > { %402 = vst.msk [vmem:[#allocation2 + $0x10] sm:$0xff] (!%p986_p10), %vm399_vm0, %v1203_v16  ;;  %403 = vst.msk [vmem:[#allocation2 + $0x18] sm:$0xff] (!%p986_p10), %vm399_vm0, %v1203_v16 }
  0x2b   : > { %404 = vst.msk [vmem:[#allocation2 + $0x20] sm:$0xff] (!%p986_p10), %vm399_vm0, %v1203_v16  ;;  %405 = vst.msk [vmem:[#allocation2 + $0x28] sm:$0xff] (!%p986_p10), %vm399_vm0, %v1203_v16 }
  0x2c   : > { %406 = vst.msk [vmem:[#allocation2 + $0x30] sm:$0xff] (!%p986_p10), %vm399_vm0, %v1203_v16  ;;  %407 = vst.msk [vmem:[#allocation2 + $0x38] sm:$0xff] (!%p986_p10), %vm399_vm0, %v1203_v16 }
  0x2d   : > { %408 = vst.msk [vmem:[#allocation2 + $0x40] sm:$0xff] (!%p986_p10), %vm399_vm0, %v1203_v16  ;;  %409 = vst.msk [vmem:[#allocation2 + $0x48] sm:$0xff] (!%p986_p10), %vm399_vm0, %v1203_v16 }
  0x2e   : > { %410 = vst.msk [vmem:[#allocation2 + $0x50] sm:$0xff] %vm399_vm0, %v1203_v16  ;;  %411 = vst.msk [vmem:[#allocation2 + $0x58] sm:$0xff] %vm399_vm0, %v1203_v16 }
  0x2f   : > { %412 = vst.msk [vmem:[#allocation2 + $0x60] sm:$0xff] %vm399_vm0, %v1203_v16  ;;  %413 = vst.msk [vmem:[#allocation2 + $0x68] sm:$0xff] %vm399_vm0, %v1203_v16 }
  0x30   : > { %414 = vst.msk [vmem:[#allocation2 + $0x70] sm:$0xff] %vm399_vm0, %v1203_v16  ;;  %415 = vst.msk [vmem:[#allocation2 + $0x78] sm:$0xff] %vm399_vm0, %v1203_v16 }
  0x31 PF: > { %v1147_v17 = vld [vmem:[%s1297_s11] sm:$0xff]   ;;  %v1148_v18 = vld [vmem:[%s1297_s11 + $0x8] sm:$0xff]   ;;  %v1149_v19 = vld [vmem:[%s1297_s11 + $0x10] sm:$0xff]   ;;  %vm673_vm1 = vcmask 523264   ;;  %p1003_p11 = scmp.ne.s32.totalorder %s1193_s17, 4 }
  0x32   : > { %1058 = vmatprep.subr.bf16.mxu0 %v1147_v17  ;;  %1090 = vmatprep.subr.bf16.mxu1 %v1147_v17  ;;  %v1150_v20 = vld [vmem:[%s1297_s11 + $0x18] sm:$0xff]   ;;  %v1155_v21 = vld [vmem:[%s1299_s12] sm:$0xff]   ;;  %v1152_v24 = vld [vmem:[%s1297_s11 + $0x28] sm:$0xff]   ;;  %vm836_vm2 = vcmask (!%p1003_p11), 519168  }
  0x33   : > { %1059 = vmatpush3.bf16.msra.mxu0 %v1147_v17  ;;  %1098 = vmatpush3.bf16.msra.mxu1 %v1147_v17  ;;  %v1156_v22 = vld [vmem:[%s1299_s12 + $0x20] sm:$0xff]   ;;  %v1153_v25 = vld [vmem:[%s1297_s11 + $0x30] sm:$0xff]   ;;  %v1154_v26 = vld [vmem:[%s1297_s11 + $0x38] sm:$0xff]  }
  0x34   : > { %1060 = vmatprep.subr.bf16.mxu0 %v1148_v18  ;;  %1091 = vmatprep.subr.bf16.mxu1 %v1148_v18  ;;  %v1151_v23 = vld [vmem:[%s1297_s11 + $0x20] sm:$0xff]   ;;  %v1157_v27 = vld [vmem:[%s1299_s12 + $0x8] sm:$0xff]   ;;  %v1159_v29 = vld [vmem:[%s1299_s12 + $0x10] sm:$0xff]  }
  0x35   : > { %1074 = vmatprep.mubr.bf16.mxu0 %v1155_v21  ;;  %1082 = vmatprep.mubr.bf16.mxu1 %v1156_v22  ;;  %v1158_v28 = vld [vmem:[%s1299_s12 + $0x28] sm:$0xff]   ;;  %v1160_v30 = vld [vmem:[%s1299_s12 + $0x30] sm:$0xff]   ;;  %v1161_v31 = vld [vmem:[%s1299_s12 + $0x18] sm:$0xff]  }
  0x36   : > { %v1162_v32 = vld [vmem:[%s1299_s12 + $0x38] sm:$0xff]   ;;  %v418_v33 = vld [vmem:[#allocation2 + $0x10] sm:$0xff]  ;;  %v416_v35 = vld [vmem:[#allocation2] sm:$0xff] }
  0x37   : > { %1061 = vmatpush3.bf16.msra.mxu0 %v1148_v18  ;;  %1099 = vmatpush3.bf16.msra.mxu1 %v1148_v18  ;;  %v426_v34 = vld [vmem:[#allocation2 + $0x50] sm:$0xff]  ;;  %v424_v36 = vld [vmem:[#allocation2 + $0x40] sm:$0xff]  ;;  %v419_v39 = vld [vmem:[#allocation2 + $0x18] sm:$0xff] }
  0x38   : > { %1062 = vmatprep.subr.bf16.mxu0 %v1149_v19  ;;  %1092 = vmatprep.subr.bf16.mxu1 %v1149_v19  ;;  %v427_v40 = vld [vmem:[#allocation2 + $0x58] sm:$0xff]  ;;  %v417_v45 = vld [vmem:[#allocation2 + $0x8] sm:$0xff]  ;;  %v422_v57 = vld [vmem:[#allocation2 + $0x30] sm:$0xff] }
  0x39   : > { %v425_v46 = vld [vmem:[#allocation2 + $0x48] sm:$0xff]  ;;  %v430_v58 = vld [vmem:[#allocation2 + $0x70] sm:$0xff]  ;;  %v420_v59 = vld [vmem:[#allocation2 + $0x20] sm:$0xff] }
  0x3a   : > { %v428_v60 = vld [vmem:[#allocation2 + $0x60] sm:$0xff]  ;;  %v423_v63 = vld [vmem:[#allocation2 + $0x38] sm:$0xff]  ;;  %v421_v5 = vld [vmem:[#allocation2 + $0x28] sm:$0xff] }
  0x3b   : > { %1063 = vmatpush3.bf16.msra.mxu0 %v1149_v19  ;;  %1100 = vmatpush3.bf16.msra.mxu1 %v1149_v19  ;;  %v431_v0 = vld [vmem:[#allocation2 + $0x78] sm:$0xff]  ;;  %v429_v6 = vld [vmem:[#allocation2 + $0x68] sm:$0xff]  ;;  %v1354_v18 = vld [vmem:[%s1474_s2] ss:$0 sm:$0xff] (!%p1003_p11) }
  0x3c   : > { %1064 = vmatprep.subr.bf16.mxu0 %v1150_v20  ;;  %1093 = vmatprep.subr.bf16.mxu1 %v1150_v20  ;;  %v1359_v19 = vld [vmem:[%s1475_s3] ss:$0 sm:$0xff] (!%p1003_p11) }
  0x3f   : > { %1065 = vmatpush3.bf16.msra.mxu0 %v1150_v20  ;;  %1101 = vmatpush3.bf16.msra.mxu1 %v1150_v20 }
  0x40   : > { %1066 = vmatprep.subr.bf16.mxu0 %v1151_v23  ;;  %1094 = vmatprep.subr.bf16.mxu1 %v1151_v23 }
  0x43   : > { %1067 = vmatpush3.bf16.msra.mxu0 %v1151_v23  ;;  %1102 = vmatpush3.bf16.msra.mxu1 %v1151_v23 }
  0x44   : > { %1068 = vmatprep.subr.bf16.mxu0 %v1152_v24  ;;  %1095 = vmatprep.subr.bf16.mxu1 %v1152_v24 }
  0x47   : > { %1069 = vmatpush3.bf16.msra.mxu0 %v1152_v24  ;;  %1103 = vmatpush3.bf16.msra.mxu1 %v1152_v24 }
  0x48   : > { %1070 = vmatprep.subr.bf16.mxu0 %v1153_v25  ;;  %1096 = vmatprep.subr.bf16.mxu1 %v1153_v25 }
  0x4b   : > { %1071 = vmatpush3.bf16.msra.mxu0 %v1153_v25  ;;  %1104 = vmatpush3.bf16.msra.mxu1 %v1153_v25 }
  0x4c   : > { %1072 = vmatprep.subr.bf16.mxu0 %v1154_v26  ;;  %1097 = vmatprep.subr.bf16.mxu1 %v1154_v26 }
  0x4f   : > { %1073 = vmatpush3.bf16.msra.mxu0 %v1154_v26  ;;  %1105 = vmatpush3.bf16.msra.mxu1 %v1154_v26 }
  0x52   : > { %1075 = vmatmul.mubr.bf16.vlgmr.msra.gmra.mrb[0].mxu0 %v1157_v27  ;;  %1083 = vmatmul.mubr.bf16.vlgmr.msra.gmra.mrb[0].mxu1 %v1158_v28 }
  0x53   : > { %1078 = vmatprep.mubr.bf16.mxu0 %v1159_v29  ;;  %1086 = vmatprep.mubr.bf16.mxu1 %v1160_v30 }
  0x5a   : > { %1079 = vmatmul.mubr.bf16.gmra.mrb[4].mxu0 %v1161_v31  ;;  %1087 = vmatmul.mubr.bf16.gmra.mrb[4].mxu1 %v1162_v32 }
 0x125   : > { %v1076_v37 = vpop.f32.mrb[0].mxu0  ;;  %v1084_v38 = vpop.f32.mrb[0].mxu1 }
 0x126   : > { %v659_v41 = vadd.f32 %v1076_v37, %v418_v33  ;;  %v667_v42 = vadd.f32 %v1084_v38, %v426_v34  ;;  %v594_v43 = vpop.f32.mrb[1].mxu0  ;;  %v626_v44 = vpop.f32.mrb[1].mxu1 }
 0x127   : > { %v657_v47 = vadd.f32 %v594_v43, %v416_v35  ;;  %v665_v48 = vadd.f32 %v626_v44, %v424_v36  ;;  %v1077_v49 = vpop.f32.mrb[2].mxu0  ;;  %v1085_v50 = vpop.f32.mrb[2].mxu1 }
 0x128   : > { %676 = vst.msk [vmem:[#allocation2 + $0x10] sm:$0xff] %vm673_vm1, %v659_v41  ;;  %684 = vst.msk [vmem:[#allocation2 + $0x50] sm:$0xff] %vm673_vm1, %v667_v42  ;;  %v660_v51 = vadd.f32 %v1077_v49, %v419_v39  ;;  %v668_v52 = vadd.f32 %v1085_v50, %v427_v40  ;;  %v597_v53 = vpop.f32.mrb[3].mxu0  ;;  %v629_v54 = vpop.f32.mrb[3].mxu1 }
 0x129   : > { %674 = vst.msk [vmem:[#allocation2] sm:$0xff] %vm673_vm1, %v657_v47  ;;  %682 = vst.msk [vmem:[#allocation2 + $0x40] sm:$0xff] %vm673_vm1, %v665_v48  ;;  %v658_v55 = vadd.f32 %v597_v53, %v417_v45  ;;  %v666_v56 = vadd.f32 %v629_v54, %v425_v46 }
 0x12a   : > { %677 = vst.msk [vmem:[#allocation2 + $0x18] sm:$0xff] %vm673_vm1, %v660_v51  ;;  %685 = vst.msk [vmem:[#allocation2 + $0x58] sm:$0xff] %vm673_vm1, %v668_v52 }
 0x12b   : > { %675 = vst.msk [vmem:[#allocation2 + $0x8] sm:$0xff] %vm673_vm1, %v658_v55  ;;  %683 = vst.msk [vmem:[#allocation2 + $0x48] sm:$0xff] %vm673_vm1, %v666_v56 }
 0x12d   : > { %v1080_v61 = vpop.f32.mrb[4].mxu0  ;;  %v1088_v62 = vpop.f32.mrb[4].mxu1  ;;  %693 = sbr.rel (%p1003_p11) target bundleno = 326 (0x146), region = 85 }
 0x12e   : > { %v663_v1 = vadd.f32 %v1080_v61, %v422_v57  ;;  %v671_v2 = vadd.f32 %v1088_v62, %v430_v58  ;;  %v610_v3 = vpop.f32.mrb[5].mxu0  ;;  %v642_v4 = vpop.f32.mrb[5].mxu1 }
 0x12f   : > { %v661_v7 = vadd.f32 %v610_v3, %v420_v59  ;;  %v669_v8 = vadd.f32 %v642_v4, %v428_v60  ;;  %v1081_v9 = vpop.f32.mrb[6].mxu0  ;;  %v1089_v10 = vpop.f32.mrb[6].mxu1  ;;  %v696_v22 = vld [vmem:[#allocation2 + $0x10] sm:$0xff] (!%p1003_p11) }
 0x130   : > { %680 = vst.msk [vmem:[#allocation2 + $0x30] sm:$0xff] %vm673_vm1, %v663_v1  ;;  %688 = vst.msk [vmem:[#allocation2 + $0x70] sm:$0xff] %vm673_vm1, %v671_v2  ;;  %v664_v11 = vadd.f32 %v1081_v9, %v423_v63  ;;  %v672_v12 = vadd.f32 %v1089_v10, %v431_v0  ;;  %v613_v13 = vpop.f32.mrb[7].mxu0  ;;  %v645_v14 = vpop.f32.mrb[7].mxu1  ;;  %v694_v17 = vld [vmem:[#allocation2] sm:$0xff] (!%p1003_p11)  ;;  %v719_v25 = vmul.f32 (!%p1003_p11), %v1354_v18, %v696_v22  ;;  %v704_v53 = vld [vmem:[#allocation2 + $0x50] sm:$0xff] (!%p1003_p11) }
 0x131   : > { %678 = vst.msk [vmem:[#allocation2 + $0x20] sm:$0xff] %vm673_vm1, %v661_v7  ;;  %686 = vst.msk [vmem:[#allocation2 + $0x60] sm:$0xff] %vm673_vm1, %v669_v8  ;;  %v662_v15 = vadd.f32 %v613_v13, %v421_v5  ;;  %v670_v16 = vadd.f32 %v645_v14, %v429_v6  ;;  %v717_v20 = vmul.f32 (!%p1003_p11), %v1354_v18, %v694_v17  ;;  %v697_v23 = vld [vmem:[#allocation2 + $0x18] sm:$0xff] (!%p1003_p11)  ;;  %v702_v47 = vld [vmem:[#allocation2 + $0x40] sm:$0xff] (!%p1003_p11) }
 0x132   : > { %681 = vst.msk [vmem:[#allocation2 + $0x38] sm:$0xff] %vm673_vm1, %v664_v11  ;;  %689 = vst.msk [vmem:[#allocation2 + $0x78] sm:$0xff] %vm673_vm1, %v672_v12  ;;  %v695_v21 = vld [vmem:[#allocation2 + $0x8] sm:$0xff] (!%p1003_p11)  ;;  %v720_v26 = vmul.f32 (!%p1003_p11), %v1354_v18, %v697_v23  ;;  %v742_v36 = vadd.f32 (!%p1003_p11), %v1359_v19, %v719_v25  ;;  %v705_v54 = vld [vmem:[#allocation2 + $0x58] sm:$0xff] (!%p1003_p11)  ;;  %v725_v1 = vmul.f32 (!%p1003_p11), %v1354_v18, %v702_v47 }
 0x133   : > { %679 = vst.msk [vmem:[#allocation2 + $0x28] sm:$0xff] %vm673_vm1, %v662_v15  ;;  %687 = vst.msk [vmem:[#allocation2 + $0x68] sm:$0xff] %vm673_vm1, %v670_v16  ;;  %v718_v24 = vmul.f32 (!%p1003_p11), %v1354_v18, %v695_v21  ;;  %v740_v30 = vadd.f32 (!%p1003_p11), %v1359_v19, %v717_v20  ;;  %v703_v52 = vld [vmem:[#allocation2 + $0x48] sm:$0xff] (!%p1003_p11)  ;;  %v727_v5 = vmul.f32 (!%p1003_p11), %v1354_v18, %v704_v53 }
 0x134   : > { %v743_v37 = vadd.f32 %v1359_v19, %v720_v26  ;;  %v758_v44 = vmax.f32 %v742_v36, 0.0  ;;  %v726_v4 = vmul.f32 %v1354_v18, %v703_v52  ;;  %v728_v6 = vmul.f32 %v1354_v18, %v705_v54 }
 0x135   : > { %v741_v35 = vadd.f32 %v1359_v19, %v718_v24  ;;  %v756_v39 = vmax.f32 %v740_v30, 0.0  ;;  %v748_v7 = vadd.f32 %v1359_v19, %v725_v1  ;;  %v750_v12 = vadd.f32 %v1359_v19, %v727_v5 }
 0x136   : > { %v759_v45 = vmax.f32 %v743_v37, 0.0  ;;  %v1028_v56 = vpack.c.bf16 %v758_v44, %v758_v44  ;;  %v749_v11 = vadd.f32 %v1359_v19, %v726_v4  ;;  %v751_v13 = vadd.f32 %v1359_v19, %v728_v6 }
 0x137   : > { %v700_v29 = vld [vmem:[#allocation2 + $0x30] sm:$0xff]  ;;  %v757_v43 = vmax.f32 %v741_v35, 0.0  ;;  %v1026_v48 = vpack.c.bf16 %v756_v39, %v756_v39  ;;  %v764_v15 = vmax.f32 %v748_v7, 0.0  ;;  %v766_v22 = vmax.f32 %v750_v12, 0.0 }
 0x138   : > { %v698_v27 = vld [vmem:[#allocation2 + $0x20] sm:$0xff]  ;;  %v723_v33 = vmul.f32 %v1354_v18, %v700_v29  ;;  %v1029_v57 = vpack.c.bf16 %v759_v45, %v759_v45  ;;  %v708_v61 = vld [vmem:[#allocation2 + $0x70] sm:$0xff]  ;;  %839 = vst.msk [vmem:[%s1476_s4 + $0x8] sm:$0xf] %vm836_vm2, %v1028_v56  ;;  %v765_v21 = vmax.f32 %v749_v11, 0.0  ;;  %v767_v23 = vmax.f32 %v751_v13, 0.0 }
 0x139   : > { %v721_v31 = vmul.f32 %v1354_v18, %v698_v27  ;;  %v701_v34 = vld [vmem:[#allocation2 + $0x38] sm:$0xff]  ;;  %v1027_v55 = vpack.c.bf16 %v757_v43, %v757_v43  ;;  %v706_v59 = vld [vmem:[#allocation2 + $0x60] sm:$0xff]  ;;  %837 = vst.msk [vmem:[%s1476_s4] sm:$0xf] %vm836_vm2, %v1026_v48  ;;  %v731_v10 = vmul.f32 %v1354_v18, %v708_v61  ;;  %v1034_v25 = vpack.c.bf16 %v764_v15, %v764_v15 }
 0x13a   : > { %v699_v28 = vld [vmem:[#allocation2 + $0x28] sm:$0xff]  ;;  %v724_v38 = vmul.f32 %v1354_v18, %v701_v34  ;;  %v746_v42 = vadd.f32 %v1359_v19, %v723_v33  ;;  %v709_v2 = vld [vmem:[#allocation2 + $0x78] sm:$0xff]  ;;  %840 = vst.msk [vmem:[%s1476_s4 + $0xc] sm:$0xf] %vm836_vm2, %v1029_v57  ;;  %v729_v8 = vmul.f32 %v1354_v18, %v706_v59  ;;  %v1035_v29 = vpack.c.bf16 %v765_v21, %v765_v21 }
 0x13b   : > { %v722_v32 = vmul.f32 %v1354_v18, %v699_v28  ;;  %v744_v40 = vadd.f32 %v1359_v19, %v721_v31  ;;  %v707_v60 = vld [vmem:[#allocation2 + $0x68] sm:$0xff]  ;;  %838 = vst.msk [vmem:[%s1476_s4 + $0x4] sm:$0xf] %vm836_vm2, %v1027_v55  ;;  %v732_v14 = vmul.f32 %v1354_v18, %v709_v2  ;;  %v754_v20 = vadd.f32 %v1359_v19, %v731_v10 }
 0x13c   : > { %v747_v46 = vadd.f32 %v1359_v19, %v724_v38  ;;  %v762_v51 = vmax.f32 %v746_v42, 0.0  ;;  %v730_v9 = vmul.f32 %v1354_v18, %v707_v60  ;;  %v752_v16 = vadd.f32 %v1359_v19, %v729_v8  ;;  %845 = vst.msk [vmem:[%s1476_s4 + $0x20] sm:$0xf] %vm836_vm2, %v1034_v25  ;;  %846 = vst.msk [vmem:[%s1476_s4 + $0x24] sm:$0xf] %vm836_vm2, %v1035_v29 }
 0x13d   : > { %v745_v41 = vadd.f32 %v1359_v19, %v722_v32  ;;  %v760_v49 = vmax.f32 %v744_v40, 0.0  ;;  %v755_v24 = vadd.f32 %v1359_v19, %v732_v14  ;;  %v770_v28 = vmax.f32 %v754_v20, 0.0 }
 0x13e   : > { %v763_v58 = vmax.f32 %v747_v46, 0.0  ;;  %v1032_v0 = vpack.c.bf16 %v762_v51, %v762_v51  ;;  %v753_v17 = vadd.f32 %v1359_v19, %v730_v9  ;;  %v768_v26 = vmax.f32 %v752_v16, 0.0 }
 0x13f   : > { %v761_v50 = vmax.f32 %v745_v41, 0.0  ;;  %v1030_v62 = vpack.c.bf16 %v760_v49, %v760_v49  ;;  %v1036_v30 = vpack.c.bf16 %v766_v22, %v766_v22  ;;  %v1037_v31 = vpack.c.bf16 %v767_v23, %v767_v23 }
 0x140   : > { %v1033_v3 = vpack.c.bf16 %v763_v58, %v763_v58  ;;  %843 = vst.msk [vmem:[%s1476_s4 + $0x18] sm:$0xf] %vm836_vm2, %v1032_v0  ;;  %v769_v27 = vmax.f32 %v753_v17, 0.0  ;;  %v771_v18 = vmax.f32 %v755_v24, 0.0  ;;  %v1038_v32 = vpack.c.bf16 %v768_v26, %v768_v26 }
 0x141   : > { %v1031_v63 = vpack.c.bf16 %v761_v50, %v761_v50  ;;  %841 = vst.msk [vmem:[%s1476_s4 + $0x10] sm:$0xf] %vm836_vm2, %v1030_v62  ;;  %v1040_v34 = vpack.c.bf16 %v770_v28, %v770_v28  ;;  %847 = vst.msk [vmem:[%s1476_s4 + $0x28] sm:$0xf] %vm836_vm2, %v1036_v30 }
 0x142   : > { %844 = vst.msk [vmem:[%s1476_s4 + $0x1c] sm:$0xf] %vm836_vm2, %v1033_v3  ;;  %v1039_v33 = vpack.c.bf16 %v769_v27, %v769_v27  ;;  %848 = vst.msk [vmem:[%s1476_s4 + $0x2c] sm:$0xf] %vm836_vm2, %v1037_v31  ;;  %v1041_v19 = vpack.c.bf16 %v771_v18, %v771_v18 }
 0x143   : > { %842 = vst.msk [vmem:[%s1476_s4 + $0x14] sm:$0xf] %vm836_vm2, %v1031_v63  ;;  %849 = vst.msk [vmem:[%s1476_s4 + $0x30] sm:$0xf] %vm836_vm2, %v1038_v32 }
 0x144   : > { %850 = vst.msk [vmem:[%s1476_s4 + $0x34] sm:$0xf] %vm836_vm2, %v1039_v33  ;;  %851 = vst.msk [vmem:[%s1476_s4 + $0x38] sm:$0xf] %vm836_vm2, %v1040_v34 }
 0x145   : > { %852 = vst.msk [vmem:[%s1476_s4 + $0x3c] sm:$0xf] %vm836_vm2, %v1041_v19 }
 0x146 PF: > { %s14_s19 = sadd.s32 1, %s1201_s19   ;;  %s1477_s15 = smov %s1189_s16 }
 0x147   : > { %p11_p12 = scmp.ge.s32.totalorder %s14_s19, 7   ;;  %s1478_s16 = smov %s1264_s23 }
 0x148   : > { %s1479_s17 = smov %s1197_s18  ;;  %s1480_s18 = smov %s1482_s20 }
 0x149   :  { %13 = sbr.rel (!%p11_p12) target bundleno = 3 (0x3), region = 129 }

// kernel: combined_model_forward.29
= control target key start
LH: loop header
LB: loop body
LE: loop exit
PB: predicated region body
PF: predicated region fallthrough
CT: control target
= control target key end

     0   :  { %s867_s15 = smov 0   ;;  %s869_s16 = smov 0   ;;  %s963_s0 = inlined_call_operand.vmem [shape: bf16[32,640], index: 0, kind: input, shape index: {}]   ;;  %s964_s1 = inlined_call_operand.vmem [shape: bf16[640,128], index: 1, kind: input, shape index: {}]   ;;  %s965_s2 = inlined_call_operand.vmem [shape: f32[1,128], index: 2, kind: input, shape index: {}]   ;;  %s966_s3 = inlined_call_operand.vmem [shape: f32[1,128], index: 3, kind: input, shape index: {}]   ;;  %s967_s4 = inlined_call_operand.vmem [shape: bf16[32,128], index: 4, kind: output, shape index: {}]  }
   0x1   :  { %s871_s17 = smov 0   ;;  %s873_s18 = smov 0  }
   0x2   :  { %s875_s19 = smov 0  }
   0x3 LB: > { %s26_s20 = sadd.s32 1, %s835_s18  ;;  %p49_p1 = scmp.ne.s32.totalorder %s827_s16, %s823_s15  ;;  %s839_s19 = sphi %s875_s19, %s14_s19   ;;  %s835_s18 = sphi %s873_s18, %s971_s18   ;;  %s831_s17 = sphi %s871_s17, %s970_s17   ;;  %s827_s16 = sphi %s869_s16, %s969_s16   ;;  %s823_s15 = sphi %s867_s15, %s968_s15  }
   0x4   : > { %p27_p0 = scmp.ge.s32.totalorder %s26_s20, 5  ;;  %p50_p2 = scmp.eq.s32.totalorder %s839_s19, 0 }
   0x5   : > { %s42_s22 = sadd.s32 1, %s827_s16  ;;  %p676_p5 = scmp.ge.s32.totalorder %s839_s19, 5 }
   0x6   : > { %s973_s20 = smov (%p27_p0, %s26_s20), 0  ;;  %p51_p3 = por %p50_p2, %p49_p1 }
   0x7   : > { %s38_s21 = ssub.s32 %s835_s18, %s973_s20  ;;  %195 = sbr.rel (%p676_p5) target bundleno = 21 (0x15), region = 24 }
   0x8   : > { %p40_p4 = scmp.eq.s32.totalorder %s38_s21, 0 }
   0xa   : > { %s902_s23 = scalar_select %p40_p4, %s827_s16, %s42_s22  }
   0xe   : > { %198 = sbr.rel (!%p51_p3) target bundleno = 21 (0x15), region = 28  ;;  %s200_s24 = sand.u32 (%p51_p3), 1, %s827_s16  }
   0xf   : > { %s678_s25 = sshll.u32 (%p51_p3), %s835_s18, 2  ;;  %s677_s26 = sshll.u32 (%p51_p3), %s200_s24, 4 }
  0x10   : > { %s207_s29 = scalar_lea.vmem (%p51_p3), %s963_s0, %s678_s25  ;;  %s202_s30 = scalar_lea.vmem (%p51_p3), [#allocation3], %s677_s26 }
  0x11   : > { %v223_v0 = vld [vmem:[%s207_s29] sm:$0xf] (%p51_p3)  ;;  %v225_v1 = vld [vmem:[%s207_s29 + $0x14] sm:$0xf] (%p51_p3)  ;;  %v227_v2 = vld [vmem:[%s207_s29 + $0x28] sm:$0xf] (%p51_p3) }
  0x12   : > { %224 = vst [vmem:[%s202_s30] sm:$0xf] (%p51_p3), %v223_v0  ;;  %226 = vst [vmem:[%s202_s30 + $0x4] sm:$0xf] (%p51_p3), %v225_v1  ;;  %v229_v3 = vld [vmem:[%s207_s29 + $0x3c] sm:$0xf] (%p51_p3) }
  0x13   : > { %228 = vst [vmem:[%s202_s30 + $0x8] sm:$0xf] (%p51_p3), %v227_v2  ;;  %230 = vst [vmem:[%s202_s30 + $0xc] sm:$0xf] (%p51_p3), %v229_v3 }
  0x15 PF: > { %p679_p6 = scmp.ge.s32.totalorder %s839_s19, 1  ;;  %p272_p7 = scmp.lt.s32.totalorder %s839_s19, 6 }
  0x17   : > { %p273_p8 = pnand %p679_p6, %p272_p7 }
  0x18   : > { %s279_s5 = sand.u32 (!%p273_p8), 1, %s823_s15   ;;  %s681_s6 = sshll.u32 (!%p273_p8), %s831_s17, 4 }
  0x19   : > { %276 = sbr.rel (%p273_p8) target bundleno = 306 (0x132), region = 73  ;;  %s914_s7 = sshll.u32 (!%p273_p8), %s279_s5, 4 }
  0x1a   : > { %p323_p9 = scmp.lt.s32.totalorder (!%p273_p8), %s681_s6, 79  ;;  %s281_s12 = scalar_lea.vmem (!%p273_p8), [#allocation3], %s914_s7 }
  0x1b   : > { %p683_p10 = scmp.ne.s32.totalorder (!%p273_p8), %s831_s17, 0 }
  0x20   : > { %s975_s6 = smov (!%p323_p9, %s681_s6), 79  ;;  %350 = sbr.rel (%p683_p10) target bundleno = 39 (0x27), region = 81 }
  0x21   : > { %s682_s8 = sshll.u32 %s975_s6, 2  ;;  %v841_v4 = vmov (!%p683_p10), 0.0  }
  0x22   : > { %s919_s11 = scalar_lea.vmem %s964_s1, %s682_s8  ;;  %351 = vst [vmem:[#allocation2] sm:$0xff] (!%p683_p10), %v841_v4  ;;  %352 = vst [vmem:[#allocation2 + $0x8] sm:$0xff] (!%p683_p10), %v841_v4 }
  0x23   : > { %353 = vst [vmem:[#allocation2 + $0x10] sm:$0xff] (!%p683_p10), %v841_v4  ;;  %354 = vst [vmem:[#allocation2 + $0x18] sm:$0xff] (!%p683_p10), %v841_v4 }
  0x27 PF: > { %v791_v5 = vld [vmem:[%s919_s11] sm:$0xff]   ;;  %v792_v6 = vld [vmem:[%s919_s11 + $0x8] sm:$0xff]   ;;  %v793_v7 = vld [vmem:[%s919_s11 + $0x10] sm:$0xff]   ;;  %p694_p11 = scmp.ne.s32.totalorder %s831_s17, 4 }
  0x28   : > { %730 = vmatprep.subr.bf16.mxu0 %v791_v5  ;;  %v794_v8 = vld [vmem:[%s919_s11 + $0x18] sm:$0xff]   ;;  %v799_v9 = vld [vmem:[%s281_s12] sm:$0xff]   ;;  %v796_v11 = vld [vmem:[%s919_s11 + $0x28] sm:$0xff]  }
  0x29   : > { %731 = vmatpush3.bf16.msra.mxu0 %v791_v5  ;;  %746 = vmatprep.mubr.bf16.mxu0 %v799_v9  ;;  %v795_v10 = vld [vmem:[%s919_s11 + $0x20] sm:$0xff]   ;;  %v797_v12 = vld [vmem:[%s919_s11 + $0x30] sm:$0xff]   ;;  %v798_v13 = vld [vmem:[%s919_s11 + $0x38] sm:$0xff]  }
  0x2a   : > { %732 = vmatprep.subr.bf16.mxu0 %v792_v6  ;;  %v800_v14 = vld [vmem:[%s281_s12 + $0x8] sm:$0xff]   ;;  %v357_v15 = vld [vmem:[#allocation2 + $0x10] sm:$0xff]  ;;  %v355_v16 = vld [vmem:[#allocation2] sm:$0xff] }
  0x2b   : > { %v358_v18 = vld [vmem:[#allocation2 + $0x18] sm:$0xff]  ;;  %v356_v21 = vld [vmem:[#allocation2 + $0x8] sm:$0xff]  ;;  %v695_v29 = vld [vmem:[%s965_s2] ss:$0 sm:$0xff] (!%p694_p11) }
  0x2c   : > { %v696_v32 = vld [vmem:[%s966_s3] ss:$0 sm:$0xff] (!%p694_p11) }
  0x2d   : > { %733 = vmatpush3.bf16.msra.mxu0 %v792_v6 }
  0x2e   : > { %734 = vmatprep.subr.bf16.mxu0 %v793_v7 }
  0x31   : > { %735 = vmatpush3.bf16.msra.mxu0 %v793_v7 }
  0x32   : > { %736 = vmatprep.subr.bf16.mxu0 %v794_v8 }
  0x35   : > { %737 = vmatpush3.bf16.msra.mxu0 %v794_v8 }
  0x36   : > { %738 = vmatprep.subr.bf16.mxu0 %v795_v10 }
  0x39   : > { %739 = vmatpush3.bf16.msra.mxu0 %v795_v10 }
  0x3a   : > { %740 = vmatprep.subr.bf16.mxu0 %v796_v11 }
  0x3d   : > { %741 = vmatpush3.bf16.msra.mxu0 %v796_v11 }
  0x3e   : > { %742 = vmatprep.subr.bf16.mxu0 %v797_v12 }
  0x41   : > { %743 = vmatpush3.bf16.msra.mxu0 %v797_v12 }
  0x42   : > { %744 = vmatprep.subr.bf16.mxu0 %v798_v13 }
  0x45   : > { %745 = vmatpush3.bf16.msra.mxu0 %v798_v13 }
  0x48   : > { %747 = vmatmul.mubr.bf16.vlgmr.msra.gmra.mrb[0].mxu0 %v800_v14 }
 0x11b   : > { %v748_v17 = vpop.f32.mrb[0].mxu0  ;;  %499 = sbr.rel (%p694_p11) target bundleno = 306 (0x132), region = 85 }
 0x11c   : > { %v490_v19 = vadd.f32 %v748_v17, %v357_v15  ;;  %v473_v20 = vpop.f32.mrb[1].mxu0 }
 0x11d   : > { %v488_v22 = vadd.f32 %v473_v20, %v355_v16  ;;  %v749_v23 = vpop.f32.mrb[2].mxu0 }
 0x11e   : > { %494 = vst [vmem:[#allocation2 + $0x10] sm:$0xff] %v490_v19  ;;  %v491_v24 = vadd.f32 %v749_v23, %v358_v18  ;;  %v476_v25 = vpop.f32.mrb[3].mxu0 }
 0x11f   : > { %492 = vst [vmem:[#allocation2] sm:$0xff] %v488_v22  ;;  %v489_v26 = vadd.f32 %v476_v25, %v356_v21 }
 0x120   : > { %495 = vst [vmem:[#allocation2 + $0x18] sm:$0xff] %v491_v24 }
 0x121   : > { %493 = vst [vmem:[#allocation2 + $0x8] sm:$0xff] %v489_v26 }
 0x125   : > { %v502_v33 = vld [vmem:[#allocation2 + $0x10] sm:$0xff] }
 0x126   : > { %v500_v27 = vld [vmem:[#allocation2] sm:$0xff]  ;;  %v513_v35 = vmul.f32 %v695_v29, %v502_v33 }
 0x127   : > { %v511_v30 = vmul.f32 %v695_v29, %v500_v27  ;;  %v503_v34 = vld [vmem:[#allocation2 + $0x18] sm:$0xff] }
 0x128   : > { %v501_v28 = vld [vmem:[#allocation2 + $0x8] sm:$0xff]  ;;  %v514_v36 = vmul.f32 %v695_v29, %v503_v34  ;;  %v524_v39 = vadd.f32 %v696_v32, %v513_v35 }
 0x129   : > { %v512_v31 = vmul.f32 %v695_v29, %v501_v28  ;;  %v522_v37 = vadd.f32 %v696_v32, %v511_v30 }
 0x12a   : > { %v525_v40 = vadd.f32 %v696_v32, %v514_v36  ;;  %v528_v43 = vmax.f32 %v524_v39, 0.0 }
 0x12b   : > { %v523_v38 = vadd.f32 %v696_v32, %v512_v31  ;;  %v526_v41 = vmax.f32 %v522_v37, 0.0 }
 0x12c   : > { %v529_v44 = vmax.f32 %v525_v40, 0.0 }
 0x12d   : > { %v527_v42 = vmax.f32 %v523_v38, 0.0 }
 0x12e   : > { %v717_v46 = vpack.c.bf16 %v529_v44, %v528_v43 }
 0x12f   : > { %v712_v45 = vpack.c.bf16 %v527_v42, %v526_v41 }
 0x130   : > { %719 = vst [vmem:[%s967_s4 + $0x8] sm:$0xff] %v717_v46  }
 0x131   : > { %713 = vst [vmem:[%s967_s4] sm:$0xff] %v712_v45  }
 0x132 PF: > { %s14_s19 = sadd.s32 1, %s839_s19   ;;  %s968_s15 = smov %s827_s16 }
 0x133   : > { %p11_p12 = scmp.ge.s32.totalorder %s14_s19, 7   ;;  %s969_s16 = smov %s902_s23 }
 0x134   : > { %s970_s17 = smov %s835_s18  ;;  %s971_s18 = smov %s973_s20 }
 0x135   :  { %13 = sbr.rel (!%p11_p12) target bundleno = 3 (0x3), region = 129 }

// kernel: combined_model_forward.30
= control target key start
LH: loop header
LB: loop body
LE: loop exit
PB: predicated region body
PF: predicated region fallthrough
CT: control target
= control target key end

     0   :  { %s358_s1 = inlined_call_operand.vmem [shape: bf16[128,128], index: 1, kind: input, shape index: {}]   ;;  %s359_s0 = inlined_call_operand.vmem [shape: bf16[32,128], index: 0, kind: input, shape index: {}]   ;;  %s360_s2 = inlined_call_operand.vmem [shape: f32[1,128], index: 2, kind: input, shape index: {}]   ;;  %s361_s3 = inlined_call_operand.vmem [shape: f32[1,128], index: 3, kind: input, shape index: {}]   ;;  %s362_s4 = inlined_call_operand.vmem [shape: bf16[32,128], index: 4, kind: output, shape index: {}]  }
   0x1   :  { %v281_v0 = vld [vmem:[%s358_s1] sm:$0xff]   ;;  %v282_v1 = vld [vmem:[%s358_s1 + $0x8] sm:$0xff]   ;;  %v283_v2 = vld [vmem:[%s358_s1 + $0x10] sm:$0xff]  }
   0x2   :  { %261 = vmatprep.subr.bf16.mxu0 %v281_v0  ;;  %v284_v3 = vld [vmem:[%s358_s1 + $0x18] sm:$0xff]   ;;  %v289_v4 = vld [vmem:[%s359_s0] sm:$0xff]   ;;  %v286_v6 = vld [vmem:[%s358_s1 + $0x28] sm:$0xff]  }
   0x3   :  { %262 = vmatpush3.bf16.msra.mxu0 %v281_v0  ;;  %277 = vmatprep.mubr.bf16.mxu0 %v289_v4  ;;  %v285_v5 = vld [vmem:[%s358_s1 + $0x20] sm:$0xff]   ;;  %v287_v7 = vld [vmem:[%s358_s1 + $0x30] sm:$0xff]   ;;  %v288_v8 = vld [vmem:[%s358_s1 + $0x38] sm:$0xff]  }
   0x4   :  { %263 = vmatprep.subr.bf16.mxu0 %v282_v1  ;;  %v290_v9 = vld [vmem:[%s359_s0 + $0x8] sm:$0xff]   ;;  %v230_v10 = vld [vmem:[%s360_s2] ss:$0 sm:$0xff] }
   0x5   :  { %v231_v14 = vld [vmem:[%s361_s3] ss:$0 sm:$0xff] }
   0x7   :  { %264 = vmatpush3.bf16.msra.mxu0 %v282_v1 }
   0x8   :  { %265 = vmatprep.subr.bf16.mxu0 %v283_v2 }
   0xb   :  { %266 = vmatpush3.bf16.msra.mxu0 %v283_v2 }
   0xc   :  { %267 = vmatprep.subr.bf16.mxu0 %v284_v3 }
   0xf   :  { %268 = vmatpush3.bf16.msra.mxu0 %v284_v3 }
  0x10   :  { %269 = vmatprep.subr.bf16.mxu0 %v285_v5 }
  0x13   :  { %270 = vmatpush3.bf16.msra.mxu0 %v285_v5 }
  0x14   :  { %271 = vmatprep.subr.bf16.mxu0 %v286_v6 }
  0x17   :  { %272 = vmatpush3.bf16.msra.mxu0 %v286_v6 }
  0x18   :  { %273 = vmatprep.subr.bf16.mxu0 %v287_v7 }
  0x1b   :  { %274 = vmatpush3.bf16.msra.mxu0 %v287_v7 }
  0x1c   :  { %275 = vmatprep.subr.bf16.mxu0 %v288_v8 }
  0x1f   :  { %276 = vmatpush3.bf16.msra.mxu0 %v288_v8 }
  0x22   :  { %278 = vmatmul.mubr.bf16.vlgmr.msra.gmra.mrb[0].mxu0 %v290_v9 }
  0xf5   :  { %v279_v11 = vpop.f32.mrb[0].mxu0 }
  0xf6   :  { %v183_v12 = vmul.f32 %v279_v11, %v230_v10  ;;  %v144_v13 = vpop.f32.mrb[1].mxu0 }
  0xf7   :  { %v181_v15 = vmul.f32 %v230_v10, %v144_v13  ;;  %v280_v16 = vpop.f32.mrb[2].mxu0 }
  0xf8   :  { %v184_v17 = vmul.f32 %v280_v16, %v230_v10  ;;  %v147_v18 = vpop.f32.mrb[3].mxu0  ;;  %v194_v20 = vadd.f32 %v231_v14, %v183_v12 }
  0xf9   :  { %v182_v19 = vmul.f32 %v230_v10, %v147_v18  ;;  %v192_v22 = vadd.f32 %v231_v14, %v181_v15 }
  0xfa   :  { %v195_v21 = vadd.f32 %v231_v14, %v184_v17 }
  0xfb   :  { %v193_v23 = vadd.f32 %v231_v14, %v182_v19 }
  0xfc   :  { %v248_v24 = vpack.c.bf16 %v195_v21, %v194_v20 }
  0xfd   :  { %v243_v25 = vpack.c.bf16 %v193_v23, %v192_v22 }
  0xfe   :  { %250 = vst [vmem:[%s362_s4 + $0x8] sm:$0xff] %v248_v24  }
  0xff   :  { %244 = vst [vmem:[%s362_s4] sm:$0xff] %v243_v25  }

// kernel: combined_model_forward.31
= control target key start
LH: loop header
LB: loop body
LE: loop exit
PB: predicated region body
PF: predicated region fallthrough
CT: control target
= control target key end

     0   :  { %s1247_s18 = smov 0   ;;  %s1249_s19 = smov 0   ;;  %s1366_s0 = inlined_call_operand.vmem [shape: bf16[32,1152], index: 0, kind: input, shape index: {}]   ;;  %s1367_s1 = inlined_call_operand.vmem [shape: bf16[1152,128], index: 1, kind: input, shape index: {}]   ;;  %s1368_s2 = inlined_call_operand.vmem [shape: f32[1,128], index: 2, kind: input, shape index: {}]   ;;  %s1369_s3 = inlined_call_operand.vmem [shape: f32[1,128], index: 3, kind: input, shape index: {}]   ;;  %s1370_s4 = inlined_call_operand.vmem [shape: bf16[32,128], index: 4, kind: input, shape index: {}]   ;;  %s1371_s5 = inlined_call_operand.vmem [shape: bf16[32,128], index: 5, kind: output, shape index: {}]  }
   0x1   :  { %s1251_s20 = smov 0   ;;  %s1253_s21 = smov 0  }
   0x2   :  { %s1255_s22 = smov 0  }
   0x3 LB: > { %s27_s23 = sadd.s32 1, %s1210_s21  ;;  %p50_p1 = scmp.ne.s32.totalorder %s1202_s19, %s1198_s18  ;;  %s1214_s22 = sphi %s1255_s22, %s15_s22   ;;  %s1210_s21 = sphi %s1253_s21, %s1375_s21   ;;  %s1206_s20 = sphi %s1251_s20, %s1374_s20   ;;  %s1202_s19 = sphi %s1249_s19, %s1373_s19   ;;  %s1198_s18 = sphi %s1247_s18, %s1372_s18  }
   0x4   : > { %p28_p0 = scmp.ge.s32.totalorder %s27_s23, 3  ;;  %p51_p2 = scmp.eq.s32.totalorder %s1214_s22, 0 }
   0x5   : > { %s43_s25 = sadd.s32 1, %s1202_s19  ;;  %p964_p5 = scmp.ge.s32.totalorder %s1214_s22, 3 }
   0x6   : > { %s1377_s23 = smov (%p28_p0, %s27_s23), 0  ;;  %p52_p3 = por %p51_p2, %p50_p1 }
   0x7   : > { %s39_s24 = ssub.s32 %s1210_s21, %s1377_s23  ;;  %236 = sbr.rel (%p964_p5) target bundleno = 23 (0x17), region = 28 }
   0x8   : > { %p41_p4 = scmp.eq.s32.totalorder %s39_s24, 0 }
   0xa   : > { %s1282_s26 = scalar_select %p41_p4, %s1202_s19, %s43_s25  }
   0xe   : > { %239 = sbr.rel (!%p52_p3) target bundleno = 23 (0x17), region = 32  ;;  %s241_s27 = sand.u32 (%p52_p3), 1, %s1202_s19  }
   0xf   : > { %s1018_s28 = smul.u32 (%p52_p3), 12, %s1210_s21 }
  0x10   : > { %s1101_s29 = smul.u32 (%p52_p3), 48, %s241_s27 }
  0x11   : > { %s249_s7 = scalar_lea.vmem (%p52_p3), %s1366_s0, %s1018_s28 }
  0x12   : > { %v264_v0 = vld [vmem:[%s249_s7] sm:$0xff] (%p52_p3)  ;;  %v268_v2 = vld [vmem:[%s249_s7 + $0x48] sm:$0xff] (%p52_p3)  ;;  %s243_s8 = scalar_lea.vmem (%p52_p3), [#allocation3], %s1101_s29  ;;  %v970_v6 = vld [vmem:[%s249_s7 + $0x50] sm:$0xf] (%p52_p3) }
  0x13   : > { %v266_v1 = vld [vmem:[%s249_s7 + $0x24] sm:$0xff] (%p52_p3)  ;;  %265 = vst [vmem:[%s243_s8] sm:$0xff] (%p52_p3), %v264_v0  ;;  %269 = vst [vmem:[%s243_s8 + $0x18] sm:$0xff] (%p52_p3), %v268_v2  ;;  %v270_v3 = vld [vmem:[%s249_s7 + $0x6c] sm:$0xff] (%p52_p3) }
  0x14   : > { %267 = vst [vmem:[%s243_s8 + $0xc] sm:$0xff] (%p52_p3), %v266_v1  ;;  %v966_v4 = vld [vmem:[%s249_s7 + $0x8] sm:$0xf] (%p52_p3)  ;;  %v968_v5 = vld [vmem:[%s249_s7 + $0x2c] sm:$0xf] (%p52_p3)  ;;  %271 = vst [vmem:[%s243_s8 + $0x24] sm:$0xff] (%p52_p3), %v270_v3 }
  0x15   : > { %967 = vst [vmem:[%s243_s8 + $0x8] sm:$0xf] %v966_v4  ;;  %969 = vst [vmem:[%s243_s8 + $0x14] sm:$0xf] %v968_v5  ;;  %v972_v7 = vld [vmem:[%s249_s7 + $0x74] sm:$0xf] }
  0x16   : > { %971 = vst [vmem:[%s243_s8 + $0x20] sm:$0xf] %v970_v6  ;;  %973 = vst [vmem:[%s243_s8 + $0x2c] sm:$0xf] %v972_v7 }
  0x17 PF: > { %p974_p6 = scmp.ge.s32.totalorder %s1214_s22, 1  ;;  %p303_p7 = scmp.lt.s32.totalorder %s1214_s22, 4 }
  0x19   : > { %p304_p8 = pnand %p974_p6, %p303_p7 }
  0x1a   : > { %s310_s9 = sand.u32 (!%p304_p8), 1, %s1198_s18   ;;  %s364_s10 = smul.u32 (!%p304_p8), 48, %s1206_s20 }
  0x1b   : > { %307 = sbr.rel (%p304_p8) target bundleno = 322 (0x142), region = 62  ;;  %p976_p10 = scmp.ne.s32.totalorder (!%p304_p8), %s1206_s20, 0 }
  0x1c   : > { %s1102_s11 = smul.u32 (!%p304_p8), 48, %s310_s9  ;;  %p365_p9 = scmp.lt.s32.totalorder (!%p304_p8), %s364_s10, 143 }
  0x1e   : > { %s1299_s16 = scalar_lea.vmem (!%p304_p8), [#allocation3], %s1102_s11 }
  0x22   : > { %s1379_s10 = smov (!%p365_p9, %s364_s10), 143  ;;  %401 = sbr.rel (%p976_p10) target bundleno = 41 (0x29), region = 70 }
  0x23   : > { %s975_s12 = sshll.u32 %s1379_s10, 2  ;;  %v1216_v8 = vmov (!%p976_p10), 0.0  }
  0x24   : > { %s1297_s15 = scalar_lea.vmem %s1367_s1, %s975_s12  ;;  %402 = vst [vmem:[#allocation2] sm:$0xff] (!%p976_p10), %v1216_v8  ;;  %403 = vst [vmem:[#allocation2 + $0x8] sm:$0xff] (!%p976_p10), %v1216_v8 }
  0x25   : > { %404 = vst [vmem:[#allocation2 + $0x10] sm:$0xff] (!%p976_p10), %v1216_v8  ;;  %405 = vst [vmem:[#allocation2 + $0x18] sm:$0xff] (!%p976_p10), %v1216_v8 }
  0x29 PF: > { %v1144_v9 = vld [vmem:[%s1297_s15 + $0x40] sm:$0xff]   ;;  %v1147_v12 = vld [vmem:[%s1297_s15 + $0x48] sm:$0xff]   ;;  %v1150_v15 = vld [vmem:[%s1297_s15 + $0x50] sm:$0xff]   ;;  %p1007_p11 = scmp.ne.s32.totalorder %s1206_s20, 2 }
  0x2a   : > { %v1145_v10 = vld [vmem:[%s1297_s15] sm:$0xff]   ;;  %1043 = vmatprep.subr.bf16.mxu0 %v1144_v9  ;;  %v1148_v13 = vld [vmem:[%s1297_s15 + $0x8] sm:$0xff]   ;;  %v1151_v16 = vld [vmem:[%s1297_s15 + $0x10] sm:$0xff]  }
  0x2b   : > { %v1146_v11 = vld [vmem:[%s1297_s15 + $0x80] sm:$0xff]   ;;  %1044 = vmatpush3.bf16.msra.mxu0 %v1145_v10  ;;  %v1149_v14 = vld [vmem:[%s1297_s15 + $0x88] sm:$0xff]   ;;  %v1152_v17 = vld [vmem:[%s1297_s15 + $0x90] sm:$0xff]  }
  0x2c   : > { %1081 = vmatprep.subr.bf16.mxu1 %v1146_v11  ;;  %1045 = vmatprep.subr.bf16.mxu0 %v1147_v12  ;;  %v1153_v18 = vld [vmem:[%s1297_s15 + $0x58] sm:$0xff]   ;;  %v1156_v21 = vld [vmem:[%s1297_s15 + $0x60] sm:$0xff]   ;;  %v1159_v24 = vld [vmem:[%s1297_s15 + $0x68] sm:$0xff]  }
  0x2d   : > { %1082 = vmatpush3.bf16.msra.mxu1 %v1146_v11  ;;  %v1154_v19 = vld [vmem:[%s1297_s15 + $0x18] sm:$0xff]   ;;  %v1158_v22 = vld [vmem:[%s1297_s15 + $0xa0] sm:$0xff]   ;;  %v1161_v25 = vld [vmem:[%s1297_s15 + $0xa8] sm:$0xff]  }
  0x2e   : > { %1083 = vmatprep.subr.bf16.mxu1 %v1149_v14  ;;  %v1155_v20 = vld [vmem:[%s1297_s15 + $0x98] sm:$0xff]   ;;  %v1157_v23 = vld [vmem:[%s1297_s15 + $0x20] sm:$0xff]   ;;  %v1160_v26 = vld [vmem:[%s1297_s15 + $0x28] sm:$0xff]  }
  0x2f   : > { %1046 = vmatpush3.bf16.msra.mxu0 %v1148_v13  ;;  %v1162_v27 = vld [vmem:[%s1297_s15 + $0x70] sm:$0xff]   ;;  %v1165_v30 = vld [vmem:[%s1297_s15 + $0x78] sm:$0xff]   ;;  %v406_v45 = vld [vmem:[#allocation2] sm:$0xff] }
  0x30   : > { %1047 = vmatprep.subr.bf16.mxu0 %v1150_v15  ;;  %v1163_v28 = vld [vmem:[%s1297_s15 + $0x30] sm:$0xff]   ;;  %v1167_v31 = vld [vmem:[%s1297_s15 + $0xb8] sm:$0xff]   ;;  %v407_v50 = vld [vmem:[#allocation2 + $0x8] sm:$0xff] }
  0x31   : > { %1084 = vmatpush3.bf16.msra.mxu1 %v1149_v14  ;;  %v1164_v29 = vld [vmem:[%s1297_s15 + $0xb0] sm:$0xff]   ;;  %v1166_v34 = vld [vmem:[%s1297_s15 + $0x38] sm:$0xff]   ;;  %v1008_v5 = vld [vmem:[%s1368_s2] ss:$0 sm:$0xff] (!%p1007_p11) }
  0x32   : > { %1085 = vmatprep.subr.bf16.mxu1 %v1152_v17  ;;  %v1170_v32 = vld [vmem:[%s1299_s16 + $0x4] ss:$12 sps:$4 sm:$0xff]   ;;  %v1171_v33 = vld [vmem:[%s1299_s16 + $0x8] ss:$12 sps:$4 sm:$0xff]   ;;  %v1168_v35 = vld [vmem:[%s1299_s16] ss:$12 sps:$4 sm:$0xff]  }
  0x33   : > { %1048 = vmatpush3.bf16.msra.mxu0 %v1151_v16  ;;  %674 = vmatprep.mubr.bf16.mxu0 %v1170_v32  ;;  %v1173_v36 = vld [vmem:[%s1299_s16 + $0x1c] ss:$12 sps:$4 sm:$0xff]   ;;  %v1172_v37 = vld [vmem:[%s1299_s16 + $0x20] ss:$12 sps:$4 sm:$0xff]   ;;  %v1175_v38 = vld [vmem:[%s1299_s16 + $0x18] ss:$12 sps:$4 sm:$0xff]  }
  0x34   : > { %1049 = vmatprep.subr.bf16.mxu0 %v1153_v18  ;;  %1097 = vmatprep.mubr.bf16.mxu1 %v1171_v33  ;;  %v408_v59 = vld [vmem:[#allocation2 + $0x10] sm:$0xff]  ;;  %v409_v63 = vld [vmem:[#allocation2 + $0x18] sm:$0xff]  ;;  %v1009_v8 = vld [vmem:[%s1369_s3] ss:$0 sm:$0xff] (!%p1007_p11) }
  0x35   : > { %1086 = vmatpush3.bf16.msra.mxu1 %v1152_v17  ;;  %v1024_v9 = vld [vmem:[%s1370_s4] sm:$0xff] (!%p1007_p11)   ;;  %v1041_v15 = vld [vmem:[%s1370_s4 + $0x8] sm:$0xff] (!%p1007_p11)  }
  0x36   : > { %1087 = vmatprep.subr.bf16.mxu1 %v1155_v20  ;;  %v1025_v11 = vunpack.c.l.bf16 (!%p1007_p11), %v1024_v9  ;;  %v1026_v12 = vunpack.c.h.bf16 (!%p1007_p11), %v1024_v9 }
  0x37   : > { %1050 = vmatpush3.bf16.msra.mxu0 %v1154_v19  ;;  %v1029_v19 = vunpack.c.l.bf16 (!%p1007_p11), %v1041_v15 }
  0x38   : > { %1051 = vmatprep.subr.bf16.mxu0 %v1156_v21  ;;  %v1030_v21 = vunpack.c.h.bf16 (!%p1007_p11), %v1041_v15 }
  0x39   : > { %1088 = vmatpush3.bf16.msra.mxu1 %v1155_v20 }
  0x3a   : > { %1089 = vmatprep.subr.bf16.mxu1 %v1158_v22 }
  0x3b   : > { %1052 = vmatpush3.bf16.msra.mxu0 %v1157_v23 }
  0x3c   : > { %1053 = vmatprep.subr.bf16.mxu0 %v1159_v24 }
  0x3d   : > { %1090 = vmatpush3.bf16.msra.mxu1 %v1158_v22 }
  0x3e   : > { %1091 = vmatprep.subr.bf16.mxu1 %v1161_v25 }
  0x3f   : > { %1054 = vmatpush3.bf16.msra.mxu0 %v1160_v26 }
  0x40   : > { %1055 = vmatprep.subr.bf16.mxu0 %v1162_v27 }
  0x41   : > { %1092 = vmatpush3.bf16.msra.mxu1 %v1161_v25 }
  0x42   : > { %1093 = vmatprep.subr.bf16.mxu1 %v1164_v29 }
  0x43   : > { %1056 = vmatpush3.bf16.msra.mxu0 %v1163_v28 }
  0x44   : > { %1057 = vmatprep.subr.bf16.mxu0 %v1165_v30 }
  0x45   : > { %1094 = vmatpush3.bf16.msra.mxu1 %v1164_v29 }
  0x46   : > { %1095 = vmatprep.subr.bf16.mxu1 %v1167_v31 }
  0x47   : > { %1058 = vmatpush3.bf16.msra.mxu0 %v1166_v34 }
  0x49   : > { %1096 = vmatpush3.bf16.msra.mxu1 %v1167_v31 }
  0x4a   : > { %675 = vmatmul.mubr.bf16.vlgmr.msra.gmra.mrb[0].mxu0 %v1168_v35 }
  0x4b   : > { %682 = vmatprep.mubr.bf16.mxu0 %v1173_v36 }
  0x4c   : > { %1098 = vmatmul.mubr.bf16.vlgmr.msra.gmra.mrb[0].mxu1 %v1172_v37 }
  0x52   : > { %683 = vmatmul.mubr.bf16.gmra.mrb[4].mxu0 %v1175_v38 }
 0x11d   : > { %v1059_v39 = vpop.f32.mrb[0].mxu0 }
 0x11e   : > { %v1060_v40 = vpop.f32.mrb[1].mxu0 }
 0x11f   : > { %v1061_v41 = vadd.f32 %v1060_v40, %v1059_v39  ;;  %v1062_v42 = vpop.f32.mrb[2].mxu0  ;;  %v1099_v43 = vpop.f32.mrb[0].mxu1 }
 0x120   : > { %v1063_v44 = vpop.f32.mrb[3].mxu0  ;;  %v725_v46 = vpop.f32.mrb[1].mxu1 }
 0x121   : > { %v1064_v47 = vadd.f32 %v1063_v44, %v1062_v42  ;;  %v726_v48 = vadd.f32 %v1061_v41, %v725_v46  ;;  %v1100_v49 = vpop.f32.mrb[2].mxu1 }
 0x122   : > { %v728_v51 = vpop.f32.mrb[3].mxu1 }
 0x123   : > { %v740_v52 = vadd.f32 %v726_v48, %v406_v45  ;;  %v729_v53 = vadd.f32 %v1064_v47, %v728_v51 }
 0x125   : > { %744 = vst [vmem:[#allocation2] sm:$0xff] %v740_v52  ;;  %v741_v54 = vadd.f32 %v729_v53, %v407_v50  ;;  %v1065_v55 = vpop.f32.mrb[4].mxu0 }
 0x126   : > { %v1066_v56 = vpop.f32.mrb[5].mxu0 }
 0x127   : > { %745 = vst [vmem:[#allocation2 + $0x8] sm:$0xff] %v741_v54  ;;  %v1067_v57 = vadd.f32 %v1066_v56, %v1065_v55  ;;  %v1068_v58 = vpop.f32.mrb[6].mxu0 }
 0x128   : > { %v1069_v60 = vpop.f32.mrb[7].mxu0 }
 0x129   : > { %v734_v61 = vadd.f32 %v1099_v43, %v1067_v57  ;;  %v1070_v62 = vadd.f32 %v1069_v60, %v1068_v58  ;;  %751 = sbr.rel (%p1007_p11) target bundleno = 322 (0x142), region = 74 }
 0x12b   : > { %v742_v0 = vadd.f32 %v734_v61, %v408_v59  ;;  %v737_v1 = vadd.f32 %v1100_v49, %v1070_v62 }
 0x12c   : > { %v752_v3 = vld [vmem:[#allocation2] sm:$0xff] (!%p1007_p11) }
 0x12d   : > { %746 = vst [vmem:[#allocation2 + $0x10] sm:$0xff] %v742_v0  ;;  %v743_v2 = vadd.f32 %v737_v1, %v409_v63  ;;  %v763_v6 = vmul.f32 (!%p1007_p11), %v1008_v5, %v752_v3 }
 0x12e   : > { %v753_v4 = vld [vmem:[#allocation2 + $0x8] sm:$0xff] (!%p1007_p11) }
 0x12f   : > { %747 = vst [vmem:[#allocation2 + $0x18] sm:$0xff] %v743_v2  ;;  %v764_v7 = vmul.f32 (!%p1007_p11), %v1008_v5, %v753_v4  ;;  %v774_v16 = vadd.f32 (!%p1007_p11), %v1009_v8, %v763_v6 }
 0x131   : > { %v775_v17 = vadd.f32 %v1009_v8, %v764_v7  ;;  %v786_v22 = vadd.f32 %v1025_v11, %v774_v16 }
 0x133   : > { %v787_v23 = vadd.f32 %v1026_v12, %v775_v17  ;;  %v790_v26 = vmax.f32 %v786_v22, 0.0 }
 0x134   : > { %v754_v10 = vld [vmem:[#allocation2 + $0x10] sm:$0xff] }
 0x135   : > { %v765_v14 = vmul.f32 %v1008_v5, %v754_v10  ;;  %v791_v27 = vmax.f32 %v787_v23, 0.0 }
 0x136   : > { %v755_v13 = vld [vmem:[#allocation2 + $0x18] sm:$0xff] }
 0x137   : > { %v766_v18 = vmul.f32 %v1008_v5, %v755_v13  ;;  %v776_v20 = vadd.f32 %v1009_v8, %v765_v14  ;;  %v1034_v30 = vpack.c.bf16 %v791_v27, %v790_v26 }
 0x139   : > { %v777_v24 = vadd.f32 %v1009_v8, %v766_v18  ;;  %v788_v25 = vadd.f32 %v1029_v19, %v776_v20  ;;  %1035 = vst [vmem:[%s1371_s5] sm:$0xff] %v1034_v30  }
 0x13b   : > { %v789_v28 = vadd.f32 %v1030_v21, %v777_v24  ;;  %v792_v29 = vmax.f32 %v788_v25, 0.0 }
 0x13d   : > { %v793_v31 = vmax.f32 %v789_v28, 0.0 }
 0x13f   : > { %v1039_v32 = vpack.c.bf16 %v793_v31, %v792_v29 }
 0x141   : > { %1042 = vst [vmem:[%s1371_s5 + $0x8] sm:$0xff] %v1039_v32  }
 0x142 PF: > { %s15_s22 = sadd.s32 1, %s1214_s22   ;;  %s1372_s18 = smov %s1202_s19 }
 0x143   : > { %p12_p12 = scmp.ge.s32.totalorder %s15_s22, 5   ;;  %s1373_s19 = smov %s1282_s26 }
 0x144   : > { %s1374_s20 = smov %s1210_s21  ;;  %s1375_s21 = smov %s1377_s23 }
 0x145   :  { %14 = sbr.rel (!%p12_p12) target bundleno = 3 (0x3), region = 127 }

// kernel: combined_model_forward.32
= control target key start
LH: loop header
LB: loop body
LE: loop exit
PB: predicated region body
PF: predicated region fallthrough
CT: control target
= control target key end

     0   :  { %s1142_s15 = smov 0   ;;  %s1144_s16 = smov 0   ;;  %s1255_s0 = inlined_call_operand.vmem [shape: bf16[32,1152], index: 0, kind: input, shape index: {}]   ;;  %s1256_s1 = inlined_call_operand.vmem [shape: bf16[1152,128], index: 1, kind: input, shape index: {}]   ;;  %s1257_s2 = inlined_call_operand.vmem [shape: f32[1,128], index: 2, kind: input, shape index: {}]   ;;  %s1258_s3 = inlined_call_operand.vmem [shape: f32[1,128], index: 3, kind: input, shape index: {}]   ;;  %s1259_s4 = inlined_call_operand.vmem [shape: bf16[32,128], index: 4, kind: output, shape index: {}]  }
   0x1   :  { %s1146_s17 = smov 0   ;;  %s1148_s18 = smov 0  }
   0x2   :  { %s1150_s19 = smov 0  }
   0x3 LB: > { %s26_s20 = sadd.s32 1, %s1110_s18  ;;  %p49_p1 = scmp.ne.s32.totalorder %s1102_s16, %s1098_s15  ;;  %s1114_s19 = sphi %s1150_s19, %s14_s19   ;;  %s1110_s18 = sphi %s1148_s18, %s1263_s18   ;;  %s1106_s17 = sphi %s1146_s17, %s1262_s17   ;;  %s1102_s16 = sphi %s1144_s16, %s1261_s16   ;;  %s1098_s15 = sphi %s1142_s15, %s1260_s15  }
   0x4   : > { %p27_p0 = scmp.ge.s32.totalorder %s26_s20, 3  ;;  %p50_p2 = scmp.eq.s32.totalorder %s1114_s19, 0 }
   0x5   : > { %s42_s22 = sadd.s32 1, %s1102_s16  ;;  %p873_p5 = scmp.ge.s32.totalorder %s1114_s19, 3 }
   0x6   : > { %s1265_s20 = smov (%p27_p0, %s26_s20), 0  ;;  %p51_p3 = por %p50_p2, %p49_p1 }
   0x7   : > { %s38_s21 = ssub.s32 %s1110_s18, %s1265_s20  ;;  %195 = sbr.rel (%p873_p5) target bundleno = 23 (0x17), region = 24 }
   0x8   : > { %p40_p4 = scmp.eq.s32.totalorder %s38_s21, 0 }
   0xa   : > { %s1177_s23 = scalar_select %p40_p4, %s1102_s16, %s42_s22  }
   0xe   : > { %198 = sbr.rel (!%p51_p3) target bundleno = 23 (0x17), region = 28  ;;  %s200_s24 = sand.u32 (%p51_p3), 1, %s1102_s16  }
   0xf   : > { %s927_s25 = smul.u32 (%p51_p3), 12, %s1110_s18 }
  0x10   : > { %s1001_s26 = smul.u32 (%p51_p3), 48, %s200_s24 }
  0x11   : > { %s208_s29 = scalar_lea.vmem (%p51_p3), %s1255_s0, %s927_s25 }
  0x12   : > { %v223_v0 = vld [vmem:[%s208_s29] sm:$0xff] (%p51_p3)  ;;  %v227_v2 = vld [vmem:[%s208_s29 + $0x48] sm:$0xff] (%p51_p3)  ;;  %s202_s30 = scalar_lea.vmem (%p51_p3), [#allocation3], %s1001_s26  ;;  %v879_v6 = vld [vmem:[%s208_s29 + $0x50] sm:$0xf] (%p51_p3) }
  0x13   : > { %v225_v1 = vld [vmem:[%s208_s29 + $0x24] sm:$0xff] (%p51_p3)  ;;  %224 = vst [vmem:[%s202_s30] sm:$0xff] (%p51_p3), %v223_v0  ;;  %228 = vst [vmem:[%s202_s30 + $0x18] sm:$0xff] (%p51_p3), %v227_v2  ;;  %v229_v3 = vld [vmem:[%s208_s29 + $0x6c] sm:$0xff] (%p51_p3) }
  0x14   : > { %226 = vst [vmem:[%s202_s30 + $0xc] sm:$0xff] (%p51_p3), %v225_v1  ;;  %v875_v4 = vld [vmem:[%s208_s29 + $0x8] sm:$0xf] (%p51_p3)  ;;  %v877_v5 = vld [vmem:[%s208_s29 + $0x2c] sm:$0xf] (%p51_p3)  ;;  %230 = vst [vmem:[%s202_s30 + $0x24] sm:$0xff] (%p51_p3), %v229_v3 }
  0x15   : > { %876 = vst [vmem:[%s202_s30 + $0x8] sm:$0xf] %v875_v4  ;;  %878 = vst [vmem:[%s202_s30 + $0x14] sm:$0xf] %v877_v5  ;;  %v881_v7 = vld [vmem:[%s208_s29 + $0x74] sm:$0xf] }
  0x16   : > { %880 = vst [vmem:[%s202_s30 + $0x20] sm:$0xf] %v879_v6  ;;  %882 = vst [vmem:[%s202_s30 + $0x2c] sm:$0xf] %v881_v7 }
  0x17 PF: > { %p883_p6 = scmp.ge.s32.totalorder %s1114_s19, 1  ;;  %p262_p7 = scmp.lt.s32.totalorder %s1114_s19, 4 }
  0x19   : > { %p263_p8 = pnand %p883_p6, %p262_p7 }
  0x1a   : > { %s269_s5 = sand.u32 (!%p263_p8), 1, %s1098_s15   ;;  %s313_s6 = smul.u32 (!%p263_p8), 48, %s1106_s17 }
  0x1b   : > { %266 = sbr.rel (%p263_p8) target bundleno = 320 (0x140), region = 58  ;;  %p885_p10 = scmp.ne.s32.totalorder (!%p263_p8), %s1106_s17, 0 }
  0x1c   : > { %s1002_s7 = smul.u32 (!%p263_p8), 48, %s269_s5  ;;  %p314_p9 = scmp.lt.s32.totalorder (!%p263_p8), %s313_s6, 143 }
  0x1e   : > { %s1194_s12 = scalar_lea.vmem (!%p263_p8), [#allocation3], %s1002_s7 }
  0x22   : > { %s1267_s6 = smov (!%p314_p9, %s313_s6), 143  ;;  %341 = sbr.rel (%p885_p10) target bundleno = 41 (0x29), region = 66 }
  0x23   : > { %s884_s8 = sshll.u32 %s1267_s6, 2  ;;  %v1116_v8 = vmov (!%p885_p10), 0.0  }
  0x24   : > { %s1192_s11 = scalar_lea.vmem %s1256_s1, %s884_s8  ;;  %342 = vst [vmem:[#allocation2] sm:$0xff] (!%p885_p10), %v1116_v8  ;;  %343 = vst [vmem:[#allocation2 + $0x8] sm:$0xff] (!%p885_p10), %v1116_v8 }
  0x25   : > { %344 = vst [vmem:[#allocation2 + $0x10] sm:$0xff] (!%p885_p10), %v1116_v8  ;;  %345 = vst [vmem:[#allocation2 + $0x18] sm:$0xff] (!%p885_p10), %v1116_v8 }
  0x29 PF: > { %v1044_v9 = vld [vmem:[%s1192_s11 + $0x40] sm:$0xff]   ;;  %v1047_v12 = vld [vmem:[%s1192_s11 + $0x48] sm:$0xff]   ;;  %v1050_v15 = vld [vmem:[%s1192_s11 + $0x50] sm:$0xff]   ;;  %p916_p11 = scmp.ne.s32.totalorder %s1106_s17, 2 }
  0x2a   : > { %v1045_v10 = vld [vmem:[%s1192_s11] sm:$0xff]   ;;  %943 = vmatprep.subr.bf16.mxu0 %v1044_v9  ;;  %v1048_v13 = vld [vmem:[%s1192_s11 + $0x8] sm:$0xff]   ;;  %v1051_v16 = vld [vmem:[%s1192_s11 + $0x10] sm:$0xff]  }
  0x2b   : > { %v1046_v11 = vld [vmem:[%s1192_s11 + $0x80] sm:$0xff]   ;;  %944 = vmatpush3.bf16.msra.mxu0 %v1045_v10  ;;  %v1049_v14 = vld [vmem:[%s1192_s11 + $0x88] sm:$0xff]   ;;  %v1052_v17 = vld [vmem:[%s1192_s11 + $0x90] sm:$0xff]  }
  0x2c   : > { %981 = vmatprep.subr.bf16.mxu1 %v1046_v11  ;;  %945 = vmatprep.subr.bf16.mxu0 %v1047_v12  ;;  %v1053_v18 = vld [vmem:[%s1192_s11 + $0x58] sm:$0xff]   ;;  %v1056_v21 = vld [vmem:[%s1192_s11 + $0x60] sm:$0xff]   ;;  %v1059_v24 = vld [vmem:[%s1192_s11 + $0x68] sm:$0xff]  }
  0x2d   : > { %982 = vmatpush3.bf16.msra.mxu1 %v1046_v11  ;;  %v1054_v19 = vld [vmem:[%s1192_s11 + $0x18] sm:$0xff]   ;;  %v1058_v22 = vld [vmem:[%s1192_s11 + $0xa0] sm:$0xff]   ;;  %v1061_v25 = vld [vmem:[%s1192_s11 + $0xa8] sm:$0xff]  }
  0x2e   : > { %983 = vmatprep.subr.bf16.mxu1 %v1049_v14  ;;  %v1055_v20 = vld [vmem:[%s1192_s11 + $0x98] sm:$0xff]   ;;  %v1057_v23 = vld [vmem:[%s1192_s11 + $0x20] sm:$0xff]   ;;  %v1060_v26 = vld [vmem:[%s1192_s11 + $0x28] sm:$0xff]  }
  0x2f   : > { %946 = vmatpush3.bf16.msra.mxu0 %v1048_v13  ;;  %v1062_v27 = vld [vmem:[%s1192_s11 + $0x70] sm:$0xff]   ;;  %v1065_v30 = vld [vmem:[%s1192_s11 + $0x78] sm:$0xff]   ;;  %v346_v45 = vld [vmem:[#allocation2] sm:$0xff] }
  0x30   : > { %947 = vmatprep.subr.bf16.mxu0 %v1050_v15  ;;  %v1063_v28 = vld [vmem:[%s1192_s11 + $0x30] sm:$0xff]   ;;  %v1067_v31 = vld [vmem:[%s1192_s11 + $0xb8] sm:$0xff]   ;;  %v347_v50 = vld [vmem:[#allocation2 + $0x8] sm:$0xff] }
  0x31   : > { %984 = vmatpush3.bf16.msra.mxu1 %v1049_v14  ;;  %v1064_v29 = vld [vmem:[%s1192_s11 + $0xb0] sm:$0xff]   ;;  %v1066_v34 = vld [vmem:[%s1192_s11 + $0x38] sm:$0xff]   ;;  %v917_v5 = vld [vmem:[%s1257_s2] ss:$0 sm:$0xff] (!%p916_p11) }
  0x32   : > { %985 = vmatprep.subr.bf16.mxu1 %v1052_v17  ;;  %v1070_v32 = vld [vmem:[%s1194_s12 + $0x4] ss:$12 sps:$4 sm:$0xff]   ;;  %v1071_v33 = vld [vmem:[%s1194_s12 + $0x8] ss:$12 sps:$4 sm:$0xff]   ;;  %v1068_v35 = vld [vmem:[%s1194_s12] ss:$12 sps:$4 sm:$0xff]  }
  0x33   : > { %948 = vmatpush3.bf16.msra.mxu0 %v1051_v16  ;;  %614 = vmatprep.mubr.bf16.mxu0 %v1070_v32  ;;  %v1073_v36 = vld [vmem:[%s1194_s12 + $0x1c] ss:$12 sps:$4 sm:$0xff]   ;;  %v1072_v37 = vld [vmem:[%s1194_s12 + $0x20] ss:$12 sps:$4 sm:$0xff]   ;;  %v1075_v38 = vld [vmem:[%s1194_s12 + $0x18] ss:$12 sps:$4 sm:$0xff]  }
  0x34   : > { %949 = vmatprep.subr.bf16.mxu0 %v1053_v18  ;;  %997 = vmatprep.mubr.bf16.mxu1 %v1071_v33  ;;  %v348_v59 = vld [vmem:[#allocation2 + $0x10] sm:$0xff]  ;;  %v349_v63 = vld [vmem:[#allocation2 + $0x18] sm:$0xff]  ;;  %v918_v8 = vld [vmem:[%s1258_s3] ss:$0 sm:$0xff] (!%p916_p11) }
  0x35   : > { %986 = vmatpush3.bf16.msra.mxu1 %v1052_v17 }
  0x36   : > { %987 = vmatprep.subr.bf16.mxu1 %v1055_v20 }
  0x37   : > { %950 = vmatpush3.bf16.msra.mxu0 %v1054_v19 }
  0x38   : > { %951 = vmatprep.subr.bf16.mxu0 %v1056_v21 }
  0x39   : > { %988 = vmatpush3.bf16.msra.mxu1 %v1055_v20 }
  0x3a   : > { %989 = vmatprep.subr.bf16.mxu1 %v1058_v22 }
  0x3b   : > { %952 = vmatpush3.bf16.msra.mxu0 %v1057_v23 }
  0x3c   : > { %953 = vmatprep.subr.bf16.mxu0 %v1059_v24 }
  0x3d   : > { %990 = vmatpush3.bf16.msra.mxu1 %v1058_v22 }
  0x3e   : > { %991 = vmatprep.subr.bf16.mxu1 %v1061_v25 }
  0x3f   : > { %954 = vmatpush3.bf16.msra.mxu0 %v1060_v26 }
  0x40   : > { %955 = vmatprep.subr.bf16.mxu0 %v1062_v27 }
  0x41   : > { %992 = vmatpush3.bf16.msra.mxu1 %v1061_v25 }
  0x42   : > { %993 = vmatprep.subr.bf16.mxu1 %v1064_v29 }
  0x43   : > { %956 = vmatpush3.bf16.msra.mxu0 %v1063_v28 }
  0x44   : > { %957 = vmatprep.subr.bf16.mxu0 %v1065_v30 }
  0x45   : > { %994 = vmatpush3.bf16.msra.mxu1 %v1064_v29 }
  0x46   : > { %995 = vmatprep.subr.bf16.mxu1 %v1067_v31 }
  0x47   : > { %958 = vmatpush3.bf16.msra.mxu0 %v1066_v34 }
  0x49   : > { %996 = vmatpush3.bf16.msra.mxu1 %v1067_v31 }
  0x4a   : > { %615 = vmatmul.mubr.bf16.vlgmr.msra.gmra.mrb[0].mxu0 %v1068_v35 }
  0x4b   : > { %622 = vmatprep.mubr.bf16.mxu0 %v1073_v36 }
  0x4c   : > { %998 = vmatmul.mubr.bf16.vlgmr.msra.gmra.mrb[0].mxu1 %v1072_v37 }
  0x52   : > { %623 = vmatmul.mubr.bf16.gmra.mrb[4].mxu0 %v1075_v38 }
 0x11d   : > { %v959_v39 = vpop.f32.mrb[0].mxu0 }
 0x11e   : > { %v960_v40 = vpop.f32.mrb[1].mxu0 }
 0x11f   : > { %v961_v41 = vadd.f32 %v960_v40, %v959_v39  ;;  %v962_v42 = vpop.f32.mrb[2].mxu0  ;;  %v999_v43 = vpop.f32.mrb[0].mxu1 }
 0x120   : > { %v963_v44 = vpop.f32.mrb[3].mxu0  ;;  %v665_v46 = vpop.f32.mrb[1].mxu1 }
 0x121   : > { %v964_v47 = vadd.f32 %v963_v44, %v962_v42  ;;  %v666_v48 = vadd.f32 %v961_v41, %v665_v46  ;;  %v1000_v49 = vpop.f32.mrb[2].mxu1 }
 0x122   : > { %v668_v51 = vpop.f32.mrb[3].mxu1 }
 0x123   : > { %v680_v52 = vadd.f32 %v666_v48, %v346_v45  ;;  %v669_v53 = vadd.f32 %v964_v47, %v668_v51 }
 0x125   : > { %684 = vst [vmem:[#allocation2] sm:$0xff] %v680_v52  ;;  %v681_v54 = vadd.f32 %v669_v53, %v347_v50  ;;  %v965_v55 = vpop.f32.mrb[4].mxu0 }
 0x126   : > { %v966_v56 = vpop.f32.mrb[5].mxu0 }
 0x127   : > { %685 = vst [vmem:[#allocation2 + $0x8] sm:$0xff] %v681_v54  ;;  %v967_v57 = vadd.f32 %v966_v56, %v965_v55  ;;  %v968_v58 = vpop.f32.mrb[6].mxu0 }
 0x128   : > { %v969_v60 = vpop.f32.mrb[7].mxu0 }
 0x129   : > { %v674_v61 = vadd.f32 %v999_v43, %v967_v57  ;;  %v970_v62 = vadd.f32 %v969_v60, %v968_v58  ;;  %691 = sbr.rel (%p916_p11) target bundleno = 320 (0x140), region = 70 }
 0x12b   : > { %v682_v0 = vadd.f32 %v674_v61, %v348_v59  ;;  %v677_v1 = vadd.f32 %v1000_v49, %v970_v62 }
 0x12c   : > { %v692_v3 = vld [vmem:[#allocation2] sm:$0xff] (!%p916_p11) }
 0x12d   : > { %686 = vst [vmem:[#allocation2 + $0x10] sm:$0xff] %v682_v0  ;;  %v683_v2 = vadd.f32 %v677_v1, %v349_v63  ;;  %v703_v6 = vmul.f32 (!%p916_p11), %v917_v5, %v692_v3 }
 0x12e   : > { %v693_v4 = vld [vmem:[#allocation2 + $0x8] sm:$0xff] (!%p916_p11) }
 0x12f   : > { %687 = vst [vmem:[#allocation2 + $0x18] sm:$0xff] %v683_v2  ;;  %v704_v7 = vmul.f32 (!%p916_p11), %v917_v5, %v693_v4  ;;  %v714_v13 = vadd.f32 (!%p916_p11), %v918_v8, %v703_v6 }
 0x131   : > { %v715_v14 = vadd.f32 %v918_v8, %v704_v7  ;;  %v718_v17 = vmax.f32 %v714_v13, 0.0 }
 0x133   : > { %v719_v18 = vmax.f32 %v715_v14, 0.0 }
 0x134   : > { %v694_v9 = vld [vmem:[#allocation2 + $0x10] sm:$0xff] }
 0x135   : > { %v705_v11 = vmul.f32 %v917_v5, %v694_v9  ;;  %v935_v21 = vpack.c.bf16 %v719_v18, %v718_v17 }
 0x136   : > { %v695_v10 = vld [vmem:[#allocation2 + $0x18] sm:$0xff] }
 0x137   : > { %v706_v12 = vmul.f32 %v917_v5, %v695_v10  ;;  %v716_v15 = vadd.f32 %v918_v8, %v705_v11  ;;  %936 = vst [vmem:[%s1259_s4] sm:$0xff] %v935_v21  }
 0x139   : > { %v717_v16 = vadd.f32 %v918_v8, %v706_v12  ;;  %v720_v19 = vmax.f32 %v716_v15, 0.0 }
 0x13b   : > { %v721_v20 = vmax.f32 %v717_v16, 0.0 }
 0x13d   : > { %v940_v22 = vpack.c.bf16 %v721_v20, %v720_v19 }
 0x13f   : > { %942 = vst [vmem:[%s1259_s4 + $0x8] sm:$0xff] %v940_v22  }
 0x140 PF: > { %s14_s19 = sadd.s32 1, %s1114_s19   ;;  %s1260_s15 = smov %s1102_s16 }
 0x141   : > { %p11_p12 = scmp.ge.s32.totalorder %s14_s19, 5   ;;  %s1261_s16 = smov %s1177_s23 }
 0x142   : > { %s1262_s17 = smov %s1110_s18  ;;  %s1263_s18 = smov %s1265_s20 }
 0x143   :  { %13 = sbr.rel (!%p11_p12) target bundleno = 3 (0x3), region = 120 }

// kernel: combined_model_forward.34
= control target key start
LH: loop header
LB: loop body
LE: loop exit
PB: predicated region body
PF: predicated region fallthrough
CT: control target
= control target key end

     0   :  { %s1114_s15 = smov 0   ;;  %s1116_s16 = smov 0   ;;  %s1216_s0 = inlined_call_operand.vmem [shape: bf16[8,1152], index: 0, kind: input, shape index: {}]   ;;  %s1217_s1 = inlined_call_operand.vmem [shape: bf16[1152,256], index: 1, kind: input, shape index: {}]   ;;  %s1218_s2 = inlined_call_operand.vmem [shape: f32[1,256], index: 2, kind: input, shape index: {}]   ;;  %s1219_s3 = inlined_call_operand.vmem [shape: f32[1,256], index: 3, kind: input, shape index: {}]   ;;  %s1220_s4 = inlined_call_operand.vmem [shape: bf16[8,256], index: 4, kind: output, shape index: {}]  }
   0x1   :  { %s1118_s17 = smov 0  }
   0x2 LB: > { %s26_s18 = sadd.s32 1, %s1081_s16  ;;  %p898_p0 = scmp.ge.s32.totalorder %s1085_s17, 1  ;;  %s1085_s17 = sphi %s1118_s17, %s14_s17   ;;  %s1081_s16 = sphi %s1116_s16, %s1222_s16   ;;  %s1077_s15 = sphi %s1114_s15, %s1221_s15  }
   0x3   : > { %p27_p1 = scmp.ge.s32.totalorder %s26_s18, 3  ;;  %p229_p2 = scmp.lt.s32.totalorder %s1085_s17, 4 }
   0x5   : > { %s1224_s18 = smov (%p27_p1, %s26_s18), 0  ;;  %p230_p3 = pnand %p898_p0, %p229_p2 }
   0x6   : > { %s281_s19 = smul.u32 (!%p230_p3), 3, %s1077_s15  ;;  %p902_p6 = scmp.ne.s32.totalorder (!%p230_p3), %s1077_s15, 0 }
   0x7   : > { %233 = sbr.rel (%p230_p3) target bundleno = 323 (0x143), region = 36 }
   0x8   : > { %s291_s20 = smul.u32 (!%p230_p3), 48, %s1077_s15  ;;  %p284_p4 = scmp.lt.s32.totalorder (!%p230_p3), %s281_s19, 8 }
   0xa   : > { %p293_p5 = scmp.lt.s32.totalorder (!%p230_p3), %s291_s20, 143 }
   0xe   : > { %s1226_s19 = smov (!%p284_p4, %s281_s19), 8  ;;  %s1228_s20 = smov (!%p293_p5, %s291_s20), 143 }
   0xf   : > { %s899_s21 = sshll.u32 %s1226_s19, 2  ;;  %s960_s25 = sshll.u32 %s1228_s20, 3  ;;  %v1087_v0 = vmov (!%p902_p6), 0.0  }
  0x10   : > { %s1139_s24 = scalar_lea.vmem %s1216_s0, %s899_s21  ;;  %s1144_s28 = scalar_lea.vmem %s1217_s1, %s960_s25  ;;  %328 = vst [vmem:[#allocation2] sm:$0xff] (!%p902_p6), %v1087_v0  ;;  %329 = vst [vmem:[#allocation2 + $0x8] sm:$0xff] (!%p902_p6), %v1087_v0 }
  0x11   : > { %327 = sbr.rel (%p902_p6) target bundleno = 24 (0x18), region = 40 }
  0x18 PF: > { %v988_v1 = vld [vmem:[%s1144_s28 + $0x4] ss:$8 sps:$4 sm:$0xff]   ;;  %v990_v2 = vld [vmem:[%s1144_s28] ss:$8 sps:$4 sm:$0xff]   ;;  %v1088_v3 = vmov 0   ;;  %p954_p7 = scmp.ne.s32.totalorder %s1077_s15, 2 }
  0x19   : > { %706 = vmatprep.mubr.bf16.mxu1 %v1088_v3  ;;  %633 = vmatprep.subr.bf16.mxu0 %v988_v1  ;;  %v991_v4 = vld [vmem:[%s1144_s28 + $0x14] ss:$8 sps:$4 sm:$0xff]   ;;  %v993_v5 = vld [vmem:[%s1144_s28 + $0x10] ss:$8 sps:$4 sm:$0xff]   ;;  %v994_v6 = vld [vmem:[%s1144_s28 + $0x24] ss:$8 sps:$4 sm:$0xff]  }
  0x1a   : > { %634 = vmatpush1.bf16.msra.mxu0 %v990_v2  ;;  %v996_v7 = vld [vmem:[%s1144_s28 + $0x20] ss:$8 sps:$4 sm:$0xff]   ;;  %v997_v8 = vld [vmem:[%s1144_s28 + $0x34] ss:$8 sps:$4 sm:$0xff]   ;;  %v999_v9 = vld [vmem:[%s1144_s28 + $0x30] ss:$8 sps:$4 sm:$0xff]  }
  0x1b   : > { %635 = vmatprep.subr.bf16.mxu0 %v991_v4  ;;  %v1012_v10 = vld [vmem:[%s1144_s28 + $0x104] ss:$8 sps:$4 sm:$0xff]   ;;  %v1014_v11 = vld [vmem:[%s1144_s28 + $0x100] ss:$8 sps:$4 sm:$0xff]   ;;  %v1018_v13 = vld [vmem:[%s1144_s28 + $0x114] ss:$8 sps:$4 sm:$0xff]   ;;  %v727_v4 = vlaneseq (!%p954_p7) }
  0x1c   : > { %v1000_v12 = vld [vmem:[%s1144_s28 + $0x44] ss:$8 sps:$4 sm:$0xff]   ;;  %674 = vmatprep.subr.bf16.mxu1 %v1012_v10  ;;  %v1020_v14 = vld [vmem:[%s1144_s28 + $0x110] ss:$8 sps:$4 sm:$0xff]   ;;  %v1002_v15 = vld [vmem:[%s1144_s28 + $0x40] ss:$8 sps:$4 sm:$0xff]  }
  0x1d   : > { %675 = vmatpush1.bf16.msra.mxu1 %v1014_v11  ;;  %v1003_v16 = vld [vmem:[%s1144_s28 + $0x54] ss:$8 sps:$4 sm:$0xff]   ;;  %v1024_v17 = vld [vmem:[%s1144_s28 + $0x124] ss:$8 sps:$4 sm:$0xff]   ;;  %v1026_v18 = vld [vmem:[%s1144_s28 + $0x120] ss:$8 sps:$4 sm:$0xff]  }
  0x1e   : > { %636 = vmatpush1.bf16.msra.mxu0 %v993_v5  ;;  %676 = vmatprep.subr.bf16.mxu1 %v1018_v13  ;;  %v1005_v19 = vld [vmem:[%s1144_s28 + $0x50] ss:$8 sps:$4 sm:$0xff]   ;;  %v1030_v20 = vld [vmem:[%s1144_s28 + $0x134] ss:$8 sps:$4 sm:$0xff]   ;;  %v1006_v21 = vld [vmem:[%s1144_s28 + $0x64] ss:$8 sps:$4 sm:$0xff]  }
  0x1f   : > { %637 = vmatprep.subr.bf16.mxu0 %v994_v6  ;;  %v1032_v22 = vld [vmem:[%s1144_s28 + $0x130] ss:$8 sps:$4 sm:$0xff]   ;;  %v1008_v23 = vld [vmem:[%s1144_s28 + $0x60] ss:$8 sps:$4 sm:$0xff]   ;;  %v1036_v24 = vld [vmem:[%s1144_s28 + $0x144] ss:$8 sps:$4 sm:$0xff]  }
  0x20   : > { %v1009_v25 = vld [vmem:[%s1144_s28 + $0x74] ss:$8 sps:$4 sm:$0xff]   ;;  %v1038_v26 = vld [vmem:[%s1144_s28 + $0x140] ss:$8 sps:$4 sm:$0xff]   ;;  %v1011_v27 = vld [vmem:[%s1144_s28 + $0x70] ss:$8 sps:$4 sm:$0xff]  }
  0x21   : > { %677 = vmatpush1.bf16.msra.mxu1 %v1020_v14  ;;  %v1042_v28 = vld [vmem:[%s1144_s28 + $0x154] ss:$8 sps:$4 sm:$0xff]   ;;  %v1015_v29 = vld [vmem:[%s1144_s28 + $0x84] ss:$8 sps:$4 sm:$0xff]   ;;  %v1044_v30 = vld [vmem:[%s1144_s28 + $0x150] ss:$8 sps:$4 sm:$0xff]  }
  0x22   : > { %638 = vmatpush1.bf16.msra.mxu0 %v996_v7  ;;  %678 = vmatprep.subr.bf16.mxu1 %v1024_v17  ;;  %v1017_v31 = vld [vmem:[%s1144_s28 + $0x80] ss:$8 sps:$4 sm:$0xff]   ;;  %v1048_v32 = vld [vmem:[%s1144_s28 + $0x164] ss:$8 sps:$4 sm:$0xff]   ;;  %v1021_v33 = vld [vmem:[%s1144_s28 + $0x94] ss:$8 sps:$4 sm:$0xff]  }
  0x23   : > { %639 = vmatprep.subr.bf16.mxu0 %v997_v8  ;;  %v332_v34 = vld [vmem:[%s1139_s24] sm:$0xff]  ;;  %v1023_v37 = vld [vmem:[%s1144_s28 + $0x90] ss:$8 sps:$4 sm:$0xff]   ;;  %v1054_v38 = vld [vmem:[%s1144_s28 + $0x174] ss:$8 sps:$4 sm:$0xff]   ;;  %v728_v5 = vshrl.u32 (!%p954_p7), %v727_v4, 7 }
  0x24   : > { %v904_v35 = vcombine.high %v332_v34, %v332_v34  ;;  %v1050_v36 = vld [vmem:[%s1144_s28 + $0x160] ss:$8 sps:$4 sm:$0xff]   ;;  %v1027_v39 = vld [vmem:[%s1144_s28 + $0xa4] ss:$8 sps:$4 sm:$0xff]   ;;  %v1056_v40 = vld [vmem:[%s1144_s28 + $0x170] ss:$8 sps:$4 sm:$0xff]   ;;  %v903_v53 = vcombine.low %v332_v34, %v332_v34 }
  0x25   : > { %679 = vmatpush1.bf16.msra.mxu1 %v1026_v18  ;;  %v1029_v41 = vld [vmem:[%s1144_s28 + $0xa0] ss:$8 sps:$4 sm:$0xff]   ;;  %v1033_v42 = vld [vmem:[%s1144_s28 + $0xb4] ss:$8 sps:$4 sm:$0xff]   ;;  %v1035_v44 = vld [vmem:[%s1144_s28 + $0xb0] ss:$8 sps:$4 sm:$0xff]  }
  0x26   : > { %640 = vmatpush1.bf16.msra.mxu0 %v999_v9  ;;  %680 = vmatprep.subr.bf16.mxu1 %v1030_v20  ;;  %v1060_v43 = vld [vmem:[%s1139_s24 + $0x8] ss:$0 sps:$4 sm:$0xff]   ;;  %v1039_v45 = vld [vmem:[%s1144_s28 + $0xc4] ss:$8 sps:$4 sm:$0xff]   ;;  %v1045_v47 = vld [vmem:[%s1144_s28 + $0xd4] ss:$8 sps:$4 sm:$0xff]  }
  0x27   : > { %641 = vmatprep.subr.bf16.mxu0 %v1000_v12  ;;  %665 = vmatprep.mubr.bf16.mxu0 %v904_v35  ;;  %v1041_v46 = vld [vmem:[%s1144_s28 + $0xc0] ss:$8 sps:$4 sm:$0xff]   ;;  %v1047_v48 = vld [vmem:[%s1144_s28 + $0xd0] ss:$8 sps:$4 sm:$0xff]   ;;  %v1051_v49 = vld [vmem:[%s1144_s28 + $0xe4] ss:$8 sps:$4 sm:$0xff]  }
  0x28   : > { %v1053_v50 = vld [vmem:[%s1144_s28 + $0xe0] ss:$8 sps:$4 sm:$0xff]   ;;  %v1057_v51 = vld [vmem:[%s1144_s28 + $0xf4] ss:$8 sps:$4 sm:$0xff]   ;;  %v1059_v52 = vld [vmem:[%s1144_s28 + $0xf0] ss:$8 sps:$4 sm:$0xff]  }
  0x29   : > { %681 = vmatpush1.bf16.msra.mxu1 %v1032_v22  ;;  %v330_v58 = vld [vmem:[#allocation2] sm:$0xff]  ;;  %v331_v61 = vld [vmem:[#allocation2 + $0x8] sm:$0xff]  ;;  %v729_v8 = vsub.s32 (!%p954_p7), 0, %v728_v5  ;;  %v733_v9 = vsub.s32 (!%p954_p7), 1, %v728_v5 }
  0x2a   : > { %642 = vmatpush1.bf16.msra.mxu0 %v1002_v15  ;;  %682 = vmatprep.subr.bf16.mxu1 %v1036_v24  ;;  %v725_v6 = vld [vmem:[%s1218_s2] sm:$0x3] (!%p954_p7) }
  0x2b   : > { %643 = vmatprep.subr.bf16.mxu0 %v1003_v16  ;;  %v739_v7 = vld [vmem:[%s1219_s3] sm:$0x3] (!%p954_p7)  ;;  %v730_v12 = vrot.slane (!%p954_p7), %v725_v6, %v729_v8  ;;  %v734_v13 = vrot.slane (!%p954_p7), %v725_v6, %v733_v9 }
  0x2c   : > { %v744_v14 = vrot.slane (!%p954_p7), %v739_v7, %v729_v8  ;;  %v748_v15 = vrot.slane (!%p954_p7), %v739_v7, %v733_v9 }
  0x2d   : > { %683 = vmatpush1.bf16.msra.mxu1 %v1038_v26 }
  0x2e   : > { %644 = vmatpush1.bf16.msra.mxu0 %v1005_v19  ;;  %684 = vmatprep.subr.bf16.mxu1 %v1042_v28 }
  0x2f   : > { %645 = vmatprep.subr.bf16.mxu0 %v1006_v21 }
  0x31   : > { %685 = vmatpush1.bf16.msra.mxu1 %v1044_v30 }
  0x32   : > { %646 = vmatpush1.bf16.msra.mxu0 %v1008_v23  ;;  %686 = vmatprep.subr.bf16.mxu1 %v1048_v32 }
  0x33   : > { %647 = vmatprep.subr.bf16.mxu0 %v1009_v25 }
  0x35   : > { %687 = vmatpush1.bf16.msra.mxu1 %v1050_v36 }
  0x36   : > { %648 = vmatpush1.bf16.msra.mxu0 %v1011_v27  ;;  %688 = vmatprep.subr.bf16.mxu1 %v1054_v38 }
  0x37   : > { %649 = vmatprep.subr.bf16.mxu0 %v1015_v29 }
  0x39   : > { %689 = vmatpush1.bf16.msra.mxu1 %v1056_v40 }
  0x3a   : > { %650 = vmatpush1.bf16.msra.mxu0 %v1017_v31 }
  0x3b   : > { %651 = vmatprep.subr.bf16.mxu0 %v1021_v33 }
  0x3c   : > { %707 = vmatmul.mubr.bf16.vlgmr.msra.gmra.mrb[0].mxu1 %v1060_v43 }
  0x3e   : > { %652 = vmatpush1.bf16.msra.mxu0 %v1023_v37 }
  0x3f   : > { %653 = vmatprep.subr.bf16.mxu0 %v1027_v39 }
  0x42   : > { %654 = vmatpush1.bf16.msra.mxu0 %v1029_v41 }
  0x43   : > { %655 = vmatprep.subr.bf16.mxu0 %v1033_v42 }
  0x46   : > { %656 = vmatpush1.bf16.msra.mxu0 %v1035_v44 }
  0x47   : > { %657 = vmatprep.subr.bf16.mxu0 %v1039_v45 }
  0x4a   : > { %658 = vmatpush1.bf16.msra.mxu0 %v1041_v46 }
  0x4b   : > { %659 = vmatprep.subr.bf16.mxu0 %v1045_v47 }
  0x4e   : > { %660 = vmatpush1.bf16.msra.mxu0 %v1047_v48 }
  0x4f   : > { %661 = vmatprep.subr.bf16.mxu0 %v1051_v49 }
  0x52   : > { %662 = vmatpush1.bf16.msra.mxu0 %v1053_v50 }
  0x53   : > { %663 = vmatprep.subr.bf16.mxu0 %v1057_v51 }
  0x56   : > { %664 = vmatpush1.bf16.msra.mxu0 %v1059_v52 }
  0x59   : > { %666 = vmatmul.mubr.bf16.vlgmr.msra.gmra.mrb[0].mxu0 %v903_v53 }
 0x10f   : > { %v708_v54 = vpop.f32.mrb[0].mxu1 }
 0x110   : > { %v710_v55 = vpop.f32.mrb[1].mxu1 }
 0x111   : > { %v712_v56 = vpop.f32.mrb[2].mxu1 }
 0x112   : > { %v713_v57 = vpop.f32.mrb[3].mxu1 }
 0x12c   : > { %v667_v59 = vpop.f32.mrb[0].mxu0  ;;  %722 = sbr.rel (%p954_p7) target bundleno = 323 (0x143), region = 44 }
 0x12d   : > { %v709_v60 = vadd.f32 %v708_v54, %v667_v59  ;;  %v669_v62 = vpop.f32.mrb[1].mxu0 }
 0x12e   : > { %v711_v63 = vadd.f32 %v710_v55, %v669_v62  ;;  %v671_v0 = vpop.f32.mrb[2].mxu0 }
 0x12f   : > { %v715_v1 = vadd.f32 %v709_v60, %v330_v58  ;;  %v672_v2 = vpop.f32.mrb[3].mxu0 }
 0x130   : > { %v716_v3 = vadd.f32 %v711_v63, %v331_v61 }
 0x131   : > { %717 = vst [vmem:[#allocation2] sm:$0xff] %v715_v1 }
 0x132   : > { %718 = vst [vmem:[#allocation2 + $0x8] sm:$0xff] %v716_v3 }
 0x138   : > { %v723_v10 = vld [vmem:[#allocation2] sm:$0xff] }
 0x139   : > { %v724_v11 = vld [vmem:[#allocation2 + $0x8] sm:$0xff]  ;;  %v737_v16 = vmul.f32 %v730_v12, %v723_v10 }
 0x13a   : > { %v738_v17 = vmul.f32 %v734_v13, %v724_v11 }
 0x13b   : > { %v751_v18 = vadd.f32 %v744_v14, %v737_v16 }
 0x13c   : > { %v752_v19 = vadd.f32 %v748_v15, %v738_v17 }
 0x13d   : > { %v753_v20 = vmax.f32 %v751_v18, 0.0 }
 0x13e   : > { %v754_v21 = vmax.f32 %v752_v19, 0.0 }
 0x140   : > { %v961_v22 = vpack.c.bf16 %v754_v21, %v753_v20 }
 0x142   : > { %763 = vst [vmem:[%s1220_s4] sm:$0xff] %v961_v22 }
 0x143 PF: > { %s14_s17 = sadd.s32 1, %s1085_s17   ;;  %s1221_s15 = smov %s1081_s16 }
 0x144   : > { %p11_p8 = scmp.ge.s32.totalorder %s14_s17, 5   ;;  %s1222_s16 = smov %s1224_s18 }
 0x146   :  { %13 = sbr.rel (!%p11_p8) target bundleno = 2 (0x2), region = 83 }

// kernel: combined_model_forward.35
= control target key start
LH: loop header
LB: loop body
LE: loop exit
PB: predicated region body
PF: predicated region fallthrough
CT: control target
= control target key end

     0   :  { %v257_v1 = vmov 0   ;;  %v175_v18 = vlaneseq  ;;  %s343_s1 = inlined_call_operand.vmem [shape: bf16[128,256], index: 1, kind: input, shape index: {}]   ;;  %s344_s0 = inlined_call_operand.vmem [shape: bf16[8,128], index: 0, kind: input, shape index: {}]   ;;  %s345_s2 = inlined_call_operand.vmem [shape: f32[1,256], index: 2, kind: input, shape index: {}]   ;;  %s346_s3 = inlined_call_operand.vmem [shape: f32[1,256], index: 3, kind: input, shape index: {}]   ;;  %s347_s4 = inlined_call_operand.vmem [shape: bf16[8,256], index: 4, kind: output, shape index: {}]  }
   0x1   :  { %v233_v0 = vld [vmem:[%s343_s1 + $0x4] ss:$8 sps:$4 sm:$0xff]   ;;  %155 = vmatprep.mubr.bf16.mxu0 %v257_v1  ;;  %v235_v2 = vld [vmem:[%s343_s1] ss:$8 sps:$4 sm:$0xff]   ;;  %v236_v3 = vld [vmem:[%s343_s1 + $0x14] ss:$8 sps:$4 sm:$0xff]  }
   0x2   :  { %123 = vmatprep.subr.bf16.mxu0 %v233_v0  ;;  %v238_v4 = vld [vmem:[%s343_s1 + $0x10] ss:$8 sps:$4 sm:$0xff]   ;;  %v239_v5 = vld [vmem:[%s343_s1 + $0x24] ss:$8 sps:$4 sm:$0xff]   ;;  %v241_v6 = vld [vmem:[%s343_s1 + $0x20] ss:$8 sps:$4 sm:$0xff]  }
   0x3   :  { %124 = vmatpush1.bf16.msra.mxu0 %v235_v2  ;;  %v242_v7 = vld [vmem:[%s343_s1 + $0x34] ss:$8 sps:$4 sm:$0xff]   ;;  %v244_v8 = vld [vmem:[%s343_s1 + $0x30] ss:$8 sps:$4 sm:$0xff]   ;;  %v245_v9 = vld [vmem:[%s343_s1 + $0x44] ss:$8 sps:$4 sm:$0xff]  }
   0x4   :  { %125 = vmatprep.subr.bf16.mxu0 %v236_v3  ;;  %v247_v10 = vld [vmem:[%s343_s1 + $0x40] ss:$8 sps:$4 sm:$0xff]   ;;  %v248_v11 = vld [vmem:[%s343_s1 + $0x54] ss:$8 sps:$4 sm:$0xff]   ;;  %v250_v12 = vld [vmem:[%s343_s1 + $0x50] ss:$8 sps:$4 sm:$0xff]  }
   0x5   :  { %v251_v13 = vld [vmem:[%s343_s1 + $0x64] ss:$8 sps:$4 sm:$0xff]   ;;  %v253_v14 = vld [vmem:[%s343_s1 + $0x60] ss:$8 sps:$4 sm:$0xff]   ;;  %v254_v15 = vld [vmem:[%s343_s1 + $0x74] ss:$8 sps:$4 sm:$0xff]  }
   0x6   :  { %v256_v16 = vld [vmem:[%s343_s1 + $0x70] ss:$8 sps:$4 sm:$0xff]   ;;  %v26_v17 = vld [vmem:[%s344_s0] sm:$0xf]  ;;  %v176_v19 = vshrl.u32 %v175_v18, 7 }
   0x7   :  { %126 = vmatpush1.bf16.msra.mxu0 %v238_v4  ;;  %v173_v21 = vld [vmem:[%s345_s2] sm:$0x3] }
   0x8   :  { %127 = vmatprep.subr.bf16.mxu0 %v239_v5  ;;  %v177_v20 = vsub.s32 0, %v176_v19  ;;  %v181_v22 = vsub.s32 1, %v176_v19  ;;  %v187_v23 = vld [vmem:[%s346_s3] sm:$0x3] }
   0xa   :  { %v178_v24 = vrot.slane %v173_v21, %v177_v20  ;;  %v182_v25 = vrot.slane %v173_v21, %v181_v22  ;;  %v192_v26 = vrot.slane %v187_v23, %v177_v20  ;;  %v196_v28 = vrot.slane %v187_v23, %v181_v22 }
   0xb   :  { %128 = vmatpush1.bf16.msra.mxu0 %v241_v6 }
   0xc   :  { %129 = vmatprep.subr.bf16.mxu0 %v242_v7 }
   0xf   :  { %130 = vmatpush1.bf16.msra.mxu0 %v244_v8 }
  0x10   :  { %131 = vmatprep.subr.bf16.mxu0 %v245_v9 }
  0x13   :  { %132 = vmatpush1.bf16.msra.mxu0 %v247_v10 }
  0x14   :  { %133 = vmatprep.subr.bf16.mxu0 %v248_v11 }
  0x17   :  { %134 = vmatpush1.bf16.msra.mxu0 %v250_v12 }
  0x18   :  { %135 = vmatprep.subr.bf16.mxu0 %v251_v13 }
  0x1b   :  { %136 = vmatpush1.bf16.msra.mxu0 %v253_v14 }
  0x1c   :  { %137 = vmatprep.subr.bf16.mxu0 %v254_v15 }
  0x1f   :  { %138 = vmatpush1.bf16.msra.mxu0 %v256_v16 }
  0x22   :  { %156 = vmatmul.mubr.bf16.vlgmr.msra.gmra.mrb[0].mxu0 %v26_v17 }
  0xf5   :  { %v157_v27 = vpop.f32.mrb[0].mxu0 }
  0xf6   :  { %v185_v29 = vmul.f32 %v178_v24, %v157_v27  ;;  %v159_v30 = vpop.f32.mrb[1].mxu0 }
  0xf7   :  { %v186_v31 = vmul.f32 %v182_v25, %v159_v30  ;;  %v161_v32 = vpop.f32.mrb[2].mxu0 }
  0xf8   :  { %v199_v33 = vadd.f32 %v192_v26, %v185_v29  ;;  %v162_v34 = vpop.f32.mrb[3].mxu0 }
  0xf9   :  { %v200_v35 = vadd.f32 %v196_v28, %v186_v31 }
  0xfb   :  { %v231_v36 = vpack.c.bf16 %v200_v35, %v199_v33 }
  0xfd   :  { %209 = vst [vmem:[%s347_s4] sm:$0xff] %v231_v36 }

// kernel: combined_model_forward.36
= control target key start
LH: loop header
LB: loop body
LE: loop exit
PB: predicated region body
PF: predicated region fallthrough
CT: control target
= control target key end

     0   :  { %s1209_s18 = smov 0   ;;  %s1211_s19 = smov 0   ;;  %s1314_s0 = inlined_call_operand.vmem [shape: bf16[8,2304], index: 0, kind: input, shape index: {}]   ;;  %s1315_s1 = inlined_call_operand.vmem [shape: bf16[2304,256], index: 1, kind: input, shape index: {}]   ;;  %s1316_s2 = inlined_call_operand.vmem [shape: f32[1,256], index: 2, kind: input, shape index: {}]   ;;  %s1317_s3 = inlined_call_operand.vmem [shape: f32[1,256], index: 3, kind: input, shape index: {}]   ;;  %s1318_s4 = inlined_call_operand.vmem [shape: bf16[8,256], index: 4, kind: input, shape index: {}]   ;;  %s1319_s5 = inlined_call_operand.vmem [shape: bf16[8,256], index: 5, kind: output, shape index: {}]  }
   0x1   :  { %s1213_s20 = smov 0  }
   0x2 LB: > { %s27_s21 = sadd.s32 1, %s1171_s19  ;;  %p988_p0 = scmp.ge.s32.totalorder %s1175_s20, 1  ;;  %s1175_s20 = sphi %s1213_s20, %s15_s20   ;;  %s1171_s19 = sphi %s1211_s19, %s1321_s19   ;;  %s1167_s18 = sphi %s1209_s18, %s1320_s18  }
   0x3   : > { %p28_p1 = scmp.ge.s32.totalorder %s27_s21, 6  ;;  %p271_p2 = scmp.lt.s32.totalorder %s1175_s20, 7 }
   0x5   : > { %s1323_s21 = smov (%p28_p1, %s27_s21), 0  ;;  %p272_p3 = pnand %p988_p0, %p271_p2 }
   0x6   : > { %s334_s22 = smul.u32 (!%p272_p3), 3, %s1167_s18  ;;  %p992_p6 = scmp.ne.s32.totalorder (!%p272_p3), %s1167_s18, 0 }
   0x7   : > { %275 = sbr.rel (%p272_p3) target bundleno = 325 (0x145), region = 40 }
   0x8   : > { %s344_s23 = smul.u32 (!%p272_p3), 48, %s1167_s18  ;;  %p337_p4 = scmp.lt.s32.totalorder (!%p272_p3), %s334_s22, 17 }
   0xa   : > { %p346_p5 = scmp.lt.s32.totalorder (!%p272_p3), %s344_s23, 287 }
   0xe   : > { %s1325_s22 = smov (!%p337_p4, %s334_s22), 17  ;;  %s1327_s23 = smov (!%p346_p5, %s344_s23), 287 }
   0xf   : > { %s989_s24 = sshll.u32 %s1325_s22, 2  ;;  %s1050_s28 = sshll.u32 %s1327_s23, 3  ;;  %v1177_v0 = vmov (!%p992_p6), 0.0  }
  0x10   : > { %s1234_s27 = scalar_lea.vmem %s1314_s0, %s989_s24  ;;  %s1239_s6 = scalar_lea.vmem %s1315_s1, %s1050_s28  ;;  %391 = vst [vmem:[#allocation2] sm:$0xff] (!%p992_p6), %v1177_v0  ;;  %392 = vst [vmem:[#allocation2 + $0x8] sm:$0xff] (!%p992_p6), %v1177_v0 }
  0x11   : > { %390 = sbr.rel (%p992_p6) target bundleno = 24 (0x18), region = 44 }
  0x18 PF: > { %v1078_v1 = vld [vmem:[%s1239_s6 + $0x4] ss:$8 sps:$4 sm:$0xff]   ;;  %v1080_v2 = vld [vmem:[%s1239_s6] ss:$8 sps:$4 sm:$0xff]   ;;  %v1178_v3 = vmov 0   ;;  %p1044_p7 = scmp.ne.s32.totalorder %s1167_s18, 5 }
  0x19   : > { %769 = vmatprep.mubr.bf16.mxu1 %v1178_v3  ;;  %696 = vmatprep.subr.bf16.mxu0 %v1078_v1  ;;  %v1081_v4 = vld [vmem:[%s1239_s6 + $0x14] ss:$8 sps:$4 sm:$0xff]   ;;  %v1083_v5 = vld [vmem:[%s1239_s6 + $0x10] ss:$8 sps:$4 sm:$0xff]   ;;  %v1084_v6 = vld [vmem:[%s1239_s6 + $0x24] ss:$8 sps:$4 sm:$0xff]  }
  0x1a   : > { %697 = vmatpush1.bf16.msra.mxu0 %v1080_v2  ;;  %v1086_v7 = vld [vmem:[%s1239_s6 + $0x20] ss:$8 sps:$4 sm:$0xff]   ;;  %v1087_v8 = vld [vmem:[%s1239_s6 + $0x34] ss:$8 sps:$4 sm:$0xff]   ;;  %v1089_v9 = vld [vmem:[%s1239_s6 + $0x30] ss:$8 sps:$4 sm:$0xff]  }
  0x1b   : > { %698 = vmatprep.subr.bf16.mxu0 %v1081_v4  ;;  %v1102_v10 = vld [vmem:[%s1239_s6 + $0x104] ss:$8 sps:$4 sm:$0xff]   ;;  %v1104_v11 = vld [vmem:[%s1239_s6 + $0x100] ss:$8 sps:$4 sm:$0xff]   ;;  %v1108_v13 = vld [vmem:[%s1239_s6 + $0x114] ss:$8 sps:$4 sm:$0xff]   ;;  %v790_v4 = vlaneseq (!%p1044_p7) }
  0x1c   : > { %v1090_v12 = vld [vmem:[%s1239_s6 + $0x44] ss:$8 sps:$4 sm:$0xff]   ;;  %737 = vmatprep.subr.bf16.mxu1 %v1102_v10  ;;  %v1110_v14 = vld [vmem:[%s1239_s6 + $0x110] ss:$8 sps:$4 sm:$0xff]   ;;  %v1092_v15 = vld [vmem:[%s1239_s6 + $0x40] ss:$8 sps:$4 sm:$0xff]  }
  0x1d   : > { %738 = vmatpush1.bf16.msra.mxu1 %v1104_v11  ;;  %v1093_v16 = vld [vmem:[%s1239_s6 + $0x54] ss:$8 sps:$4 sm:$0xff]   ;;  %v1114_v17 = vld [vmem:[%s1239_s6 + $0x124] ss:$8 sps:$4 sm:$0xff]   ;;  %v1116_v18 = vld [vmem:[%s1239_s6 + $0x120] ss:$8 sps:$4 sm:$0xff]  }
  0x1e   : > { %699 = vmatpush1.bf16.msra.mxu0 %v1083_v5  ;;  %739 = vmatprep.subr.bf16.mxu1 %v1108_v13  ;;  %v1095_v19 = vld [vmem:[%s1239_s6 + $0x50] ss:$8 sps:$4 sm:$0xff]   ;;  %v1120_v20 = vld [vmem:[%s1239_s6 + $0x134] ss:$8 sps:$4 sm:$0xff]   ;;  %v1096_v21 = vld [vmem:[%s1239_s6 + $0x64] ss:$8 sps:$4 sm:$0xff]  }
  0x1f   : > { %700 = vmatprep.subr.bf16.mxu0 %v1084_v6  ;;  %v1122_v22 = vld [vmem:[%s1239_s6 + $0x130] ss:$8 sps:$4 sm:$0xff]   ;;  %v1098_v23 = vld [vmem:[%s1239_s6 + $0x60] ss:$8 sps:$4 sm:$0xff]   ;;  %v1126_v24 = vld [vmem:[%s1239_s6 + $0x144] ss:$8 sps:$4 sm:$0xff]  }
  0x20   : > { %v1099_v25 = vld [vmem:[%s1239_s6 + $0x74] ss:$8 sps:$4 sm:$0xff]   ;;  %v1128_v26 = vld [vmem:[%s1239_s6 + $0x140] ss:$8 sps:$4 sm:$0xff]   ;;  %v1101_v27 = vld [vmem:[%s1239_s6 + $0x70] ss:$8 sps:$4 sm:$0xff]  }
  0x21   : > { %740 = vmatpush1.bf16.msra.mxu1 %v1110_v14  ;;  %v1132_v28 = vld [vmem:[%s1239_s6 + $0x154] ss:$8 sps:$4 sm:$0xff]   ;;  %v1105_v29 = vld [vmem:[%s1239_s6 + $0x84] ss:$8 sps:$4 sm:$0xff]   ;;  %v1134_v30 = vld [vmem:[%s1239_s6 + $0x150] ss:$8 sps:$4 sm:$0xff]  }
  0x22   : > { %701 = vmatpush1.bf16.msra.mxu0 %v1086_v7  ;;  %741 = vmatprep.subr.bf16.mxu1 %v1114_v17  ;;  %v1107_v31 = vld [vmem:[%s1239_s6 + $0x80] ss:$8 sps:$4 sm:$0xff]   ;;  %v1138_v32 = vld [vmem:[%s1239_s6 + $0x164] ss:$8 sps:$4 sm:$0xff]   ;;  %v1111_v33 = vld [vmem:[%s1239_s6 + $0x94] ss:$8 sps:$4 sm:$0xff]  }
  0x23   : > { %702 = vmatprep.subr.bf16.mxu0 %v1087_v8  ;;  %v395_v34 = vld [vmem:[%s1234_s27] sm:$0xff]  ;;  %v1113_v37 = vld [vmem:[%s1239_s6 + $0x90] ss:$8 sps:$4 sm:$0xff]   ;;  %v1144_v38 = vld [vmem:[%s1239_s6 + $0x174] ss:$8 sps:$4 sm:$0xff]   ;;  %v791_v5 = vshrl.u32 (!%p1044_p7), %v790_v4, 7 }
  0x24   : > { %v994_v35 = vcombine.high %v395_v34, %v395_v34  ;;  %v1140_v36 = vld [vmem:[%s1239_s6 + $0x160] ss:$8 sps:$4 sm:$0xff]   ;;  %v1117_v39 = vld [vmem:[%s1239_s6 + $0xa4] ss:$8 sps:$4 sm:$0xff]   ;;  %v1146_v40 = vld [vmem:[%s1239_s6 + $0x170] ss:$8 sps:$4 sm:$0xff]   ;;  %v993_v53 = vcombine.low %v395_v34, %v395_v34 }
  0x25   : > { %742 = vmatpush1.bf16.msra.mxu1 %v1116_v18  ;;  %v1119_v41 = vld [vmem:[%s1239_s6 + $0xa0] ss:$8 sps:$4 sm:$0xff]   ;;  %v1123_v42 = vld [vmem:[%s1239_s6 + $0xb4] ss:$8 sps:$4 sm:$0xff]   ;;  %v1125_v44 = vld [vmem:[%s1239_s6 + $0xb0] ss:$8 sps:$4 sm:$0xff]  }
  0x26   : > { %703 = vmatpush1.bf16.msra.mxu0 %v1089_v9  ;;  %743 = vmatprep.subr.bf16.mxu1 %v1120_v20  ;;  %v1150_v43 = vld [vmem:[%s1234_s27 + $0x8] ss:$0 sps:$4 sm:$0xff]   ;;  %v1129_v45 = vld [vmem:[%s1239_s6 + $0xc4] ss:$8 sps:$4 sm:$0xff]   ;;  %v1135_v47 = vld [vmem:[%s1239_s6 + $0xd4] ss:$8 sps:$4 sm:$0xff]  }
  0x27   : > { %704 = vmatprep.subr.bf16.mxu0 %v1090_v12  ;;  %728 = vmatprep.mubr.bf16.mxu0 %v994_v35  ;;  %v1131_v46 = vld [vmem:[%s1239_s6 + $0xc0] ss:$8 sps:$4 sm:$0xff]   ;;  %v1137_v48 = vld [vmem:[%s1239_s6 + $0xd0] ss:$8 sps:$4 sm:$0xff]   ;;  %v1141_v49 = vld [vmem:[%s1239_s6 + $0xe4] ss:$8 sps:$4 sm:$0xff]  }
  0x28   : > { %v1143_v50 = vld [vmem:[%s1239_s6 + $0xe0] ss:$8 sps:$4 sm:$0xff]   ;;  %v1147_v51 = vld [vmem:[%s1239_s6 + $0xf4] ss:$8 sps:$4 sm:$0xff]   ;;  %v1149_v52 = vld [vmem:[%s1239_s6 + $0xf0] ss:$8 sps:$4 sm:$0xff]  }
  0x29   : > { %744 = vmatpush1.bf16.msra.mxu1 %v1122_v22  ;;  %v393_v58 = vld [vmem:[#allocation2] sm:$0xff]  ;;  %v394_v61 = vld [vmem:[#allocation2 + $0x8] sm:$0xff]  ;;  %v792_v8 = vsub.s32 (!%p1044_p7), 0, %v791_v5  ;;  %v796_v9 = vsub.s32 (!%p1044_p7), 1, %v791_v5 }
  0x2a   : > { %705 = vmatpush1.bf16.msra.mxu0 %v1092_v15  ;;  %745 = vmatprep.subr.bf16.mxu1 %v1126_v24  ;;  %v788_v6 = vld [vmem:[%s1316_s2] sm:$0x3] (!%p1044_p7) }
  0x2b   : > { %706 = vmatprep.subr.bf16.mxu0 %v1093_v16  ;;  %v802_v7 = vld [vmem:[%s1317_s3] sm:$0x3] (!%p1044_p7)  ;;  %v793_v13 = vrot.slane (!%p1044_p7), %v788_v6, %v792_v8  ;;  %v797_v14 = vrot.slane (!%p1044_p7), %v788_v6, %v796_v9 }
  0x2c   : > { %v816_v12 = vld [vmem:[%s1318_s4] sm:$0xff] (!%p1044_p7)  ;;  %v807_v15 = vrot.slane (!%p1044_p7), %v802_v7, %v792_v8  ;;  %v811_v16 = vrot.slane (!%p1044_p7), %v802_v7, %v796_v9 }
  0x2d   : > { %746 = vmatpush1.bf16.msra.mxu1 %v1128_v26  ;;  %v818_v20 = vunpack.c.h.bf16 (!%p1044_p7), %v816_v12 }
  0x2e   : > { %707 = vmatpush1.bf16.msra.mxu0 %v1095_v19  ;;  %747 = vmatprep.subr.bf16.mxu1 %v1132_v28  ;;  %v817_v19 = vunpack.c.l.bf16 (!%p1044_p7), %v816_v12 }
  0x2f   : > { %708 = vmatprep.subr.bf16.mxu0 %v1096_v21 }
  0x31   : > { %748 = vmatpush1.bf16.msra.mxu1 %v1134_v30 }
  0x32   : > { %709 = vmatpush1.bf16.msra.mxu0 %v1098_v23  ;;  %749 = vmatprep.subr.bf16.mxu1 %v1138_v32 }
  0x33   : > { %710 = vmatprep.subr.bf16.mxu0 %v1099_v25 }
  0x35   : > { %750 = vmatpush1.bf16.msra.mxu1 %v1140_v36 }
  0x36   : > { %711 = vmatpush1.bf16.msra.mxu0 %v1101_v27  ;;  %751 = vmatprep.subr.bf16.mxu1 %v1144_v38 }
  0x37   : > { %712 = vmatprep.subr.bf16.mxu0 %v1105_v29 }
  0x39   : > { %752 = vmatpush1.bf16.msra.mxu1 %v1146_v40 }
  0x3a   : > { %713 = vmatpush1.bf16.msra.mxu0 %v1107_v31 }
  0x3b   : > { %714 = vmatprep.subr.bf16.mxu0 %v1111_v33 }
  0x3c   : > { %770 = vmatmul.mubr.bf16.vlgmr.msra.gmra.mrb[0].mxu1 %v1150_v43 }
  0x3e   : > { %715 = vmatpush1.bf16.msra.mxu0 %v1113_v37 }
  0x3f   : > { %716 = vmatprep.subr.bf16.mxu0 %v1117_v39 }
  0x42   : > { %717 = vmatpush1.bf16.msra.mxu0 %v1119_v41 }
  0x43   : > { %718 = vmatprep.subr.bf16.mxu0 %v1123_v42 }
  0x46   : > { %719 = vmatpush1.bf16.msra.mxu0 %v1125_v44 }
  0x47   : > { %720 = vmatprep.subr.bf16.mxu0 %v1129_v45 }
  0x4a   : > { %721 = vmatpush1.bf16.msra.mxu0 %v1131_v46 }
  0x4b   : > { %722 = vmatprep.subr.bf16.mxu0 %v1135_v47 }
  0x4e   : > { %723 = vmatpush1.bf16.msra.mxu0 %v1137_v48 }
  0x4f   : > { %724 = vmatprep.subr.bf16.mxu0 %v1141_v49 }
  0x52   : > { %725 = vmatpush1.bf16.msra.mxu0 %v1143_v50 }
  0x53   : > { %726 = vmatprep.subr.bf16.mxu0 %v1147_v51 }
  0x56   : > { %727 = vmatpush1.bf16.msra.mxu0 %v1149_v52 }
  0x59   : > { %729 = vmatmul.mubr.bf16.vlgmr.msra.gmra.mrb[0].mxu0 %v993_v53 }
 0x10f   : > { %v771_v54 = vpop.f32.mrb[0].mxu1 }
 0x110   : > { %v773_v55 = vpop.f32.mrb[1].mxu1 }
 0x111   : > { %v775_v56 = vpop.f32.mrb[2].mxu1 }
 0x112   : > { %v776_v57 = vpop.f32.mrb[3].mxu1 }
 0x12c   : > { %v730_v59 = vpop.f32.mrb[0].mxu0  ;;  %785 = sbr.rel (%p1044_p7) target bundleno = 325 (0x145), region = 48 }
 0x12d   : > { %v772_v60 = vadd.f32 %v771_v54, %v730_v59  ;;  %v732_v62 = vpop.f32.mrb[1].mxu0 }
 0x12e   : > { %v774_v63 = vadd.f32 %v773_v55, %v732_v62  ;;  %v734_v0 = vpop.f32.mrb[2].mxu0 }
 0x12f   : > { %v778_v1 = vadd.f32 %v772_v60, %v393_v58  ;;  %v735_v2 = vpop.f32.mrb[3].mxu0 }
 0x130   : > { %v779_v3 = vadd.f32 %v774_v63, %v394_v61 }
 0x131   : > { %780 = vst [vmem:[#allocation2] sm:$0xff] %v778_v1 }
 0x132   : > { %781 = vst [vmem:[#allocation2 + $0x8] sm:$0xff] %v779_v3 }
 0x138   : > { %v786_v10 = vld [vmem:[#allocation2] sm:$0xff] }
 0x139   : > { %v787_v11 = vld [vmem:[#allocation2 + $0x8] sm:$0xff]  ;;  %v800_v17 = vmul.f32 %v793_v13, %v786_v10 }
 0x13a   : > { %v801_v18 = vmul.f32 %v797_v14, %v787_v11 }
 0x13b   : > { %v814_v21 = vadd.f32 %v807_v15, %v800_v17 }
 0x13c   : > { %v815_v22 = vadd.f32 %v811_v16, %v801_v18 }
 0x13d   : > { %v819_v23 = vadd.f32 %v817_v19, %v814_v21 }
 0x13e   : > { %v820_v24 = vadd.f32 %v818_v20, %v815_v22 }
 0x13f   : > { %v821_v25 = vmax.f32 %v819_v23, 0.0 }
 0x140   : > { %v822_v26 = vmax.f32 %v820_v24, 0.0 }
 0x142   : > { %v1051_v27 = vpack.c.bf16 %v822_v26, %v821_v25 }
 0x144   : > { %831 = vst [vmem:[%s1319_s5] sm:$0xff] %v1051_v27 }
 0x145 PF: > { %s15_s20 = sadd.s32 1, %s1175_s20   ;;  %s1320_s18 = smov %s1171_s19 }
 0x146   : > { %p12_p8 = scmp.ge.s32.totalorder %s15_s20, 8   ;;  %s1321_s19 = smov %s1323_s21 }
 0x148   :  { %14 = sbr.rel (!%p12_p8) target bundleno = 2 (0x2), region = 90 }

// kernel: combined_model_forward.37
= control target key start
LH: loop header
LB: loop body
LE: loop exit
PB: predicated region body
PF: predicated region fallthrough
CT: control target
= control target key end

     0   :  { %s1114_s15 = smov 0   ;;  %s1116_s16 = smov 0   ;;  %s1216_s0 = inlined_call_operand.vmem [shape: bf16[8,2304], index: 0, kind: input, shape index: {}]   ;;  %s1217_s1 = inlined_call_operand.vmem [shape: bf16[2304,256], index: 1, kind: input, shape index: {}]   ;;  %s1218_s2 = inlined_call_operand.vmem [shape: f32[1,256], index: 2, kind: input, shape index: {}]   ;;  %s1219_s3 = inlined_call_operand.vmem [shape: f32[1,256], index: 3, kind: input, shape index: {}]   ;;  %s1220_s4 = inlined_call_operand.vmem [shape: bf16[8,256], index: 4, kind: output, shape index: {}]  }
   0x1   :  { %s1118_s17 = smov 0  }
   0x2 LB: > { %s26_s18 = sadd.s32 1, %s1081_s16  ;;  %p898_p0 = scmp.ge.s32.totalorder %s1085_s17, 1  ;;  %s1085_s17 = sphi %s1118_s17, %s14_s17   ;;  %s1081_s16 = sphi %s1116_s16, %s1222_s16   ;;  %s1077_s15 = sphi %s1114_s15, %s1221_s15  }
   0x3   : > { %p27_p1 = scmp.ge.s32.totalorder %s26_s18, 6  ;;  %p229_p2 = scmp.lt.s32.totalorder %s1085_s17, 7 }
   0x5   : > { %s1224_s18 = smov (%p27_p1, %s26_s18), 0  ;;  %p230_p3 = pnand %p898_p0, %p229_p2 }
   0x6   : > { %s281_s19 = smul.u32 (!%p230_p3), 3, %s1077_s15  ;;  %p902_p6 = scmp.ne.s32.totalorder (!%p230_p3), %s1077_s15, 0 }
   0x7   : > { %233 = sbr.rel (%p230_p3) target bundleno = 323 (0x143), region = 36 }
   0x8   : > { %s291_s20 = smul.u32 (!%p230_p3), 48, %s1077_s15  ;;  %p284_p4 = scmp.lt.s32.totalorder (!%p230_p3), %s281_s19, 17 }
   0xa   : > { %p293_p5 = scmp.lt.s32.totalorder (!%p230_p3), %s291_s20, 287 }
   0xe   : > { %s1226_s19 = smov (!%p284_p4, %s281_s19), 17  ;;  %s1228_s20 = smov (!%p293_p5, %s291_s20), 287 }
   0xf   : > { %s899_s21 = sshll.u32 %s1226_s19, 2  ;;  %s960_s25 = sshll.u32 %s1228_s20, 3  ;;  %v1087_v0 = vmov (!%p902_p6), 0.0  }
  0x10   : > { %s1139_s24 = scalar_lea.vmem %s1216_s0, %s899_s21  ;;  %s1144_s28 = scalar_lea.vmem %s1217_s1, %s960_s25  ;;  %328 = vst [vmem:[#allocation2] sm:$0xff] (!%p902_p6), %v1087_v0  ;;  %329 = vst [vmem:[#allocation2 + $0x8] sm:$0xff] (!%p902_p6), %v1087_v0 }
  0x11   : > { %327 = sbr.rel (%p902_p6) target bundleno = 24 (0x18), region = 40 }
  0x18 PF: > { %v988_v1 = vld [vmem:[%s1144_s28 + $0x4] ss:$8 sps:$4 sm:$0xff]   ;;  %v990_v2 = vld [vmem:[%s1144_s28] ss:$8 sps:$4 sm:$0xff]   ;;  %v1088_v3 = vmov 0   ;;  %p954_p7 = scmp.ne.s32.totalorder %s1077_s15, 5 }
  0x19   : > { %706 = vmatprep.mubr.bf16.mxu1 %v1088_v3  ;;  %633 = vmatprep.subr.bf16.mxu0 %v988_v1  ;;  %v991_v4 = vld [vmem:[%s1144_s28 + $0x14] ss:$8 sps:$4 sm:$0xff]   ;;  %v993_v5 = vld [vmem:[%s1144_s28 + $0x10] ss:$8 sps:$4 sm:$0xff]   ;;  %v994_v6 = vld [vmem:[%s1144_s28 + $0x24] ss:$8 sps:$4 sm:$0xff]  }
  0x1a   : > { %634 = vmatpush1.bf16.msra.mxu0 %v990_v2  ;;  %v996_v7 = vld [vmem:[%s1144_s28 + $0x20] ss:$8 sps:$4 sm:$0xff]   ;;  %v997_v8 = vld [vmem:[%s1144_s28 + $0x34] ss:$8 sps:$4 sm:$0xff]   ;;  %v999_v9 = vld [vmem:[%s1144_s28 + $0x30] ss:$8 sps:$4 sm:$0xff]  }
  0x1b   : > { %635 = vmatprep.subr.bf16.mxu0 %v991_v4  ;;  %v1012_v10 = vld [vmem:[%s1144_s28 + $0x104] ss:$8 sps:$4 sm:$0xff]   ;;  %v1014_v11 = vld [vmem:[%s1144_s28 + $0x100] ss:$8 sps:$4 sm:$0xff]   ;;  %v1018_v13 = vld [vmem:[%s1144_s28 + $0x114] ss:$8 sps:$4 sm:$0xff]   ;;  %v727_v4 = vlaneseq (!%p954_p7) }
  0x1c   : > { %v1000_v12 = vld [vmem:[%s1144_s28 + $0x44] ss:$8 sps:$4 sm:$0xff]   ;;  %674 = vmatprep.subr.bf16.mxu1 %v1012_v10  ;;  %v1020_v14 = vld [vmem:[%s1144_s28 + $0x110] ss:$8 sps:$4 sm:$0xff]   ;;  %v1002_v15 = vld [vmem:[%s1144_s28 + $0x40] ss:$8 sps:$4 sm:$0xff]  }
  0x1d   : > { %675 = vmatpush1.bf16.msra.mxu1 %v1014_v11  ;;  %v1003_v16 = vld [vmem:[%s1144_s28 + $0x54] ss:$8 sps:$4 sm:$0xff]   ;;  %v1024_v17 = vld [vmem:[%s1144_s28 + $0x124] ss:$8 sps:$4 sm:$0xff]   ;;  %v1026_v18 = vld [vmem:[%s1144_s28 + $0x120] ss:$8 sps:$4 sm:$0xff]  }
  0x1e   : > { %636 = vmatpush1.bf16.msra.mxu0 %v993_v5  ;;  %676 = vmatprep.subr.bf16.mxu1 %v1018_v13  ;;  %v1005_v19 = vld [vmem:[%s1144_s28 + $0x50] ss:$8 sps:$4 sm:$0xff]   ;;  %v1030_v20 = vld [vmem:[%s1144_s28 + $0x134] ss:$8 sps:$4 sm:$0xff]   ;;  %v1006_v21 = vld [vmem:[%s1144_s28 + $0x64] ss:$8 sps:$4 sm:$0xff]  }
  0x1f   : > { %637 = vmatprep.subr.bf16.mxu0 %v994_v6  ;;  %v1032_v22 = vld [vmem:[%s1144_s28 + $0x130] ss:$8 sps:$4 sm:$0xff]   ;;  %v1008_v23 = vld [vmem:[%s1144_s28 + $0x60] ss:$8 sps:$4 sm:$0xff]   ;;  %v1036_v24 = vld [vmem:[%s1144_s28 + $0x144] ss:$8 sps:$4 sm:$0xff]  }
  0x20   : > { %v1009_v25 = vld [vmem:[%s1144_s28 + $0x74] ss:$8 sps:$4 sm:$0xff]   ;;  %v1038_v26 = vld [vmem:[%s1144_s28 + $0x140] ss:$8 sps:$4 sm:$0xff]   ;;  %v1011_v27 = vld [vmem:[%s1144_s28 + $0x70] ss:$8 sps:$4 sm:$0xff]  }
  0x21   : > { %677 = vmatpush1.bf16.msra.mxu1 %v1020_v14  ;;  %v1042_v28 = vld [vmem:[%s1144_s28 + $0x154] ss:$8 sps:$4 sm:$0xff]   ;;  %v1015_v29 = vld [vmem:[%s1144_s28 + $0x84] ss:$8 sps:$4 sm:$0xff]   ;;  %v1044_v30 = vld [vmem:[%s1144_s28 + $0x150] ss:$8 sps:$4 sm:$0xff]  }
  0x22   : > { %638 = vmatpush1.bf16.msra.mxu0 %v996_v7  ;;  %678 = vmatprep.subr.bf16.mxu1 %v1024_v17  ;;  %v1017_v31 = vld [vmem:[%s1144_s28 + $0x80] ss:$8 sps:$4 sm:$0xff]   ;;  %v1048_v32 = vld [vmem:[%s1144_s28 + $0x164] ss:$8 sps:$4 sm:$0xff]   ;;  %v1021_v33 = vld [vmem:[%s1144_s28 + $0x94] ss:$8 sps:$4 sm:$0xff]  }
  0x23   : > { %639 = vmatprep.subr.bf16.mxu0 %v997_v8  ;;  %v332_v34 = vld [vmem:[%s1139_s24] sm:$0xff]  ;;  %v1023_v37 = vld [vmem:[%s1144_s28 + $0x90] ss:$8 sps:$4 sm:$0xff]   ;;  %v1054_v38 = vld [vmem:[%s1144_s28 + $0x174] ss:$8 sps:$4 sm:$0xff]   ;;  %v728_v5 = vshrl.u32 (!%p954_p7), %v727_v4, 7 }
  0x24   : > { %v904_v35 = vcombine.high %v332_v34, %v332_v34  ;;  %v1050_v36 = vld [vmem:[%s1144_s28 + $0x160] ss:$8 sps:$4 sm:$0xff]   ;;  %v1027_v39 = vld [vmem:[%s1144_s28 + $0xa4] ss:$8 sps:$4 sm:$0xff]   ;;  %v1056_v40 = vld [vmem:[%s1144_s28 + $0x170] ss:$8 sps:$4 sm:$0xff]   ;;  %v903_v53 = vcombine.low %v332_v34, %v332_v34 }
  0x25   : > { %679 = vmatpush1.bf16.msra.mxu1 %v1026_v18  ;;  %v1029_v41 = vld [vmem:[%s1144_s28 + $0xa0] ss:$8 sps:$4 sm:$0xff]   ;;  %v1033_v42 = vld [vmem:[%s1144_s28 + $0xb4] ss:$8 sps:$4 sm:$0xff]   ;;  %v1035_v44 = vld [vmem:[%s1144_s28 + $0xb0] ss:$8 sps:$4 sm:$0xff]  }
  0x26   : > { %640 = vmatpush1.bf16.msra.mxu0 %v999_v9  ;;  %680 = vmatprep.subr.bf16.mxu1 %v1030_v20  ;;  %v1060_v43 = vld [vmem:[%s1139_s24 + $0x8] ss:$0 sps:$4 sm:$0xff]   ;;  %v1039_v45 = vld [vmem:[%s1144_s28 + $0xc4] ss:$8 sps:$4 sm:$0xff]   ;;  %v1045_v47 = vld [vmem:[%s1144_s28 + $0xd4] ss:$8 sps:$4 sm:$0xff]  }
  0x27   : > { %641 = vmatprep.subr.bf16.mxu0 %v1000_v12  ;;  %665 = vmatprep.mubr.bf16.mxu0 %v904_v35  ;;  %v1041_v46 = vld [vmem:[%s1144_s28 + $0xc0] ss:$8 sps:$4 sm:$0xff]   ;;  %v1047_v48 = vld [vmem:[%s1144_s28 + $0xd0] ss:$8 sps:$4 sm:$0xff]   ;;  %v1051_v49 = vld [vmem:[%s1144_s28 + $0xe4] ss:$8 sps:$4 sm:$0xff]  }
  0x28   : > { %v1053_v50 = vld [vmem:[%s1144_s28 + $0xe0] ss:$8 sps:$4 sm:$0xff]   ;;  %v1057_v51 = vld [vmem:[%s1144_s28 + $0xf4] ss:$8 sps:$4 sm:$0xff]   ;;  %v1059_v52 = vld [vmem:[%s1144_s28 + $0xf0] ss:$8 sps:$4 sm:$0xff]  }
  0x29   : > { %681 = vmatpush1.bf16.msra.mxu1 %v1032_v22  ;;  %v330_v58 = vld [vmem:[#allocation2] sm:$0xff]  ;;  %v331_v61 = vld [vmem:[#allocation2 + $0x8] sm:$0xff]  ;;  %v729_v8 = vsub.s32 (!%p954_p7), 0, %v728_v5  ;;  %v733_v9 = vsub.s32 (!%p954_p7), 1, %v728_v5 }
  0x2a   : > { %642 = vmatpush1.bf16.msra.mxu0 %v1002_v15  ;;  %682 = vmatprep.subr.bf16.mxu1 %v1036_v24  ;;  %v725_v6 = vld [vmem:[%s1218_s2] sm:$0x3] (!%p954_p7) }
  0x2b   : > { %643 = vmatprep.subr.bf16.mxu0 %v1003_v16  ;;  %v739_v7 = vld [vmem:[%s1219_s3] sm:$0x3] (!%p954_p7)  ;;  %v730_v12 = vrot.slane (!%p954_p7), %v725_v6, %v729_v8  ;;  %v734_v13 = vrot.slane (!%p954_p7), %v725_v6, %v733_v9 }
  0x2c   : > { %v744_v14 = vrot.slane (!%p954_p7), %v739_v7, %v729_v8  ;;  %v748_v15 = vrot.slane (!%p954_p7), %v739_v7, %v733_v9 }
  0x2d   : > { %683 = vmatpush1.bf16.msra.mxu1 %v1038_v26 }
  0x2e   : > { %644 = vmatpush1.bf16.msra.mxu0 %v1005_v19  ;;  %684 = vmatprep.subr.bf16.mxu1 %v1042_v28 }
  0x2f   : > { %645 = vmatprep.subr.bf16.mxu0 %v1006_v21 }
  0x31   : > { %685 = vmatpush1.bf16.msra.mxu1 %v1044_v30 }
  0x32   : > { %646 = vmatpush1.bf16.msra.mxu0 %v1008_v23  ;;  %686 = vmatprep.subr.bf16.mxu1 %v1048_v32 }
  0x33   : > { %647 = vmatprep.subr.bf16.mxu0 %v1009_v25 }
  0x35   : > { %687 = vmatpush1.bf16.msra.mxu1 %v1050_v36 }
  0x36   : > { %648 = vmatpush1.bf16.msra.mxu0 %v1011_v27  ;;  %688 = vmatprep.subr.bf16.mxu1 %v1054_v38 }
  0x37   : > { %649 = vmatprep.subr.bf16.mxu0 %v1015_v29 }
  0x39   : > { %689 = vmatpush1.bf16.msra.mxu1 %v1056_v40 }
  0x3a   : > { %650 = vmatpush1.bf16.msra.mxu0 %v1017_v31 }
  0x3b   : > { %651 = vmatprep.subr.bf16.mxu0 %v1021_v33 }
  0x3c   : > { %707 = vmatmul.mubr.bf16.vlgmr.msra.gmra.mrb[0].mxu1 %v1060_v43 }
  0x3e   : > { %652 = vmatpush1.bf16.msra.mxu0 %v1023_v37 }
  0x3f   : > { %653 = vmatprep.subr.bf16.mxu0 %v1027_v39 }
  0x42   : > { %654 = vmatpush1.bf16.msra.mxu0 %v1029_v41 }
  0x43   : > { %655 = vmatprep.subr.bf16.mxu0 %v1033_v42 }
  0x46   : > { %656 = vmatpush1.bf16.msra.mxu0 %v1035_v44 }
  0x47   : > { %657 = vmatprep.subr.bf16.mxu0 %v1039_v45 }
  0x4a   : > { %658 = vmatpush1.bf16.msra.mxu0 %v1041_v46 }
  0x4b   : > { %659 = vmatprep.subr.bf16.mxu0 %v1045_v47 }
  0x4e   : > { %660 = vmatpush1.bf16.msra.mxu0 %v1047_v48 }
  0x4f   : > { %661 = vmatprep.subr.bf16.mxu0 %v1051_v49 }
  0x52   : > { %662 = vmatpush1.bf16.msra.mxu0 %v1053_v50 }
  0x53   : > { %663 = vmatprep.subr.bf16.mxu0 %v1057_v51 }
  0x56   : > { %664 = vmatpush1.bf16.msra.mxu0 %v1059_v52 }
  0x59   : > { %666 = vmatmul.mubr.bf16.vlgmr.msra.gmra.mrb[0].mxu0 %v903_v53 }
 0x10f   : > { %v708_v54 = vpop.f32.mrb[0].mxu1 }
 0x110   : > { %v710_v55 = vpop.f32.mrb[1].mxu1 }
 0x111   : > { %v712_v56 = vpop.f32.mrb[2].mxu1 }
 0x112   : > { %v713_v57 = vpop.f32.mrb[3].mxu1 }
 0x12c   : > { %v667_v59 = vpop.f32.mrb[0].mxu0  ;;  %722 = sbr.rel (%p954_p7) target bundleno = 323 (0x143), region = 44 }
 0x12d   : > { %v709_v60 = vadd.f32 %v708_v54, %v667_v59  ;;  %v669_v62 = vpop.f32.mrb[1].mxu0 }
 0x12e   : > { %v711_v63 = vadd.f32 %v710_v55, %v669_v62  ;;  %v671_v0 = vpop.f32.mrb[2].mxu0 }
 0x12f   : > { %v715_v1 = vadd.f32 %v709_v60, %v330_v58  ;;  %v672_v2 = vpop.f32.mrb[3].mxu0 }
 0x130   : > { %v716_v3 = vadd.f32 %v711_v63, %v331_v61 }
 0x131   : > { %717 = vst [vmem:[#allocation2] sm:$0xff] %v715_v1 }
 0x132   : > { %718 = vst [vmem:[#allocation2 + $0x8] sm:$0xff] %v716_v3 }
 0x138   : > { %v723_v10 = vld [vmem:[#allocation2] sm:$0xff] }
 0x139   : > { %v724_v11 = vld [vmem:[#allocation2 + $0x8] sm:$0xff]  ;;  %v737_v16 = vmul.f32 %v730_v12, %v723_v10 }
 0x13a   : > { %v738_v17 = vmul.f32 %v734_v13, %v724_v11 }
 0x13b   : > { %v751_v18 = vadd.f32 %v744_v14, %v737_v16 }
 0x13c   : > { %v752_v19 = vadd.f32 %v748_v15, %v738_v17 }
 0x13d   : > { %v753_v20 = vmax.f32 %v751_v18, 0.0 }
 0x13e   : > { %v754_v21 = vmax.f32 %v752_v19, 0.0 }
 0x140   : > { %v961_v22 = vpack.c.bf16 %v754_v21, %v753_v20 }
 0x142   : > { %763 = vst [vmem:[%s1220_s4] sm:$0xff] %v961_v22 }
 0x143 PF: > { %s14_s17 = sadd.s32 1, %s1085_s17   ;;  %s1221_s15 = smov %s1081_s16 }
 0x144   : > { %p11_p8 = scmp.ge.s32.totalorder %s14_s17, 8   ;;  %s1222_s16 = smov %s1224_s18 }
 0x146   :  { %13 = sbr.rel (!%p11_p8) target bundleno = 2 (0x2), region = 83 }

// kernel: combined_model_forward.39
= control target key start
LH: loop header
LB: loop body
LE: loop exit
PB: predicated region body
PF: predicated region fallthrough
CT: control target
= control target key end

     0   :  { %s1394_s15 = smov 0   ;;  %s1396_s16 = smov 0   ;;  %s1666_s0 = inlined_call_operand.vmem [shape: bf16[8,2304], index: 0, kind: input, shape index: {}]   ;;  %s1667_s1 = inlined_call_operand.vmem [shape: bf16[2304,512], index: 1, kind: input, shape index: {}]   ;;  %s1668_s2 = inlined_call_operand.vmem [shape: f32[1,512], index: 2, kind: input, shape index: {}]   ;;  %s1669_s3 = inlined_call_operand.vmem [shape: f32[1,512], index: 3, kind: input, shape index: {}]   ;;  %s1670_s4 = inlined_call_operand.vmem [shape: bf16[8,512], index: 4, kind: output, shape index: {}]  }
   0x1   :  { %s1398_s17 = smov 0   ;;  %s1400_s18 = smov 0  }
   0x2   :  { %s1402_s19 = smov 0   ;;  %s1404_s20 = smov 0  }
   0x3   :  { %s1406_s21 = smov 0  }
   0x4 LB: > { %s26_s22 = sadd.s32 1, %s1357_s19  ;;  %s29_s23 = sadd.s32 1, %s1361_s20  ;;  %s1365_s21 = sphi %s1406_s21, %s14_s21   ;;  %s1361_s20 = sphi %s1404_s20, %s1676_s20   ;;  %s1357_s19 = sphi %s1402_s19, %s1675_s19   ;;  %s1353_s18 = sphi %s1400_s18, %s1674_s18   ;;  %s1349_s17 = sphi %s1398_s17, %s1673_s17   ;;  %s1345_s16 = sphi %s1396_s16, %s1672_s16   ;;  %s1341_s15 = sphi %s1394_s15, %s1671_s15  }
   0x5   : > { %p27_p0 = scmp.ge.s32.totalorder %s26_s22, 6  ;;  %p77_p1 = scmp.ne.s32.totalorder %s1345_s16, %s1341_s15 }
   0x6   : > { %p78_p2 = scmp.eq.s32.totalorder %s1365_s21, 0  ;;  %s70_s27 = sadd.s32 1, %s1345_s16 }
   0x7   : > { %s1678_s22 = smov (%p27_p0, %s26_s22), 0  ;;  %s1680_s23 = smov (!%p27_p0, %s29_s23), %s1361_s20 }
   0x8   : > { %p79_p3 = por %p78_p2, %p77_p1  ;;  %p31_p4 = scmp.ge.s32.totalorder %s1680_s23, 2 }
   0x9   : > { %s65_s24 = ssub.s32 %s1357_s19, %s1678_s22  ;;  %p1108_p6 = scmp.ge.s32.totalorder %s1365_s21, 12 }
   0xa   : > { %s1682_s23 = smov (%p31_p4, %s1680_s23), 0 }
   0xb   : > { %s66_s25 = ssub.s32 %s1361_s20, %s1682_s23  ;;  %183 = sbr.rel (%p1108_p6) target bundleno = 50 (0x32), region = 16 }
   0xc   : > { %s67_s26 = sor.u32 %s66_s25, %s65_s24 }
   0xd   : > { %p68_p5 = scmp.eq.s32.totalorder %s67_s26, 0 }
   0xf   : > { %s1445_s28 = scalar_select %p68_p5, %s1345_s16, %s70_s27  }
  0x12   : > { %199 = sbr.rel (!%p79_p3) target bundleno = 50 (0x32), region = 24  ;;  %s201_s29 = sand.u32 (%p79_p3), 1, %s1345_s16  }
  0x13   : > { %s1176_s30 = smul.u32 (%p79_p3), 384, %s201_s29  ;;  %s1109_s5 = sshll.u32 (%p79_p3), %s1361_s20, 1 }
  0x14   : > { %s1174_s6 = smul.u32 (%p79_p3), 192, %s1357_s19 }
  0x15   : > { %s1459_s12 = scalar_lea.vmem (%p79_p3), [#allocation3], %s1176_s30 }
  0x16   : > { %s207_s7 = sadd.s32 (%p79_p3), %s1174_s6, %s1109_s5 }
  0x17   : > { %s1111_s8 = sshll.u32 (%p79_p3), %s207_s7, 2 }
  0x18   : > { %s1454_s11 = scalar_lea.vmem (%p79_p3), %s1667_s1, %s1111_s8 }
  0x19   : > { %v331_v0 = vld [vmem:[%s1454_s11] sm:$0xff]  ;;  %v333_v1 = vld [vmem:[%s1454_s11 + $0x10] sm:$0xff] }
  0x1a   : > { %v335_v2 = vld [vmem:[%s1454_s11 + $0x20] sm:$0xff]  ;;  %332 = vst [vmem:[%s1459_s12] sm:$0xff] %v331_v0  ;;  %334 = vst [vmem:[%s1459_s12 + $0x8] sm:$0xff] %v333_v1  ;;  %v337_v3 = vld [vmem:[%s1454_s11 + $0x30] sm:$0xff] }
  0x1b   : > { %336 = vst [vmem:[%s1459_s12 + $0x10] sm:$0xff] %v335_v2  ;;  %v339_v4 = vld [vmem:[%s1454_s11 + $0x40] sm:$0xff]  ;;  %v341_v5 = vld [vmem:[%s1454_s11 + $0x50] sm:$0xff]  ;;  %338 = vst [vmem:[%s1459_s12 + $0x18] sm:$0xff] %v337_v3 }
  0x1c   : > { %340 = vst [vmem:[%s1459_s12 + $0x20] sm:$0xff] %v339_v4  ;;  %342 = vst [vmem:[%s1459_s12 + $0x28] sm:$0xff] %v341_v5  ;;  %v343_v6 = vld [vmem:[%s1454_s11 + $0x60] sm:$0xff]  ;;  %v345_v7 = vld [vmem:[%s1454_s11 + $0x70] sm:$0xff] }
  0x1d   : > { %v347_v8 = vld [vmem:[%s1454_s11 + $0x80] sm:$0xff]  ;;  %344 = vst [vmem:[%s1459_s12 + $0x30] sm:$0xff] %v343_v6  ;;  %346 = vst [vmem:[%s1459_s12 + $0x38] sm:$0xff] %v345_v7  ;;  %v349_v9 = vld [vmem:[%s1454_s11 + $0x90] sm:$0xff] }
  0x1e   : > { %348 = vst [vmem:[%s1459_s12 + $0x40] sm:$0xff] %v347_v8  ;;  %v351_v10 = vld [vmem:[%s1454_s11 + $0xa0] sm:$0xff]  ;;  %v353_v11 = vld [vmem:[%s1454_s11 + $0xb0] sm:$0xff]  ;;  %350 = vst [vmem:[%s1459_s12 + $0x48] sm:$0xff] %v349_v9 }
  0x1f   : > { %352 = vst [vmem:[%s1459_s12 + $0x50] sm:$0xff] %v351_v10  ;;  %354 = vst [vmem:[%s1459_s12 + $0x58] sm:$0xff] %v353_v11  ;;  %v355_v12 = vld [vmem:[%s1454_s11 + $0xc0] sm:$0xff]  ;;  %v357_v13 = vld [vmem:[%s1454_s11 + $0xd0] sm:$0xff] }
  0x20   : > { %v359_v14 = vld [vmem:[%s1454_s11 + $0xe0] sm:$0xff]  ;;  %356 = vst [vmem:[%s1459_s12 + $0x60] sm:$0xff] %v355_v12  ;;  %358 = vst [vmem:[%s1459_s12 + $0x68] sm:$0xff] %v357_v13  ;;  %v361_v15 = vld [vmem:[%s1454_s11 + $0xf0] sm:$0xff] }
  0x21   : > { %360 = vst [vmem:[%s1459_s12 + $0x70] sm:$0xff] %v359_v14  ;;  %v363_v16 = vld [vmem:[%s1454_s11 + $0x100] sm:$0xff]  ;;  %v365_v17 = vld [vmem:[%s1454_s11 + $0x110] sm:$0xff]  ;;  %362 = vst [vmem:[%s1459_s12 + $0x78] sm:$0xff] %v361_v15 }
  0x22   : > { %364 = vst [vmem:[%s1459_s12 + $0x80] sm:$0xff] %v363_v16  ;;  %366 = vst [vmem:[%s1459_s12 + $0x88] sm:$0xff] %v365_v17  ;;  %v367_v18 = vld [vmem:[%s1454_s11 + $0x120] sm:$0xff]  ;;  %v369_v19 = vld [vmem:[%s1454_s11 + $0x130] sm:$0xff] }
  0x23   : > { %v371_v20 = vld [vmem:[%s1454_s11 + $0x140] sm:$0xff]  ;;  %368 = vst [vmem:[%s1459_s12 + $0x90] sm:$0xff] %v367_v18  ;;  %370 = vst [vmem:[%s1459_s12 + $0x98] sm:$0xff] %v369_v19  ;;  %v373_v21 = vld [vmem:[%s1454_s11 + $0x150] sm:$0xff] }
  0x24   : > { %372 = vst [vmem:[%s1459_s12 + $0xa0] sm:$0xff] %v371_v20  ;;  %v375_v22 = vld [vmem:[%s1454_s11 + $0x160] sm:$0xff]  ;;  %v377_v23 = vld [vmem:[%s1454_s11 + $0x170] sm:$0xff]  ;;  %374 = vst [vmem:[%s1459_s12 + $0xa8] sm:$0xff] %v373_v21 }
  0x25   : > { %376 = vst [vmem:[%s1459_s12 + $0xb0] sm:$0xff] %v375_v22  ;;  %378 = vst [vmem:[%s1459_s12 + $0xb8] sm:$0xff] %v377_v23  ;;  %v379_v24 = vld [vmem:[%s1454_s11 + $0x180] sm:$0xff]  ;;  %v381_v25 = vld [vmem:[%s1454_s11 + $0x190] sm:$0xff] }
  0x26   : > { %v383_v26 = vld [vmem:[%s1454_s11 + $0x1a0] sm:$0xff]  ;;  %380 = vst [vmem:[%s1459_s12 + $0xc0] sm:$0xff] %v379_v24  ;;  %382 = vst [vmem:[%s1459_s12 + $0xc8] sm:$0xff] %v381_v25  ;;  %v385_v27 = vld [vmem:[%s1454_s11 + $0x1b0] sm:$0xff] }
  0x27   : > { %384 = vst [vmem:[%s1459_s12 + $0xd0] sm:$0xff] %v383_v26  ;;  %v387_v28 = vld [vmem:[%s1454_s11 + $0x1c0] sm:$0xff]  ;;  %v389_v29 = vld [vmem:[%s1454_s11 + $0x1d0] sm:$0xff]  ;;  %386 = vst [vmem:[%s1459_s12 + $0xd8] sm:$0xff] %v385_v27 }
  0x28   : > { %388 = vst [vmem:[%s1459_s12 + $0xe0] sm:$0xff] %v387_v28  ;;  %390 = vst [vmem:[%s1459_s12 + $0xe8] sm:$0xff] %v389_v29  ;;  %v391_v30 = vld [vmem:[%s1454_s11 + $0x1e0] sm:$0xff]  ;;  %v393_v31 = vld [vmem:[%s1454_s11 + $0x1f0] sm:$0xff] }
  0x29   : > { %v395_v32 = vld [vmem:[%s1454_s11 + $0x200] sm:$0xff]  ;;  %392 = vst [vmem:[%s1459_s12 + $0xf0] sm:$0xff] %v391_v30  ;;  %394 = vst [vmem:[%s1459_s12 + $0xf8] sm:$0xff] %v393_v31  ;;  %v397_v33 = vld [vmem:[%s1454_s11 + $0x210] sm:$0xff] }
  0x2a   : > { %396 = vst [vmem:[%s1459_s12 + $0x100] sm:$0xff] %v395_v32  ;;  %v399_v34 = vld [vmem:[%s1454_s11 + $0x220] sm:$0xff]  ;;  %v401_v35 = vld [vmem:[%s1454_s11 + $0x230] sm:$0xff]  ;;  %398 = vst [vmem:[%s1459_s12 + $0x108] sm:$0xff] %v397_v33 }
  0x2b   : > { %400 = vst [vmem:[%s1459_s12 + $0x110] sm:$0xff] %v399_v34  ;;  %402 = vst [vmem:[%s1459_s12 + $0x118] sm:$0xff] %v401_v35  ;;  %v403_v36 = vld [vmem:[%s1454_s11 + $0x240] sm:$0xff]  ;;  %v405_v37 = vld [vmem:[%s1454_s11 + $0x250] sm:$0xff] }
  0x2c   : > { %v407_v38 = vld [vmem:[%s1454_s11 + $0x260] sm:$0xff]  ;;  %404 = vst [vmem:[%s1459_s12 + $0x120] sm:$0xff] %v403_v36  ;;  %406 = vst [vmem:[%s1459_s12 + $0x128] sm:$0xff] %v405_v37  ;;  %v409_v39 = vld [vmem:[%s1454_s11 + $0x270] sm:$0xff] }
  0x2d   : > { %408 = vst [vmem:[%s1459_s12 + $0x130] sm:$0xff] %v407_v38  ;;  %v411_v40 = vld [vmem:[%s1454_s11 + $0x280] sm:$0xff]  ;;  %v413_v41 = vld [vmem:[%s1454_s11 + $0x290] sm:$0xff]  ;;  %410 = vst [vmem:[%s1459_s12 + $0x138] sm:$0xff] %v409_v39 }
  0x2e   : > { %412 = vst [vmem:[%s1459_s12 + $0x140] sm:$0xff] %v411_v40  ;;  %414 = vst [vmem:[%s1459_s12 + $0x148] sm:$0xff] %v413_v41  ;;  %v415_v42 = vld [vmem:[%s1454_s11 + $0x2a0] sm:$0xff]  ;;  %v417_v43 = vld [vmem:[%s1454_s11 + $0x2b0] sm:$0xff] }
  0x2f   : > { %v419_v44 = vld [vmem:[%s1454_s11 + $0x2c0] sm:$0xff]  ;;  %416 = vst [vmem:[%s1459_s12 + $0x150] sm:$0xff] %v415_v42  ;;  %418 = vst [vmem:[%s1459_s12 + $0x158] sm:$0xff] %v417_v43  ;;  %v421_v45 = vld [vmem:[%s1454_s11 + $0x2d0] sm:$0xff] }
  0x30   : > { %420 = vst [vmem:[%s1459_s12 + $0x160] sm:$0xff] %v419_v44  ;;  %v423_v46 = vld [vmem:[%s1454_s11 + $0x2e0] sm:$0xff]  ;;  %v425_v47 = vld [vmem:[%s1454_s11 + $0x2f0] sm:$0xff]  ;;  %422 = vst [vmem:[%s1459_s12 + $0x168] sm:$0xff] %v421_v45 }
  0x31   : > { %424 = vst [vmem:[%s1459_s12 + $0x170] sm:$0xff] %v423_v46  ;;  %426 = vst [vmem:[%s1459_s12 + $0x178] sm:$0xff] %v425_v47 }
  0x32 PF: > { %p1112_p7 = scmp.ge.s32.totalorder %s1365_s21, 1  ;;  %p447_p8 = scmp.lt.s32.totalorder %s1365_s21, 13 }
  0x34   : > { %p448_p9 = pnand %p1112_p7, %p447_p8 }
  0x35   : > { %s454_s13 = sand.u32 (!%p448_p9), 1, %s1341_s15   ;;  %s500_s14 = smul.u32 (!%p448_p9), 3, %s1349_s17 }
  0x36   : > { %451 = sbr.rel (%p448_p9) target bundleno = 370 (0x172), region = 70  ;;  %s1114_s25 = sshll.u32 (!%p448_p9), %s1353_s18, 1 }
  0x37   : > { %s1177_s24 = smul.u32 (!%p448_p9), 384, %s454_s13  ;;  %p503_p10 = scmp.lt.s32.totalorder (!%p448_p9), %s500_s14, 17 }
  0x38   : > { %p513_p11 = scmp.lt.s32.totalorder (!%p448_p9), %s1114_s25, 3  ;;  %p1118_p12 = scmp.ne.s32.totalorder (!%p448_p9), %s1349_s17, 0 }
  0x39   : > { %s1580_s13 = scalar_lea.vmem (!%p448_p9), [#allocation3], %s1177_s24 }
  0x3d   : > { %s1684_s14 = smov (!%p503_p10, %s500_s14), 17  ;;  %s1686_s25 = smov (!%p513_p11, %s1114_s25), 3 }
  0x3e   : > { %s1113_s26 = sshll.u32 %s1684_s14, 2  ;;  %s515_s15 = scalar_lea.vmem %s1668_s2, %s1686_s25  ;;  %v1367_v48 = vmov (!%p1118_p12), 0.0  }
  0x3f   : > { %s1564_s30 = scalar_lea.vmem %s1666_s0, %s1113_s26  ;;  %s520_s8 = scalar_lea.vmem %s1669_s3, %s1686_s25  ;;  %537 = vst [vmem:[#allocation2] sm:$0xff] (!%p1118_p12), %v1367_v48  ;;  %538 = vst [vmem:[#allocation2 + $0x8] sm:$0xff] (!%p1118_p12), %v1367_v48 }
  0x40   : > { %s1117_s9 = sshll.u32 %s1686_s25, 2  ;;  %536 = sbr.rel (%p1118_p12) target bundleno = 71 (0x47), region = 78 }
  0x41   : > { %s1578_s12 = scalar_lea.vmem %s1670_s4, %s1117_s9 }
  0x47 PF: > { %v1236_v49 = vld [vmem:[%s1580_s13 + $0x4] ss:$8 sps:$4 sm:$0xff]   ;;  %v1238_v50 = vld [vmem:[%s1580_s13] ss:$8 sps:$4 sm:$0xff]   ;;  %v1368_v51 = vmov 0   ;;  %v541_v18 = vld [vmem:[%s1564_s30] sm:$0xff] }
  0x48   : > { %915 = vmatprep.mubr.bf16.mxu1 %v1368_v51  ;;  %842 = vmatprep.subr.bf16.mxu0 %v1236_v49  ;;  %v1239_v52 = vld [vmem:[%s1580_s13 + $0x14] ss:$8 sps:$4 sm:$0xff]   ;;  %v1241_v53 = vld [vmem:[%s1580_s13 + $0x10] ss:$8 sps:$4 sm:$0xff]   ;;  %v1242_v54 = vld [vmem:[%s1580_s13 + $0x24] ss:$8 sps:$4 sm:$0xff]   ;;  %v1120_v19 = vcombine.high %v541_v18, %v541_v18  ;;  %v1119_v37 = vcombine.low %v541_v18, %v541_v18 }
  0x49   : > { %843 = vmatpush1.bf16.msra.mxu0 %v1238_v50  ;;  %v1244_v55 = vld [vmem:[%s1580_s13 + $0x20] ss:$8 sps:$4 sm:$0xff]   ;;  %v1245_v56 = vld [vmem:[%s1580_s13 + $0x34] ss:$8 sps:$4 sm:$0xff]   ;;  %v1247_v57 = vld [vmem:[%s1580_s13 + $0x30] ss:$8 sps:$4 sm:$0xff]  }
  0x4a   : > { %844 = vmatprep.subr.bf16.mxu0 %v1239_v52  ;;  %v1260_v58 = vld [vmem:[%s1580_s13 + $0x104] ss:$8 sps:$4 sm:$0xff]   ;;  %v1262_v59 = vld [vmem:[%s1580_s13 + $0x100] ss:$8 sps:$4 sm:$0xff]   ;;  %v1266_v61 = vld [vmem:[%s1580_s13 + $0x114] ss:$8 sps:$4 sm:$0xff]   ;;  %874 = vmatprep.mubr.bf16.mxu0 %v1120_v19 }
  0x4b   : > { %v1248_v60 = vld [vmem:[%s1580_s13 + $0x44] ss:$8 sps:$4 sm:$0xff]   ;;  %883 = vmatprep.subr.bf16.mxu1 %v1260_v58  ;;  %v1268_v62 = vld [vmem:[%s1580_s13 + $0x110] ss:$8 sps:$4 sm:$0xff]   ;;  %v1250_v63 = vld [vmem:[%s1580_s13 + $0x40] ss:$8 sps:$4 sm:$0xff]  }
  0x4c   : > { %884 = vmatpush1.bf16.msra.mxu1 %v1262_v59  ;;  %v1251_v0 = vld [vmem:[%s1580_s13 + $0x54] ss:$8 sps:$4 sm:$0xff]   ;;  %v1272_v1 = vld [vmem:[%s1580_s13 + $0x124] ss:$8 sps:$4 sm:$0xff]   ;;  %v1274_v2 = vld [vmem:[%s1580_s13 + $0x120] ss:$8 sps:$4 sm:$0xff]  }
  0x4d   : > { %845 = vmatpush1.bf16.msra.mxu0 %v1241_v53  ;;  %885 = vmatprep.subr.bf16.mxu1 %v1266_v61  ;;  %v1253_v3 = vld [vmem:[%s1580_s13 + $0x50] ss:$8 sps:$4 sm:$0xff]   ;;  %v1278_v4 = vld [vmem:[%s1580_s13 + $0x134] ss:$8 sps:$4 sm:$0xff]   ;;  %v1254_v5 = vld [vmem:[%s1580_s13 + $0x64] ss:$8 sps:$4 sm:$0xff]  }
  0x4e   : > { %846 = vmatprep.subr.bf16.mxu0 %v1242_v54  ;;  %v1280_v6 = vld [vmem:[%s1580_s13 + $0x130] ss:$8 sps:$4 sm:$0xff]   ;;  %v1256_v7 = vld [vmem:[%s1580_s13 + $0x60] ss:$8 sps:$4 sm:$0xff]   ;;  %v1284_v8 = vld [vmem:[%s1580_s13 + $0x144] ss:$8 sps:$4 sm:$0xff]  }
  0x4f   : > { %v1257_v9 = vld [vmem:[%s1580_s13 + $0x74] ss:$8 sps:$4 sm:$0xff]   ;;  %v1286_v10 = vld [vmem:[%s1580_s13 + $0x140] ss:$8 sps:$4 sm:$0xff]   ;;  %v1259_v11 = vld [vmem:[%s1580_s13 + $0x70] ss:$8 sps:$4 sm:$0xff]  }
  0x50   : > { %886 = vmatpush1.bf16.msra.mxu1 %v1268_v62  ;;  %v1290_v12 = vld [vmem:[%s1580_s13 + $0x154] ss:$8 sps:$4 sm:$0xff]   ;;  %v1263_v13 = vld [vmem:[%s1580_s13 + $0x84] ss:$8 sps:$4 sm:$0xff]   ;;  %v1292_v14 = vld [vmem:[%s1580_s13 + $0x150] ss:$8 sps:$4 sm:$0xff]  }
  0x51   : > { %847 = vmatpush1.bf16.msra.mxu0 %v1244_v55  ;;  %887 = vmatprep.subr.bf16.mxu1 %v1272_v1  ;;  %v1265_v15 = vld [vmem:[%s1580_s13 + $0x80] ss:$8 sps:$4 sm:$0xff]   ;;  %v1296_v16 = vld [vmem:[%s1580_s13 + $0x164] ss:$8 sps:$4 sm:$0xff]   ;;  %v1269_v17 = vld [vmem:[%s1580_s13 + $0x94] ss:$8 sps:$4 sm:$0xff]  }
  0x52   : > { %848 = vmatprep.subr.bf16.mxu0 %v1245_v56  ;;  %v1298_v20 = vld [vmem:[%s1580_s13 + $0x160] ss:$8 sps:$4 sm:$0xff]   ;;  %v1271_v21 = vld [vmem:[%s1580_s13 + $0x90] ss:$8 sps:$4 sm:$0xff]   ;;  %v1302_v22 = vld [vmem:[%s1580_s13 + $0x174] ss:$8 sps:$4 sm:$0xff]  }
  0x53   : > { %v1275_v23 = vld [vmem:[%s1580_s13 + $0xa4] ss:$8 sps:$4 sm:$0xff]   ;;  %v1304_v24 = vld [vmem:[%s1580_s13 + $0x170] ss:$8 sps:$4 sm:$0xff]   ;;  %v1277_v25 = vld [vmem:[%s1580_s13 + $0xa0] ss:$8 sps:$4 sm:$0xff]  }
  0x54   : > { %888 = vmatpush1.bf16.msra.mxu1 %v1274_v2  ;;  %v1281_v26 = vld [vmem:[%s1580_s13 + $0xb4] ss:$8 sps:$4 sm:$0xff]   ;;  %v1308_v27 = vld [vmem:[%s1564_s30 + $0x8] ss:$0 sps:$4 sm:$0xff]   ;;  %v1287_v29 = vld [vmem:[%s1580_s13 + $0xc4] ss:$8 sps:$4 sm:$0xff]  }
  0x55   : > { %849 = vmatpush1.bf16.msra.mxu0 %v1247_v57  ;;  %889 = vmatprep.subr.bf16.mxu1 %v1278_v4  ;;  %v1283_v28 = vld [vmem:[%s1580_s13 + $0xb0] ss:$8 sps:$4 sm:$0xff]   ;;  %v1289_v30 = vld [vmem:[%s1580_s13 + $0xc0] ss:$8 sps:$4 sm:$0xff]   ;;  %v1293_v31 = vld [vmem:[%s1580_s13 + $0xd4] ss:$8 sps:$4 sm:$0xff]  }
  0x56   : > { %850 = vmatprep.subr.bf16.mxu0 %v1248_v60  ;;  %v1295_v32 = vld [vmem:[%s1580_s13 + $0xd0] ss:$8 sps:$4 sm:$0xff]   ;;  %v1299_v33 = vld [vmem:[%s1580_s13 + $0xe4] ss:$8 sps:$4 sm:$0xff]   ;;  %v1301_v34 = vld [vmem:[%s1580_s13 + $0xe0] ss:$8 sps:$4 sm:$0xff]  }
  0x57   : > { %v1305_v35 = vld [vmem:[%s1580_s13 + $0xf4] ss:$8 sps:$4 sm:$0xff]   ;;  %v1307_v36 = vld [vmem:[%s1580_s13 + $0xf0] ss:$8 sps:$4 sm:$0xff]   ;;  %p1170_p13 = scmp.ne.s32.totalorder %s1349_s17, 5 }
  0x58   : > { %890 = vmatpush1.bf16.msra.mxu1 %v1280_v6  ;;  %v539_v42 = vld [vmem:[#allocation2] sm:$0xff]  ;;  %v540_v45 = vld [vmem:[#allocation2 + $0x8] sm:$0xff]  ;;  %v936_v52 = vlaneseq (!%p1170_p13) }
  0x59   : > { %851 = vmatpush1.bf16.msra.mxu0 %v1250_v63  ;;  %891 = vmatprep.subr.bf16.mxu1 %v1284_v8  ;;  %v934_v54 = vld [vmem:[%s515_s15] sm:$0x3] (!%p1170_p13) }
  0x5a   : > { %852 = vmatprep.subr.bf16.mxu0 %v1251_v0  ;;  %v937_v53 = vshrl.u32 (!%p1170_p13), %v936_v52, 7  ;;  %v948_v55 = vld [vmem:[%s520_s8] sm:$0x3] (!%p1170_p13) }
  0x5c   : > { %892 = vmatpush1.bf16.msra.mxu1 %v1286_v10  ;;  %v938_v56 = vsub.s32 (!%p1170_p13), 0, %v937_v53  ;;  %v942_v57 = vsub.s32 (!%p1170_p13), 1, %v937_v53 }
  0x5d   : > { %853 = vmatpush1.bf16.msra.mxu0 %v1253_v3  ;;  %893 = vmatprep.subr.bf16.mxu1 %v1290_v12 }
  0x5e   : > { %854 = vmatprep.subr.bf16.mxu0 %v1254_v5  ;;  %v939_v60 = vrot.slane (!%p1170_p13), %v934_v54, %v938_v56  ;;  %v943_v61 = vrot.slane (!%p1170_p13), %v934_v54, %v942_v57  ;;  %v953_v62 = vrot.slane (!%p1170_p13), %v948_v55, %v938_v56  ;;  %v957_v63 = vrot.slane (!%p1170_p13), %v948_v55, %v942_v57 }
  0x60   : > { %894 = vmatpush1.bf16.msra.mxu1 %v1292_v14 }
  0x61   : > { %855 = vmatpush1.bf16.msra.mxu0 %v1256_v7  ;;  %895 = vmatprep.subr.bf16.mxu1 %v1296_v16 }
  0x62   : > { %856 = vmatprep.subr.bf16.mxu0 %v1257_v9 }
  0x64   : > { %896 = vmatpush1.bf16.msra.mxu1 %v1298_v20 }
  0x65   : > { %857 = vmatpush1.bf16.msra.mxu0 %v1259_v11  ;;  %897 = vmatprep.subr.bf16.mxu1 %v1302_v22 }
  0x66   : > { %858 = vmatprep.subr.bf16.mxu0 %v1263_v13 }
  0x68   : > { %898 = vmatpush1.bf16.msra.mxu1 %v1304_v24 }
  0x69   : > { %859 = vmatpush1.bf16.msra.mxu0 %v1265_v15 }
  0x6a   : > { %860 = vmatprep.subr.bf16.mxu0 %v1269_v17 }
  0x6b   : > { %916 = vmatmul.mubr.bf16.vlgmr.msra.gmra.mrb[0].mxu1 %v1308_v27 }
  0x6d   : > { %861 = vmatpush1.bf16.msra.mxu0 %v1271_v21 }
  0x6e   : > { %862 = vmatprep.subr.bf16.mxu0 %v1275_v23 }
  0x71   : > { %863 = vmatpush1.bf16.msra.mxu0 %v1277_v25 }
  0x72   : > { %864 = vmatprep.subr.bf16.mxu0 %v1281_v26 }
  0x75   : > { %865 = vmatpush1.bf16.msra.mxu0 %v1283_v28 }
  0x76   : > { %866 = vmatprep.subr.bf16.mxu0 %v1287_v29 }
  0x79   : > { %867 = vmatpush1.bf16.msra.mxu0 %v1289_v30 }
  0x7a   : > { %868 = vmatprep.subr.bf16.mxu0 %v1293_v31 }
  0x7d   : > { %869 = vmatpush1.bf16.msra.mxu0 %v1295_v32 }
  0x7e   : > { %870 = vmatprep.subr.bf16.mxu0 %v1299_v33 }
  0x81   : > { %871 = vmatpush1.bf16.msra.mxu0 %v1301_v34 }
  0x82   : > { %872 = vmatprep.subr.bf16.mxu0 %v1305_v35 }
  0x85   : > { %873 = vmatpush1.bf16.msra.mxu0 %v1307_v36 }
  0x88   : > { %875 = vmatmul.mubr.bf16.vlgmr.msra.gmra.mrb[0].mxu0 %v1119_v37 }
 0x13e   : > { %v917_v38 = vpop.f32.mrb[0].mxu1 }
 0x13f   : > { %v919_v39 = vpop.f32.mrb[1].mxu1 }
 0x140   : > { %v921_v40 = vpop.f32.mrb[2].mxu1 }
 0x141   : > { %v922_v41 = vpop.f32.mrb[3].mxu1 }
 0x15b   : > { %v876_v43 = vpop.f32.mrb[0].mxu0  ;;  %931 = sbr.rel (%p1170_p13) target bundleno = 370 (0x172), region = 82 }
 0x15c   : > { %v918_v44 = vadd.f32 %v917_v38, %v876_v43  ;;  %v878_v46 = vpop.f32.mrb[1].mxu0 }
 0x15d   : > { %v920_v47 = vadd.f32 %v919_v39, %v878_v46  ;;  %v880_v48 = vpop.f32.mrb[2].mxu0 }
 0x15e   : > { %v924_v49 = vadd.f32 %v918_v44, %v539_v42  ;;  %v881_v50 = vpop.f32.mrb[3].mxu0 }
 0x15f   : > { %v925_v51 = vadd.f32 %v920_v47, %v540_v45 }
 0x160   : > { %926 = vst [vmem:[#allocation2] sm:$0xff] %v924_v49 }
 0x161   : > { %927 = vst [vmem:[#allocation2 + $0x8] sm:$0xff] %v925_v51 }
 0x167   : > { %v932_v58 = vld [vmem:[#allocation2] sm:$0xff] }
 0x168   : > { %v933_v59 = vld [vmem:[#allocation2 + $0x8] sm:$0xff]  ;;  %v946_v0 = vmul.f32 %v939_v60, %v932_v58 }
 0x169   : > { %v947_v1 = vmul.f32 %v943_v61, %v933_v59 }
 0x16a   : > { %v960_v2 = vadd.f32 %v953_v62, %v946_v0 }
 0x16b   : > { %v961_v3 = vadd.f32 %v957_v63, %v947_v1 }
 0x16c   : > { %v962_v4 = vmax.f32 %v960_v2, 0.0 }
 0x16d   : > { %v963_v5 = vmax.f32 %v961_v3, 0.0 }
 0x16f   : > { %v1175_v6 = vpack.c.bf16 %v963_v5, %v962_v4 }
 0x171   : > { %972 = vst [vmem:[%s1578_s12] sm:$0xff] %v1175_v6 }
 0x172 PF: > { %s14_s21 = sadd.s32 1, %s1365_s21   ;;  %s1671_s15 = smov %s1345_s16 }
 0x173   : > { %p11_p0 = scmp.ge.s32.totalorder %s14_s21, 14   ;;  %s1672_s16 = smov %s1445_s28 }
 0x174   : > { %s1673_s17 = smov %s1357_s19  ;;  %s1674_s18 = smov %s1361_s20 }
 0x175   : > { %s1675_s19 = smov %s1678_s22  ;;  %s1676_s20 = smov %s1682_s23 }
 0x176   :  { %13 = sbr.rel (!%p11_p0) target bundleno = 4 (0x4), region = 126 }

// kernel: combined_model_forward.40
= control target key start
LH: loop header
LB: loop body
LE: loop exit
PB: predicated region body
PF: predicated region fallthrough
CT: control target
= control target key end

     0   :  { %s1103_s15 = smov 0   ;;  %s1105_s16 = smov 0   ;;  %s1285_s0 = inlined_call_operand.vmem [shape: bf16[8,256], index: 0, kind: input, shape index: {}]   ;;  %s1286_s1 = inlined_call_operand.vmem [shape: bf16[256,512], index: 1, kind: input, shape index: {}]   ;;  %s1287_s2 = inlined_call_operand.vmem [shape: f32[1,512], index: 2, kind: input, shape index: {}]   ;;  %s1288_s3 = inlined_call_operand.vmem [shape: f32[1,512], index: 3, kind: input, shape index: {}]   ;;  %s1289_s4 = inlined_call_operand.vmem [shape: bf16[8,512], index: 4, kind: output, shape index: {}]  }
   0x1   :  { %s1107_s17 = smov 0   ;;  %s1109_s18 = smov 0  }
   0x2   :  { %s1111_s19 = smov 0  }
   0x3 LB: > { %s29_s20 = sadd.s32 1, %s1072_s18  ;;  %p77_p1 = scmp.ne.s32.totalorder %s1064_s16, %s1060_s15  ;;  %s1076_s19 = sphi %s1111_s19, %s14_s19   ;;  %s1072_s18 = sphi %s1109_s18, %s1293_s18   ;;  %s1068_s17 = sphi %s1107_s17, %s1292_s17   ;;  %s1064_s16 = sphi %s1105_s16, %s1291_s16   ;;  %s1060_s15 = sphi %s1103_s15, %s1290_s15  }
   0x4   : > { %p31_p0 = scmp.ge.s32.totalorder %s29_s20, 2  ;;  %p78_p2 = scmp.eq.s32.totalorder %s1076_s19, 0 }
   0x5   : > { %s70_s22 = sadd.s32 1, %s1064_s16  ;;  %p899_p5 = scmp.ge.s32.totalorder %s1076_s19, 2 }
   0x6   : > { %s1295_s20 = smov (%p31_p0, %s29_s20), 0  ;;  %p79_p3 = por %p78_p2, %p77_p1 }
   0x7   : > { %s66_s21 = ssub.s32 %s1072_s18, %s1295_s20  ;;  %196 = sbr.rel (%p899_p5) target bundleno = 34 (0x22), region = 20 }
   0x8   : > { %p68_p4 = scmp.eq.s32.totalorder %s66_s21, 0 }
   0xa   : > { %s1138_s23 = scalar_select %p68_p4, %s1064_s16, %s70_s22  }
   0xe   : > { %199 = sbr.rel (!%p79_p3) target bundleno = 34 (0x22), region = 24  ;;  %s201_s24 = sand.u32 (%p79_p3), 1, %s1064_s16  }
   0xf   : > { %s946_s25 = sshll.u32 (%p79_p3), %s1072_s18, 3  ;;  %s900_s26 = sshll.u32 (%p79_p3), %s201_s24, 8 }
  0x10   : > { %s1146_s29 = scalar_lea.vmem (%p79_p3), %s1286_s1, %s946_s25  ;;  %s1151_s30 = scalar_lea.vmem (%p79_p3), [#allocation3], %s900_s26 }
  0x11   : > { %v299_v0 = vld [vmem:[%s1146_s29] sm:$0xff] (%p79_p3)  ;;  %v301_v1 = vld [vmem:[%s1146_s29 + $0x10] sm:$0xff] (%p79_p3) }
  0x12   : > { %v303_v2 = vld [vmem:[%s1146_s29 + $0x20] sm:$0xff] (%p79_p3)  ;;  %300 = vst [vmem:[%s1151_s30] sm:$0xff] (%p79_p3), %v299_v0  ;;  %302 = vst [vmem:[%s1151_s30 + $0x8] sm:$0xff] (%p79_p3), %v301_v1  ;;  %v305_v3 = vld [vmem:[%s1146_s29 + $0x30] sm:$0xff] (%p79_p3) }
  0x13   : > { %304 = vst [vmem:[%s1151_s30 + $0x10] sm:$0xff] (%p79_p3), %v303_v2  ;;  %v307_v4 = vld [vmem:[%s1146_s29 + $0x40] sm:$0xff] (%p79_p3)  ;;  %v309_v5 = vld [vmem:[%s1146_s29 + $0x50] sm:$0xff] (%p79_p3)  ;;  %306 = vst [vmem:[%s1151_s30 + $0x18] sm:$0xff] (%p79_p3), %v305_v3 }
  0x14   : > { %308 = vst [vmem:[%s1151_s30 + $0x20] sm:$0xff] (%p79_p3), %v307_v4  ;;  %310 = vst [vmem:[%s1151_s30 + $0x28] sm:$0xff] (%p79_p3), %v309_v5  ;;  %v311_v6 = vld [vmem:[%s1146_s29 + $0x60] sm:$0xff] (%p79_p3)  ;;  %v313_v7 = vld [vmem:[%s1146_s29 + $0x70] sm:$0xff] (%p79_p3) }
  0x15   : > { %v315_v8 = vld [vmem:[%s1146_s29 + $0x80] sm:$0xff]  ;;  %312 = vst [vmem:[%s1151_s30 + $0x30] sm:$0xff] %v311_v6  ;;  %314 = vst [vmem:[%s1151_s30 + $0x38] sm:$0xff] %v313_v7  ;;  %v317_v9 = vld [vmem:[%s1146_s29 + $0x90] sm:$0xff] }
  0x16   : > { %316 = vst [vmem:[%s1151_s30 + $0x40] sm:$0xff] %v315_v8  ;;  %v319_v10 = vld [vmem:[%s1146_s29 + $0xa0] sm:$0xff]  ;;  %v321_v11 = vld [vmem:[%s1146_s29 + $0xb0] sm:$0xff]  ;;  %318 = vst [vmem:[%s1151_s30 + $0x48] sm:$0xff] %v317_v9 }
  0x17   : > { %320 = vst [vmem:[%s1151_s30 + $0x50] sm:$0xff] %v319_v10  ;;  %322 = vst [vmem:[%s1151_s30 + $0x58] sm:$0xff] %v321_v11  ;;  %v323_v12 = vld [vmem:[%s1146_s29 + $0xc0] sm:$0xff]  ;;  %v325_v13 = vld [vmem:[%s1146_s29 + $0xd0] sm:$0xff] }
  0x18   : > { %v327_v14 = vld [vmem:[%s1146_s29 + $0xe0] sm:$0xff]  ;;  %324 = vst [vmem:[%s1151_s30 + $0x60] sm:$0xff] %v323_v12  ;;  %326 = vst [vmem:[%s1151_s30 + $0x68] sm:$0xff] %v325_v13  ;;  %v329_v15 = vld [vmem:[%s1146_s29 + $0xf0] sm:$0xff] }
  0x19   : > { %328 = vst [vmem:[%s1151_s30 + $0x70] sm:$0xff] %v327_v14  ;;  %v331_v16 = vld [vmem:[%s1146_s29 + $0x100] sm:$0xff]  ;;  %v333_v17 = vld [vmem:[%s1146_s29 + $0x110] sm:$0xff]  ;;  %330 = vst [vmem:[%s1151_s30 + $0x78] sm:$0xff] %v329_v15 }
  0x1a   : > { %332 = vst [vmem:[%s1151_s30 + $0x80] sm:$0xff] %v331_v16  ;;  %334 = vst [vmem:[%s1151_s30 + $0x88] sm:$0xff] %v333_v17  ;;  %v335_v18 = vld [vmem:[%s1146_s29 + $0x120] sm:$0xff]  ;;  %v337_v19 = vld [vmem:[%s1146_s29 + $0x130] sm:$0xff] }
  0x1b   : > { %v339_v20 = vld [vmem:[%s1146_s29 + $0x140] sm:$0xff]  ;;  %336 = vst [vmem:[%s1151_s30 + $0x90] sm:$0xff] %v335_v18  ;;  %338 = vst [vmem:[%s1151_s30 + $0x98] sm:$0xff] %v337_v19  ;;  %v341_v21 = vld [vmem:[%s1146_s29 + $0x150] sm:$0xff] }
  0x1c   : > { %340 = vst [vmem:[%s1151_s30 + $0xa0] sm:$0xff] %v339_v20  ;;  %v343_v22 = vld [vmem:[%s1146_s29 + $0x160] sm:$0xff]  ;;  %v345_v23 = vld [vmem:[%s1146_s29 + $0x170] sm:$0xff]  ;;  %342 = vst [vmem:[%s1151_s30 + $0xa8] sm:$0xff] %v341_v21 }
  0x1d   : > { %344 = vst [vmem:[%s1151_s30 + $0xb0] sm:$0xff] %v343_v22  ;;  %346 = vst [vmem:[%s1151_s30 + $0xb8] sm:$0xff] %v345_v23  ;;  %v347_v24 = vld [vmem:[%s1146_s29 + $0x180] sm:$0xff]  ;;  %v349_v25 = vld [vmem:[%s1146_s29 + $0x190] sm:$0xff] }
  0x1e   : > { %v351_v26 = vld [vmem:[%s1146_s29 + $0x1a0] sm:$0xff]  ;;  %348 = vst [vmem:[%s1151_s30 + $0xc0] sm:$0xff] %v347_v24  ;;  %350 = vst [vmem:[%s1151_s30 + $0xc8] sm:$0xff] %v349_v25  ;;  %v353_v27 = vld [vmem:[%s1146_s29 + $0x1b0] sm:$0xff] }
  0x1f   : > { %352 = vst [vmem:[%s1151_s30 + $0xd0] sm:$0xff] %v351_v26  ;;  %v355_v28 = vld [vmem:[%s1146_s29 + $0x1c0] sm:$0xff]  ;;  %v357_v29 = vld [vmem:[%s1146_s29 + $0x1d0] sm:$0xff]  ;;  %354 = vst [vmem:[%s1151_s30 + $0xd8] sm:$0xff] %v353_v27 }
  0x20   : > { %356 = vst [vmem:[%s1151_s30 + $0xe0] sm:$0xff] %v355_v28  ;;  %358 = vst [vmem:[%s1151_s30 + $0xe8] sm:$0xff] %v357_v29  ;;  %v359_v30 = vld [vmem:[%s1146_s29 + $0x1e0] sm:$0xff]  ;;  %v361_v31 = vld [vmem:[%s1146_s29 + $0x1f0] sm:$0xff] }
  0x21   : > { %360 = vst [vmem:[%s1151_s30 + $0xf0] sm:$0xff] %v359_v30  ;;  %362 = vst [vmem:[%s1151_s30 + $0xf8] sm:$0xff] %v361_v31 }
  0x22 PF: > { %p903_p6 = scmp.ge.s32.totalorder %s1076_s19, 1  ;;  %p383_p7 = scmp.lt.s32.totalorder %s1076_s19, 3 }
  0x24   : > { %p384_p8 = pnand %p903_p6, %p383_p7 }
  0x25   : > { %s390_s5 = sand.u32 (!%p384_p8), 1, %s1060_s15   ;;  %v1220_v32 = vld [vmem:[%s1285_s0] sm:$0xff] (!%p384_p8)  ;;  %s905_s10 = sshll.u32 (!%p384_p8), %s1068_s17, 1  ;;  %v728_v3 = vlaneseq (!%p384_p8) }
  0x26   : > { %387 = sbr.rel (%p384_p8) target bundleno = 325 (0x145), region = 70  ;;  %s904_s8 = sshll.u32 (!%p384_p8), %s390_s5, 8  ;;  %v910_v33 = vcombine.high (!%p384_p8), %v1220_v32, %v1220_v32  ;;  %v909_v2 = vcombine.low (!%p384_p8), %v1220_v32, %v1220_v32 }
  0x27   : > { %s1224_s9 = scalar_lea.vmem (!%p384_p8), [#allocation3], %s904_s8  ;;  %p449_p9 = scmp.lt.s32.totalorder (!%p384_p8), %s905_s10, 3  ;;  %v729_v4 = vshrl.u32 (!%p384_p8), %v728_v3, 7 }
  0x28   : > { %v988_v34 = vld [vmem:[%s1224_s9 + $0x4] ss:$8 sps:$4 sm:$0xff] (!%p384_p8)   ;;  %708 = vmatprep.mubr.bf16.mxu0 (!%p384_p8), %v910_v33  ;;  %v990_v35 = vld [vmem:[%s1224_s9] ss:$8 sps:$4 sm:$0xff] (!%p384_p8)   ;;  %v991_v36 = vld [vmem:[%s1224_s9 + $0x14] ss:$8 sps:$4 sm:$0xff] (!%p384_p8)  }
  0x29   : > { %676 = vmatprep.subr.bf16.mxu0 (!%p384_p8), %v988_v34  ;;  %v993_v37 = vld [vmem:[%s1224_s9 + $0x10] ss:$8 sps:$4 sm:$0xff] (!%p384_p8)   ;;  %v994_v38 = vld [vmem:[%s1224_s9 + $0x24] ss:$8 sps:$4 sm:$0xff] (!%p384_p8)   ;;  %v996_v39 = vld [vmem:[%s1224_s9 + $0x20] ss:$8 sps:$4 sm:$0xff] (!%p384_p8)  }
  0x2a   : > { %677 = vmatpush1.bf16.msra.mxu0 (!%p384_p8), %v990_v35  ;;  %v997_v40 = vld [vmem:[%s1224_s9 + $0x34] ss:$8 sps:$4 sm:$0xff] (!%p384_p8)   ;;  %v999_v41 = vld [vmem:[%s1224_s9 + $0x30] ss:$8 sps:$4 sm:$0xff] (!%p384_p8)   ;;  %v1000_v42 = vld [vmem:[%s1224_s9 + $0x44] ss:$8 sps:$4 sm:$0xff] (!%p384_p8)  }
  0x2b   : > { %678 = vmatprep.subr.bf16.mxu0 (!%p384_p8), %v991_v36  ;;  %v1002_v43 = vld [vmem:[%s1224_s9 + $0x40] ss:$8 sps:$4 sm:$0xff] (!%p384_p8)   ;;  %v1003_v44 = vld [vmem:[%s1224_s9 + $0x54] ss:$8 sps:$4 sm:$0xff] (!%p384_p8)   ;;  %v1005_v45 = vld [vmem:[%s1224_s9 + $0x50] ss:$8 sps:$4 sm:$0xff] (!%p384_p8)  }
  0x2c   : > { %v1006_v46 = vld [vmem:[%s1224_s9 + $0x64] ss:$8 sps:$4 sm:$0xff] (!%p384_p8)   ;;  %v1008_v47 = vld [vmem:[%s1224_s9 + $0x60] ss:$8 sps:$4 sm:$0xff] (!%p384_p8)   ;;  %v1009_v48 = vld [vmem:[%s1224_s9 + $0x74] ss:$8 sps:$4 sm:$0xff] (!%p384_p8)  }
  0x2d   : > { %v1011_v49 = vld [vmem:[%s1224_s9 + $0x70] ss:$8 sps:$4 sm:$0xff]   ;;  %v1012_v50 = vld [vmem:[%s1224_s9 + $0x84] ss:$8 sps:$4 sm:$0xff]   ;;  %v1014_v51 = vld [vmem:[%s1224_s9 + $0x80] ss:$8 sps:$4 sm:$0xff]  }
  0x2e   : > { %679 = vmatpush1.bf16.msra.mxu0 %v993_v37  ;;  %v1015_v52 = vld [vmem:[%s1224_s9 + $0x94] ss:$8 sps:$4 sm:$0xff]   ;;  %v1017_v53 = vld [vmem:[%s1224_s9 + $0x90] ss:$8 sps:$4 sm:$0xff]   ;;  %v1018_v54 = vld [vmem:[%s1224_s9 + $0xa4] ss:$8 sps:$4 sm:$0xff]  }
  0x2f   : > { %680 = vmatprep.subr.bf16.mxu0 %v994_v38  ;;  %v1020_v55 = vld [vmem:[%s1224_s9 + $0xa0] ss:$8 sps:$4 sm:$0xff]   ;;  %v1021_v56 = vld [vmem:[%s1224_s9 + $0xb4] ss:$8 sps:$4 sm:$0xff]   ;;  %v1023_v57 = vld [vmem:[%s1224_s9 + $0xb0] ss:$8 sps:$4 sm:$0xff]  }
  0x30   : > { %v1024_v58 = vld [vmem:[%s1224_s9 + $0xc4] ss:$8 sps:$4 sm:$0xff]   ;;  %v1026_v59 = vld [vmem:[%s1224_s9 + $0xc0] ss:$8 sps:$4 sm:$0xff]   ;;  %v1027_v60 = vld [vmem:[%s1224_s9 + $0xd4] ss:$8 sps:$4 sm:$0xff]  }
  0x31   : > { %v1029_v61 = vld [vmem:[%s1224_s9 + $0xd0] ss:$8 sps:$4 sm:$0xff]   ;;  %v1030_v62 = vld [vmem:[%s1224_s9 + $0xe4] ss:$8 sps:$4 sm:$0xff]   ;;  %v1032_v63 = vld [vmem:[%s1224_s9 + $0xe0] ss:$8 sps:$4 sm:$0xff]  }
  0x32   : > { %681 = vmatpush1.bf16.msra.mxu0 %v996_v39  ;;  %v1033_v0 = vld [vmem:[%s1224_s9 + $0xf4] ss:$8 sps:$4 sm:$0xff]   ;;  %v1035_v1 = vld [vmem:[%s1224_s9 + $0xf0] ss:$8 sps:$4 sm:$0xff]   ;;  %s1297_s10 = smov (!%p449_p9, %s905_s10), 3  ;;  %v730_v5 = vsub.s32 0, %v729_v4 }
  0x33   : > { %682 = vmatprep.subr.bf16.mxu0 %v997_v40  ;;  %s451_s13 = scalar_lea.vmem %s1287_s2, %s1297_s10  ;;  %s456_s21 = scalar_lea.vmem %s1288_s3, %s1297_s10  ;;  %v734_v7 = vsub.s32 1, %v729_v4 }
  0x34   : > { %v726_v6 = vld [vmem:[%s451_s13] sm:$0x3]  ;;  %s908_s17 = sshll.u32 %s1297_s10, 2 }
  0x35   : > { %v740_v8 = vld [vmem:[%s456_s21] sm:$0x3]  ;;  %v731_v9 = vrot.slane %v726_v6, %v730_v5  ;;  %v735_v10 = vrot.slane %v726_v6, %v734_v7  ;;  %s466_s25 = scalar_lea.vmem %s1289_s4, %s908_s17 }
  0x36   : > { %683 = vmatpush1.bf16.msra.mxu0 %v999_v41  ;;  %v745_v11 = vrot.slane %v740_v8, %v730_v5  ;;  %v749_v13 = vrot.slane %v740_v8, %v734_v7 }
  0x37   : > { %684 = vmatprep.subr.bf16.mxu0 %v1000_v42 }
  0x3a   : > { %685 = vmatpush1.bf16.msra.mxu0 %v1002_v43 }
  0x3b   : > { %686 = vmatprep.subr.bf16.mxu0 %v1003_v44 }
  0x3e   : > { %687 = vmatpush1.bf16.msra.mxu0 %v1005_v45 }
  0x3f   : > { %688 = vmatprep.subr.bf16.mxu0 %v1006_v46 }
  0x42   : > { %689 = vmatpush1.bf16.msra.mxu0 %v1008_v47 }
  0x43   : > { %690 = vmatprep.subr.bf16.mxu0 %v1009_v48 }
  0x46   : > { %691 = vmatpush1.bf16.msra.mxu0 %v1011_v49 }
  0x47   : > { %692 = vmatprep.subr.bf16.mxu0 %v1012_v50 }
  0x4a   : > { %693 = vmatpush1.bf16.msra.mxu0 %v1014_v51 }
  0x4b   : > { %694 = vmatprep.subr.bf16.mxu0 %v1015_v52 }
  0x4e   : > { %695 = vmatpush1.bf16.msra.mxu0 %v1017_v53 }
  0x4f   : > { %696 = vmatprep.subr.bf16.mxu0 %v1018_v54 }
  0x52   : > { %697 = vmatpush1.bf16.msra.mxu0 %v1020_v55 }
  0x53   : > { %698 = vmatprep.subr.bf16.mxu0 %v1021_v56 }
  0x56   : > { %699 = vmatpush1.bf16.msra.mxu0 %v1023_v57 }
  0x57   : > { %700 = vmatprep.subr.bf16.mxu0 %v1024_v58 }
  0x5a   : > { %701 = vmatpush1.bf16.msra.mxu0 %v1026_v59 }
  0x5b   : > { %702 = vmatprep.subr.bf16.mxu0 %v1027_v60 }
  0x5e   : > { %703 = vmatpush1.bf16.msra.mxu0 %v1029_v61 }
  0x5f   : > { %704 = vmatprep.subr.bf16.mxu0 %v1030_v62 }
  0x62   : > { %705 = vmatpush1.bf16.msra.mxu0 %v1032_v63 }
  0x63   : > { %706 = vmatprep.subr.bf16.mxu0 %v1033_v0 }
  0x66   : > { %707 = vmatpush1.bf16.msra.mxu0 %v1035_v1 }
  0x69   : > { %709 = vmatmul.mubr.bf16.vlgmr.msra.gmra.mrb[0].mxu0 %v909_v2 }
 0x13c   : > { %v710_v12 = vpop.f32.mrb[0].mxu0 }
 0x13d   : > { %v738_v14 = vmul.f32 %v731_v9, %v710_v12  ;;  %v712_v15 = vpop.f32.mrb[1].mxu0 }
 0x13e   : > { %v739_v16 = vmul.f32 %v735_v10, %v712_v15  ;;  %v714_v17 = vpop.f32.mrb[2].mxu0 }
 0x13f   : > { %v752_v18 = vadd.f32 %v745_v11, %v738_v14  ;;  %v715_v19 = vpop.f32.mrb[3].mxu0 }
 0x140   : > { %v753_v20 = vadd.f32 %v749_v13, %v739_v16 }
 0x142   : > { %v947_v21 = vpack.c.bf16 %v753_v20, %v752_v18 }
 0x144   : > { %762 = vst [vmem:[%s466_s25] sm:$0xff] %v947_v21 }
 0x145 PF: > { %s14_s19 = sadd.s32 1, %s1076_s19   ;;  %s1290_s15 = smov %s1064_s16 }
 0x146   : > { %p11_p10 = scmp.ge.s32.totalorder %s14_s19, 4   ;;  %s1291_s16 = smov %s1138_s23 }
 0x147   : > { %s1292_s17 = smov %s1072_s18  ;;  %s1293_s18 = smov %s1295_s20 }
 0x148   :  { %13 = sbr.rel (!%p11_p10) target bundleno = 3 (0x3), region = 126 }

// kernel: combined_model_forward.41
= control target key start
LH: loop header
LB: loop body
LE: loop exit
PB: predicated region body
PF: predicated region fallthrough
CT: control target
= control target key end

     0   :  { %s1691_s18 = smov 0   ;;  %s1693_s19 = smov 0   ;;  %s2017_s0 = inlined_call_operand.vmem [shape: bf16[8,4608], index: 0, kind: input, shape index: {}]   ;;  %s2018_s1 = inlined_call_operand.vmem [shape: bf16[4608,512], index: 1, kind: input, shape index: {}]   ;;  %s2019_s2 = inlined_call_operand.vmem [shape: f32[1,512], index: 2, kind: input, shape index: {}]   ;;  %s2020_s3 = inlined_call_operand.vmem [shape: f32[1,512], index: 3, kind: input, shape index: {}]   ;;  %s2021_s4 = inlined_call_operand.vmem [shape: bf16[8,512], index: 4, kind: input, shape index: {}]   ;;  %s2022_s5 = inlined_call_operand.vmem [shape: bf16[8,512], index: 5, kind: output, shape index: {}]  }
   0x1   :  { %s1695_s20 = smov 0   ;;  %s1697_s21 = smov 0  }
   0x2   :  { %s1699_s22 = smov 0   ;;  %s1701_s23 = smov 0  }
   0x3   :  { %s1703_s24 = smov 0  }
   0x4 LB: > { %s27_s25 = sadd.s32 1, %s1650_s22  ;;  %s30_s26 = sadd.s32 1, %s1654_s23  ;;  %s1658_s24 = sphi %s1703_s24, %s15_s24   ;;  %s1654_s23 = sphi %s1701_s23, %s2028_s23   ;;  %s1650_s22 = sphi %s1699_s22, %s2027_s22   ;;  %s1646_s21 = sphi %s1697_s21, %s2026_s21   ;;  %s1642_s20 = sphi %s1695_s20, %s2025_s20   ;;  %s1638_s19 = sphi %s1693_s19, %s2024_s19   ;;  %s1634_s18 = sphi %s1691_s18, %s2023_s18  }
   0x5   : > { %p28_p0 = scmp.ge.s32.totalorder %s27_s25, 9  ;;  %p78_p1 = scmp.ne.s32.totalorder %s1638_s19, %s1634_s18 }
   0x6   : > { %p79_p2 = scmp.eq.s32.totalorder %s1658_s24, 0  ;;  %s71_s30 = sadd.s32 1, %s1638_s19 }
   0x7   : > { %s2030_s25 = smov (%p28_p0, %s27_s25), 0  ;;  %s2032_s26 = smov (!%p28_p0, %s30_s26), %s1654_s23 }
   0x8   : > { %p80_p3 = por %p79_p2, %p78_p1  ;;  %p32_p4 = scmp.ge.s32.totalorder %s2032_s26, 2 }
   0x9   : > { %s66_s27 = ssub.s32 %s1650_s22, %s2030_s25  ;;  %p1356_p6 = scmp.ge.s32.totalorder %s1658_s24, 18 }
   0xa   : > { %s2034_s26 = smov (%p32_p4, %s2032_s26), 0 }
   0xb   : > { %s67_s28 = ssub.s32 %s1654_s23, %s2034_s26  ;;  %212 = sbr.rel (%p1356_p6) target bundleno = 57 (0x39), region = 16 }
   0xc   : > { %s68_s29 = sor.u32 %s67_s28, %s66_s27 }
   0xd   : > { %p69_p5 = scmp.eq.s32.totalorder %s68_s29, 0 }
   0xf   : > { %s1742_s6 = scalar_select %p69_p5, %s1638_s19, %s71_s30  }
  0x12   : > { %228 = sbr.rel (!%p80_p3) target bundleno = 57 (0x39), region = 24  ;;  %s230_s7 = sand.u32 (%p80_p3), 1, %s1638_s19  }
  0x13   : > { %s1359_s8 = sshll.u32 (%p80_p3), %s1654_s23, 1  ;;  %s1357_s9 = sshll.u32 (%p80_p3), %s230_s7, 9 }
  0x14   : > { %s1445_s10 = sshll.u32 (%p80_p3), %s1650_s22, 8  ;;  %s1756_s16 = scalar_lea.vmem (%p80_p3), [#allocation3], %s1357_s9 }
  0x15   : > { %s236_s11 = sadd.s32 (%p80_p3), %s1445_s10, %s1359_s8 }
  0x16   : > { %s1361_s12 = sshll.u32 (%p80_p3), %s236_s11, 2 }
  0x17   : > { %s1751_s15 = scalar_lea.vmem (%p80_p3), %s2018_s1, %s1361_s12 }
  0x18   : > { %v392_v0 = vld [vmem:[%s1751_s15] sm:$0xff] (%p80_p3)  ;;  %v394_v1 = vld [vmem:[%s1751_s15 + $0x10] sm:$0xff] (%p80_p3) }
  0x19   : > { %v396_v2 = vld [vmem:[%s1751_s15 + $0x20] sm:$0xff]  ;;  %393 = vst [vmem:[%s1756_s16] sm:$0xff] %v392_v0  ;;  %395 = vst [vmem:[%s1756_s16 + $0x8] sm:$0xff] %v394_v1  ;;  %v398_v3 = vld [vmem:[%s1751_s15 + $0x30] sm:$0xff] }
  0x1a   : > { %397 = vst [vmem:[%s1756_s16 + $0x10] sm:$0xff] %v396_v2  ;;  %v400_v4 = vld [vmem:[%s1751_s15 + $0x40] sm:$0xff]  ;;  %v402_v5 = vld [vmem:[%s1751_s15 + $0x50] sm:$0xff]  ;;  %399 = vst [vmem:[%s1756_s16 + $0x18] sm:$0xff] %v398_v3 }
  0x1b   : > { %401 = vst [vmem:[%s1756_s16 + $0x20] sm:$0xff] %v400_v4  ;;  %403 = vst [vmem:[%s1756_s16 + $0x28] sm:$0xff] %v402_v5  ;;  %v404_v6 = vld [vmem:[%s1751_s15 + $0x60] sm:$0xff]  ;;  %v406_v7 = vld [vmem:[%s1751_s15 + $0x70] sm:$0xff] }
  0x1c   : > { %v408_v8 = vld [vmem:[%s1751_s15 + $0x80] sm:$0xff]  ;;  %405 = vst [vmem:[%s1756_s16 + $0x30] sm:$0xff] %v404_v6  ;;  %407 = vst [vmem:[%s1756_s16 + $0x38] sm:$0xff] %v406_v7  ;;  %v410_v9 = vld [vmem:[%s1751_s15 + $0x90] sm:$0xff] }
  0x1d   : > { %409 = vst [vmem:[%s1756_s16 + $0x40] sm:$0xff] %v408_v8  ;;  %v412_v10 = vld [vmem:[%s1751_s15 + $0xa0] sm:$0xff]  ;;  %v414_v11 = vld [vmem:[%s1751_s15 + $0xb0] sm:$0xff]  ;;  %411 = vst [vmem:[%s1756_s16 + $0x48] sm:$0xff] %v410_v9 }
  0x1e   : > { %413 = vst [vmem:[%s1756_s16 + $0x50] sm:$0xff] %v412_v10  ;;  %415 = vst [vmem:[%s1756_s16 + $0x58] sm:$0xff] %v414_v11  ;;  %v416_v12 = vld [vmem:[%s1751_s15 + $0xc0] sm:$0xff]  ;;  %v418_v13 = vld [vmem:[%s1751_s15 + $0xd0] sm:$0xff] }
  0x1f   : > { %v420_v14 = vld [vmem:[%s1751_s15 + $0xe0] sm:$0xff]  ;;  %417 = vst [vmem:[%s1756_s16 + $0x60] sm:$0xff] %v416_v12  ;;  %419 = vst [vmem:[%s1756_s16 + $0x68] sm:$0xff] %v418_v13  ;;  %v422_v15 = vld [vmem:[%s1751_s15 + $0xf0] sm:$0xff] }
  0x20   : > { %421 = vst [vmem:[%s1756_s16 + $0x70] sm:$0xff] %v420_v14  ;;  %v424_v16 = vld [vmem:[%s1751_s15 + $0x100] sm:$0xff]  ;;  %v426_v17 = vld [vmem:[%s1751_s15 + $0x110] sm:$0xff]  ;;  %423 = vst [vmem:[%s1756_s16 + $0x78] sm:$0xff] %v422_v15 }
  0x21   : > { %425 = vst [vmem:[%s1756_s16 + $0x80] sm:$0xff] %v424_v16  ;;  %427 = vst [vmem:[%s1756_s16 + $0x88] sm:$0xff] %v426_v17  ;;  %v428_v18 = vld [vmem:[%s1751_s15 + $0x120] sm:$0xff]  ;;  %v430_v19 = vld [vmem:[%s1751_s15 + $0x130] sm:$0xff] }
  0x22   : > { %v432_v20 = vld [vmem:[%s1751_s15 + $0x140] sm:$0xff]  ;;  %429 = vst [vmem:[%s1756_s16 + $0x90] sm:$0xff] %v428_v18  ;;  %431 = vst [vmem:[%s1756_s16 + $0x98] sm:$0xff] %v430_v19  ;;  %v434_v21 = vld [vmem:[%s1751_s15 + $0x150] sm:$0xff] }
  0x23   : > { %433 = vst [vmem:[%s1756_s16 + $0xa0] sm:$0xff] %v432_v20  ;;  %v436_v22 = vld [vmem:[%s1751_s15 + $0x160] sm:$0xff]  ;;  %v438_v23 = vld [vmem:[%s1751_s15 + $0x170] sm:$0xff]  ;;  %435 = vst [vmem:[%s1756_s16 + $0xa8] sm:$0xff] %v434_v21 }
  0x24   : > { %437 = vst [vmem:[%s1756_s16 + $0xb0] sm:$0xff] %v436_v22  ;;  %439 = vst [vmem:[%s1756_s16 + $0xb8] sm:$0xff] %v438_v23  ;;  %v440_v24 = vld [vmem:[%s1751_s15 + $0x180] sm:$0xff]  ;;  %v442_v25 = vld [vmem:[%s1751_s15 + $0x190] sm:$0xff] }
  0x25   : > { %v444_v26 = vld [vmem:[%s1751_s15 + $0x1a0] sm:$0xff]  ;;  %441 = vst [vmem:[%s1756_s16 + $0xc0] sm:$0xff] %v440_v24  ;;  %443 = vst [vmem:[%s1756_s16 + $0xc8] sm:$0xff] %v442_v25  ;;  %v446_v27 = vld [vmem:[%s1751_s15 + $0x1b0] sm:$0xff] }
  0x26   : > { %445 = vst [vmem:[%s1756_s16 + $0xd0] sm:$0xff] %v444_v26  ;;  %v448_v28 = vld [vmem:[%s1751_s15 + $0x1c0] sm:$0xff]  ;;  %v450_v29 = vld [vmem:[%s1751_s15 + $0x1d0] sm:$0xff]  ;;  %447 = vst [vmem:[%s1756_s16 + $0xd8] sm:$0xff] %v446_v27 }
  0x27   : > { %449 = vst [vmem:[%s1756_s16 + $0xe0] sm:$0xff] %v448_v28  ;;  %451 = vst [vmem:[%s1756_s16 + $0xe8] sm:$0xff] %v450_v29  ;;  %v452_v30 = vld [vmem:[%s1751_s15 + $0x1e0] sm:$0xff]  ;;  %v454_v31 = vld [vmem:[%s1751_s15 + $0x1f0] sm:$0xff] }
  0x28   : > { %v456_v32 = vld [vmem:[%s1751_s15 + $0x200] sm:$0xff]  ;;  %453 = vst [vmem:[%s1756_s16 + $0xf0] sm:$0xff] %v452_v30  ;;  %455 = vst [vmem:[%s1756_s16 + $0xf8] sm:$0xff] %v454_v31  ;;  %v458_v33 = vld [vmem:[%s1751_s15 + $0x210] sm:$0xff] }
  0x29   : > { %457 = vst [vmem:[%s1756_s16 + $0x100] sm:$0xff] %v456_v32  ;;  %v460_v34 = vld [vmem:[%s1751_s15 + $0x220] sm:$0xff]  ;;  %v462_v35 = vld [vmem:[%s1751_s15 + $0x230] sm:$0xff]  ;;  %459 = vst [vmem:[%s1756_s16 + $0x108] sm:$0xff] %v458_v33 }
  0x2a   : > { %461 = vst [vmem:[%s1756_s16 + $0x110] sm:$0xff] %v460_v34  ;;  %463 = vst [vmem:[%s1756_s16 + $0x118] sm:$0xff] %v462_v35  ;;  %v464_v36 = vld [vmem:[%s1751_s15 + $0x240] sm:$0xff]  ;;  %v466_v37 = vld [vmem:[%s1751_s15 + $0x250] sm:$0xff] }
  0x2b   : > { %v468_v38 = vld [vmem:[%s1751_s15 + $0x260] sm:$0xff]  ;;  %465 = vst [vmem:[%s1756_s16 + $0x120] sm:$0xff] %v464_v36  ;;  %467 = vst [vmem:[%s1756_s16 + $0x128] sm:$0xff] %v466_v37  ;;  %v470_v39 = vld [vmem:[%s1751_s15 + $0x270] sm:$0xff] }
  0x2c   : > { %469 = vst [vmem:[%s1756_s16 + $0x130] sm:$0xff] %v468_v38  ;;  %v472_v40 = vld [vmem:[%s1751_s15 + $0x280] sm:$0xff]  ;;  %v474_v41 = vld [vmem:[%s1751_s15 + $0x290] sm:$0xff]  ;;  %471 = vst [vmem:[%s1756_s16 + $0x138] sm:$0xff] %v470_v39 }
  0x2d   : > { %473 = vst [vmem:[%s1756_s16 + $0x140] sm:$0xff] %v472_v40  ;;  %475 = vst [vmem:[%s1756_s16 + $0x148] sm:$0xff] %v474_v41  ;;  %v476_v42 = vld [vmem:[%s1751_s15 + $0x2a0] sm:$0xff]  ;;  %v478_v43 = vld [vmem:[%s1751_s15 + $0x2b0] sm:$0xff] }
  0x2e   : > { %v480_v44 = vld [vmem:[%s1751_s15 + $0x2c0] sm:$0xff]  ;;  %477 = vst [vmem:[%s1756_s16 + $0x150] sm:$0xff] %v476_v42  ;;  %479 = vst [vmem:[%s1756_s16 + $0x158] sm:$0xff] %v478_v43  ;;  %v482_v45 = vld [vmem:[%s1751_s15 + $0x2d0] sm:$0xff] }
  0x2f   : > { %481 = vst [vmem:[%s1756_s16 + $0x160] sm:$0xff] %v480_v44  ;;  %v484_v46 = vld [vmem:[%s1751_s15 + $0x2e0] sm:$0xff]  ;;  %v486_v47 = vld [vmem:[%s1751_s15 + $0x2f0] sm:$0xff]  ;;  %483 = vst [vmem:[%s1756_s16 + $0x168] sm:$0xff] %v482_v45 }
  0x30   : > { %485 = vst [vmem:[%s1756_s16 + $0x170] sm:$0xff] %v484_v46  ;;  %487 = vst [vmem:[%s1756_s16 + $0x178] sm:$0xff] %v486_v47  ;;  %v488_v48 = vld [vmem:[%s1751_s15 + $0x300] sm:$0xff]  ;;  %v490_v49 = vld [vmem:[%s1751_s15 + $0x310] sm:$0xff] }
  0x31   : > { %v492_v50 = vld [vmem:[%s1751_s15 + $0x320] sm:$0xff]  ;;  %489 = vst [vmem:[%s1756_s16 + $0x180] sm:$0xff] %v488_v48  ;;  %491 = vst [vmem:[%s1756_s16 + $0x188] sm:$0xff] %v490_v49  ;;  %v494_v51 = vld [vmem:[%s1751_s15 + $0x330] sm:$0xff] }
  0x32   : > { %493 = vst [vmem:[%s1756_s16 + $0x190] sm:$0xff] %v492_v50  ;;  %v496_v52 = vld [vmem:[%s1751_s15 + $0x340] sm:$0xff]  ;;  %v498_v53 = vld [vmem:[%s1751_s15 + $0x350] sm:$0xff]  ;;  %495 = vst [vmem:[%s1756_s16 + $0x198] sm:$0xff] %v494_v51 }
  0x33   : > { %497 = vst [vmem:[%s1756_s16 + $0x1a0] sm:$0xff] %v496_v52  ;;  %499 = vst [vmem:[%s1756_s16 + $0x1a8] sm:$0xff] %v498_v53  ;;  %v500_v54 = vld [vmem:[%s1751_s15 + $0x360] sm:$0xff]  ;;  %v502_v55 = vld [vmem:[%s1751_s15 + $0x370] sm:$0xff] }
  0x34   : > { %v504_v56 = vld [vmem:[%s1751_s15 + $0x380] sm:$0xff]  ;;  %501 = vst [vmem:[%s1756_s16 + $0x1b0] sm:$0xff] %v500_v54  ;;  %503 = vst [vmem:[%s1756_s16 + $0x1b8] sm:$0xff] %v502_v55  ;;  %v506_v57 = vld [vmem:[%s1751_s15 + $0x390] sm:$0xff] }
  0x35   : > { %505 = vst [vmem:[%s1756_s16 + $0x1c0] sm:$0xff] %v504_v56  ;;  %v508_v58 = vld [vmem:[%s1751_s15 + $0x3a0] sm:$0xff]  ;;  %v510_v59 = vld [vmem:[%s1751_s15 + $0x3b0] sm:$0xff]  ;;  %507 = vst [vmem:[%s1756_s16 + $0x1c8] sm:$0xff] %v506_v57 }
  0x36   : > { %509 = vst [vmem:[%s1756_s16 + $0x1d0] sm:$0xff] %v508_v58  ;;  %511 = vst [vmem:[%s1756_s16 + $0x1d8] sm:$0xff] %v510_v59  ;;  %v512_v60 = vld [vmem:[%s1751_s15 + $0x3c0] sm:$0xff]  ;;  %v514_v61 = vld [vmem:[%s1751_s15 + $0x3d0] sm:$0xff] }
  0x37   : > { %v516_v62 = vld [vmem:[%s1751_s15 + $0x3e0] sm:$0xff]  ;;  %513 = vst [vmem:[%s1756_s16 + $0x1e0] sm:$0xff] %v512_v60  ;;  %515 = vst [vmem:[%s1756_s16 + $0x1e8] sm:$0xff] %v514_v61  ;;  %v518_v63 = vld [vmem:[%s1751_s15 + $0x3f0] sm:$0xff] }
  0x38   : > { %517 = vst [vmem:[%s1756_s16 + $0x1f0] sm:$0xff] %v516_v62  ;;  %519 = vst [vmem:[%s1756_s16 + $0x1f8] sm:$0xff] %v518_v63 }
  0x39 PF: > { %p1362_p7 = scmp.ge.s32.totalorder %s1658_s24, 1  ;;  %p553_p8 = scmp.lt.s32.totalorder %s1658_s24, 19 }
  0x3b   : > { %p554_p9 = pnand %p1362_p7, %p553_p8 }
  0x3c   : > { %s560_s17 = sand.u32 (!%p554_p9), 1, %s1634_s18   ;;  %s1364_s27 = sshll.u32 (!%p554_p9), %s1642_s20, 2 }
  0x3d   : > { %557 = sbr.rel (%p554_p9) target bundleno = 380 (0x17c), region = 74  ;;  %s1363_s28 = sshll.u32 (!%p554_p9), %s560_s17, 9 }
  0x3e   : > { %p620_p10 = scmp.lt.s32.totalorder (!%p554_p9), %s1364_s27, 35  ;;  %s1366_s29 = sshll.u32 (!%p554_p9), %s1646_s21, 1 }
  0x3f   : > { %p630_p11 = scmp.lt.s32.totalorder (!%p554_p9), %s1366_s29, 3  ;;  %s1914_s8 = scalar_lea.vmem (!%p554_p9), [#allocation3], %s1363_s28 }
  0x40   : > { %p1372_p12 = scmp.ne.s32.totalorder (!%p554_p9), %s1642_s20, 0 }
  0x44   : > { %s2036_s27 = smov (!%p620_p10, %s1364_s27), 35  ;;  %s2038_s29 = smov (!%p630_p11, %s1366_s29), 3 }
  0x45   : > { %s1365_s30 = sshll.u32 %s2036_s27, 2  ;;  %s632_s18 = scalar_lea.vmem %s2019_s2, %s2038_s29  ;;  %v1660_v0 = vmov (!%p1372_p12), 0.0  }
  0x46   : > { %s1891_s9 = scalar_lea.vmem %s2017_s0, %s1365_s30  ;;  %s637_s21 = scalar_lea.vmem %s2020_s3, %s2038_s29  ;;  %663 = vst [vmem:[#allocation2] sm:$0xff] (!%p1372_p12), %v1660_v0  ;;  %664 = vst [vmem:[#allocation2 + $0x8] sm:$0xff] (!%p1372_p12), %v1660_v0 }
  0x47   : > { %s1369_s14 = sshll.u32 %s2038_s29, 2  ;;  %662 = sbr.rel (%p1372_p12) target bundleno = 78 (0x4e), region = 82 }
  0x48   : > { %s1907_s17 = scalar_lea.vmem %s2021_s4, %s1369_s14  ;;  %s1912_s7 = scalar_lea.vmem %s2022_s5, %s1369_s14 }
  0x4e PF: > { %v1504_v1 = vld [vmem:[%s1914_s8 + $0x4] ss:$8 sps:$4 sm:$0xff]   ;;  %v1508_v3 = vld [vmem:[%s1914_s8] ss:$8 sps:$4 sm:$0xff]   ;;  %v1510_v5 = vld [vmem:[%s1914_s8 + $0x14] ss:$8 sps:$4 sm:$0xff]  }
  0x4f   : > { %v1506_v2 = vld [vmem:[%s1914_s8 + $0x104] ss:$8 sps:$4 sm:$0xff]   ;;  %1067 = vmatprep.subr.bf16.mxu0 %v1504_v1  ;;  %v1509_v4 = vld [vmem:[%s1914_s8 + $0x100] ss:$8 sps:$4 sm:$0xff]   ;;  %v1512_v6 = vld [vmem:[%s1914_s8 + $0x114] ss:$8 sps:$4 sm:$0xff]  }
  0x50   : > { %1108 = vmatprep.subr.bf16.mxu1 %v1506_v2  ;;  %1068 = vmatpush1.bf16.msra.mxu0 %v1508_v3  ;;  %v1514_v7 = vld [vmem:[%s1914_s8 + $0x10] ss:$8 sps:$4 sm:$0xff]   ;;  %v1516_v9 = vld [vmem:[%s1914_s8 + $0x24] ss:$8 sps:$4 sm:$0xff]   ;;  %v1520_v11 = vld [vmem:[%s1914_s8 + $0x20] ss:$8 sps:$4 sm:$0xff]  }
  0x51   : > { %1109 = vmatpush1.bf16.msra.mxu1 %v1509_v4  ;;  %1069 = vmatprep.subr.bf16.mxu0 %v1510_v5  ;;  %v1515_v8 = vld [vmem:[%s1914_s8 + $0x110] ss:$8 sps:$4 sm:$0xff]   ;;  %v1518_v10 = vld [vmem:[%s1914_s8 + $0x124] ss:$8 sps:$4 sm:$0xff]   ;;  %v1521_v12 = vld [vmem:[%s1914_s8 + $0x120] ss:$8 sps:$4 sm:$0xff]  }
  0x52   : > { %1110 = vmatprep.subr.bf16.mxu1 %v1512_v6  ;;  %v1522_v13 = vld [vmem:[%s1914_s8 + $0x34] ss:$8 sps:$4 sm:$0xff]   ;;  %v1526_v15 = vld [vmem:[%s1914_s8 + $0x30] ss:$8 sps:$4 sm:$0xff]   ;;  %v1528_v17 = vld [vmem:[%s1914_s8 + $0x44] ss:$8 sps:$4 sm:$0xff]  }
  0x53   : > { %v1524_v14 = vld [vmem:[%s1914_s8 + $0x134] ss:$8 sps:$4 sm:$0xff]   ;;  %v1527_v16 = vld [vmem:[%s1914_s8 + $0x130] ss:$8 sps:$4 sm:$0xff]   ;;  %v1530_v18 = vld [vmem:[%s1914_s8 + $0x144] ss:$8 sps:$4 sm:$0xff]  }
  0x54   : > { %1070 = vmatpush1.bf16.msra.mxu0 %v1514_v7  ;;  %v1532_v19 = vld [vmem:[%s1914_s8 + $0x40] ss:$8 sps:$4 sm:$0xff]   ;;  %v1534_v21 = vld [vmem:[%s1914_s8 + $0x54] ss:$8 sps:$4 sm:$0xff]   ;;  %v1538_v23 = vld [vmem:[%s1914_s8 + $0x50] ss:$8 sps:$4 sm:$0xff]  }
  0x55   : > { %1111 = vmatpush1.bf16.msra.mxu1 %v1515_v8  ;;  %1071 = vmatprep.subr.bf16.mxu0 %v1516_v9  ;;  %v1533_v20 = vld [vmem:[%s1914_s8 + $0x140] ss:$8 sps:$4 sm:$0xff]   ;;  %v1536_v22 = vld [vmem:[%s1914_s8 + $0x154] ss:$8 sps:$4 sm:$0xff]   ;;  %v1539_v24 = vld [vmem:[%s1914_s8 + $0x150] ss:$8 sps:$4 sm:$0xff]  }
  0x56   : > { %1112 = vmatprep.subr.bf16.mxu1 %v1518_v10  ;;  %v1540_v25 = vld [vmem:[%s1914_s8 + $0x64] ss:$8 sps:$4 sm:$0xff]   ;;  %v1544_v27 = vld [vmem:[%s1914_s8 + $0x60] ss:$8 sps:$4 sm:$0xff]   ;;  %v1546_v29 = vld [vmem:[%s1914_s8 + $0x74] ss:$8 sps:$4 sm:$0xff]  }
  0x57   : > { %v1542_v26 = vld [vmem:[%s1914_s8 + $0x164] ss:$8 sps:$4 sm:$0xff]   ;;  %v1545_v28 = vld [vmem:[%s1914_s8 + $0x160] ss:$8 sps:$4 sm:$0xff]   ;;  %v1548_v30 = vld [vmem:[%s1914_s8 + $0x174] ss:$8 sps:$4 sm:$0xff]  }
  0x58   : > { %1072 = vmatpush1.bf16.msra.mxu0 %v1520_v11  ;;  %v1550_v31 = vld [vmem:[%s1914_s8 + $0x70] ss:$8 sps:$4 sm:$0xff]   ;;  %v1552_v33 = vld [vmem:[%s1914_s8 + $0x84] ss:$8 sps:$4 sm:$0xff]   ;;  %v1556_v35 = vld [vmem:[%s1914_s8 + $0x80] ss:$8 sps:$4 sm:$0xff]  }
  0x59   : > { %1113 = vmatpush1.bf16.msra.mxu1 %v1521_v12  ;;  %1073 = vmatprep.subr.bf16.mxu0 %v1522_v13  ;;  %v1551_v32 = vld [vmem:[%s1914_s8 + $0x170] ss:$8 sps:$4 sm:$0xff]   ;;  %v1554_v34 = vld [vmem:[%s1914_s8 + $0x184] ss:$8 sps:$4 sm:$0xff]   ;;  %v1557_v36 = vld [vmem:[%s1914_s8 + $0x180] ss:$8 sps:$4 sm:$0xff]  }
  0x5a   : > { %1114 = vmatprep.subr.bf16.mxu1 %v1524_v14  ;;  %v1558_v37 = vld [vmem:[%s1914_s8 + $0x94] ss:$8 sps:$4 sm:$0xff]   ;;  %v1562_v39 = vld [vmem:[%s1914_s8 + $0x90] ss:$8 sps:$4 sm:$0xff]   ;;  %v1564_v41 = vld [vmem:[%s1914_s8 + $0xa4] ss:$8 sps:$4 sm:$0xff]  }
  0x5b   : > { %v1560_v38 = vld [vmem:[%s1914_s8 + $0x194] ss:$8 sps:$4 sm:$0xff]   ;;  %v1563_v40 = vld [vmem:[%s1914_s8 + $0x190] ss:$8 sps:$4 sm:$0xff]   ;;  %v1566_v42 = vld [vmem:[%s1914_s8 + $0x1a4] ss:$8 sps:$4 sm:$0xff]  }
  0x5c   : > { %1074 = vmatpush1.bf16.msra.mxu0 %v1526_v15  ;;  %v1568_v43 = vld [vmem:[%s1914_s8 + $0xa0] ss:$8 sps:$4 sm:$0xff]   ;;  %v1570_v45 = vld [vmem:[%s1914_s8 + $0xb4] ss:$8 sps:$4 sm:$0xff]   ;;  %v1574_v50 = vld [vmem:[%s1914_s8 + $0xb0] ss:$8 sps:$4 sm:$0xff]  }
  0x5d   : > { %1115 = vmatpush1.bf16.msra.mxu1 %v1527_v16  ;;  %1075 = vmatprep.subr.bf16.mxu0 %v1528_v17  ;;  %v1569_v44 = vld [vmem:[%s1914_s8 + $0x1a0] ss:$8 sps:$4 sm:$0xff]   ;;  %v1572_v46 = vld [vmem:[%s1914_s8 + $0x1b4] ss:$8 sps:$4 sm:$0xff]   ;;  %v1575_v51 = vld [vmem:[%s1914_s8 + $0x1b0] ss:$8 sps:$4 sm:$0xff]  }
  0x5e   : > { %1116 = vmatprep.subr.bf16.mxu1 %v1530_v18  ;;  %v667_v47 = vld [vmem:[%s1891_s9] sm:$0xff]  ;;  %v668_v49 = vld [vmem:[%s1891_s9 + $0x8] sm:$0xff]  ;;  %v1576_v53 = vld [vmem:[%s1914_s8 + $0xc4] ss:$8 sps:$4 sm:$0xff]   ;;  %p1441_p13 = scmp.ne.s32.totalorder %s1642_s20, 8 }
  0x5f   : > { %v1374_v48 = vcombine.high %v667_v47, %v667_v47  ;;  %v1376_v52 = vcombine.high %v668_v49, %v668_v49  ;;  %v1578_v54 = vld [vmem:[%s1914_s8 + $0x1c4] ss:$8 sps:$4 sm:$0xff]   ;;  %v1580_v55 = vld [vmem:[%s1914_s8 + $0xc0] ss:$8 sps:$4 sm:$0xff]   ;;  %v1582_v57 = vld [vmem:[%s1914_s8 + $0xd4] ss:$8 sps:$4 sm:$0xff]   ;;  %v1373_v5 = vcombine.low %v667_v47, %v667_v47  ;;  %v1375_v6 = vcombine.low %v668_v49, %v668_v49 }
  0x60   : > { %1076 = vmatpush1.bf16.msra.mxu0 %v1532_v19  ;;  %v1581_v56 = vld [vmem:[%s1914_s8 + $0x1c0] ss:$8 sps:$4 sm:$0xff]   ;;  %v1584_v58 = vld [vmem:[%s1914_s8 + $0x1d4] ss:$8 sps:$4 sm:$0xff]   ;;  %v1586_v59 = vld [vmem:[%s1914_s8 + $0xd0] ss:$8 sps:$4 sm:$0xff]  }
  0x61   : > { %1117 = vmatpush1.bf16.msra.mxu1 %v1533_v20  ;;  %1077 = vmatprep.subr.bf16.mxu0 %v1534_v21  ;;  %v1587_v60 = vld [vmem:[%s1914_s8 + $0x1d0] ss:$8 sps:$4 sm:$0xff]   ;;  %v1588_v61 = vld [vmem:[%s1914_s8 + $0xe4] ss:$8 sps:$4 sm:$0xff]   ;;  %v1592_v63 = vld [vmem:[%s1914_s8 + $0xe0] ss:$8 sps:$4 sm:$0xff]   ;;  %v1161_v21 = vlaneseq (!%p1441_p13) }
  0x62   : > { %1118 = vmatprep.subr.bf16.mxu1 %v1536_v22  ;;  %1099 = vmatprep.mubr.bf16.mxu0 %v1374_v48  ;;  %v1590_v62 = vld [vmem:[%s1914_s8 + $0x1e4] ss:$8 sps:$4 sm:$0xff]   ;;  %v1593_v0 = vld [vmem:[%s1914_s8 + $0x1e0] ss:$8 sps:$4 sm:$0xff]   ;;  %v1594_v1 = vld [vmem:[%s1914_s8 + $0xf4] ss:$8 sps:$4 sm:$0xff]  }
  0x63   : > { %1140 = vmatprep.mubr.bf16.mxu1 %v1376_v52  ;;  %v1596_v2 = vld [vmem:[%s1914_s8 + $0x1f4] ss:$8 sps:$4 sm:$0xff]   ;;  %v1598_v3 = vld [vmem:[%s1914_s8 + $0xf0] ss:$8 sps:$4 sm:$0xff]   ;;  %v1162_v22 = vshrl.u32 (!%p1441_p13), %v1161_v21, 7 }
  0x64   : > { %1078 = vmatpush1.bf16.msra.mxu0 %v1538_v23  ;;  %v1599_v4 = vld [vmem:[%s1914_s8 + $0x1f0] ss:$8 sps:$4 sm:$0xff]  }
  0x65   : > { %1119 = vmatpush1.bf16.msra.mxu1 %v1539_v24  ;;  %1079 = vmatprep.subr.bf16.mxu0 %v1540_v25  ;;  %v665_v8 = vld [vmem:[#allocation2] sm:$0xff]  ;;  %v666_v12 = vld [vmem:[#allocation2 + $0x8] sm:$0xff]  ;;  %v1163_v25 = vsub.s32 (!%p1441_p13), 0, %v1162_v22 }
  0x66   : > { %1120 = vmatprep.subr.bf16.mxu1 %v1542_v26  ;;  %v1159_v23 = vld [vmem:[%s632_s18] sm:$0x3] (!%p1441_p13)  ;;  %v1167_v26 = vsub.s32 (!%p1441_p13), 1, %v1162_v22 }
  0x67   : > { %v1173_v24 = vld [vmem:[%s637_s21] sm:$0x3] (!%p1441_p13) }
  0x68   : > { %1080 = vmatpush1.bf16.msra.mxu0 %v1544_v27 }
  0x69   : > { %1121 = vmatpush1.bf16.msra.mxu1 %v1545_v28  ;;  %1081 = vmatprep.subr.bf16.mxu0 %v1546_v29  ;;  %v1187_v29 = vld [vmem:[%s1907_s17] sm:$0xff] (!%p1441_p13) }
  0x6a   : > { %1122 = vmatprep.subr.bf16.mxu1 %v1548_v30  ;;  %v1164_v30 = vrot.slane (!%p1441_p13), %v1159_v23, %v1163_v25 }
  0x6c   : > { %1082 = vmatpush1.bf16.msra.mxu0 %v1550_v31  ;;  %v1168_v31 = vrot.slane (!%p1441_p13), %v1159_v23, %v1167_v26 }
  0x6d   : > { %1123 = vmatpush1.bf16.msra.mxu1 %v1551_v32  ;;  %1083 = vmatprep.subr.bf16.mxu0 %v1552_v33  ;;  %v1178_v32 = vrot.slane (!%p1441_p13), %v1173_v24, %v1163_v25  ;;  %v1182_v33 = vrot.slane (!%p1441_p13), %v1173_v24, %v1167_v26 }
  0x6e   : > { %1124 = vmatprep.subr.bf16.mxu1 %v1554_v34 }
  0x70   : > { %1084 = vmatpush1.bf16.msra.mxu0 %v1556_v35 }
  0x71   : > { %1125 = vmatpush1.bf16.msra.mxu1 %v1557_v36  ;;  %1085 = vmatprep.subr.bf16.mxu0 %v1558_v37  ;;  %v1188_v36 = vunpack.c.l.bf16 (!%p1441_p13), %v1187_v29  ;;  %v1189_v37 = vunpack.c.h.bf16 (!%p1441_p13), %v1187_v29 }
  0x72   : > { %1126 = vmatprep.subr.bf16.mxu1 %v1560_v38 }
  0x74   : > { %1086 = vmatpush1.bf16.msra.mxu0 %v1562_v39 }
  0x75   : > { %1127 = vmatpush1.bf16.msra.mxu1 %v1563_v40  ;;  %1087 = vmatprep.subr.bf16.mxu0 %v1564_v41 }
  0x76   : > { %1128 = vmatprep.subr.bf16.mxu1 %v1566_v42 }
  0x78   : > { %1088 = vmatpush1.bf16.msra.mxu0 %v1568_v43 }
  0x79   : > { %1129 = vmatpush1.bf16.msra.mxu1 %v1569_v44  ;;  %1089 = vmatprep.subr.bf16.mxu0 %v1570_v45 }
  0x7a   : > { %1130 = vmatprep.subr.bf16.mxu1 %v1572_v46 }
  0x7c   : > { %1090 = vmatpush1.bf16.msra.mxu0 %v1574_v50 }
  0x7d   : > { %1131 = vmatpush1.bf16.msra.mxu1 %v1575_v51  ;;  %1091 = vmatprep.subr.bf16.mxu0 %v1576_v53 }
  0x7e   : > { %1132 = vmatprep.subr.bf16.mxu1 %v1578_v54 }
  0x80   : > { %1092 = vmatpush1.bf16.msra.mxu0 %v1580_v55 }
  0x81   : > { %1133 = vmatpush1.bf16.msra.mxu1 %v1581_v56  ;;  %1093 = vmatprep.subr.bf16.mxu0 %v1582_v57 }
  0x82   : > { %1134 = vmatprep.subr.bf16.mxu1 %v1584_v58 }
  0x84   : > { %1094 = vmatpush1.bf16.msra.mxu0 %v1586_v59 }
  0x85   : > { %1135 = vmatpush1.bf16.msra.mxu1 %v1587_v60  ;;  %1095 = vmatprep.subr.bf16.mxu0 %v1588_v61 }
  0x86   : > { %1136 = vmatprep.subr.bf16.mxu1 %v1590_v62 }
  0x88   : > { %1096 = vmatpush1.bf16.msra.mxu0 %v1592_v63 }
  0x89   : > { %1137 = vmatpush1.bf16.msra.mxu1 %v1593_v0  ;;  %1097 = vmatprep.subr.bf16.mxu0 %v1594_v1 }
  0x8a   : > { %1138 = vmatprep.subr.bf16.mxu1 %v1596_v2 }
  0x8c   : > { %1098 = vmatpush1.bf16.msra.mxu0 %v1598_v3 }
  0x8d   : > { %1139 = vmatpush1.bf16.msra.mxu1 %v1599_v4 }
  0x8f   : > { %1100 = vmatmul.mubr.bf16.vlgmr.msra.gmra.mrb[0].mxu0 %v1373_v5 }
  0x90   : > { %1141 = vmatmul.mubr.bf16.vlgmr.msra.gmra.mrb[0].mxu1 %v1375_v6 }
 0x162   : > { %v1101_v7 = vpop.f32.mrb[0].mxu0 }
 0x163   : > { %v1142_v9 = vpop.f32.mrb[0].mxu1  ;;  %v1103_v11 = vpop.f32.mrb[1].mxu0  ;;  %1156 = sbr.rel (%p1441_p13) target bundleno = 380 (0x17c), region = 86 }
 0x164   : > { %v1143_v10 = vadd.f32 %v1142_v9, %v1101_v7  ;;  %v1144_v13 = vpop.f32.mrb[1].mxu1  ;;  %v1105_v15 = vpop.f32.mrb[2].mxu0 }
 0x165   : > { %v1145_v14 = vadd.f32 %v1144_v13, %v1103_v11  ;;  %v1146_v16 = vpop.f32.mrb[2].mxu1  ;;  %v1106_v18 = vpop.f32.mrb[3].mxu0 }
 0x166   : > { %v1149_v17 = vadd.f32 %v1143_v10, %v665_v8  ;;  %v1147_v19 = vpop.f32.mrb[3].mxu1 }
 0x167   : > { %v1150_v20 = vadd.f32 %v1145_v14, %v666_v12 }
 0x168   : > { %1151 = vst [vmem:[#allocation2] sm:$0xff] %v1149_v17 }
 0x169   : > { %1152 = vst [vmem:[#allocation2 + $0x8] sm:$0xff] %v1150_v20 }
 0x16f   : > { %v1157_v27 = vld [vmem:[#allocation2] sm:$0xff] }
 0x170   : > { %v1158_v28 = vld [vmem:[#allocation2 + $0x8] sm:$0xff]  ;;  %v1171_v34 = vmul.f32 %v1164_v30, %v1157_v27 }
 0x171   : > { %v1172_v35 = vmul.f32 %v1168_v31, %v1158_v28 }
 0x172   : > { %v1185_v38 = vadd.f32 %v1178_v32, %v1171_v34 }
 0x173   : > { %v1186_v39 = vadd.f32 %v1182_v33, %v1172_v35 }
 0x174   : > { %v1190_v40 = vadd.f32 %v1188_v36, %v1185_v38 }
 0x175   : > { %v1191_v41 = vadd.f32 %v1189_v37, %v1186_v39 }
 0x176   : > { %v1192_v42 = vmax.f32 %v1190_v40, 0.0 }
 0x177   : > { %v1193_v43 = vmax.f32 %v1191_v41, 0.0 }
 0x179   : > { %v1446_v44 = vpack.c.bf16 %v1193_v43, %v1192_v42 }
 0x17b   : > { %1202 = vst [vmem:[%s1912_s7] sm:$0xff] %v1446_v44 }
 0x17c PF: > { %s15_s24 = sadd.s32 1, %s1658_s24   ;;  %s2023_s18 = smov %s1638_s19 }
 0x17d   : > { %p12_p0 = scmp.ge.s32.totalorder %s15_s24, 20   ;;  %s2024_s19 = smov %s1742_s6 }
 0x17e   : > { %s2025_s20 = smov %s1650_s22  ;;  %s2026_s21 = smov %s1654_s23 }
 0x17f   : > { %s2027_s22 = smov %s2030_s25  ;;  %s2028_s23 = smov %s2034_s26 }
 0x180   :  { %14 = sbr.rel (!%p12_p0) target bundleno = 4 (0x4), region = 133 }

// kernel: combined_model_forward.44
= control target key start
LH: loop header
LB: loop body
LE: loop exit
PB: predicated region body
PF: predicated region fallthrough
CT: control target
= control target key end

     0   :  { %vm21_vm0 = vcmask 1041409   ;;  %vm23_vm1 = vcmask 1043459   ;;  %vm25_vm2 = vcmask 1045509   ;;  %vm27_vm3 = vcmask 1047559   ;;  %s55_s0 = inlined_call_operand.vmem [shape: bf16[2,1,512], index: 0, kind: input, shape index: {}]   ;;  %s56_s1 = inlined_call_operand.vmem [shape: f32[2,512], index: 1, kind: output, shape index: {}]  }
   0x1   :  { %v36_v0 = vld [vmem:[%s55_s0] sm:$0xff]  }
   0x2   :  { %v37_v1 = vunpack.c.l.bf16 %v36_v0  ;;  %v38_v2 = vunpack.c.h.bf16 %v36_v0 }
   0x4   :  { %v20_v3 = vrot.slane %v38_v2, 7 }
   0x6   :  { %v22_v4 = vsel %vm21_vm0, %v20_v3, %v37_v1 }
   0x7   :  { %v24_v5 = vsel %vm23_vm1, %v20_v3, %v22_v4 }
   0x8   :  { %v26_v6 = vsel %vm25_vm2, %v20_v3, %v24_v5 }
   0x9   :  { %v28_v7 = vsel %vm27_vm3, %v20_v3, %v26_v6 }
   0xa   :  { %30 = vst [vmem:[%s56_s1] sm:$0xff] %v28_v7 }

// kernel: combined_model_forward.42
= control target key start
LH: loop header
LB: loop body
LE: loop exit
PB: predicated region body
PF: predicated region fallthrough
CT: control target
= control target key end

     0   :  { %s1598_s15 = smov 0   ;;  %s1600_s16 = smov 0   ;;  %s1918_s0 = inlined_call_operand.vmem [shape: bf16[8,4608], index: 0, kind: input, shape index: {}]   ;;  %s1919_s1 = inlined_call_operand.vmem [shape: bf16[4608,512], index: 1, kind: input, shape index: {}]   ;;  %s1920_s2 = inlined_call_operand.vmem [shape: f32[1,512], index: 2, kind: input, shape index: {}]   ;;  %s1921_s3 = inlined_call_operand.vmem [shape: f32[1,512], index: 3, kind: input, shape index: {}]   ;;  %s1922_s4 = inlined_call_operand.vmem [shape: bf16[8,512], index: 4, kind: output, shape index: {}]  }
   0x1   :  { %s1602_s17 = smov 0   ;;  %s1604_s18 = smov 0  }
   0x2   :  { %s1606_s19 = smov 0   ;;  %s1608_s20 = smov 0  }
   0x3   :  { %s1610_s21 = smov 0  }
   0x4 LB: > { %s26_s22 = sadd.s32 1, %s1562_s19  ;;  %s29_s23 = sadd.s32 1, %s1566_s20  ;;  %s1570_s21 = sphi %s1610_s21, %s14_s21   ;;  %s1566_s20 = sphi %s1608_s20, %s1928_s20   ;;  %s1562_s19 = sphi %s1606_s19, %s1927_s19   ;;  %s1558_s18 = sphi %s1604_s18, %s1926_s18   ;;  %s1554_s17 = sphi %s1602_s17, %s1925_s17   ;;  %s1550_s16 = sphi %s1600_s16, %s1924_s16   ;;  %s1546_s15 = sphi %s1598_s15, %s1923_s15  }
   0x5   : > { %p27_p0 = scmp.ge.s32.totalorder %s26_s22, 9  ;;  %p77_p1 = scmp.ne.s32.totalorder %s1550_s16, %s1546_s15 }
   0x6   : > { %p78_p2 = scmp.eq.s32.totalorder %s1570_s21, 0  ;;  %s70_s27 = sadd.s32 1, %s1550_s16 }
   0x7   : > { %s1930_s22 = smov (%p27_p0, %s26_s22), 0  ;;  %s1932_s23 = smov (!%p27_p0, %s29_s23), %s1566_s20 }
   0x8   : > { %p79_p3 = por %p78_p2, %p77_p1  ;;  %p31_p4 = scmp.ge.s32.totalorder %s1932_s23, 2 }
   0x9   : > { %s65_s24 = ssub.s32 %s1562_s19, %s1930_s22  ;;  %p1270_p6 = scmp.ge.s32.totalorder %s1570_s21, 18 }
   0xa   : > { %s1934_s23 = smov (%p31_p4, %s1932_s23), 0 }
   0xb   : > { %s66_s25 = ssub.s32 %s1566_s20, %s1934_s23  ;;  %183 = sbr.rel (%p1270_p6) target bundleno = 57 (0x39), region = 16 }
   0xc   : > { %s67_s26 = sor.u32 %s66_s25, %s65_s24 }
   0xd   : > { %p68_p5 = scmp.eq.s32.totalorder %s67_s26, 0 }
   0xf   : > { %s1649_s28 = scalar_select %p68_p5, %s1550_s16, %s70_s27  }
  0x12   : > { %199 = sbr.rel (!%p79_p3) target bundleno = 57 (0x39), region = 24  ;;  %s201_s29 = sand.u32 (%p79_p3), 1, %s1550_s16  }
  0x13   : > { %s1273_s30 = sshll.u32 (%p79_p3), %s1566_s20, 1  ;;  %s1271_s5 = sshll.u32 (%p79_p3), %s201_s29, 9 }
  0x14   : > { %s1357_s6 = sshll.u32 (%p79_p3), %s1562_s19, 8  ;;  %s1663_s12 = scalar_lea.vmem (%p79_p3), [#allocation3], %s1271_s5 }
  0x15   : > { %s207_s7 = sadd.s32 (%p79_p3), %s1357_s6, %s1273_s30 }
  0x16   : > { %s1275_s8 = sshll.u32 (%p79_p3), %s207_s7, 2 }
  0x17   : > { %s1658_s11 = scalar_lea.vmem (%p79_p3), %s1919_s1, %s1275_s8 }
  0x18   : > { %v363_v0 = vld [vmem:[%s1658_s11] sm:$0xff] (%p79_p3)  ;;  %v365_v1 = vld [vmem:[%s1658_s11 + $0x10] sm:$0xff] (%p79_p3) }
  0x19   : > { %v367_v2 = vld [vmem:[%s1658_s11 + $0x20] sm:$0xff]  ;;  %364 = vst [vmem:[%s1663_s12] sm:$0xff] %v363_v0  ;;  %366 = vst [vmem:[%s1663_s12 + $0x8] sm:$0xff] %v365_v1  ;;  %v369_v3 = vld [vmem:[%s1658_s11 + $0x30] sm:$0xff] }
  0x1a   : > { %368 = vst [vmem:[%s1663_s12 + $0x10] sm:$0xff] %v367_v2  ;;  %v371_v4 = vld [vmem:[%s1658_s11 + $0x40] sm:$0xff]  ;;  %v373_v5 = vld [vmem:[%s1658_s11 + $0x50] sm:$0xff]  ;;  %370 = vst [vmem:[%s1663_s12 + $0x18] sm:$0xff] %v369_v3 }
  0x1b   : > { %372 = vst [vmem:[%s1663_s12 + $0x20] sm:$0xff] %v371_v4  ;;  %374 = vst [vmem:[%s1663_s12 + $0x28] sm:$0xff] %v373_v5  ;;  %v375_v6 = vld [vmem:[%s1658_s11 + $0x60] sm:$0xff]  ;;  %v377_v7 = vld [vmem:[%s1658_s11 + $0x70] sm:$0xff] }
  0x1c   : > { %v379_v8 = vld [vmem:[%s1658_s11 + $0x80] sm:$0xff]  ;;  %376 = vst [vmem:[%s1663_s12 + $0x30] sm:$0xff] %v375_v6  ;;  %378 = vst [vmem:[%s1663_s12 + $0x38] sm:$0xff] %v377_v7  ;;  %v381_v9 = vld [vmem:[%s1658_s11 + $0x90] sm:$0xff] }
  0x1d   : > { %380 = vst [vmem:[%s1663_s12 + $0x40] sm:$0xff] %v379_v8  ;;  %v383_v10 = vld [vmem:[%s1658_s11 + $0xa0] sm:$0xff]  ;;  %v385_v11 = vld [vmem:[%s1658_s11 + $0xb0] sm:$0xff]  ;;  %382 = vst [vmem:[%s1663_s12 + $0x48] sm:$0xff] %v381_v9 }
  0x1e   : > { %384 = vst [vmem:[%s1663_s12 + $0x50] sm:$0xff] %v383_v10  ;;  %386 = vst [vmem:[%s1663_s12 + $0x58] sm:$0xff] %v385_v11  ;;  %v387_v12 = vld [vmem:[%s1658_s11 + $0xc0] sm:$0xff]  ;;  %v389_v13 = vld [vmem:[%s1658_s11 + $0xd0] sm:$0xff] }
  0x1f   : > { %v391_v14 = vld [vmem:[%s1658_s11 + $0xe0] sm:$0xff]  ;;  %388 = vst [vmem:[%s1663_s12 + $0x60] sm:$0xff] %v387_v12  ;;  %390 = vst [vmem:[%s1663_s12 + $0x68] sm:$0xff] %v389_v13  ;;  %v393_v15 = vld [vmem:[%s1658_s11 + $0xf0] sm:$0xff] }
  0x20   : > { %392 = vst [vmem:[%s1663_s12 + $0x70] sm:$0xff] %v391_v14  ;;  %v395_v16 = vld [vmem:[%s1658_s11 + $0x100] sm:$0xff]  ;;  %v397_v17 = vld [vmem:[%s1658_s11 + $0x110] sm:$0xff]  ;;  %394 = vst [vmem:[%s1663_s12 + $0x78] sm:$0xff] %v393_v15 }
  0x21   : > { %396 = vst [vmem:[%s1663_s12 + $0x80] sm:$0xff] %v395_v16  ;;  %398 = vst [vmem:[%s1663_s12 + $0x88] sm:$0xff] %v397_v17  ;;  %v399_v18 = vld [vmem:[%s1658_s11 + $0x120] sm:$0xff]  ;;  %v401_v19 = vld [vmem:[%s1658_s11 + $0x130] sm:$0xff] }
  0x22   : > { %v403_v20 = vld [vmem:[%s1658_s11 + $0x140] sm:$0xff]  ;;  %400 = vst [vmem:[%s1663_s12 + $0x90] sm:$0xff] %v399_v18  ;;  %402 = vst [vmem:[%s1663_s12 + $0x98] sm:$0xff] %v401_v19  ;;  %v405_v21 = vld [vmem:[%s1658_s11 + $0x150] sm:$0xff] }
  0x23   : > { %404 = vst [vmem:[%s1663_s12 + $0xa0] sm:$0xff] %v403_v20  ;;  %v407_v22 = vld [vmem:[%s1658_s11 + $0x160] sm:$0xff]  ;;  %v409_v23 = vld [vmem:[%s1658_s11 + $0x170] sm:$0xff]  ;;  %406 = vst [vmem:[%s1663_s12 + $0xa8] sm:$0xff] %v405_v21 }
  0x24   : > { %408 = vst [vmem:[%s1663_s12 + $0xb0] sm:$0xff] %v407_v22  ;;  %410 = vst [vmem:[%s1663_s12 + $0xb8] sm:$0xff] %v409_v23  ;;  %v411_v24 = vld [vmem:[%s1658_s11 + $0x180] sm:$0xff]  ;;  %v413_v25 = vld [vmem:[%s1658_s11 + $0x190] sm:$0xff] }
  0x25   : > { %v415_v26 = vld [vmem:[%s1658_s11 + $0x1a0] sm:$0xff]  ;;  %412 = vst [vmem:[%s1663_s12 + $0xc0] sm:$0xff] %v411_v24  ;;  %414 = vst [vmem:[%s1663_s12 + $0xc8] sm:$0xff] %v413_v25  ;;  %v417_v27 = vld [vmem:[%s1658_s11 + $0x1b0] sm:$0xff] }
  0x26   : > { %416 = vst [vmem:[%s1663_s12 + $0xd0] sm:$0xff] %v415_v26  ;;  %v419_v28 = vld [vmem:[%s1658_s11 + $0x1c0] sm:$0xff]  ;;  %v421_v29 = vld [vmem:[%s1658_s11 + $0x1d0] sm:$0xff]  ;;  %418 = vst [vmem:[%s1663_s12 + $0xd8] sm:$0xff] %v417_v27 }
  0x27   : > { %420 = vst [vmem:[%s1663_s12 + $0xe0] sm:$0xff] %v419_v28  ;;  %422 = vst [vmem:[%s1663_s12 + $0xe8] sm:$0xff] %v421_v29  ;;  %v423_v30 = vld [vmem:[%s1658_s11 + $0x1e0] sm:$0xff]  ;;  %v425_v31 = vld [vmem:[%s1658_s11 + $0x1f0] sm:$0xff] }
  0x28   : > { %v427_v32 = vld [vmem:[%s1658_s11 + $0x200] sm:$0xff]  ;;  %424 = vst [vmem:[%s1663_s12 + $0xf0] sm:$0xff] %v423_v30  ;;  %426 = vst [vmem:[%s1663_s12 + $0xf8] sm:$0xff] %v425_v31  ;;  %v429_v33 = vld [vmem:[%s1658_s11 + $0x210] sm:$0xff] }
  0x29   : > { %428 = vst [vmem:[%s1663_s12 + $0x100] sm:$0xff] %v427_v32  ;;  %v431_v34 = vld [vmem:[%s1658_s11 + $0x220] sm:$0xff]  ;;  %v433_v35 = vld [vmem:[%s1658_s11 + $0x230] sm:$0xff]  ;;  %430 = vst [vmem:[%s1663_s12 + $0x108] sm:$0xff] %v429_v33 }
  0x2a   : > { %432 = vst [vmem:[%s1663_s12 + $0x110] sm:$0xff] %v431_v34  ;;  %434 = vst [vmem:[%s1663_s12 + $0x118] sm:$0xff] %v433_v35  ;;  %v435_v36 = vld [vmem:[%s1658_s11 + $0x240] sm:$0xff]  ;;  %v437_v37 = vld [vmem:[%s1658_s11 + $0x250] sm:$0xff] }
  0x2b   : > { %v439_v38 = vld [vmem:[%s1658_s11 + $0x260] sm:$0xff]  ;;  %436 = vst [vmem:[%s1663_s12 + $0x120] sm:$0xff] %v435_v36  ;;  %438 = vst [vmem:[%s1663_s12 + $0x128] sm:$0xff] %v437_v37  ;;  %v441_v39 = vld [vmem:[%s1658_s11 + $0x270] sm:$0xff] }
  0x2c   : > { %440 = vst [vmem:[%s1663_s12 + $0x130] sm:$0xff] %v439_v38  ;;  %v443_v40 = vld [vmem:[%s1658_s11 + $0x280] sm:$0xff]  ;;  %v445_v41 = vld [vmem:[%s1658_s11 + $0x290] sm:$0xff]  ;;  %442 = vst [vmem:[%s1663_s12 + $0x138] sm:$0xff] %v441_v39 }
  0x2d   : > { %444 = vst [vmem:[%s1663_s12 + $0x140] sm:$0xff] %v443_v40  ;;  %446 = vst [vmem:[%s1663_s12 + $0x148] sm:$0xff] %v445_v41  ;;  %v447_v42 = vld [vmem:[%s1658_s11 + $0x2a0] sm:$0xff]  ;;  %v449_v43 = vld [vmem:[%s1658_s11 + $0x2b0] sm:$0xff] }
  0x2e   : > { %v451_v44 = vld [vmem:[%s1658_s11 + $0x2c0] sm:$0xff]  ;;  %448 = vst [vmem:[%s1663_s12 + $0x150] sm:$0xff] %v447_v42  ;;  %450 = vst [vmem:[%s1663_s12 + $0x158] sm:$0xff] %v449_v43  ;;  %v453_v45 = vld [vmem:[%s1658_s11 + $0x2d0] sm:$0xff] }
  0x2f   : > { %452 = vst [vmem:[%s1663_s12 + $0x160] sm:$0xff] %v451_v44  ;;  %v455_v46 = vld [vmem:[%s1658_s11 + $0x2e0] sm:$0xff]  ;;  %v457_v47 = vld [vmem:[%s1658_s11 + $0x2f0] sm:$0xff]  ;;  %454 = vst [vmem:[%s1663_s12 + $0x168] sm:$0xff] %v453_v45 }
  0x30   : > { %456 = vst [vmem:[%s1663_s12 + $0x170] sm:$0xff] %v455_v46  ;;  %458 = vst [vmem:[%s1663_s12 + $0x178] sm:$0xff] %v457_v47  ;;  %v459_v48 = vld [vmem:[%s1658_s11 + $0x300] sm:$0xff]  ;;  %v461_v49 = vld [vmem:[%s1658_s11 + $0x310] sm:$0xff] }
  0x31   : > { %v463_v50 = vld [vmem:[%s1658_s11 + $0x320] sm:$0xff]  ;;  %460 = vst [vmem:[%s1663_s12 + $0x180] sm:$0xff] %v459_v48  ;;  %462 = vst [vmem:[%s1663_s12 + $0x188] sm:$0xff] %v461_v49  ;;  %v465_v51 = vld [vmem:[%s1658_s11 + $0x330] sm:$0xff] }
  0x32   : > { %464 = vst [vmem:[%s1663_s12 + $0x190] sm:$0xff] %v463_v50  ;;  %v467_v52 = vld [vmem:[%s1658_s11 + $0x340] sm:$0xff]  ;;  %v469_v53 = vld [vmem:[%s1658_s11 + $0x350] sm:$0xff]  ;;  %466 = vst [vmem:[%s1663_s12 + $0x198] sm:$0xff] %v465_v51 }
  0x33   : > { %468 = vst [vmem:[%s1663_s12 + $0x1a0] sm:$0xff] %v467_v52  ;;  %470 = vst [vmem:[%s1663_s12 + $0x1a8] sm:$0xff] %v469_v53  ;;  %v471_v54 = vld [vmem:[%s1658_s11 + $0x360] sm:$0xff]  ;;  %v473_v55 = vld [vmem:[%s1658_s11 + $0x370] sm:$0xff] }
  0x34   : > { %v475_v56 = vld [vmem:[%s1658_s11 + $0x380] sm:$0xff]  ;;  %472 = vst [vmem:[%s1663_s12 + $0x1b0] sm:$0xff] %v471_v54  ;;  %474 = vst [vmem:[%s1663_s12 + $0x1b8] sm:$0xff] %v473_v55  ;;  %v477_v57 = vld [vmem:[%s1658_s11 + $0x390] sm:$0xff] }
  0x35   : > { %476 = vst [vmem:[%s1663_s12 + $0x1c0] sm:$0xff] %v475_v56  ;;  %v479_v58 = vld [vmem:[%s1658_s11 + $0x3a0] sm:$0xff]  ;;  %v481_v59 = vld [vmem:[%s1658_s11 + $0x3b0] sm:$0xff]  ;;  %478 = vst [vmem:[%s1663_s12 + $0x1c8] sm:$0xff] %v477_v57 }
  0x36   : > { %480 = vst [vmem:[%s1663_s12 + $0x1d0] sm:$0xff] %v479_v58  ;;  %482 = vst [vmem:[%s1663_s12 + $0x1d8] sm:$0xff] %v481_v59  ;;  %v483_v60 = vld [vmem:[%s1658_s11 + $0x3c0] sm:$0xff]  ;;  %v485_v61 = vld [vmem:[%s1658_s11 + $0x3d0] sm:$0xff] }
  0x37   : > { %v487_v62 = vld [vmem:[%s1658_s11 + $0x3e0] sm:$0xff]  ;;  %484 = vst [vmem:[%s1663_s12 + $0x1e0] sm:$0xff] %v483_v60  ;;  %486 = vst [vmem:[%s1663_s12 + $0x1e8] sm:$0xff] %v485_v61  ;;  %v489_v63 = vld [vmem:[%s1658_s11 + $0x3f0] sm:$0xff] }
  0x38   : > { %488 = vst [vmem:[%s1663_s12 + $0x1f0] sm:$0xff] %v487_v62  ;;  %490 = vst [vmem:[%s1663_s12 + $0x1f8] sm:$0xff] %v489_v63 }
  0x39 PF: > { %p1276_p7 = scmp.ge.s32.totalorder %s1570_s21, 1  ;;  %p511_p8 = scmp.lt.s32.totalorder %s1570_s21, 19 }
  0x3b   : > { %p512_p9 = pnand %p1276_p7, %p511_p8 }
  0x3c   : > { %s518_s13 = sand.u32 (!%p512_p9), 1, %s1546_s15   ;;  %s1278_s14 = sshll.u32 (!%p512_p9), %s1554_s17, 2 }
  0x3d   : > { %515 = sbr.rel (%p512_p9) target bundleno = 378 (0x17a), region = 70  ;;  %s1277_s24 = sshll.u32 (!%p512_p9), %s518_s13, 9 }
  0x3e   : > { %p567_p10 = scmp.lt.s32.totalorder (!%p512_p9), %s1278_s14, 35  ;;  %s1280_s25 = sshll.u32 (!%p512_p9), %s1558_s18, 1 }
  0x3f   : > { %p577_p11 = scmp.lt.s32.totalorder (!%p512_p9), %s1280_s25, 3  ;;  %s1816_s13 = scalar_lea.vmem (!%p512_p9), [#allocation3], %s1277_s24 }
  0x40   : > { %p1284_p12 = scmp.ne.s32.totalorder (!%p512_p9), %s1554_s17, 0 }
  0x44   : > { %s1936_s14 = smov (!%p567_p10, %s1278_s14), 35  ;;  %s1938_s25 = smov (!%p577_p11, %s1280_s25), 3 }
  0x45   : > { %s1279_s26 = sshll.u32 %s1936_s14, 2  ;;  %s579_s15 = scalar_lea.vmem %s1920_s2, %s1938_s25  ;;  %v1572_v0 = vmov (!%p1284_p12), 0.0  }
  0x46   : > { %s1798_s30 = scalar_lea.vmem %s1918_s0, %s1279_s26  ;;  %s584_s18 = scalar_lea.vmem %s1921_s3, %s1938_s25  ;;  %600 = vst [vmem:[#allocation2] sm:$0xff] (!%p1284_p12), %v1572_v0  ;;  %601 = vst [vmem:[#allocation2 + $0x8] sm:$0xff] (!%p1284_p12), %v1572_v0 }
  0x47   : > { %s1283_s9 = sshll.u32 %s1938_s25, 2  ;;  %599 = sbr.rel (%p1284_p12) target bundleno = 78 (0x4e), region = 78 }
  0x48   : > { %s1814_s12 = scalar_lea.vmem %s1922_s4, %s1283_s9 }
  0x4e PF: > { %v1416_v1 = vld [vmem:[%s1816_s13 + $0x4] ss:$8 sps:$4 sm:$0xff]   ;;  %v1420_v3 = vld [vmem:[%s1816_s13] ss:$8 sps:$4 sm:$0xff]   ;;  %v1422_v5 = vld [vmem:[%s1816_s13 + $0x14] ss:$8 sps:$4 sm:$0xff]  }
  0x4f   : > { %v1418_v2 = vld [vmem:[%s1816_s13 + $0x104] ss:$8 sps:$4 sm:$0xff]   ;;  %1004 = vmatprep.subr.bf16.mxu0 %v1416_v1  ;;  %v1421_v4 = vld [vmem:[%s1816_s13 + $0x100] ss:$8 sps:$4 sm:$0xff]   ;;  %v1424_v6 = vld [vmem:[%s1816_s13 + $0x114] ss:$8 sps:$4 sm:$0xff]  }
  0x50   : > { %1045 = vmatprep.subr.bf16.mxu1 %v1418_v2  ;;  %1005 = vmatpush1.bf16.msra.mxu0 %v1420_v3  ;;  %v1426_v7 = vld [vmem:[%s1816_s13 + $0x10] ss:$8 sps:$4 sm:$0xff]   ;;  %v1428_v9 = vld [vmem:[%s1816_s13 + $0x24] ss:$8 sps:$4 sm:$0xff]   ;;  %v1432_v11 = vld [vmem:[%s1816_s13 + $0x20] ss:$8 sps:$4 sm:$0xff]  }
  0x51   : > { %1046 = vmatpush1.bf16.msra.mxu1 %v1421_v4  ;;  %1006 = vmatprep.subr.bf16.mxu0 %v1422_v5  ;;  %v1427_v8 = vld [vmem:[%s1816_s13 + $0x110] ss:$8 sps:$4 sm:$0xff]   ;;  %v1430_v10 = vld [vmem:[%s1816_s13 + $0x124] ss:$8 sps:$4 sm:$0xff]   ;;  %v1433_v12 = vld [vmem:[%s1816_s13 + $0x120] ss:$8 sps:$4 sm:$0xff]  }
  0x52   : > { %1047 = vmatprep.subr.bf16.mxu1 %v1424_v6  ;;  %v1434_v13 = vld [vmem:[%s1816_s13 + $0x34] ss:$8 sps:$4 sm:$0xff]   ;;  %v1438_v15 = vld [vmem:[%s1816_s13 + $0x30] ss:$8 sps:$4 sm:$0xff]   ;;  %v1440_v17 = vld [vmem:[%s1816_s13 + $0x44] ss:$8 sps:$4 sm:$0xff]  }
  0x53   : > { %v1436_v14 = vld [vmem:[%s1816_s13 + $0x134] ss:$8 sps:$4 sm:$0xff]   ;;  %v1439_v16 = vld [vmem:[%s1816_s13 + $0x130] ss:$8 sps:$4 sm:$0xff]   ;;  %v1442_v18 = vld [vmem:[%s1816_s13 + $0x144] ss:$8 sps:$4 sm:$0xff]  }
  0x54   : > { %1007 = vmatpush1.bf16.msra.mxu0 %v1426_v7  ;;  %v1444_v19 = vld [vmem:[%s1816_s13 + $0x40] ss:$8 sps:$4 sm:$0xff]   ;;  %v1446_v21 = vld [vmem:[%s1816_s13 + $0x54] ss:$8 sps:$4 sm:$0xff]   ;;  %v1450_v23 = vld [vmem:[%s1816_s13 + $0x50] ss:$8 sps:$4 sm:$0xff]  }
  0x55   : > { %1048 = vmatpush1.bf16.msra.mxu1 %v1427_v8  ;;  %1008 = vmatprep.subr.bf16.mxu0 %v1428_v9  ;;  %v1445_v20 = vld [vmem:[%s1816_s13 + $0x140] ss:$8 sps:$4 sm:$0xff]   ;;  %v1448_v22 = vld [vmem:[%s1816_s13 + $0x154] ss:$8 sps:$4 sm:$0xff]   ;;  %v1451_v24 = vld [vmem:[%s1816_s13 + $0x150] ss:$8 sps:$4 sm:$0xff]  }
  0x56   : > { %1049 = vmatprep.subr.bf16.mxu1 %v1430_v10  ;;  %v1452_v25 = vld [vmem:[%s1816_s13 + $0x64] ss:$8 sps:$4 sm:$0xff]   ;;  %v1456_v27 = vld [vmem:[%s1816_s13 + $0x60] ss:$8 sps:$4 sm:$0xff]   ;;  %v1458_v29 = vld [vmem:[%s1816_s13 + $0x74] ss:$8 sps:$4 sm:$0xff]  }
  0x57   : > { %v1454_v26 = vld [vmem:[%s1816_s13 + $0x164] ss:$8 sps:$4 sm:$0xff]   ;;  %v1457_v28 = vld [vmem:[%s1816_s13 + $0x160] ss:$8 sps:$4 sm:$0xff]   ;;  %v1460_v30 = vld [vmem:[%s1816_s13 + $0x174] ss:$8 sps:$4 sm:$0xff]  }
  0x58   : > { %1009 = vmatpush1.bf16.msra.mxu0 %v1432_v11  ;;  %v1462_v31 = vld [vmem:[%s1816_s13 + $0x70] ss:$8 sps:$4 sm:$0xff]   ;;  %v1464_v33 = vld [vmem:[%s1816_s13 + $0x84] ss:$8 sps:$4 sm:$0xff]   ;;  %v1468_v35 = vld [vmem:[%s1816_s13 + $0x80] ss:$8 sps:$4 sm:$0xff]  }
  0x59   : > { %1050 = vmatpush1.bf16.msra.mxu1 %v1433_v12  ;;  %1010 = vmatprep.subr.bf16.mxu0 %v1434_v13  ;;  %v1463_v32 = vld [vmem:[%s1816_s13 + $0x170] ss:$8 sps:$4 sm:$0xff]   ;;  %v1466_v34 = vld [vmem:[%s1816_s13 + $0x184] ss:$8 sps:$4 sm:$0xff]   ;;  %v1469_v36 = vld [vmem:[%s1816_s13 + $0x180] ss:$8 sps:$4 sm:$0xff]  }
  0x5a   : > { %1051 = vmatprep.subr.bf16.mxu1 %v1436_v14  ;;  %v1470_v37 = vld [vmem:[%s1816_s13 + $0x94] ss:$8 sps:$4 sm:$0xff]   ;;  %v1474_v39 = vld [vmem:[%s1816_s13 + $0x90] ss:$8 sps:$4 sm:$0xff]   ;;  %v1476_v41 = vld [vmem:[%s1816_s13 + $0xa4] ss:$8 sps:$4 sm:$0xff]  }
  0x5b   : > { %v1472_v38 = vld [vmem:[%s1816_s13 + $0x194] ss:$8 sps:$4 sm:$0xff]   ;;  %v1475_v40 = vld [vmem:[%s1816_s13 + $0x190] ss:$8 sps:$4 sm:$0xff]   ;;  %v1478_v42 = vld [vmem:[%s1816_s13 + $0x1a4] ss:$8 sps:$4 sm:$0xff]  }
  0x5c   : > { %1011 = vmatpush1.bf16.msra.mxu0 %v1438_v15  ;;  %v1480_v43 = vld [vmem:[%s1816_s13 + $0xa0] ss:$8 sps:$4 sm:$0xff]   ;;  %v1482_v45 = vld [vmem:[%s1816_s13 + $0xb4] ss:$8 sps:$4 sm:$0xff]   ;;  %v1486_v50 = vld [vmem:[%s1816_s13 + $0xb0] ss:$8 sps:$4 sm:$0xff]  }
  0x5d   : > { %1052 = vmatpush1.bf16.msra.mxu1 %v1439_v16  ;;  %1012 = vmatprep.subr.bf16.mxu0 %v1440_v17  ;;  %v1481_v44 = vld [vmem:[%s1816_s13 + $0x1a0] ss:$8 sps:$4 sm:$0xff]   ;;  %v1484_v46 = vld [vmem:[%s1816_s13 + $0x1b4] ss:$8 sps:$4 sm:$0xff]   ;;  %v1487_v51 = vld [vmem:[%s1816_s13 + $0x1b0] ss:$8 sps:$4 sm:$0xff]  }
  0x5e   : > { %1053 = vmatprep.subr.bf16.mxu1 %v1442_v18  ;;  %v604_v47 = vld [vmem:[%s1798_s30] sm:$0xff]  ;;  %v605_v49 = vld [vmem:[%s1798_s30 + $0x8] sm:$0xff]  ;;  %v1488_v53 = vld [vmem:[%s1816_s13 + $0xc4] ss:$8 sps:$4 sm:$0xff]   ;;  %p1353_p13 = scmp.ne.s32.totalorder %s1554_s17, 8 }
  0x5f   : > { %v1286_v48 = vcombine.high %v604_v47, %v604_v47  ;;  %v1288_v52 = vcombine.high %v605_v49, %v605_v49  ;;  %v1490_v54 = vld [vmem:[%s1816_s13 + $0x1c4] ss:$8 sps:$4 sm:$0xff]   ;;  %v1492_v55 = vld [vmem:[%s1816_s13 + $0xc0] ss:$8 sps:$4 sm:$0xff]   ;;  %v1494_v57 = vld [vmem:[%s1816_s13 + $0xd4] ss:$8 sps:$4 sm:$0xff]   ;;  %v1285_v5 = vcombine.low %v604_v47, %v604_v47  ;;  %v1287_v6 = vcombine.low %v605_v49, %v605_v49 }
  0x60   : > { %1013 = vmatpush1.bf16.msra.mxu0 %v1444_v19  ;;  %v1493_v56 = vld [vmem:[%s1816_s13 + $0x1c0] ss:$8 sps:$4 sm:$0xff]   ;;  %v1496_v58 = vld [vmem:[%s1816_s13 + $0x1d4] ss:$8 sps:$4 sm:$0xff]   ;;  %v1498_v59 = vld [vmem:[%s1816_s13 + $0xd0] ss:$8 sps:$4 sm:$0xff]  }
  0x61   : > { %1054 = vmatpush1.bf16.msra.mxu1 %v1445_v20  ;;  %1014 = vmatprep.subr.bf16.mxu0 %v1446_v21  ;;  %v1499_v60 = vld [vmem:[%s1816_s13 + $0x1d0] ss:$8 sps:$4 sm:$0xff]   ;;  %v1500_v61 = vld [vmem:[%s1816_s13 + $0xe4] ss:$8 sps:$4 sm:$0xff]   ;;  %v1504_v63 = vld [vmem:[%s1816_s13 + $0xe0] ss:$8 sps:$4 sm:$0xff]   ;;  %v1098_v21 = vlaneseq (!%p1353_p13) }
  0x62   : > { %1055 = vmatprep.subr.bf16.mxu1 %v1448_v22  ;;  %1036 = vmatprep.mubr.bf16.mxu0 %v1286_v48  ;;  %v1502_v62 = vld [vmem:[%s1816_s13 + $0x1e4] ss:$8 sps:$4 sm:$0xff]   ;;  %v1505_v0 = vld [vmem:[%s1816_s13 + $0x1e0] ss:$8 sps:$4 sm:$0xff]   ;;  %v1506_v1 = vld [vmem:[%s1816_s13 + $0xf4] ss:$8 sps:$4 sm:$0xff]  }
  0x63   : > { %1077 = vmatprep.mubr.bf16.mxu1 %v1288_v52  ;;  %v1508_v2 = vld [vmem:[%s1816_s13 + $0x1f4] ss:$8 sps:$4 sm:$0xff]   ;;  %v1510_v3 = vld [vmem:[%s1816_s13 + $0xf0] ss:$8 sps:$4 sm:$0xff]   ;;  %v1099_v22 = vshrl.u32 (!%p1353_p13), %v1098_v21, 7 }
  0x64   : > { %1015 = vmatpush1.bf16.msra.mxu0 %v1450_v23  ;;  %v1511_v4 = vld [vmem:[%s1816_s13 + $0x1f0] ss:$8 sps:$4 sm:$0xff]  }
  0x65   : > { %1056 = vmatpush1.bf16.msra.mxu1 %v1451_v24  ;;  %1016 = vmatprep.subr.bf16.mxu0 %v1452_v25  ;;  %v602_v8 = vld [vmem:[#allocation2] sm:$0xff]  ;;  %v603_v12 = vld [vmem:[#allocation2 + $0x8] sm:$0xff]  ;;  %v1100_v25 = vsub.s32 (!%p1353_p13), 0, %v1099_v22 }
  0x66   : > { %1057 = vmatprep.subr.bf16.mxu1 %v1454_v26  ;;  %v1096_v23 = vld [vmem:[%s579_s15] sm:$0x3] (!%p1353_p13)  ;;  %v1104_v26 = vsub.s32 (!%p1353_p13), 1, %v1099_v22 }
  0x67   : > { %v1110_v24 = vld [vmem:[%s584_s18] sm:$0x3] (!%p1353_p13) }
  0x68   : > { %1017 = vmatpush1.bf16.msra.mxu0 %v1456_v27 }
  0x69   : > { %1058 = vmatpush1.bf16.msra.mxu1 %v1457_v28  ;;  %1018 = vmatprep.subr.bf16.mxu0 %v1458_v29  ;;  %v1101_v29 = vrot.slane (!%p1353_p13), %v1096_v23, %v1100_v25 }
  0x6a   : > { %1059 = vmatprep.subr.bf16.mxu1 %v1460_v30  ;;  %v1105_v30 = vrot.slane (!%p1353_p13), %v1096_v23, %v1104_v26 }
  0x6c   : > { %1019 = vmatpush1.bf16.msra.mxu0 %v1462_v31  ;;  %v1115_v31 = vrot.slane (!%p1353_p13), %v1110_v24, %v1100_v25 }
  0x6d   : > { %1060 = vmatpush1.bf16.msra.mxu1 %v1463_v32  ;;  %1020 = vmatprep.subr.bf16.mxu0 %v1464_v33  ;;  %v1119_v32 = vrot.slane (!%p1353_p13), %v1110_v24, %v1104_v26 }
  0x6e   : > { %1061 = vmatprep.subr.bf16.mxu1 %v1466_v34 }
  0x70   : > { %1021 = vmatpush1.bf16.msra.mxu0 %v1468_v35 }
  0x71   : > { %1062 = vmatpush1.bf16.msra.mxu1 %v1469_v36  ;;  %1022 = vmatprep.subr.bf16.mxu0 %v1470_v37 }
  0x72   : > { %1063 = vmatprep.subr.bf16.mxu1 %v1472_v38 }
  0x74   : > { %1023 = vmatpush1.bf16.msra.mxu0 %v1474_v39 }
  0x75   : > { %1064 = vmatpush1.bf16.msra.mxu1 %v1475_v40  ;;  %1024 = vmatprep.subr.bf16.mxu0 %v1476_v41 }
  0x76   : > { %1065 = vmatprep.subr.bf16.mxu1 %v1478_v42 }
  0x78   : > { %1025 = vmatpush1.bf16.msra.mxu0 %v1480_v43 }
  0x79   : > { %1066 = vmatpush1.bf16.msra.mxu1 %v1481_v44  ;;  %1026 = vmatprep.subr.bf16.mxu0 %v1482_v45 }
  0x7a   : > { %1067 = vmatprep.subr.bf16.mxu1 %v1484_v46 }
  0x7c   : > { %1027 = vmatpush1.bf16.msra.mxu0 %v1486_v50 }
  0x7d   : > { %1068 = vmatpush1.bf16.msra.mxu1 %v1487_v51  ;;  %1028 = vmatprep.subr.bf16.mxu0 %v1488_v53 }
  0x7e   : > { %1069 = vmatprep.subr.bf16.mxu1 %v1490_v54 }
  0x80   : > { %1029 = vmatpush1.bf16.msra.mxu0 %v1492_v55 }
  0x81   : > { %1070 = vmatpush1.bf16.msra.mxu1 %v1493_v56  ;;  %1030 = vmatprep.subr.bf16.mxu0 %v1494_v57 }
  0x82   : > { %1071 = vmatprep.subr.bf16.mxu1 %v1496_v58 }
  0x84   : > { %1031 = vmatpush1.bf16.msra.mxu0 %v1498_v59 }
  0x85   : > { %1072 = vmatpush1.bf16.msra.mxu1 %v1499_v60  ;;  %1032 = vmatprep.subr.bf16.mxu0 %v1500_v61 }
  0x86   : > { %1073 = vmatprep.subr.bf16.mxu1 %v1502_v62 }
  0x88   : > { %1033 = vmatpush1.bf16.msra.mxu0 %v1504_v63 }
  0x89   : > { %1074 = vmatpush1.bf16.msra.mxu1 %v1505_v0  ;;  %1034 = vmatprep.subr.bf16.mxu0 %v1506_v1 }
  0x8a   : > { %1075 = vmatprep.subr.bf16.mxu1 %v1508_v2 }
  0x8c   : > { %1035 = vmatpush1.bf16.msra.mxu0 %v1510_v3 }
  0x8d   : > { %1076 = vmatpush1.bf16.msra.mxu1 %v1511_v4 }
  0x8f   : > { %1037 = vmatmul.mubr.bf16.vlgmr.msra.gmra.mrb[0].mxu0 %v1285_v5 }
  0x90   : > { %1078 = vmatmul.mubr.bf16.vlgmr.msra.gmra.mrb[0].mxu1 %v1287_v6 }
 0x162   : > { %v1038_v7 = vpop.f32.mrb[0].mxu0 }
 0x163   : > { %v1079_v9 = vpop.f32.mrb[0].mxu1  ;;  %v1040_v11 = vpop.f32.mrb[1].mxu0  ;;  %1093 = sbr.rel (%p1353_p13) target bundleno = 378 (0x17a), region = 82 }
 0x164   : > { %v1080_v10 = vadd.f32 %v1079_v9, %v1038_v7  ;;  %v1081_v13 = vpop.f32.mrb[1].mxu1  ;;  %v1042_v15 = vpop.f32.mrb[2].mxu0 }
 0x165   : > { %v1082_v14 = vadd.f32 %v1081_v13, %v1040_v11  ;;  %v1083_v16 = vpop.f32.mrb[2].mxu1  ;;  %v1043_v18 = vpop.f32.mrb[3].mxu0 }
 0x166   : > { %v1086_v17 = vadd.f32 %v1080_v10, %v602_v8  ;;  %v1084_v19 = vpop.f32.mrb[3].mxu1 }
 0x167   : > { %v1087_v20 = vadd.f32 %v1082_v14, %v603_v12 }
 0x168   : > { %1088 = vst [vmem:[#allocation2] sm:$0xff] %v1086_v17 }
 0x169   : > { %1089 = vst [vmem:[#allocation2 + $0x8] sm:$0xff] %v1087_v20 }
 0x16f   : > { %v1094_v27 = vld [vmem:[#allocation2] sm:$0xff] }
 0x170   : > { %v1095_v28 = vld [vmem:[#allocation2 + $0x8] sm:$0xff]  ;;  %v1108_v33 = vmul.f32 %v1101_v29, %v1094_v27 }
 0x171   : > { %v1109_v34 = vmul.f32 %v1105_v30, %v1095_v28 }
 0x172   : > { %v1122_v35 = vadd.f32 %v1115_v31, %v1108_v33 }
 0x173   : > { %v1123_v36 = vadd.f32 %v1119_v32, %v1109_v34 }
 0x174   : > { %v1124_v37 = vmax.f32 %v1122_v35, 0.0 }
 0x175   : > { %v1125_v38 = vmax.f32 %v1123_v36, 0.0 }
 0x177   : > { %v1358_v39 = vpack.c.bf16 %v1125_v38, %v1124_v37 }
 0x179   : > { %1134 = vst [vmem:[%s1814_s12] sm:$0xff] %v1358_v39 }
 0x17a PF: > { %s14_s21 = sadd.s32 1, %s1570_s21   ;;  %s1923_s15 = smov %s1550_s16 }
 0x17b   : > { %p11_p0 = scmp.ge.s32.totalorder %s14_s21, 20   ;;  %s1924_s16 = smov %s1649_s28 }
 0x17c   : > { %s1925_s17 = smov %s1562_s19  ;;  %s1926_s18 = smov %s1566_s20 }
 0x17d   : > { %s1927_s19 = smov %s1930_s22  ;;  %s1928_s20 = smov %s1934_s23 }
 0x17e   :  { %13 = sbr.rel (!%p11_p0) target bundleno = 4 (0x4), region = 126 }

// kernel: combined_model_forward.45
= control target key start
LH: loop header
LB: loop body
LE: loop exit
PB: predicated region body
PF: predicated region fallthrough
CT: control target
= control target key end

     0   :  { %v1275_v0 = vmov 0.0|0.0   ;;  %vm1276_vm0 = vmmov 0   ;;  %v1277_v4 = vmov 0.0   ;;  %s1882_s2 = inlined_call_operand.vmem [shape: f32[128,128], index: 2, kind: input, shape index: {}]   ;;  %s1883_s4 = inlined_call_operand.vmem [shape: f32[128,128], index: 4, kind: input, shape index: {}]   ;;  %s1884_s1 = inlined_call_operand.vmem [shape: f32[8,128], index: 1, kind: input, shape index: {}]   ;;  %s1885_s6 = inlined_call_operand.vmem [shape: f32[512,128], index: 6, kind: input, shape index: {}]   ;;  %s1886_s7 = inlined_call_operand.vmem [shape: f32[128,128], index: 7, kind: input, shape index: {}]   ;;  %s1887_s3 = inlined_call_operand.vmem [shape: f32[1,128], index: 3, kind: input, shape index: {}]   ;;  %s1888_s0 = inlined_call_operand.vmem [shape: f32[8,512], index: 0, kind: input, shape index: {}]   ;;  %s1889_s5 = inlined_call_operand.vmem [shape: f32[1,128], index: 5, kind: input, shape index: {}]   ;;  %s1890_s10 = inlined_call_operand.vmem [shape: f32[128,128], index: 10, kind: input, shape index: {}]   ;;  %s1891_s13 = inlined_call_operand.vmem [shape: f32[128,128], index: 13, kind: input, shape index: {}]   ;;  %s1892_s8 = inlined_call_operand.vmem [shape: f32[1,128], index: 8, kind: input, shape index: {}]   ;;  %s1893_s9 = inlined_call_operand.vmem [shape: f32[1,128], index: 9, kind: input, shape index: {}]   ;;  %s1894_s11 = inlined_call_operand.vmem [shape: f32[1,128], index: 11, kind: input, shape index: {}]   ;;  %s1895_s12 = inlined_call_operand.vmem [shape: f32[1,128], index: 12, kind: input, shape index: {}]   ;;  %s1896_s14 = inlined_call_operand.vmem [shape: f32[1,128], index: 14, kind: input, shape index: {}]   ;;  %s1897_s15 = inlined_call_operand.vmem [shape: f32[8,128], index: 15, kind: output, shape index: {}]  }
   0x1   :  { %1088 = vmatprep.subr.bf16.mxu0 %v1275_v0  ;;  %v51_v1 = vld [vmem:[%s1882_s2] sm:$0xff]  ;;  %v52_v2 = vld [vmem:[%s1882_s2 + $0x8] sm:$0xff]  ;;  %v53_v3 = vld [vmem:[%s1882_s2 + $0x10] sm:$0xff]  ;;  %945 = vmatprep.mubr.msk.f32.mxu0 %vm1276_vm0, %v1277_v4 }
   0x2   :  { %v1089_v5 = vpack.c.bf16 %v52_v2, %v51_v1  ;;  %v54_v6 = vld [vmem:[%s1882_s2 + $0x18] sm:$0xff]  ;;  %1112 = vmatprep.subr.bf16.mxu1 %v1275_v0  ;;  %980 = vmatprep.mubr.msk.f32.mxu1 %vm1276_vm0, %v1277_v4  ;;  %v55_v8 = vld [vmem:[%s1882_s2 + $0x20] sm:$0xff]  ;;  %v56_v9 = vld [vmem:[%s1882_s2 + $0x28] sm:$0xff] }
   0x3   :  { %v1092_v7 = vpack.c.bf16 %v54_v6, %v53_v3  ;;  %v145_v10 = vld [vmem:[%s1883_s4] sm:$0xff]  ;;  %v146_v11 = vld [vmem:[%s1883_s4 + $0x8] sm:$0xff]  ;;  %v147_v12 = vld [vmem:[%s1883_s4 + $0x10] sm:$0xff]  ;;  %v1095_v14 = vpack.c.bf16 %v56_v9, %v55_v8 }
   0x4   :  { %1090 = vmatpush3.bf16.msra.mxu0 %v1089_v5  ;;  %v148_v13 = vld [vmem:[%s1883_s4 + $0x18] sm:$0xff]  ;;  %v1113_v15 = vpack.c.bf16 %v146_v11, %v145_v10  ;;  %v57_v16 = vld [vmem:[%s1882_s2 + $0x30] sm:$0xff]  ;;  %v149_v19 = vld [vmem:[%s1883_s4 + $0x20] sm:$0xff] }
   0x5   :  { %1091 = vmatprep.subr.bf16.mxu0 %v1275_v0  ;;  %v58_v17 = vld [vmem:[%s1882_s2 + $0x38] sm:$0xff]  ;;  %v1116_v18 = vpack.c.bf16 %v148_v13, %v147_v12  ;;  %v150_v20 = vld [vmem:[%s1883_s4 + $0x28] sm:$0xff]  ;;  %v59_v22 = vld [vmem:[%s1882_s2 + $0x40] sm:$0xff] }
   0x6   :  { %1114 = vmatpush3.bf16.msra.mxu1 %v1113_v15  ;;  %v1098_v21 = vpack.c.bf16 %v58_v17, %v57_v16  ;;  %v60_v23 = vld [vmem:[%s1882_s2 + $0x48] sm:$0xff]  ;;  %v1119_v24 = vpack.c.bf16 %v150_v20, %v149_v19  ;;  %v151_v25 = vld [vmem:[%s1883_s4 + $0x30] sm:$0xff]  ;;  %v152_v26 = vld [vmem:[%s1883_s4 + $0x38] sm:$0xff] }
   0x7   :  { %1115 = vmatprep.subr.bf16.mxu1 %v1275_v0  ;;  %v1101_v27 = vpack.c.bf16 %v60_v23, %v59_v22  ;;  %v61_v28 = vld [vmem:[%s1882_s2 + $0x50] sm:$0xff]  ;;  %v62_v29 = vld [vmem:[%s1882_s2 + $0x58] sm:$0xff]  ;;  %v1122_v30 = vpack.c.bf16 %v152_v26, %v151_v25  ;;  %v153_v31 = vld [vmem:[%s1883_s4 + $0x40] sm:$0xff] }
   0x8   :  { %1093 = vmatpush3.bf16.msra.mxu0 %v1092_v7  ;;  %v154_v32 = vld [vmem:[%s1883_s4 + $0x48] sm:$0xff]  ;;  %v1104_v33 = vpack.c.bf16 %v62_v29, %v61_v28  ;;  %v63_v34 = vld [vmem:[%s1882_s2 + $0x60] sm:$0xff]  ;;  %v155_v37 = vld [vmem:[%s1883_s4 + $0x50] sm:$0xff] }
   0x9   :  { %1094 = vmatprep.subr.bf16.mxu0 %v1275_v0  ;;  %v64_v35 = vld [vmem:[%s1882_s2 + $0x68] sm:$0xff]  ;;  %v1125_v36 = vpack.c.bf16 %v154_v32, %v153_v31  ;;  %v156_v38 = vld [vmem:[%s1883_s4 + $0x58] sm:$0xff]  ;;  %v65_v40 = vld [vmem:[%s1882_s2 + $0x70] sm:$0xff] }
   0xa   :  { %1117 = vmatpush3.bf16.msra.mxu1 %v1116_v18  ;;  %v1107_v39 = vpack.c.bf16 %v64_v35, %v63_v34  ;;  %v66_v41 = vld [vmem:[%s1882_s2 + $0x78] sm:$0xff]  ;;  %v1128_v42 = vpack.c.bf16 %v156_v38, %v155_v37  ;;  %v157_v43 = vld [vmem:[%s1883_s4 + $0x60] sm:$0xff]  ;;  %v158_v44 = vld [vmem:[%s1883_s4 + $0x68] sm:$0xff] }
   0xb   :  { %1118 = vmatprep.subr.bf16.mxu1 %v1275_v0  ;;  %v1110_v45 = vpack.c.bf16 %v66_v41, %v65_v40  ;;  %v1131_v46 = vpack.c.bf16 %v158_v44, %v157_v43  ;;  %v50_v47 = vld [vmem:[%s1884_s1] sm:$0xff]  ;;  %v159_v48 = vld [vmem:[%s1883_s4 + $0x70] sm:$0xff]  ;;  %v160_v49 = vld [vmem:[%s1883_s4 + $0x78] sm:$0xff] }
   0xc   :  { %1096 = vmatpush3.bf16.msra.mxu0 %v1095_v14  ;;  %v1134_v50 = vpack.c.bf16 %v160_v49, %v159_v48  ;;  %v259_v51 = vld [vmem:[%s1885_s6 + $0x80] sm:$0xff]  ;;  %v260_v52 = vld [vmem:[%s1885_s6 + $0x88] sm:$0xff]  ;;  %v309_v57 = vld [vmem:[%s1886_s7 + $0x10] sm:$0xff] }
   0xd   :  { %1097 = vmatprep.subr.bf16.mxu0 %v1275_v0  ;;  %v1160_v53 = vpack.c.bf16 %v260_v52, %v259_v51  ;;  %v307_v54 = vld [vmem:[%s1886_s7] sm:$0xff]  ;;  %v308_v55 = vld [vmem:[%s1886_s7 + $0x8] sm:$0xff]  ;;  %v310_v58 = vld [vmem:[%s1886_s7 + $0x18] sm:$0xff] }
   0xe   :  { %1120 = vmatpush3.bf16.msra.mxu1 %v1119_v24  ;;  %v1137_v56 = vpack.c.bf16 %v308_v55, %v307_v54  ;;  %v1140_v59 = vpack.c.bf16 %v310_v58, %v309_v57  ;;  %v311_v60 = vld [vmem:[%s1886_s7 + $0x20] sm:$0xff]  ;;  %v312_v61 = vld [vmem:[%s1886_s7 + $0x28] sm:$0xff]  ;;  %v313_v63 = vld [vmem:[%s1886_s7 + $0x30] sm:$0xff] }
   0xf   :  { %1121 = vmatprep.subr.bf16.mxu1 %v1275_v0  ;;  %v1143_v62 = vpack.c.bf16 %v312_v61, %v311_v60  ;;  %v314_v1 = vld [vmem:[%s1886_s7 + $0x38] sm:$0xff]  ;;  %v315_v3 = vld [vmem:[%s1886_s7 + $0x40] sm:$0xff]  ;;  %v316_v5 = vld [vmem:[%s1886_s7 + $0x48] sm:$0xff] }
  0x10   :  { %1099 = vmatpush3.bf16.msra.mxu0 %v1098_v21  ;;  %v1146_v2 = vpack.c.bf16 %v314_v1, %v313_v63  ;;  %v1149_v6 = vpack.c.bf16 %v316_v5, %v315_v3  ;;  %v317_v7 = vld [vmem:[%s1886_s7 + $0x50] sm:$0xff]  ;;  %v318_v8 = vld [vmem:[%s1886_s7 + $0x58] sm:$0xff]  ;;  %v319_v10 = vld [vmem:[%s1886_s7 + $0x60] sm:$0xff] }
  0x11   :  { %1100 = vmatprep.subr.bf16.mxu0 %v1275_v0  ;;  %v1152_v9 = vpack.c.bf16 %v318_v8, %v317_v7  ;;  %v320_v11 = vld [vmem:[%s1886_s7 + $0x68] sm:$0xff]  ;;  %v751_v13 = vld [vmem:[%s1887_s3] ss:$0 sm:$0xff]  ;;  %v261_v17 = vld [vmem:[%s1885_s6 + $0x90] sm:$0xff] }
  0x12   :  { %1123 = vmatpush3.bf16.msra.mxu1 %v1122_v30  ;;  %v1155_v12 = vpack.c.bf16 %v320_v11, %v319_v10  ;;  %v243_v14 = vld [vmem:[%s1885_s6] sm:$0xff]  ;;  %v244_v15 = vld [vmem:[%s1885_s6 + $0x8] sm:$0xff]  ;;  %v262_v18 = vld [vmem:[%s1885_s6 + $0x98] sm:$0xff] }
  0x13   :  { %1124 = vmatprep.subr.bf16.mxu1 %v1275_v0  ;;  %v1162_v21 = vpack.c.bf16 %v244_v15, %v243_v14  ;;  %v1164_v23 = vpack.c.bf16 %v262_v18, %v261_v17  ;;  %v245_v24 = vld [vmem:[%s1885_s6 + $0x10] sm:$0xff]  ;;  %v246_v25 = vld [vmem:[%s1885_s6 + $0x18] sm:$0xff]  ;;  %v263_v26 = vld [vmem:[%s1885_s6 + $0xa0] sm:$0xff] }
  0x14   :  { %1102 = vmatpush3.bf16.msra.mxu0 %v1101_v27  ;;  %v264_v27 = vld [vmem:[%s1885_s6 + $0xa8] sm:$0xff]  ;;  %v1166_v28 = vpack.c.bf16 %v246_v25, %v245_v24  ;;  %v247_v30 = vld [vmem:[%s1885_s6 + $0x20] sm:$0xff]  ;;  %v265_v32 = vld [vmem:[%s1885_s6 + $0xb0] sm:$0xff] }
  0x15   :  { %1103 = vmatprep.subr.bf16.mxu0 %v1275_v0  ;;  %v1168_v29 = vpack.c.bf16 %v264_v27, %v263_v26  ;;  %v248_v31 = vld [vmem:[%s1885_s6 + $0x28] sm:$0xff]  ;;  %v250_v37 = vld [vmem:[%s1885_s6 + $0x38] sm:$0xff]  ;;  %v267_v38 = vld [vmem:[%s1885_s6 + $0xc0] sm:$0xff] }
  0x16   :  { %1126 = vmatpush3.bf16.msra.mxu1 %v1125_v36  ;;  %v1170_v34 = vpack.c.bf16 %v248_v31, %v247_v30  ;;  %v249_v36 = vld [vmem:[%s1885_s6 + $0x30] sm:$0xff]  ;;  %v252_v43 = vld [vmem:[%s1885_s6 + $0x48] sm:$0xff]  ;;  %v254_v49 = vld [vmem:[%s1885_s6 + $0x58] sm:$0xff] }
  0x17   :  { %1127 = vmatprep.subr.bf16.mxu1 %v1275_v0  ;;  %v1174_v40 = vpack.c.bf16 %v250_v37, %v249_v36  ;;  %v269_v44 = vld [vmem:[%s1885_s6 + $0xd0] sm:$0xff]  ;;  %v272_v51 = vld [vmem:[%s1885_s6 + $0xe8] sm:$0xff]  ;;  %v255_v54 = vld [vmem:[%s1885_s6 + $0x60] sm:$0xff] }
  0x18   :  { %1105 = vmatpush3.bf16.msra.mxu0 %v1104_v33  ;;  %v266_v33 = vld [vmem:[%s1885_s6 + $0xb8] sm:$0xff]  ;;  %v253_v48 = vld [vmem:[%s1885_s6 + $0x50] sm:$0xff]  ;;  %v256_v55 = vld [vmem:[%s1885_s6 + $0x68] sm:$0xff] }
  0x19   :  { %1106 = vmatprep.subr.bf16.mxu0 %v1275_v0  ;;  %v1172_v35 = vpack.c.bf16 %v266_v33, %v265_v32  ;;  %v1182_v52 = vpack.c.bf16 %v254_v49, %v253_v48  ;;  %v274_v57 = vld [vmem:[%s1885_s6 + $0xf8] sm:$0xff]  ;;  %v1186_v58 = vpack.c.bf16 %v256_v55, %v255_v54  ;;  %v257_v60 = vld [vmem:[%s1885_s6 + $0x70] sm:$0xff]  ;;  %v240_v3 = vld [vmem:[%s1888_s0 + $0x8] sm:$0xff] }
  0x1a   :  { %1129 = vmatpush3.bf16.msra.mxu1 %v1128_v42  ;;  %v251_v42 = vld [vmem:[%s1885_s6 + $0x40] sm:$0xff]  ;;  %v258_v61 = vld [vmem:[%s1885_s6 + $0x78] sm:$0xff]  ;;  %v321_v63 = vld [vmem:[%s1886_s7 + $0x70] sm:$0xff] }
  0x1b   :  { %1130 = vmatprep.subr.bf16.mxu1 %v1275_v0  ;;  %v322_v1 = vld [vmem:[%s1886_s7 + $0x78] sm:$0xff]  ;;  %v239_v5 = vld [vmem:[%s1888_s0] sm:$0xff]  ;;  %v292_v7 = vld [vmem:[%s1885_s6 + $0x188] sm:$0xff] }
  0x1c   :  { %1108 = vmatpush3.bf16.msra.mxu0 %v1107_v39  ;;  %v268_v39 = vld [vmem:[%s1885_s6 + $0xc8] sm:$0xff]  ;;  %v275_v10 = vld [vmem:[%s1885_s6 + $0x100] sm:$0xff]  ;;  %v294_v14 = vld [vmem:[%s1885_s6 + $0x198] sm:$0xff] }
  0x1d   :  { %1109 = vmatprep.subr.bf16.mxu0 %v1275_v0  ;;  %v1176_v41 = vpack.c.bf16 %v268_v39, %v267_v38  ;;  %v276_v11 = vld [vmem:[%s1885_s6 + $0x108] sm:$0xff]  ;;  %v279_v27 = vld [vmem:[%s1885_s6 + $0x120] sm:$0xff]  ;;  %v298_v30 = vld [vmem:[%s1885_s6 + $0x1b8] sm:$0xff] }
  0x1e   :  { %1132 = vmatpush3.bf16.msra.mxu1 %v1131_v46  ;;  %v1178_v46 = vpack.c.bf16 %v252_v43, %v251_v42  ;;  %v1194_v17 = vpack.c.bf16 %v276_v11, %v275_v10  ;;  %v296_v24 = vld [vmem:[%s1885_s6 + $0x1a8] sm:$0xff]  ;;  %v281_v33 = vld [vmem:[%s1885_s6 + $0x130] sm:$0xff]  ;;  %v283_v39 = vld [vmem:[%s1885_s6 + $0x140] sm:$0xff] }
  0x1f   :  { %1133 = vmatprep.subr.bf16.mxu1 %v1275_v0  ;;  %v300_v36 = vld [vmem:[%s1885_s6 + $0x1c8] sm:$0xff]  ;;  %v302_v42 = vld [vmem:[%s1885_s6 + $0x1d8] sm:$0xff]  ;;  %v556_v10 = vld [vmem:[%s1890_s10 + $0x30] sm:$0xff] }
  0x20   :  { %1111 = vmatpush3.bf16.msra.mxu0 %v1110_v45  ;;  %v270_v45 = vld [vmem:[%s1885_s6 + $0xd8] sm:$0xff]  ;;  %v304_v48 = vld [vmem:[%s1885_s6 + $0x1e8] sm:$0xff] }
  0x21   :  { %1136 = vmatprep.subr.bf16.mxu0 %v1275_v0  ;;  %v306_v54 = vld [vmem:[%s1885_s6 + $0x1f8] sm:$0xff] }
  0x22   :  { %1135 = vmatpush3.bf16.msra.mxu1 %v1134_v50  ;;  %v271_v50 = vld [vmem:[%s1885_s6 + $0xe0] sm:$0xff]  ;;  %v557_v11 = vld [vmem:[%s1890_s10 + $0x38] sm:$0xff] }
  0x23   :  { %946 = vmatmul.mubr.f32.vlgmr.msra.gmra.mrb[0].mxu0 %v50_v47  ;;  %1161 = vmatprep.subr.bf16.mxu1 %v1160_v53  ;;  %v1180_v47 = vpack.c.bf16 %v270_v45, %v269_v44  ;;  %v1184_v53 = vpack.c.bf16 %v272_v51, %v271_v50  ;;  %v285_v45 = vld [vmem:[%s1885_s6 + $0x150] sm:$0xff]  ;;  %v287_v51 = vld [vmem:[%s1885_s6 + $0x160] sm:$0xff] }
  0x24   :  { %1015 = vmatprep.mubr.msk.f32.mxu0 %vm1276_vm0, %v1277_v4  ;;  %1138 = vmatpush3.bf16.msra.mxu0 %v1137_v56  ;;  %v273_v56 = vld [vmem:[%s1885_s6 + $0xf0] sm:$0xff] }
  0x25   :  { %1139 = vmatprep.subr.bf16.mxu0 %v1275_v0 }
  0x28   :  { %1141 = vmatpush3.bf16.msra.mxu0 %v1140_v59  ;;  %v1188_v59 = vpack.c.bf16 %v274_v57, %v273_v56  ;;  %v289_v57 = vld [vmem:[%s1885_s6 + $0x170] sm:$0xff] }
  0x29   :  { %1142 = vmatprep.subr.bf16.mxu0 %v1275_v0 }
  0x2c   :  { %1144 = vmatpush3.bf16.msra.mxu0 %v1143_v62  ;;  %v1190_v62 = vpack.c.bf16 %v258_v61, %v257_v60  ;;  %v241_v60 = vld [vmem:[%s1888_s0 + $0x10] sm:$0xff] }
  0x2d   :  { %1145 = vmatprep.subr.bf16.mxu0 %v1275_v0 }
  0x30   :  { %1147 = vmatpush3.bf16.msra.mxu0 %v1146_v2  ;;  %v1158_v2 = vpack.c.bf16 %v322_v1, %v321_v63  ;;  %v550_v1 = vld [vmem:[%s1890_s10] sm:$0xff] }
  0x31   :  { %1148 = vmatprep.subr.bf16.mxu0 %v1275_v0 }
  0x34   :  { %1150 = vmatpush3.bf16.msra.mxu0 %v1149_v6  ;;  %v291_v6 = vld [vmem:[%s1885_s6 + $0x180] sm:$0xff] }
  0x35   :  { %1151 = vmatprep.subr.bf16.mxu0 %v1275_v0  ;;  %v1192_v8 = vpack.c.bf16 %v292_v7, %v291_v6  ;;  %v554_v7 = vld [vmem:[%s1890_s10 + $0x20] sm:$0xff] }
  0x38   :  { %1153 = vmatpush3.bf16.msra.mxu0 %v1152_v9  ;;  %v752_v9 = vld [vmem:[%s1889_s5] ss:$0 sm:$0xff] }
  0x39   :  { %1154 = vmatprep.subr.bf16.mxu0 %v1275_v0 }
  0x3c   :  { %1156 = vmatpush3.bf16.msra.mxu0 %v1155_v12 }
  0x3d   :  { %1157 = vmatprep.subr.bf16.mxu0 %v1275_v0 }
  0x40   :  { %1159 = vmatpush3.bf16.msra.mxu0 %v1158_v2  ;;  %v551_v2 = vld [vmem:[%s1890_s10 + $0x8] sm:$0xff] }
  0x41   :  { %1193 = vmatprep.subr.bf16.mxu0 %v1192_v8  ;;  %v555_v8 = vld [vmem:[%s1890_s10 + $0x28] sm:$0xff] }
  0xf6   :  { %v140_v16 = vpop.f32.mrb[0].mxu0 }
  0xf7   :  { %v141_v19 = vadd.f32 %v751_v13, %v140_v16  ;;  %v947_v20 = vpop.f32.mrb[1].mxu0  ;;  %v293_v13 = vld [vmem:[%s1885_s6 + $0x190] sm:$0xff] }
  0xf8   :  { %v277_v20 = vld [vmem:[%s1885_s6 + $0x110] sm:$0xff] }
  0xf9   :  { %v144_v22 = vmax.f32 %v141_v19, 0.0  ;;  %v1196_v19 = vpack.c.bf16 %v294_v14, %v293_v13  ;;  %v558_v13 = vld [vmem:[%s1890_s10 + $0x40] sm:$0xff]  ;;  %v559_v14 = vld [vmem:[%s1890_s10 + $0x48] sm:$0xff] }
  0xfb   :  { %981 = vmatmul.mubr.f32.vlgmr.msra.gmra.mrb[0].mxu1 %v144_v22  ;;  %v242_v22 = vld [vmem:[%s1888_s0 + $0x18] sm:$0xff] }
  0xfc   :  { %1163 = vmatpush3.bf16.msra.mxu1 %v1162_v21  ;;  %457 = vmatprep.mubr.f32.mxu1 %v240_v3  ;;  %v278_v21 = vld [vmem:[%s1885_s6 + $0x118] sm:$0xff]  ;;  %v552_v3 = vld [vmem:[%s1890_s10 + $0x10] sm:$0xff] }
  0xfd   :  { %1165 = vmatprep.subr.bf16.mxu1 %v1164_v23  ;;  %v295_v23 = vld [vmem:[%s1885_s6 + $0x1a0] sm:$0xff]  ;;  %v1198_v25 = vpack.c.bf16 %v278_v21, %v277_v20  ;;  %v563_v20 = vld [vmem:[%s1890_s10 + $0x68] sm:$0xff] }
  0xfe   :  { %v1200_v26 = vpack.c.bf16 %v296_v24, %v295_v23  ;;  %v565_v23 = vld [vmem:[%s1890_s10 + $0x78] sm:$0xff] }
 0x100   :  { %1167 = vmatpush3.bf16.msra.mxu1 %v1166_v28  ;;  %v280_v28 = vld [vmem:[%s1885_s6 + $0x128] sm:$0xff] }
 0x101   :  { %1169 = vmatprep.subr.bf16.mxu1 %v1168_v29  ;;  %v297_v29 = vld [vmem:[%s1885_s6 + $0x1b0] sm:$0xff]  ;;  %v1202_v31 = vpack.c.bf16 %v280_v28, %v279_v27 }
 0x102   :  { %v1204_v32 = vpack.c.bf16 %v298_v30, %v297_v29  ;;  %v655_v27 = vld [vmem:[%s1891_s13 + $0x10] sm:$0xff]  ;;  %v656_v29 = vld [vmem:[%s1891_s13 + $0x18] sm:$0xff] }
 0x103   :  { %v1252_v30 = vpack.c.bf16 %v656_v29, %v655_v27 }
 0x104   :  { %1171 = vmatpush3.bf16.msra.mxu1 %v1170_v34  ;;  %v282_v34 = vld [vmem:[%s1885_s6 + $0x138] sm:$0xff] }
 0x105   :  { %1173 = vmatprep.subr.bf16.mxu1 %v1172_v35  ;;  %v299_v35 = vld [vmem:[%s1885_s6 + $0x1c0] sm:$0xff]  ;;  %v1206_v37 = vpack.c.bf16 %v282_v34, %v281_v33  ;;  %v659_v34 = vld [vmem:[%s1891_s13 + $0x30] sm:$0xff] }
 0x106   :  { %v1208_v38 = vpack.c.bf16 %v300_v36, %v299_v35  ;;  %v660_v35 = vld [vmem:[%s1891_s13 + $0x38] sm:$0xff] }
 0x107   :  { %v1258_v36 = vpack.c.bf16 %v660_v35, %v659_v34 }
 0x108   :  { %1175 = vmatpush3.bf16.msra.mxu1 %v1174_v40  ;;  %v284_v40 = vld [vmem:[%s1885_s6 + $0x148] sm:$0xff] }
 0x109   :  { %1177 = vmatprep.subr.bf16.mxu1 %v1176_v41  ;;  %v301_v41 = vld [vmem:[%s1885_s6 + $0x1d0] sm:$0xff]  ;;  %v1210_v43 = vpack.c.bf16 %v284_v40, %v283_v39 }
 0x10a   :  { %v1212_v44 = vpack.c.bf16 %v302_v42, %v301_v41  ;;  %v663_v40 = vld [vmem:[%s1891_s13 + $0x50] sm:$0xff]  ;;  %v664_v41 = vld [vmem:[%s1891_s13 + $0x58] sm:$0xff] }
 0x10b   :  { %v1264_v42 = vpack.c.bf16 %v664_v41, %v663_v40 }
 0x10c   :  { %1179 = vmatpush3.bf16.msra.mxu1 %v1178_v46  ;;  %v286_v46 = vld [vmem:[%s1885_s6 + $0x158] sm:$0xff] }
 0x10d   :  { %1181 = vmatprep.subr.bf16.mxu1 %v1180_v47  ;;  %v303_v47 = vld [vmem:[%s1885_s6 + $0x1e0] sm:$0xff]  ;;  %v1214_v49 = vpack.c.bf16 %v286_v46, %v285_v45 }
 0x10e   :  { %v1216_v50 = vpack.c.bf16 %v304_v48, %v303_v47 }
 0x110   :  { %1183 = vmatpush3.bf16.msra.mxu1 %v1182_v52  ;;  %v288_v52 = vld [vmem:[%s1885_s6 + $0x168] sm:$0xff] }
 0x111   :  { %1185 = vmatprep.subr.bf16.mxu1 %v1184_v53  ;;  %v305_v53 = vld [vmem:[%s1885_s6 + $0x1f0] sm:$0xff]  ;;  %v1218_v55 = vpack.c.bf16 %v288_v52, %v287_v51  ;;  %v754_v51 = vld [vmem:[%s1893_s9] ss:$0 sm:$0xff] }
 0x112   :  { %v1220_v56 = vpack.c.bf16 %v306_v54, %v305_v53 }
 0x114   :  { %1187 = vmatpush3.bf16.msra.mxu1 %v1186_v58  ;;  %v290_v58 = vld [vmem:[%s1885_s6 + $0x178] sm:$0xff] }
 0x115   :  { %1189 = vmatprep.subr.bf16.mxu1 %v1188_v59  ;;  %v1222_v59 = vpack.c.bf16 %v290_v58, %v289_v57  ;;  %v667_v58 = vld [vmem:[%s1891_s13 + $0x70] sm:$0xff] }
 0x118   :  { %1191 = vmatpush3.bf16.msra.mxu1 %v1190_v62 }
 0x119   :  { %1224 = vmatprep.subr.bf16.mxu1 %v1275_v0 }
 0x11b   :  { %458 = vmatmul.mubr.f32.vlgmr.msra.gmra.mrb[2].mxu1 %v239_v5  ;;  %v1225_v5 = vpack.c.bf16 %v551_v2, %v550_v1 }
 0x11c   :  { %1050 = vmatprep.mubr.msk.f32.mxu1 %vm1276_vm0, %v1277_v4 }
 0x11d   :  { %1226 = vmatpush3.bf16.msra.mxu1 %v1225_v5  ;;  %v757_v5 = vld [vmem:[%s1896_s14] ss:$0 sm:$0xff] }
 0x11e   :  { %1227 = vmatprep.subr.bf16.mxu1 %v1275_v0 }
 0x1ce   :  { %v234_v12 = vpop.f32.mrb[0].mxu1 }
 0x1cf   :  { %v235_v15 = vadd.f32 %v752_v9, %v234_v12  ;;  %v982_v16 = vpop.f32.mrb[1].mxu1  ;;  %v1231_v9 = vpack.c.bf16 %v555_v8, %v554_v7  ;;  %v1234_v12 = vpack.c.bf16 %v557_v11, %v556_v10 }
 0x1d0   :  { %v560_v16 = vld [vmem:[%s1890_s10 + $0x50] sm:$0xff] }
 0x1d1   :  { %v238_v18 = vmax.f32 %v235_v15, 0.0  ;;  %v1237_v15 = vpack.c.bf16 %v559_v14, %v558_v13 }
 0x1d3   :  { %1016 = vmatmul.mubr.f32.vlgmr.msra.gmra.mrb[2].mxu0 %v238_v18 }
 0x1d4   :  { %1195 = vmatpush3.bf16.msra.mxu0 %v1194_v17  ;;  %527 = vmatprep.mubr.f32.mxu0 %v242_v22  ;;  %v561_v17 = vld [vmem:[%s1890_s10 + $0x58] sm:$0xff]  ;;  %v564_v22 = vld [vmem:[%s1890_s10 + $0x70] sm:$0xff] }
 0x1d5   :  { %1197 = vmatprep.subr.bf16.mxu0 %v1196_v19  ;;  %v1240_v18 = vpack.c.bf16 %v561_v17, %v560_v16  ;;  %v562_v19 = vld [vmem:[%s1890_s10 + $0x60] sm:$0xff]  ;;  %v1246_v24 = vpack.c.bf16 %v565_v23, %v564_v22 }
 0x1d6   :  { %v1243_v21 = vpack.c.bf16 %v563_v20, %v562_v19 }
 0x1d8   :  { %1199 = vmatpush3.bf16.msra.mxu0 %v1198_v25  ;;  %v653_v25 = vld [vmem:[%s1891_s13] sm:$0xff] }
 0x1d9   :  { %1201 = vmatprep.subr.bf16.mxu0 %v1200_v26  ;;  %v654_v26 = vld [vmem:[%s1891_s13 + $0x8] sm:$0xff] }
 0x1da   :  { %v1249_v28 = vpack.c.bf16 %v654_v26, %v653_v25 }
 0x1dc   :  { %1203 = vmatpush3.bf16.msra.mxu0 %v1202_v31  ;;  %v657_v31 = vld [vmem:[%s1891_s13 + $0x20] sm:$0xff] }
 0x1dd   :  { %1205 = vmatprep.subr.bf16.mxu0 %v1204_v32  ;;  %v658_v32 = vld [vmem:[%s1891_s13 + $0x28] sm:$0xff] }
 0x1de   :  { %v1255_v33 = vpack.c.bf16 %v658_v32, %v657_v31 }
 0x1e0   :  { %1207 = vmatpush3.bf16.msra.mxu0 %v1206_v37  ;;  %v661_v37 = vld [vmem:[%s1891_s13 + $0x40] sm:$0xff] }
 0x1e1   :  { %1209 = vmatprep.subr.bf16.mxu0 %v1208_v38  ;;  %v662_v38 = vld [vmem:[%s1891_s13 + $0x48] sm:$0xff] }
 0x1e2   :  { %v1261_v39 = vpack.c.bf16 %v662_v38, %v661_v37 }
 0x1e4   :  { %1211 = vmatpush3.bf16.msra.mxu0 %v1210_v43 }
 0x1e5   :  { %1213 = vmatprep.subr.bf16.mxu0 %v1212_v44 }
 0x1e8   :  { %1215 = vmatpush3.bf16.msra.mxu0 %v1214_v49  ;;  %v753_v49 = vld [vmem:[%s1892_s8] ss:$0 sm:$0xff] }
 0x1e9   :  { %1217 = vmatprep.subr.bf16.mxu0 %v1216_v50 }
 0x1ec   :  { %1219 = vmatpush3.bf16.msra.mxu0 %v1218_v55  ;;  %v665_v55 = vld [vmem:[%s1891_s13 + $0x60] sm:$0xff] }
 0x1ed   :  { %1221 = vmatprep.subr.bf16.mxu0 %v1220_v56  ;;  %v666_v56 = vld [vmem:[%s1891_s13 + $0x68] sm:$0xff] }
 0x1ee   :  { %v841_v61 = vpop.f32.mrb[2].mxu1  ;;  %v1267_v57 = vpack.c.bf16 %v666_v56, %v665_v55 }
 0x1ef   :  { %v842_v62 = vpop.f32.mrb[3].mxu1 }
 0x1f0   :  { %1223 = vmatpush3.bf16.msra.mxu0 %v1222_v59  ;;  %v1751_v63 = vadd.f32 %v842_v62, %v841_v61  ;;  %v668_v59 = vld [vmem:[%s1891_s13 + $0x78] sm:$0xff]  ;;  %v755_v61 = vld [vmem:[%s1894_s11] ss:$0 sm:$0xff] }
 0x1f1   :  { %1248 = vmatprep.subr.bf16.mxu0 %v1275_v0 }
 0x1f3   :  { %528 = vmatmul.mubr.f32.vlgmr.msra.gmra.mrb[4].mxu0 %v241_v60  ;;  %v1270_v60 = vpack.c.bf16 %v668_v59, %v667_v58 }
 0x1f4   :  { %1085 = vmatprep.mubr.msk.f32.mxu0 %vm1276_vm0, %v1277_v4  ;;  %v553_v4 = vld [vmem:[%s1890_s10 + $0x18] sm:$0xff]  ;;  %1250 = vmatpush3.bf16.msra.mxu0 %v1249_v28 }
 0x1f5   :  { %v1228_v6 = vpack.c.bf16 %v553_v4, %v552_v3  ;;  %1251 = vmatprep.subr.bf16.mxu0 %v1275_v0 }
 0x1f7   :  { %1229 = vmatpush3.bf16.msra.mxu1 %v1228_v6 }
 0x1f8   :  { %1230 = vmatprep.subr.bf16.mxu1 %v1275_v0  ;;  %1253 = vmatpush3.bf16.msra.mxu0 %v1252_v30 }
 0x1f9   :  { %1254 = vmatprep.subr.bf16.mxu0 %v1275_v0 }
 0x1fb   :  { %1232 = vmatpush3.bf16.msra.mxu1 %v1231_v9 }
 0x1fc   :  { %1233 = vmatprep.subr.bf16.mxu1 %v1275_v0  ;;  %1256 = vmatpush3.bf16.msra.mxu0 %v1255_v33 }
 0x1fd   :  { %1257 = vmatprep.subr.bf16.mxu0 %v1275_v0 }
 0x1ff   :  { %1235 = vmatpush3.bf16.msra.mxu1 %v1234_v12 }
 0x200   :  { %1236 = vmatprep.subr.bf16.mxu1 %v1275_v0  ;;  %1259 = vmatpush3.bf16.msra.mxu0 %v1258_v36 }
 0x201   :  { %1260 = vmatprep.subr.bf16.mxu0 %v1275_v0 }
 0x203   :  { %1238 = vmatpush3.bf16.msra.mxu1 %v1237_v15 }
 0x204   :  { %1239 = vmatprep.subr.bf16.mxu1 %v1275_v0  ;;  %1262 = vmatpush3.bf16.msra.mxu0 %v1261_v39 }
 0x205   :  { %1263 = vmatprep.subr.bf16.mxu0 %v1275_v0 }
 0x207   :  { %1241 = vmatpush3.bf16.msra.mxu1 %v1240_v18 }
 0x208   :  { %1242 = vmatprep.subr.bf16.mxu1 %v1275_v0  ;;  %1265 = vmatpush3.bf16.msra.mxu0 %v1264_v42 }
 0x209   :  { %1266 = vmatprep.subr.bf16.mxu0 %v1275_v0 }
 0x20b   :  { %1244 = vmatpush3.bf16.msra.mxu1 %v1243_v21 }
 0x20c   :  { %1245 = vmatprep.subr.bf16.mxu1 %v1275_v0  ;;  %1268 = vmatpush3.bf16.msra.mxu0 %v1267_v57 }
 0x20d   :  { %1269 = vmatprep.subr.bf16.mxu0 %v1275_v0 }
 0x20f   :  { %1247 = vmatpush3.bf16.msra.mxu1 %v1246_v24 }
 0x210   :  { %1271 = vmatpush3.bf16.msra.mxu0 %v1270_v60 }
 0x2a6   :  { %v389_v43 = vpop.f32.mrb[2].mxu0 }
 0x2a7   :  { %v460_v44 = vadd.f32 %v1751_v63, %v389_v43  ;;  %v1017_v45 = vpop.f32.mrb[3].mxu0  ;;  %v756_v63 = vld [vmem:[%s1895_s12] ss:$0 sm:$0xff] }
 0x2c6   :  { %v876_v46 = vpop.f32.mrb[4].mxu0 }
 0x2c7   :  { %v877_v47 = vpop.f32.mrb[5].mxu0 }
 0x2c8   :  { %v878_v48 = vadd.f32 %v877_v47, %v876_v46 }
 0x2ca   :  { %v530_v50 = vadd.f32 %v878_v48, %v460_v44 }
 0x2cc   :  { %v540_v52 = vmul.f32 %v753_v49, %v530_v50 }
 0x2ce   :  { %v548_v53 = vadd.f32 %v754_v51, %v540_v52 }
 0x2d0   :  { %v549_v54 = vmax.f32 %v548_v53, 0.0 }
 0x2d2   :  { %1051 = vmatmul.mubr.f32.vlgmr.msra.gmra.mrb[4].mxu1 %v549_v54 }
 0x3a5   :  { %v632_v62 = vpop.f32.mrb[4].mxu1 }
 0x3a6   :  { %v643_v0 = vmul.f32 %v755_v61, %v632_v62  ;;  %v1052_v1 = vpop.f32.mrb[5].mxu1 }
 0x3a8   :  { %v651_v2 = vadd.f32 %v756_v63, %v643_v0 }
 0x3aa   :  { %v652_v3 = vmax.f32 %v651_v2, 0.0 }
 0x3ac   :  { %1086 = vmatmul.mubr.f32.vlgmr.msra.gmra.mrb[6].mxu0 %v652_v3 }
 0x47f   :  { %v742_v4 = vpop.f32.mrb[6].mxu0 }
 0x480   :  { %v743_v6 = vadd.f32 %v757_v5, %v742_v4  ;;  %v1087_v7 = vpop.f32.mrb[7].mxu0 }
 0x482   :  { %746 = vst [vmem:[%s1897_s15] sm:$0xff] %v743_v6 }

</bundles_post_ra>
